<compile_context>
chip_gen: v6e
topology: v6e:2x2x1
jax: 0.10.0
libtpu: 0.0.40
codegen_flags: <defaults>
</compile_context>

<pallas_src>
import functools
import math

import jax
import jax.numpy as jnp
from jax.experimental import pallas as pl
from jax.experimental.pallas import tpu as pltpu


# ----------------------------------------------------------------------------
# small helpers used inside kernels
# ----------------------------------------------------------------------------
def _gelu(x):
    # TODO(synk): PyTorch F.gelu is erf-exact; tanh approximation is used here
    # because erf is not guaranteed to lower in Mosaic.
    return jax.nn.gelu(x, approximate=True)


def _layernorm(x, g, b, eps=1e-5):
    m = jnp.mean(x, axis=-1, keepdims=True)
    v = jnp.mean((x - m) ** 2, axis=-1, keepdims=True)
    return (x - m) * jax.lax.rsqrt(v + eps) * g + b


# ----------------------------------------------------------------------------
# Kernel 1: MultiScaleFeatureExtraction + TimeAwarePositionalEncoding (fused)
#   conv1/3/5/7 become ONE matmul: the wrapper builds an im2col input
#   [B, 3, S, 7*Cin] and the combined per-tap weight is [7*Cin, D].
#   The 3 currencies are folded into the matmul M dimension (3*S rows).
# TODO(synk): reference's `time_embed.unsqueeze(1)` creates a 4-D broadcast
#   that is invalid for B>1 in PyTorch; the intended [B,S,D] addition is used.
# ----------------------------------------------------------------------------
def msfe_posenc_kernel(x_ref, te_ref, pe_ref, wc_ref, bc_ref, wp_ref, bp_ref,
                       wt_ref, bt_ref, o_ref):
    S = pe_ref.shape[0]
    K = wc_ref.shape[0]
    D = wc_ref.shape[1]

    x = x_ref[0].reshape(3 * S, K)                            # [3S, 7*Cin]
    h = _gelu(jnp.dot(x, wc_ref[...],
                      preferred_element_type=jnp.float32) + bc_ref[...])
    feat = jnp.dot(h, wp_ref[...],
                   preferred_element_type=jnp.float32) + bp_ref[...]   # [3S, D]

    tproj = jnp.dot(te_ref[0], wt_ref[...],
                    preferred_element_type=jnp.float32) + bt_ref[...]  # [S, D]
    base = pe_ref[...] + tproj                                         # [S, D]

    o_ref[0] = feat.reshape(3, S, D) + base[None, :, :]


def msfe_posenc(x_stack, te, pe, params):
    B, _, S, K = x_stack.shape
    D = params['msfe_wp'].shape[0]
    Dh = te.shape[-1]
    return pl.pallas_call(
        msfe_posenc_kernel,
        out_shape=jax.ShapeDtypeStruct((B, 3, S, D), jnp.float32),
        grid=(B,),
        in_specs=[
            pl.BlockSpec((1, 3, S, K), lambda b: (b, 0, 0, 0)),
            pl.BlockSpec((1, S, Dh), lambda b: (b, 0, 0)),
            pl.BlockSpec((S, D), lambda b: (0, 0)),
            pl.BlockSpec((K, D), lambda b: (0, 0)),
            pl.BlockSpec((1, D), lambda b: (0, 0)),
            pl.BlockSpec((D, D), lambda b: (0, 0)),
            pl.BlockSpec((1, D), lambda b: (0, 0)),
            pl.BlockSpec((Dh, D), lambda b: (0, 0)),
            pl.BlockSpec((1, D), lambda b: (0, 0)),
        ],
        out_specs=pl.BlockSpec((1, 3, S, D), lambda b: (b, 0, 0, 0)),
        compiler_params=pltpu.CompilerParams(dimension_semantics=("parallel",)),
    )(x_stack, te, pe, params['msfe_wc'], params['msfe_bc'],
      params['msfe_wp'], params['msfe_bp'], params['time_wt'], params['time_bt'])


# ----------------------------------------------------------------------------
# Kernel 2: one TransformerEncoderBlock (cross-crypto attention + FFN + LNs)
#   xs holds the 3 currencies stacked: [B, 3, S, D].
#   - Q/K/V are produced by ONE fused matmul per currency ([3,S,D]@[3,D,3D]).
#   - Attention is batched over heads with 2 einsums per (ci,cj) pair; each
#     of the 9 pairs is softmaxed independently and summed over cj (matches
#     the reference CrossCryptocurrencyAttention exactly).
#   - FFN is a batched-over-currency dot_general; LNs use rsqrt (EUP).
# ----------------------------------------------------------------------------
def encoder_kernel(xs_ref, wqkv_ref, bqkv_ref, wo_ref, bo_ref,
                   g1_ref, be1_ref, w1_ref, bf1_ref, w2_ref, bf2_ref,
                   g2_ref, be2_ref, o_ref, *, n_heads):
    S, D = xs_ref.shape[2], xs_ref.shape[3]
    H = n_heads
    hd = D // H
    scale = 1.0 / math.sqrt(hd)
    batched_dn = (((2,), (1,)), ((0,), (0,)))        # batch over currency axis

    x = xs_ref[0]                                     # [3, S, D]

    # fused Q/K/V projection per currency (one MXU pass per currency)
    qkv = jax.lax.dot_general(x, wqkv_ref[...], batched_dn,
                              preferred_element_type=jnp.float32) + bqkv_ref[...]
    q = qkv[:, :, 0:D]
    k = qkv[:, :, D:2 * D]
    v = qkv[:, :, 2 * D:3 * D]

    def split_heads(t):                               # [3, S, D] -> [3, H, S, hd]
        return jnp.swapaxes(t.reshape(3, S, H, hd), 1, 2)

    qh, kh, vh = split_heads(q), split_heads(k), split_heads(v)

    outs = []
    for ci in range(3):                               # static unroll: 3 queries
        acc = jnp.zeros((H, S, hd), jnp.float32)
        for cj in range(3):                           # static unroll: 3 keys
            s = jnp.einsum('hqd,hkd->hqk', qh[ci], kh[cj],
                           preferred_element_type=jnp.float32) * scale
            s = s - jnp.max(s, axis=-1, keepdims=True)
            p = jnp.exp(s)
            p = p * pl.reciprocal(jnp.sum(p, axis=-1, keepdims=True), approx=True)
            acc = acc + jnp.einsum('hqk,hkd->hqd', p, vh[cj],
                                   preferred_element_type=jnp.float32)
        outs.append(jnp.swapaxes(acc, 0, 1).reshape(S, D))
    attn = jnp.stack(outs, axis=0)                    # [3, S, D]

    # shared output projection on folded rows [3S, D] (dense M dimension)
    attn = (jnp.dot(attn.reshape(3 * S, D), wo_ref[...],
                    preferred_element_type=jnp.float32).reshape(3, S, D)
            + bo_ref[...])

    y = _layernorm(x + attn, g1_ref[...], be1_ref[...])

    h = _gelu(jax.lax.dot_general(y, w1_ref[...], batched_dn,
                                  preferred_element_type=jnp.float32)
              + bf1_ref[...])
    ff = jax.lax.dot_general(h, w2_ref[...], batched_dn,
                             preferred_element_type=jnp.float32) + bf2_ref[...]
    o_ref[0] = _layernorm(y + ff, g2_ref[...], be2_ref[...])


def encoder_block(xs, lp, n_heads):
    B, _, S, D = xs.shape

    def full(a):
        return pl.BlockSpec(a.shape, lambda b, _nd=a.ndim: (0,) * _nd)

    names = ['wqkv', 'bqkv', 'wo', 'bo', 'g1', 'be1',
             'w1', 'bf1', 'w2', 'bf2', 'g2', 'be2']
    kernel = functools.partial(encoder_kernel, n_heads=n_heads)
    return pl.pallas_call(
        kernel,
        out_shape=jax.ShapeDtypeStruct(xs.shape, jnp.float32),
        grid=(B,),
        in_specs=[pl.BlockSpec((1, 3, S, D), lambda b: (b, 0, 0, 0))]
                 + [full(lp[n]) for n in names],
        out_specs=pl.BlockSpec((1, 3, S, D), lambda b: (b, 0, 0, 0)),
        compiler_params=pltpu.CompilerParams(dimension_semantics=("parallel",)),
    )(xs, *[lp[n] for n in names])


# ----------------------------------------------------------------------------
# Kernel 3: global average pool + shared fc1/fc2 + per-currency output heads
#   One grid step processes ALL (B*3) pooled rows in a single fc1/fc2 matmul.
# ----------------------------------------------------------------------------
def head_kernel(xs_ref, w1_ref, b1_ref, w2_ref, b2_ref, wout_ref, bout_ref,
                o_ref):
    B = xs_ref.shape[0]
    D = xs_ref.shape[3]

    x = xs_ref[...]                                   # [B, 3, S, D]
    pooled = jnp.mean(x, axis=2).reshape(B * 3, D)    # [3B, D]
    h1 = _gelu(jnp.dot(pooled, w1_ref[...],
                       preferred_element_type=jnp.float32) + b1_ref[...])
    h2 = _gelu(jnp.dot(h1, w2_ref[...],
                       preferred_element_type=jnp.float32) + b2_ref[...])  # [3B,64]
    h2c = h2.reshape(B, 3, h2.shape[-1])
    out = jnp.sum(h2c * wout_ref[...][None, :, :], axis=-1) + bout_ref[...]
    o_ref[...] = out                                  # [B, 3]


def prediction_head(xs, params):
    B, _, S, D = xs.shape

    def full(a):
        return pl.BlockSpec(a.shape, lambda i, _nd=a.ndim: (0,) * _nd)

    return pl.pallas_call(
        head_kernel,
        out_shape=jax.ShapeDtypeStruct((B, 3), jnp.float32),
        grid=(1,),
        in_specs=[pl.BlockSpec((B, 3, S, D), lambda i: (0, 0, 0, 0)),
                  full(params['fc1_w']), full(params['fc1_b']),
                  full(params['fc2_w']), full(params['fc2_b']),
                  full(params['wout']), full(params['bout'])],
        out_specs=pl.BlockSpec((B, 3), lambda i: (0, 0)),
        compiler_params=pltpu.CompilerParams(dimension_semantics=("arbitrary",)),
    )(xs, params['fc1_w'], params['fc1_b'], params['fc2_w'], params['fc2_b'],
      params['wout'], params['bout'])


# ----------------------------------------------------------------------------
# parameter construction (deterministic, synthetic)
# ----------------------------------------------------------------------------
def init_params(key, input_dim, d_model, n_heads, n_layers, d_ff, max_seq_len):
    keys = iter(jax.random.split(key, 512))

    def nrm(shape, s=0.05):
        return jax.random.normal(next(keys), shape, jnp.float32) * s

    Dq = d_model // 4
    params = {}

    # MultiScaleFeatureExtraction: combined per-tap conv weights, im2col layout
    wc = jnp.zeros((7, input_dim, d_model), jnp.float32)
    wc = wc.at[3:4, :, 0 * Dq:1 * Dq].set(nrm((1, input_dim, Dq)))   # conv1
    wc = wc.at[2:5, :, 1 * Dq:2 * Dq].set(nrm((3, input_dim, Dq)))   # conv3
    wc = wc.at[1:6, :, 2 * Dq:3 * Dq].set(nrm((5, input_dim, Dq)))   # conv5
    wc = wc.at[0:7, :, 3 * Dq:4 * Dq].set(nrm((7, input_dim, Dq)))   # conv7
    params['msfe_wc'] = wc.reshape(7 * input_dim, d_model)           # [7*Cin, D]
    params['msfe_bc'] = nrm((1, d_model))
    params['msfe_wp'] = nrm((d_model, d_model))
    params['msfe_bp'] = nrm((1, d_model))

    # TimeAwarePositionalEncoding
    pos = jnp.arange(max_seq_len, dtype=jnp.float32)[:, None]
    div = jnp.exp(jnp.arange(0, d_model, 2, dtype=jnp.float32)
                  * (-math.log(10000.0) / d_model))
    pe = jnp.zeros((max_seq_len, d_model), jnp.float32)
    pe = pe.at[:, 0::2].set(jnp.sin(pos * div))
    pe = pe.at[:, 1::2].set(jnp.cos(pos * div))
    params['pe'] = pe
    params['hour_emb'] = nrm((24, d_model // 4), 1.0)
    params['day_emb'] = nrm((7, d_model // 4), 1.0)
    params['time_wt'] = nrm((d_model // 2, d_model))
    params['time_bt'] = nrm((1, d_model))

    # encoder layers: per currency, Q/K/V fused along the output dim
    layers = []
    for _ in range(n_layers):
        layers.append(dict(
            wqkv=nrm((3, d_model, 3 * d_model)),   # [currency, D, q|k|v]
            bqkv=nrm((3, 1, 3 * d_model)),
            wo=nrm((d_model, d_model)),
            bo=nrm((1, d_model)),
            g1=jnp.ones((3, 1, d_model), jnp.float32),
            be1=jnp.zeros((3, 1, d_model), jnp.float32),
            w1=nrm((3, d_model, d_ff)),
            bf1=nrm((3, 1, d_ff)),
            w2=nrm((3, d_ff, d_model)),
            bf2=nrm((3, 1, d_model)),
            g2=jnp.ones((3, 1, d_model), jnp.float32),
            be2=jnp.zeros((3, 1, d_model), jnp.float32),
        ))
    params['layers'] = layers

    # head
    params['fc1_w'] = nrm((d_model, 128))
    params['fc1_b'] = nrm((1, 128))
    params['fc2_w'] = nrm((128, 64))
    params['fc2_b'] = nrm((1, 64))
    params['wout'] = nrm((3, 64))        # per-currency output weights (squeezed)
    params['bout'] = nrm((1, 3))
    return params


# ----------------------------------------------------------------------------
# full forward
# ----------------------------------------------------------------------------
def crypto_transformer_forward(params, x_btc, x_eth, x_sol, time_features,
                               n_heads):
    B, S, Cin = x_btc.shape

    # im2col in plain JAX (cheap, avoids unaligned sublane slices in-kernel)
    def im2col(x):
        xp = jnp.pad(x, ((0, 0), (3, 3), (0, 0)))
        return jnp.concatenate([xp[:, t:t + S, :] for t in range(7)], axis=-1)

    x_stack = jnp.stack([im2col(x) for x in (x_btc, x_eth, x_sol)], axis=1)

    # embedding gathers are glue in plain JAX
    hour = time_features[:, :, 0].astype(jnp.int32)
    day = time_features[:, :, 1].astype(jnp.int32)
    te = jnp.concatenate([jnp.take(params['hour_emb'], hour, axis=0),
                          jnp.take(params['day_emb'], day, axis=0)], axis=-1)
    pe = params['pe'][:S]

    xs = msfe_posenc(x_stack, te, pe, params)      # [B, 3, S, D]
    for lp in params['layers']:
        xs = encoder_block(xs, lp, n_heads)

    out = prediction_head(xs, params)              # [B, 3]
    return out[:, 0:1], out[:, 1:2], out[:, 2:3]


# ----------------------------------------------------------------------------
if __name__ == "__main__":
    B, S, Cin = 2, 8, 4
    D, H, L, Dff = 32, 8, 2, 128

    key = jax.random.PRNGKey(0)
    kx, ke, ks, kt, kp = jax.random.split(key, 5)
    x_btc = jax.random.normal(kx, (B, S, Cin), jnp.float32)
    x_eth = jax.random.normal(ke, (B, S, Cin), jnp.float32)
    x_sol = jax.random.normal(ks, (B, S, Cin), jnp.float32)
    kh, kd = jax.random.split(kt)
    hours = jax.random.randint(kh, (B, S), 0, 24).astype(jnp.float32)
    days = jax.random.randint(kd, (B, S), 0, 7).astype(jnp.float32)
    time_features = jnp.stack([hours, days], axis=-1)        # [B, S, 2]

    params = init_params(kp, Cin, D, H, L, Dff, max_seq_len=120)

    fwd = jax.jit(functools.partial(crypto_transformer_forward, n_heads=H))
    out_btc, out_eth, out_sol = fwd(params, x_btc, x_eth, x_sol, time_features)
    jax.block_until_ready((out_btc, out_eth, out_sol))

    assert out_btc.shape == (B, 1) and out_eth.shape == (B, 1) and out_sol.shape == (B, 1)
    assert bool(jnp.all(jnp.isfinite(out_btc)) & jnp.all(jnp.isfinite(out_eth))
                & jnp.all(jnp.isfinite(out_sol)))
    print("KERNEL_OK")
</pallas_src>

<mosaic_0001>
module attributes {stable_mosaic.version = 11 : i64} {
  func.func @msfe_posenc_kernel(%arg0: i32, %arg1: memref<1x3x8x28xf32, #tpu.memory_space<vmem>>, %arg2: memref<1x8x16xf32, #tpu.memory_space<vmem>>, %arg3: memref<8x32xf32, #tpu.memory_space<vmem>>, %arg4: memref<28x32xf32, #tpu.memory_space<vmem>>, %arg5: memref<1x32xf32, #tpu.memory_space<vmem>>, %arg6: memref<32x32xf32, #tpu.memory_space<vmem>>, %arg7: memref<1x32xf32, #tpu.memory_space<vmem>>, %arg8: memref<16x32xf32, #tpu.memory_space<vmem>>, %arg9: memref<1x32xf32, #tpu.memory_space<vmem>>, %arg10: memref<1x3x8x32xf32, #tpu.memory_space<vmem>>) attributes {dimension_semantics = [#tpu.dimension_semantics<parallel>], iteration_bounds = array<i64: 2>, scalar_prefetch = 0 : i64, scratch_operands = 0 : i64, tpu.core_type = #tpu.core_type<tc>, window_params = [{transform_indices = @transform_0, window_bounds = array<i64: 1, 3, 8, 28>}, {transform_indices = @transform_1, window_bounds = array<i64: 1, 8, 16>}, {pipeline_mode = #tpu.pipeline_mode<synchronous>, transform_indices = @transform_2, window_bounds = array<i64: 8, 32>}, {pipeline_mode = #tpu.pipeline_mode<synchronous>, transform_indices = @transform_3, window_bounds = array<i64: 28, 32>}, {pipeline_mode = #tpu.pipeline_mode<synchronous>, transform_indices = @transform_4, window_bounds = array<i64: 1, 32>}, {pipeline_mode = #tpu.pipeline_mode<synchronous>, transform_indices = @transform_5, window_bounds = array<i64: 32, 32>}, {pipeline_mode = #tpu.pipeline_mode<synchronous>, transform_indices = @transform_6, window_bounds = array<i64: 1, 32>}, {pipeline_mode = #tpu.pipeline_mode<synchronous>, transform_indices = @transform_7, window_bounds = array<i64: 16, 32>}, {pipeline_mode = #tpu.pipeline_mode<synchronous>, transform_indices = @transform_8, window_bounds = array<i64: 1, 32>}, {transform_indices = @transform_9, window_bounds = array<i64: 1, 3, 8, 32>}]} {
    %c0 = arith.constant 0 : index
    %c0_0 = arith.constant 0 : index
    %c0_1 = arith.constant 0 : index
    %c0_2 = arith.constant 0 : index
    %0 = vector.load %arg1[%c0, %c0_0, %c0_1, %c0_2] : memref<1x3x8x28xf32, #tpu.memory_space<vmem>>, vector<1x3x8x28xf32>
    %1 = vector.shape_cast %0 : vector<1x3x8x28xf32> to vector<3x8x28xf32>
    %2 = vector.shape_cast %1 : vector<3x8x28xf32> to vector<24x28xf32>
    %c0_3 = arith.constant 0 : index
    %c0_4 = arith.constant 0 : index
    %3 = vector.load %arg4[%c0_3, %c0_4] : memref<28x32xf32, #tpu.memory_space<vmem>>, vector<28x32xf32>
    %cst = arith.constant dense<0.000000e+00> : vector<24x32xf32>
    %4 = tpu.matmul %2, %3, %cst {dimension_numbers = #tpu.dot_dimension_numbers<[1], [0], [0], [1], [0, 0, 1, 1], [], []>} : vector<24x28xf32>, vector<28x32xf32>, vector<24x32xf32> -> vector<24x32xf32>
    %c0_5 = arith.constant 0 : index
    %c0_6 = arith.constant 0 : index
    %5 = vector.load %arg5[%c0_5, %c0_6] : memref<1x32xf32, #tpu.memory_space<vmem>>, vector<1x32xf32>
    %6 = vector.broadcast %5 : vector<1x32xf32> to vector<24x32xf32>
    %7 = arith.addf %4, %6 : vector<24x32xf32>
    %8 = arith.mulf %7, %7 : vector<24x32xf32>
    %9 = arith.mulf %7, %8 : vector<24x32xf32>
    %cst_7 = arith.constant 4.471500e-02 : f32
    %10 = vector.broadcast %cst_7 : f32 to vector<24x32xf32>
    %11 = arith.mulf %10, %9 : vector<24x32xf32>
    %12 = arith.addf %7, %11 : vector<24x32xf32>
    %cst_8 = arith.constant 0.797884583 : f32
    %13 = vector.broadcast %cst_8 : f32 to vector<24x32xf32>
    %14 = arith.mulf %13, %12 : vector<24x32xf32>
    %15 = math.tanh %14 : vector<24x32xf32>
    %cst_9 = arith.constant 1.000000e+00 : f32
    %16 = vector.broadcast %cst_9 : f32 to vector<24x32xf32>
    %17 = arith.addf %16, %15 : vector<24x32xf32>
    %cst_10 = arith.constant 5.000000e-01 : f32
    %18 = vector.broadcast %cst_10 : f32 to vector<24x32xf32>
    %19 = arith.mulf %18, %17 : vector<24x32xf32>
    %20 = arith.mulf %7, %19 : vector<24x32xf32>
    %c0_11 = arith.constant 0 : index
    %c0_12 = arith.constant 0 : index
    %21 = vector.load %arg6[%c0_11, %c0_12] : memref<32x32xf32, #tpu.memory_space<vmem>>, vector<32x32xf32>
    %cst_13 = arith.constant dense<0.000000e+00> : vector<24x32xf32>
    %22 = tpu.matmul %20, %21, %cst_13 {dimension_numbers = #tpu.dot_dimension_numbers<[1], [0], [0], [1], [0, 0, 1, 1], [], []>} : vector<24x32xf32>, vector<32x32xf32>, vector<24x32xf32> -> vector<24x32xf32>
    %c0_14 = arith.constant 0 : index
    %c0_15 = arith.constant 0 : index
    %23 = vector.load %arg7[%c0_14, %c0_15] : memref<1x32xf32, #tpu.memory_space<vmem>>, vector<1x32xf32>
    %24 = vector.broadcast %23 : vector<1x32xf32> to vector<24x32xf32>
    %25 = arith.addf %22, %24 : vector<24x32xf32>
    %c0_16 = arith.constant 0 : index
    %c0_17 = arith.constant 0 : index
    %c0_18 = arith.constant 0 : index
    %26 = vector.load %arg2[%c0_16, %c0_17, %c0_18] : memref<1x8x16xf32, #tpu.memory_space<vmem>>, vector<1x8x16xf32>
    %27 = vector.shape_cast %26 : vector<1x8x16xf32> to vector<8x16xf32>
    %c0_19 = arith.constant 0 : index
    %c0_20 = arith.constant 0 : index
    %28 = vector.load %arg8[%c0_19, %c0_20] : memref<16x32xf32, #tpu.memory_space<vmem>>, vector<16x32xf32>
    %cst_21 = arith.constant dense<0.000000e+00> : vector<8x32xf32>
    %29 = tpu.matmul %27, %28, %cst_21 {dimension_numbers = #tpu.dot_dimension_numbers<[1], [0], [0], [1], [0, 0, 1, 1], [], []>} : vector<8x16xf32>, vector<16x32xf32>, vector<8x32xf32> -> vector<8x32xf32>
    %c0_22 = arith.constant 0 : index
    %c0_23 = arith.constant 0 : index
    %30 = vector.load %arg9[%c0_22, %c0_23] : memref<1x32xf32, #tpu.memory_space<vmem>>, vector<1x32xf32>
    %31 = vector.broadcast %30 : vector<1x32xf32> to vector<8x32xf32>
    %32 = arith.addf %29, %31 : vector<8x32xf32>
    %c0_24 = arith.constant 0 : index
    %c0_25 = arith.constant 0 : index
    %33 = vector.load %arg3[%c0_24, %c0_25] : memref<8x32xf32, #tpu.memory_space<vmem>>, vector<8x32xf32>
    %34 = arith.addf %33, %32 : vector<8x32xf32>
    %35 = vector.shape_cast %25 : vector<24x32xf32> to vector<3x8x32xf32>
    %36 = vector.shape_cast %34 : vector<8x32xf32> to vector<1x8x32xf32>
    %37 = vector.broadcast %36 : vector<1x8x32xf32> to vector<3x8x32xf32>
    %38 = arith.addf %35, %37 : vector<3x8x32xf32>
    %c0_26 = arith.constant 0 : index
    %c0_27 = arith.constant 0 : index
    %c0_28 = arith.constant 0 : index
    %c0_29 = arith.constant 0 : index
    %39 = vector.load %arg10[%c0_26, %c0_27, %c0_28, %c0_29] : memref<1x3x8x32xf32, #tpu.memory_space<vmem>>, vector<1x3x8x32xf32>
    %40 = vector.shape_cast %39 : vector<1x3x8x32xf32> to vector<3x8x32xf32>
    %41 = vector.shape_cast %38 : vector<3x8x32xf32> to vector<1x3x8x32xf32>
    tpu.vector_store %arg10[%c0_26, %c0_27, %c0_28, %c0_29], %41 {strides = array<i32>} : memref<1x3x8x32xf32, #tpu.memory_space<vmem>>, vector<1x3x8x32xf32>,
    return
  }
  func.func @transform_0(%arg0: i32) -> (i32, i32, i32, i32) {
    %c0_i32 = arith.constant 0 : i32
    %c0_i32_0 = arith.constant 0 : i32
    %c0_i32_1 = arith.constant 0 : i32
    %c0_i32_2 = arith.constant 0 : i32
    return %arg0, %c0_i32, %c0_i32_0, %c0_i32_1 : i32, i32, i32, i32
  }
  func.func @transform_1(%arg0: i32) -> (i32, i32, i32) {
    %c0_i32 = arith.constant 0 : i32
    %c0_i32_0 = arith.constant 0 : i32
    %c0_i32_1 = arith.constant 0 : i32
    return %arg0, %c0_i32, %c0_i32_0 : i32, i32, i32
  }
  func.func @transform_2(%arg0: i32) -> (i32, i32) {
    %c0_i32 = arith.constant 0 : i32
    %c0_i32_0 = arith.constant 0 : i32
    %c0_i32_1 = arith.constant 0 : i32
    return %c0_i32, %c0_i32_0 : i32, i32
  }
  func.func @transform_3(%arg0: i32) -> (i32, i32) {
    %c0_i32 = arith.constant 0 : i32
    %c0_i32_0 = arith.constant 0 : i32
    %c0_i32_1 = arith.constant 0 : i32
    return %c0_i32, %c0_i32_0 : i32, i32
  }
  func.func @transform_4(%arg0: i32) -> (i32, i32) {
    %c0_i32 = arith.constant 0 : i32
    %c0_i32_0 = arith.constant 0 : i32
    %c0_i32_1 = arith.constant 0 : i32
    return %c0_i32, %c0_i32_0 : i32, i32
  }
  func.func @transform_5(%arg0: i32) -> (i32, i32) {
    %c0_i32 = arith.constant 0 : i32
    %c0_i32_0 = arith.constant 0 : i32
    %c0_i32_1 = arith.constant 0 : i32
    return %c0_i32, %c0_i32_0 : i32, i32
  }
  func.func @transform_6(%arg0: i32) -> (i32, i32) {
    %c0_i32 = arith.constant 0 : i32
    %c0_i32_0 = arith.constant 0 : i32
    %c0_i32_1 = arith.constant 0 : i32
    return %c0_i32, %c0_i32_0 : i32, i32
  }
  func.func @transform_7(%arg0: i32) -> (i32, i32) {
    %c0_i32 = arith.constant 0 : i32
    %c0_i32_0 = arith.constant 0 : i32
    %c0_i32_1 = arith.constant 0 : i32
    return %c0_i32, %c0_i32_0 : i32, i32
  }
  func.func @transform_8(%arg0: i32) -> (i32, i32) {
    %c0_i32 = arith.constant 0 : i32
    %c0_i32_0 = arith.constant 0 : i32
    %c0_i32_1 = arith.constant 0 : i32
    return %c0_i32, %c0_i32_0 : i32, i32
  }
  func.func @transform_9(%arg0: i32) -> (i32, i32, i32, i32) {
    %c0_i32 = arith.constant 0 : i32
    %c0_i32_0 = arith.constant 0 : i32
    %c0_i32_1 = arith.constant 0 : i32
    %c0_i32_2 = arith.constant 0 : i32
    return %arg0, %c0_i32, %c0_i32_0, %c0_i32_1 : i32, i32, i32, i32
  }
}

module attributes {stable_mosaic.version = 11 : i64} {
  func.func @head_kernel(%arg0: i32, %arg1: memref<2x3x8x32xf32, #tpu.memory_space<vmem>>, %arg2: memref<32x128xf32, #tpu.memory_space<vmem>>, %arg3: memref<1x128xf32, #tpu.memory_space<vmem>>, %arg4: memref<128x64xf32, #tpu.memory_space<vmem>>, %arg5: memref<1x64xf32, #tpu.memory_space<vmem>>, %arg6: memref<3x64xf32, #tpu.memory_space<vmem>>, %arg7: memref<1x3xf32, #tpu.memory_space<vmem>>, %arg8: memref<2x3xf32, #tpu.memory_space<vmem>>) attributes {dimension_semantics = [#tpu.dimension_semantics<arbitrary>], iteration_bounds = array<i64: 1>, scalar_prefetch = 0 : i64, scratch_operands = 0 : i64, tpu.core_type = #tpu.core_type<tc>, window_params = [{pipeline_mode = #tpu.pipeline_mode<synchronous>, transform_indices = @transform_0, window_bounds = array<i64: 2, 3, 8, 32>}, {pipeline_mode = #tpu.pipeline_mode<synchronous>, transform_indices = @transform_1, window_bounds = array<i64: 32, 128>}, {pipeline_mode = #tpu.pipeline_mode<synchronous>, transform_indices = @transform_2, window_bounds = array<i64: 1, 128>}, {pipeline_mode = #tpu.pipeline_mode<synchronous>, transform_indices = @transform_3, window_bounds = array<i64: 128, 64>}, {pipeline_mode = #tpu.pipeline_mode<synchronous>, transform_indices = @transform_4, window_bounds = array<i64: 1, 64>}, {pipeline_mode = #tpu.pipeline_mode<synchronous>, transform_indices = @transform_5, window_bounds = array<i64: 3, 64>}, {pipeline_mode = #tpu.pipeline_mode<synchronous>, transform_indices = @transform_6, window_bounds = array<i64: 1, 3>}, {pipeline_mode = #tpu.pipeline_mode<synchronous>, transform_indices = @transform_7, window_bounds = array<i64: 2, 3>}]} {
    %c0 = arith.constant 0 : index
    %c0_0 = arith.constant 0 : index
    %c0_1 = arith.constant 0 : index
    %c0_2 = arith.constant 0 : index
    %0 = vector.load %arg1[%c0, %c0_0, %c0_1, %c0_2] : memref<2x3x8x32xf32, #tpu.memory_space<vmem>>, vector<2x3x8x32xf32>
    %cst = arith.constant dense<0.000000e+00> : vector<2x3x32xf32>
    %1 = vector.multi_reduction <add>, %0, %cst [2] : vector<2x3x8x32xf32> to vector<2x3x32xf32>
    %cst_3 = arith.constant 8.000000e+00 : f32
    %2 = vector.broadcast %cst_3 : f32 to vector<2x3x32xf32>
    %3 = arith.divf %1, %2 : vector<2x3x32xf32>
    %4 = vector.shape_cast %3 : vector<2x3x32xf32> to vector<6x32xf32>
    %c0_4 = arith.constant 0 : index
    %c0_5 = arith.constant 0 : index
    %5 = vector.load %arg2[%c0_4, %c0_5] : memref<32x128xf32, #tpu.memory_space<vmem>>, vector<32x128xf32>
    %cst_6 = arith.constant dense<0.000000e+00> : vector<6x128xf32>
    %6 = tpu.matmul %4, %5, %cst_6 {dimension_numbers = #tpu.dot_dimension_numbers<[1], [0], [0], [1], [0, 0, 1, 1], [], []>} : vector<6x32xf32>, vector<32x128xf32>, vector<6x128xf32> -> vector<6x128xf32>
    %c0_7 = arith.constant 0 : index
    %c0_8 = arith.constant 0 : index
    %7 = vector.load %arg3[%c0_7, %c0_8] : memref<1x128xf32, #tpu.memory_space<vmem>>, vector<1x128xf32>
    %8 = vector.broadcast %7 : vector<1x128xf32> to vector<6x128xf32>
    %9 = arith.addf %6, %8 : vector<6x128xf32>
    %10 = arith.mulf %9, %9 : vector<6x128xf32>
    %11 = arith.mulf %9, %10 : vector<6x128xf32>
    %cst_9 = arith.constant 4.471500e-02 : f32
    %12 = vector.broadcast %cst_9 : f32 to vector<6x128xf32>
    %13 = arith.mulf %12, %11 : vector<6x128xf32>
    %14 = arith.addf %9, %13 : vector<6x128xf32>
    %cst_10 = arith.constant 0.797884583 : f32
    %15 = vector.broadcast %cst_10 : f32 to vector<6x128xf32>
    %16 = arith.mulf %15, %14 : vector<6x128xf32>
    %17 = math.tanh %16 : vector<6x128xf32>
    %cst_11 = arith.constant 1.000000e+00 : f32
    %18 = vector.broadcast %cst_11 : f32 to vector<6x128xf32>
    %19 = arith.addf %18, %17 : vector<6x128xf32>
    %cst_12 = arith.constant 5.000000e-01 : f32
    %20 = vector.broadcast %cst_12 : f32 to vector<6x128xf32>
    %21 = arith.mulf %20, %19 : vector<6x128xf32>
    %22 = arith.mulf %9, %21 : vector<6x128xf32>
    %c0_13 = arith.constant 0 : index
    %c0_14 = arith.constant 0 : index
    %23 = vector.load %arg4[%c0_13, %c0_14] : memref<128x64xf32, #tpu.memory_space<vmem>>, vector<128x64xf32>
    %cst_15 = arith.constant dense<0.000000e+00> : vector<6x64xf32>
    %24 = tpu.matmul %22, %23, %cst_15 {dimension_numbers = #tpu.dot_dimension_numbers<[1], [0], [0], [1], [0, 0, 1, 1], [], []>} : vector<6x128xf32>, vector<128x64xf32>, vector<6x64xf32> -> vector<6x64xf32>
    %c0_16 = arith.constant 0 : index
    %c0_17 = arith.constant 0 : index
    %25 = vector.load %arg5[%c0_16, %c0_17] : memref<1x64xf32, #tpu.memory_space<vmem>>, vector<1x64xf32>
    %26 = vector.broadcast %25 : vector<1x64xf32> to vector<6x64xf32>
    %27 = arith.addf %24, %26 : vector<6x64xf32>
    %28 = arith.mulf %27, %27 : vector<6x64xf32>
    %29 = arith.mulf %27, %28 : vector<6x64xf32>
    %cst_18 = arith.constant 4.471500e-02 : f32
    %30 = vector.broadcast %cst_18 : f32 to vector<6x64xf32>
    %31 = arith.mulf %30, %29 : vector<6x64xf32>
    %32 = arith.addf %27, %31 : vector<6x64xf32>
    %cst_19 = arith.constant 0.797884583 : f32
    %33 = vector.broadcast %cst_19 : f32 to vector<6x64xf32>
    %34 = arith.mulf %33, %32 : vector<6x64xf32>
    %35 = math.tanh %34 : vector<6x64xf32>
    %cst_20 = arith.constant 1.000000e+00 : f32
    %36 = vector.broadcast %cst_20 : f32 to vector<6x64xf32>
    %37 = arith.addf %36, %35 : vector<6x64xf32>
    %cst_21 = arith.constant 5.000000e-01 : f32
    %38 = vector.broadcast %cst_21 : f32 to vector<6x64xf32>
    %39 = arith.mulf %38, %37 : vector<6x64xf32>
    %40 = arith.mulf %27, %39 : vector<6x64xf32>
    %41 = vector.shape_cast %40 : vector<6x64xf32> to vector<2x3x64xf32>
    %c0_22 = arith.constant 0 : index
    %c0_23 = arith.constant 0 : index
    %42 = vector.load %arg6[%c0_22, %c0_23] : memref<3x64xf32, #tpu.memory_space<vmem>>, vector<3x64xf32>
    %43 = vector.shape_cast %42 : vector<3x64xf32> to vector<1x3x64xf32>
    %44 = vector.broadcast %43 : vector<1x3x64xf32> to vector<2x3x64xf32>
    %45 = arith.mulf %41, %44 : vector<2x3x64xf32>
    %cst_24 = arith.constant dense<0.000000e+00> : vector<2x3xf32>
    %46 = vector.multi_reduction <add>, %45, %cst_24 [2] : vector<2x3x64xf32> to vector<2x3xf32>
    %c0_25 = arith.constant 0 : index
    %c0_26 = arith.constant 0 : index
    %47 = vector.load %arg7[%c0_25, %c0_26] : memref<1x3xf32, #tpu.memory_space<vmem>>, vector<1x3xf32>
    %48 = vector.broadcast %47 : vector<1x3xf32> to vector<2x3xf32>
    %49 = arith.addf %46, %48 : vector<2x3xf32>
    %c0_27 = arith.constant 0 : index
    %c0_28 = arith.constant 0 : index
    %50 = vector.load %arg8[%c0_27, %c0_28] : memref<2x3xf32, #tpu.memory_space<vmem>>, vector<2x3xf32>
    tpu.vector_store %arg8[%c0_27, %c0_28], %49 {strides = array<i32>} : memref<2x3xf32, #tpu.memory_space<vmem>>, vector<2x3xf32>,
    return
  }
  func.func @transform_0(%arg0: i32) -> (i32, i32, i32, i32) {
    %c0_i32 = arith.constant 0 : i32
    %c0_i32_0 = arith.constant 0 : i32
    %c0_i32_1 = arith.constant 0 : i32
    %c0_i32_2 = arith.constant 0 : i32
    %c0_i32_3 = arith.constant 0 : i32
    return %c0_i32, %c0_i32_0, %c0_i32_1, %c0_i32_2 : i32, i32, i32, i32
  }
  func.func @transform_1(%arg0: i32) -> (i32, i32) {
    %c0_i32 = arith.constant 0 : i32
    %c0_i32_0 = arith.constant 0 : i32
    %c0_i32_1 = arith.constant 0 : i32
    return %c0_i32, %c0_i32_0 : i32, i32
  }
  func.func @transform_2(%arg0: i32) -> (i32, i32) {
    %c0_i32 = arith.constant 0 : i32
    %c0_i32_0 = arith.constant 0 : i32
    %c0_i32_1 = arith.constant 0 : i32
    return %c0_i32, %c0_i32_0 : i32, i32
  }
  func.func @transform_3(%arg0: i32) -> (i32, i32) {
    %c0_i32 = arith.constant 0 : i32
    %c0_i32_0 = arith.constant 0 : i32
    %c0_i32_1 = arith.constant 0 : i32
    return %c0_i32, %c0_i32_0 : i32, i32
  }
  func.func @transform_4(%arg0: i32) -> (i32, i32) {
    %c0_i32 = arith.constant 0 : i32
    %c0_i32_0 = arith.constant 0 : i32
    %c0_i32_1 = arith.constant 0 : i32
    return %c0_i32, %c0_i32_0 : i32, i32
  }
  func.func @transform_5(%arg0: i32) -> (i32, i32) {
    %c0_i32 = arith.constant 0 : i32
    %c0_i32_0 = arith.constant 0 : i32
    %c0_i32_1 = arith.constant 0 : i32
    return %c0_i32, %c0_i32_0 : i32, i32
  }
  func.func @transform_6(%arg0: i32) -> (i32, i32) {
    %c0_i32 = arith.constant 0 : i32
    %c0_i32_0 = arith.constant 0 : i32
    %c0_i32_1 = arith.constant 0 : i32
    return %c0_i32, %c0_i32_0 : i32, i32
  }
  func.func @transform_7(%arg0: i32) -> (i32, i32) {
    %c0_i32 = arith.constant 0 : i32
    %c0_i32_0 = arith.constant 0 : i32
    %c0_i32_1 = arith.constant 0 : i32
    return %c0_i32, %c0_i32_0 : i32, i32
  }
}

module attributes {stable_mosaic.version = 11 : i64} {
  func.func @encoder_kernel(%arg0: i32, %arg1: memref<1x3x8x32xf32, #tpu.memory_space<vmem>>, %arg2: memref<3x32x96xf32, #tpu.memory_space<vmem>>, %arg3: memref<3x1x96xf32, #tpu.memory_space<vmem>>, %arg4: memref<32x32xf32, #tpu.memory_space<vmem>>, %arg5: memref<1x32xf32, #tpu.memory_space<vmem>>, %arg6: memref<3x1x32xf32, #tpu.memory_space<vmem>>, %arg7: memref<3x1x32xf32, #tpu.memory_space<vmem>>, %arg8: memref<3x32x128xf32, #tpu.memory_space<vmem>>, %arg9: memref<3x1x128xf32, #tpu.memory_space<vmem>>, %arg10: memref<3x128x32xf32, #tpu.memory_space<vmem>>, %arg11: memref<3x1x32xf32, #tpu.memory_space<vmem>>, %arg12: memref<3x1x32xf32, #tpu.memory_space<vmem>>, %arg13: memref<3x1x32xf32, #tpu.memory_space<vmem>>, %arg14: memref<1x3x8x32xf32, #tpu.memory_space<vmem>>) attributes {dimension_semantics = [#tpu.dimension_semantics<parallel>], iteration_bounds = array<i64: 2>, scalar_prefetch = 0 : i64, scratch_operands = 0 : i64, tpu.core_type = #tpu.core_type<tc>, window_params = [{transform_indices = @transform_0, window_bounds = array<i64: 1, 3, 8, 32>}, {pipeline_mode = #tpu.pipeline_mode<synchronous>, transform_indices = @transform_1, window_bounds = array<i64: 3, 32, 96>}, {pipeline_mode = #tpu.pipeline_mode<synchronous>, transform_indices = @transform_2, window_bounds = array<i64: 3, 1, 96>}, {pipeline_mode = #tpu.pipeline_mode<synchronous>, transform_indices = @transform_3, window_bounds = array<i64: 32, 32>}, {pipeline_mode = #tpu.pipeline_mode<synchronous>, transform_indices = @transform_4, window_bounds = array<i64: 1, 32>}, {pipeline_mode = #tpu.pipeline_mode<synchronous>, transform_indices = @transform_5, window_bounds = array<i64: 3, 1, 32>}, {pipeline_mode = #tpu.pipeline_mode<synchronous>, transform_indices = @transform_6, window_bounds = array<i64: 3, 1, 32>}, {pipeline_mode = #tpu.pipeline_mode<synchronous>, transform_indices = @transform_7, window_bounds = array<i64: 3, 32, 128>}, {pipeline_mode = #tpu.pipeline_mode<synchronous>, transform_indices = @transform_8, window_bounds = array<i64: 3, 1, 128>}, {pipeline_mode = #tpu.pipeline_mode<synchronous>, transform_indices = @transform_9, window_bounds = array<i64: 3, 128, 32>}, {pipeline_mode = #tpu.pipeline_mode<synchronous>, transform_indices = @transform_10, window_bounds = array<i64: 3, 1, 32>}, {pipeline_mode = #tpu.pipeline_mode<synchronous>, transform_indices = @transform_11, window_bounds = array<i64: 3, 1, 32>}, {pipeline_mode = #tpu.pipeline_mode<synchronous>, transform_indices = @transform_12, window_bounds = array<i64: 3, 1, 32>}, {transform_indices = @transform_13, window_bounds = array<i64: 1, 3, 8, 32>}]} {
    %c0 = arith.constant 0 : index
    %c0_0 = arith.constant 0 : index
    %c0_1 = arith.constant 0 : index
    %c0_2 = arith.constant 0 : index
    %0 = vector.load %arg1[%c0, %c0_0, %c0_1, %c0_2] : memref<1x3x8x32xf32, #tpu.memory_space<vmem>>, vector<1x3x8x32xf32>
    %1 = vector.shape_cast %0 : vector<1x3x8x32xf32> to vector<3x8x32xf32>
    %c0_3 = arith.constant 0 : index
    %c0_4 = arith.constant 0 : index
    %c0_5 = arith.constant 0 : index
    %2 = vector.load %arg2[%c0_3, %c0_4, %c0_5] : memref<3x32x96xf32, #tpu.memory_space<vmem>>, vector<3x32x96xf32>
    %cst = arith.constant dense<0.000000e+00> : vector<3x8x96xf32>
    %3 = tpu.matmul %1, %2, %cst {dimension_numbers = #tpu.dot_dimension_numbers<[2], [1], [1], [2], [0, 0, 0, 1, 1, 2], [0], [0]>} : vector<3x8x32xf32>, vector<3x32x96xf32>, vector<3x8x96xf32> -> vector<3x8x96xf32>
    %c0_6 = arith.constant 0 : index
    %c0_7 = arith.constant 0 : index
    %c0_8 = arith.constant 0 : index
    %4 = vector.load %arg3[%c0_6, %c0_7, %c0_8] : memref<3x1x96xf32, #tpu.memory_space<vmem>>, vector<3x1x96xf32>
    %5 = vector.broadcast %4 : vector<3x1x96xf32> to vector<3x8x96xf32>
    %6 = arith.addf %3, %5 : vector<3x8x96xf32>
    %7 = vector.extract_strided_slice %6 {offsets = [0, 0, 0], sizes = [3, 8, 32], strides = [1, 1, 1]} : vector<3x8x96xf32> to vector<3x8x32xf32>
    %8 = vector.extract_strided_slice %6 {offsets = [0, 0, 32], sizes = [3, 8, 32], strides = [1, 1, 1]} : vector<3x8x96xf32> to vector<3x8x32xf32>
    %9 = vector.extract_strided_slice %6 {offsets = [0, 0, 64], sizes = [3, 8, 32], strides = [1, 1, 1]} : vector<3x8x96xf32> to vector<3x8x32xf32>
    %10 = vector.shape_cast %7 : vector<3x8x32xf32> to vector<3x8x8x4xf32>
    %11 = tpu.transpose %10, [0, 2, 1, 3] : vector<3x8x8x4xf32> -> vector<3x8x8x4xf32>
    %12 = vector.shape_cast %8 : vector<3x8x32xf32> to vector<3x8x8x4xf32>
    %13 = tpu.transpose %12, [0, 2, 1, 3] : vector<3x8x8x4xf32> -> vector<3x8x8x4xf32>
    %14 = vector.shape_cast %9 : vector<3x8x32xf32> to vector<3x8x8x4xf32>
    %15 = tpu.transpose %14, [0, 2, 1, 3] : vector<3x8x8x4xf32> -> vector<3x8x8x4xf32>
    %cst_9 = arith.constant 0.000000e+00 : f32
    %16 = vector.broadcast %cst_9 : f32 to vector<8x8x4xf32>
    %17 = vector.extract_strided_slice %11 {offsets = [0, 0, 0, 0], sizes = [1, 8, 8, 4], strides = [1, 1, 1, 1]} : vector<3x8x8x4xf32> to vector<1x8x8x4xf32>
    %18 = vector.shape_cast %17 : vector<1x8x8x4xf32> to vector<8x8x4xf32>
    %19 = vector.extract_strided_slice %13 {offsets = [0, 0, 0, 0], sizes = [1, 8, 8, 4], strides = [1, 1, 1, 1]} : vector<3x8x8x4xf32> to vector<1x8x8x4xf32>
    %20 = vector.shape_cast %19 : vector<1x8x8x4xf32> to vector<8x8x4xf32>
    "tpu.trace_start"() <{level = 10 : i32, message = "hqd,hkd->hqk"}> : () -> ()
    %cst_10 = arith.constant dense<0.000000e+00> : vector<8x8x8xf32>
    %21 = tpu.matmul %18, %20, %cst_10 {dimension_numbers = #tpu.dot_dimension_numbers<[2], [2], [1], [1], [0, 0, 0, 1, 1, 1], [0], [0]>} : vector<8x8x4xf32>, vector<8x8x4xf32>, vector<8x8x8xf32> -> vector<8x8x8xf32>
    "tpu.trace_stop"() : () -> ()
    %cst_11 = arith.constant 5.000000e-01 : f32
    %22 = vector.broadcast %cst_11 : f32 to vector<8x8x8xf32>
    %23 = arith.mulf %21, %22 : vector<8x8x8xf32>
    %cst_12 = arith.constant dense<0xFF800000> : vector<8x8xf32>
    %24 = vector.multi_reduction <maximumf>, %23, %cst_12 [2] : vector<8x8x8xf32> to vector<8x8xf32>
    %25 = vector.shape_cast %24 : vector<8x8xf32> to vector<8x8x1xf32>
    %26 = vector.broadcast %25 : vector<8x8x1xf32> to vector<8x8x8xf32>
    %27 = arith.subf %23, %26 : vector<8x8x8xf32>
    %28 = math.exp %27 : vector<8x8x8xf32>
    %cst_13 = arith.constant dense<0.000000e+00> : vector<8x8xf32>
    %29 = vector.multi_reduction <add>, %28, %cst_13 [2] : vector<8x8x8xf32> to vector<8x8xf32>
    %30 = vector.shape_cast %29 : vector<8x8xf32> to vector<8x8x1xf32>
    %31 = tpu.reciprocal %30 {approx = true} : vector<8x8x1xf32> -> vector<8x8x1xf32>
    %32 = vector.broadcast %31 : vector<8x8x1xf32> to vector<8x8x8xf32>
    %33 = arith.mulf %28, %32 : vector<8x8x8xf32>
    %34 = vector.extract_strided_slice %15 {offsets = [0, 0, 0, 0], sizes = [1, 8, 8, 4], strides = [1, 1, 1, 1]} : vector<3x8x8x4xf32> to vector<1x8x8x4xf32>
    %35 = vector.shape_cast %34 : vector<1x8x8x4xf32> to vector<8x8x4xf32>
    "tpu.trace_start"() <{level = 10 : i32, message = "hqk,hkd->hqd"}> : () -> ()
    %cst_14 = arith.constant dense<0.000000e+00> : vector<8x8x4xf32>
    %36 = tpu.matmul %33, %35, %cst_14 {dimension_numbers = #tpu.dot_dimension_numbers<[2], [1], [1], [2], [0, 0, 0, 1, 1, 2], [0], [0]>} : vector<8x8x8xf32>, vector<8x8x4xf32>, vector<8x8x4xf32> -> vector<8x8x4xf32>
    "tpu.trace_stop"() : () -> ()
    %37 = arith.addf %16, %36 : vector<8x8x4xf32>
    %38 = vector.extract_strided_slice %11 {offsets = [0, 0, 0, 0], sizes = [1, 8, 8, 4], strides = [1, 1, 1, 1]} : vector<3x8x8x4xf32> to vector<1x8x8x4xf32>
    %39 = vector.shape_cast %38 : vector<1x8x8x4xf32> to vector<8x8x4xf32>
    %40 = vector.extract_strided_slice %13 {offsets = [1, 0, 0, 0], sizes = [1, 8, 8, 4], strides = [1, 1, 1, 1]} : vector<3x8x8x4xf32> to vector<1x8x8x4xf32>
    %41 = vector.shape_cast %40 : vector<1x8x8x4xf32> to vector<8x8x4xf32>
    "tpu.trace_start"() <{level = 10 : i32, message = "hqd,hkd->hqk"}> : () -> ()
    %cst_15 = arith.constant dense<0.000000e+00> : vector<8x8x8xf32>
    %42 = tpu.matmul %39, %41, %cst_15 {dimension_numbers = #tpu.dot_dimension_numbers<[2], [2], [1], [1], [0, 0, 0, 1, 1, 1], [0], [0]>} : vector<8x8x4xf32>, vector<8x8x4xf32>, vector<8x8x8xf32> -> vector<8x8x8xf32>
    "tpu.trace_stop"() : () -> ()
    %cst_16 = arith.constant 5.000000e-01 : f32
    %43 = vector.broadcast %cst_16 : f32 to vector<8x8x8xf32>
    %44 = arith.mulf %42, %43 : vector<8x8x8xf32>
    %cst_17 = arith.constant dense<0xFF800000> : vector<8x8xf32>
    %45 = vector.multi_reduction <maximumf>, %44, %cst_17 [2] : vector<8x8x8xf32> to vector<8x8xf32>
    %46 = vector.shape_cast %45 : vector<8x8xf32> to vector<8x8x1xf32>
    %47 = vector.broadcast %46 : vector<8x8x1xf32> to vector<8x8x8xf32>
    %48 = arith.subf %44, %47 : vector<8x8x8xf32>
    %49 = math.exp %48 : vector<8x8x8xf32>
    %cst_18 = arith.constant dense<0.000000e+00> : vector<8x8xf32>
    %50 = vector.multi_reduction <add>, %49, %cst_18 [2] : vector<8x8x8xf32> to vector<8x8xf32>
    %51 = vector.shape_cast %50 : vector<8x8xf32> to vector<8x8x1xf32>
    %52 = tpu.reciprocal %51 {approx = true} : vector<8x8x1xf32> -> vector<8x8x1xf32>
    %53 = vector.broadcast %52 : vector<8x8x1xf32> to vector<8x8x8xf32>
    %54 = arith.mulf %49, %53 : vector<8x8x8xf32>
    %55 = vector.extract_strided_slice %15 {offsets = [1, 0, 0, 0], sizes = [1, 8, 8, 4], strides = [1, 1, 1, 1]} : vector<3x8x8x4xf32> to vector<1x8x8x4xf32>
    %56 = vector.shape_cast %55 : vector<1x8x8x4xf32> to vector<8x8x4xf32>
    "tpu.trace_start"() <{level = 10 : i32, message = "hqk,hkd->hqd"}> : () -> ()
    %cst_19 = arith.constant dense<0.000000e+00> : vector<8x8x4xf32>
    %57 = tpu.matmul %54, %56, %cst_19 {dimension_numbers = #tpu.dot_dimension_numbers<[2], [1], [1], [2], [0, 0, 0, 1, 1, 2], [0], [0]>} : vector<8x8x8xf32>, vector<8x8x4xf32>, vector<8x8x4xf32> -> vector<8x8x4xf32>
    "tpu.trace_stop"() : () -> ()
    %58 = arith.addf %37, %57 : vector<8x8x4xf32>
    %59 = vector.extract_strided_slice %11 {offsets = [0, 0, 0, 0], sizes = [1, 8, 8, 4], strides = [1, 1, 1, 1]} : vector<3x8x8x4xf32> to vector<1x8x8x4xf32>
    %60 = vector.shape_cast %59 : vector<1x8x8x4xf32> to vector<8x8x4xf32>
    %61 = vector.extract_strided_slice %13 {offsets = [2, 0, 0, 0], sizes = [1, 8, 8, 4], strides = [1, 1, 1, 1]} : vector<3x8x8x4xf32> to vector<1x8x8x4xf32>
    %62 = vector.shape_cast %61 : vector<1x8x8x4xf32> to vector<8x8x4xf32>
    "tpu.trace_start"() <{level = 10 : i32, message = "hqd,hkd->hqk"}> : () -> ()
    %cst_20 = arith.constant dense<0.000000e+00> : vector<8x8x8xf32>
    %63 = tpu.matmul %60, %62, %cst_20 {dimension_numbers = #tpu.dot_dimension_numbers<[2], [2], [1], [1], [0, 0, 0, 1, 1, 1], [0], [0]>} : vector<8x8x4xf32>, vector<8x8x4xf32>, vector<8x8x8xf32> -> vector<8x8x8xf32>
    "tpu.trace_stop"() : () -> ()
    %cst_21 = arith.constant 5.000000e-01 : f32
    %64 = vector.broadcast %cst_21 : f32 to vector<8x8x8xf32>
    %65 = arith.mulf %63, %64 : vector<8x8x8xf32>
    %cst_22 = arith.constant dense<0xFF800000> : vector<8x8xf32>
    %66 = vector.multi_reduction <maximumf>, %65, %cst_22 [2] : vector<8x8x8xf32> to vector<8x8xf32>
    %67 = vector.shape_cast %66 : vector<8x8xf32> to vector<8x8x1xf32>
    %68 = vector.broadcast %67 : vector<8x8x1xf32> to vector<8x8x8xf32>
    %69 = arith.subf %65, %68 : vector<8x8x8xf32>
    %70 = math.exp %69 : vector<8x8x8xf32>
    %cst_23 = arith.constant dense<0.000000e+00> : vector<8x8xf32>
    %71 = vector.multi_reduction <add>, %70, %cst_23 [2] : vector<8x8x8xf32> to vector<8x8xf32>
    %72 = vector.shape_cast %71 : vector<8x8xf32> to vector<8x8x1xf32>
    %73 = tpu.reciprocal %72 {approx = true} : vector<8x8x1xf32> -> vector<8x8x1xf32>
    %74 = vector.broadcast %73 : vector<8x8x1xf32> to vector<8x8x8xf32>
    %75 = arith.mulf %70, %74 : vector<8x8x8xf32>
    %76 = vector.extract_strided_slice %15 {offsets = [2, 0, 0, 0], sizes = [1, 8, 8, 4], strides = [1, 1, 1, 1]} : vector<3x8x8x4xf32> to vector<1x8x8x4xf32>
    %77 = vector.shape_cast %76 : vector<1x8x8x4xf32> to vector<8x8x4xf32>
    "tpu.trace_start"() <{level = 10 : i32, message = "hqk,hkd->hqd"}> : () -> ()
    %cst_24 = arith.constant dense<0.000000e+00> : vector<8x8x4xf32>
    %78 = tpu.matmul %75, %77, %cst_24 {dimension_numbers = #tpu.dot_dimension_numbers<[2], [1], [1], [2], [0, 0, 0, 1, 1, 2], [0], [0]>} : vector<8x8x8xf32>, vector<8x8x4xf32>, vector<8x8x4xf32> -> vector<8x8x4xf32>
    "tpu.trace_stop"() : () -> ()
    %79 = arith.addf %58, %78 : vector<8x8x4xf32>
    %80 = tpu.transpose %79, [1, 0, 2] : vector<8x8x4xf32> -> vector<8x8x4xf32>
    %81 = vector.shape_cast %80 : vector<8x8x4xf32> to vector<8x32xf32>
    %cst_25 = arith.constant 0.000000e+00 : f32
    %82 = vector.broadcast %cst_25 : f32 to vector<8x8x4xf32>
    %83 = vector.extract_strided_slice %11 {offsets = [1, 0, 0, 0], sizes = [1, 8, 8, 4], strides = [1, 1, 1, 1]} : vector<3x8x8x4xf32> to vector<1x8x8x4xf32>
    %84 = vector.shape_cast %83 : vector<1x8x8x4xf32> to vector<8x8x4xf32>
    %85 = vector.extract_strided_slice %13 {offsets = [0, 0, 0, 0], sizes = [1, 8, 8, 4], strides = [1, 1, 1, 1]} : vector<3x8x8x4xf32> to vector<1x8x8x4xf32>
    %86 = vector.shape_cast %85 : vector<1x8x8x4xf32> to vector<8x8x4xf32>
    "tpu.trace_start"() <{level = 10 : i32, message = "hqd,hkd->hqk"}> : () -> ()
    %cst_26 = arith.constant dense<0.000000e+00> : vector<8x8x8xf32>
    %87 = tpu.matmul %84, %86, %cst_26 {dimension_numbers = #tpu.dot_dimension_numbers<[2], [2], [1], [1], [0, 0, 0, 1, 1, 1], [0], [0]>} : vector<8x8x4xf32>, vector<8x8x4xf32>, vector<8x8x8xf32> -> vector<8x8x8xf32>
    "tpu.trace_stop"() : () -> ()
    %cst_27 = arith.constant 5.000000e-01 : f32
    %88 = vector.broadcast %cst_27 : f32 to vector<8x8x8xf32>
    %89 = arith.mulf %87, %88 : vector<8x8x8xf32>
    %cst_28 = arith.constant dense<0xFF800000> : vector<8x8xf32>
    %90 = vector.multi_reduction <maximumf>, %89, %cst_28 [2] : vector<8x8x8xf32> to vector<8x8xf32>
    %91 = vector.shape_cast %90 : vector<8x8xf32> to vector<8x8x1xf32>
    %92 = vector.broadcast %91 : vector<8x8x1xf32> to vector<8x8x8xf32>
    %93 = arith.subf %89, %92 : vector<8x8x8xf32>
    %94 = math.exp %93 : vector<8x8x8xf32>
    %cst_29 = arith.constant dense<0.000000e+00> : vector<8x8xf32>
    %95 = vector.multi_reduction <add>, %94, %cst_29 [2] : vector<8x8x8xf32> to vector<8x8xf32>
    %96 = vector.shape_cast %95 : vector<8x8xf32> to vector<8x8x1xf32>
    %97 = tpu.reciprocal %96 {approx = true} : vector<8x8x1xf32> -> vector<8x8x1xf32>
    %98 = vector.broadcast %97 : vector<8x8x1xf32> to vector<8x8x8xf32>
    %99 = arith.mulf %94, %98 : vector<8x8x8xf32>
    %100 = vector.extract_strided_slice %15 {offsets = [0, 0, 0, 0], sizes = [1, 8, 8, 4], strides = [1, 1, 1, 1]} : vector<3x8x8x4xf32> to vector<1x8x8x4xf32>
    %101 = vector.shape_cast %100 : vector<1x8x8x4xf32> to vector<8x8x4xf32>
    "tpu.trace_start"() <{level = 10 : i32, message = "hqk,hkd->hqd"}> : () -> ()
    %cst_30 = arith.constant dense<0.000000e+00> : vector<8x8x4xf32>
    %102 = tpu.matmul %99, %101, %cst_30 {dimension_numbers = #tpu.dot_dimension_numbers<[2], [1], [1], [2], [0, 0, 0, 1, 1, 2], [0], [0]>} : vector<8x8x8xf32>, vector<8x8x4xf32>, vector<8x8x4xf32> -> vector<8x8x4xf32>
    "tpu.trace_stop"() : () -> ()
    %103 = arith.addf %82, %102 : vector<8x8x4xf32>
    %104 = vector.extract_strided_slice %11 {offsets = [1, 0, 0, 0], sizes = [1, 8, 8, 4], strides = [1, 1, 1, 1]} : vector<3x8x8x4xf32> to vector<1x8x8x4xf32>
    %105 = vector.shape_cast %104 : vector<1x8x8x4xf32> to vector<8x8x4xf32>
    %106 = vector.extract_strided_slice %13 {offsets = [1, 0, 0, 0], sizes = [1, 8, 8, 4], strides = [1, 1, 1, 1]} : vector<3x8x8x4xf32> to vector<1x8x8x4xf32>
    %107 = vector.shape_cast %106 : vector<1x8x8x4xf32> to vector<8x8x4xf32>
    "tpu.trace_start"() <{level = 10 : i32, message = "hqd,hkd->hqk"}> : () -> ()
    %cst_31 = arith.constant dense<0.000000e+00> : vector<8x8x8xf32>
    %108 = tpu.matmul %105, %107, %cst_31 {dimension_numbers = #tpu.dot_dimension_numbers<[2], [2], [1], [1], [0, 0, 0, 1, 1, 1], [0], [0]>} : vector<8x8x4xf32>, vector<8x8x4xf32>, vector<8x8x8xf32> -> vector<8x8x8xf32>
    "tpu.trace_stop"() : () -> ()
    %cst_32 = arith.constant 5.000000e-01 : f32
    %109 = vector.broadcast %cst_32 : f32 to vector<8x8x8xf32>
    %110 = arith.mulf %108, %109 : vector<8x8x8xf32>
    %cst_33 = arith.constant dense<0xFF800000> : vector<8x8xf32>
    %111 = vector.multi_reduction <maximumf>, %110, %cst_33 [2] : vector<8x8x8xf32> to vector<8x8xf32>
    %112 = vector.shape_cast %111 : vector<8x8xf32> to vector<8x8x1xf32>
    %113 = vector.broadcast %112 : vector<8x8x1xf32> to vector<8x8x8xf32>
    %114 = arith.subf %110, %113 : vector<8x8x8xf32>
    %115 = math.exp %114 : vector<8x8x8xf32>
    %cst_34 = arith.constant dense<0.000000e+00> : vector<8x8xf32>
    %116 = vector.multi_reduction <add>, %115, %cst_34 [2] : vector<8x8x8xf32> to vector<8x8xf32>
    %117 = vector.shape_cast %116 : vector<8x8xf32> to vector<8x8x1xf32>
    %118 = tpu.reciprocal %117 {approx = true} : vector<8x8x1xf32> -> vector<8x8x1xf32>
    %119 = vector.broadcast %118 : vector<8x8x1xf32> to vector<8x8x8xf32>
    %120 = arith.mulf %115, %119 : vector<8x8x8xf32>
    %121 = vector.extract_strided_slice %15 {offsets = [1, 0, 0, 0], sizes = [1, 8, 8, 4], strides = [1, 1, 1, 1]} : vector<3x8x8x4xf32> to vector<1x8x8x4xf32>
    %122 = vector.shape_cast %121 : vector<1x8x8x4xf32> to vector<8x8x4xf32>
    "tpu.trace_start"() <{level = 10 : i32, message = "hqk,hkd->hqd"}> : () -> ()
    %cst_35 = arith.constant dense<0.000000e+00> : vector<8x8x4xf32>
    %123 = tpu.matmul %120, %122, %cst_35 {dimension_numbers = #tpu.dot_dimension_numbers<[2], [1], [1], [2], [0, 0, 0, 1, 1, 2], [0], [0]>} : vector<8x8x8xf32>, vector<8x8x4xf32>, vector<8x8x4xf32> -> vector<8x8x4xf32>
    "tpu.trace_stop"() : () -> ()
    %124 = arith.addf %103, %123 : vector<8x8x4xf32>
    %125 = vector.extract_strided_slice %11 {offsets = [1, 0, 0, 0], sizes = [1, 8, 8, 4], strides = [1, 1, 1, 1]} : vector<3x8x8x4xf32> to vector<1x8x8x4xf32>
    %126 = vector.shape_cast %125 : vector<1x8x8x4xf32> to vector<8x8x4xf32>
    %127 = vector.extract_strided_slice %13 {offsets = [2, 0, 0, 0], sizes = [1, 8, 8, 4], strides = [1, 1, 1, 1]} : vector<3x8x8x4xf32> to vector<1x8x8x4xf32>
    %128 = vector.shape_cast %127 : vector<1x8x8x4xf32> to vector<8x8x4xf32>
    "tpu.trace_start"() <{level = 10 : i32, message = "hqd,hkd->hqk"}> : () -> ()
    %cst_36 = arith.constant dense<0.000000e+00> : vector<8x8x8xf32>
    %129 = tpu.matmul %126, %128, %cst_36 {dimension_numbers = #tpu.dot_dimension_numbers<[2], [2], [1], [1], [0, 0, 0, 1, 1, 1], [0], [0]>} : vector<8x8x4xf32>, vector<8x8x4xf32>, vector<8x8x8xf32> -> vector<8x8x8xf32>
    "tpu.trace_stop"() : () -> ()
    %cst_37 = arith.constant 5.000000e-01 : f32
    %130 = vector.broadcast %cst_37 : f32 to vector<8x8x8xf32>
    %131 = arith.mulf %129, %130 : vector<8x8x8xf32>
    %cst_38 = arith.constant dense<0xFF800000> : vector<8x8xf32>
    %132 = vector.multi_reduction <maximumf>, %131, %cst_38 [2] : vector<8x8x8xf32> to vector<8x8xf32>
    %133 = vector.shape_cast %132 : vector<8x8xf32> to vector<8x8x1xf32>
    %134 = vector.broadcast %133 : vector<8x8x1xf32> to vector<8x8x8xf32>
    %135 = arith.subf %131, %134 : vector<8x8x8xf32>
    %136 = math.exp %135 : vector<8x8x8xf32>
    %cst_39 = arith.constant dense<0.000000e+00> : vector<8x8xf32>
    %137 = vector.multi_reduction <add>, %136, %cst_39 [2] : vector<8x8x8xf32> to vector<8x8xf32>
    %138 = vector.shape_cast %137 : vector<8x8xf32> to vector<8x8x1xf32>
    %139 = tpu.reciprocal %138 {approx = true} : vector<8x8x1xf32> -> vector<8x8x1xf32>
    %140 = vector.broadcast %139 : vector<8x8x1xf32> to vector<8x8x8xf32>
    %141 = arith.mulf %136, %140 : vector<8x8x8xf32>
    %142 = vector.extract_strided_slice %15 {offsets = [2, 0, 0, 0], sizes = [1, 8, 8, 4], strides = [1, 1, 1, 1]} : vector<3x8x8x4xf32> to vector<1x8x8x4xf32>
    %143 = vector.shape_cast %142 : vector<1x8x8x4xf32> to vector<8x8x4xf32>
    "tpu.trace_start"() <{level = 10 : i32, message = "hqk,hkd->hqd"}> : () -> ()
    %cst_40 = arith.constant dense<0.000000e+00> : vector<8x8x4xf32>
    %144 = tpu.matmul %141, %143, %cst_40 {dimension_numbers = #tpu.dot_dimension_numbers<[2], [1], [1], [2], [0, 0, 0, 1, 1, 2], [0], [0]>} : vector<8x8x8xf32>, vector<8x8x4xf32>, vector<8x8x4xf32> -> vector<8x8x4xf32>
    "tpu.trace_stop"() : () -> ()
    %145 = arith.addf %124, %144 : vector<8x8x4xf32>
    %146 = tpu.transpose %145, [1, 0, 2] : vector<8x8x4xf32> -> vector<8x8x4xf32>
    %147 = vector.shape_cast %146 : vector<8x8x4xf32> to vector<8x32xf32>
    %cst_41 = arith.constant 0.000000e+00 : f32
    %148 = vector.broadcast %cst_41 : f32 to vector<8x8x4xf32>
    %149 = vector.extract_strided_slice %11 {offsets = [2, 0, 0, 0], sizes = [1, 8, 8, 4], strides = [1, 1, 1, 1]} : vector<3x8x8x4xf32> to vector<1x8x8x4xf32>
    %150 = vector.shape_cast %149 : vector<1x8x8x4xf32> to vector<8x8x4xf32>
    %151 = vector.extract_strided_slice %13 {offsets = [0, 0, 0, 0], sizes = [1, 8, 8, 4], strides = [1, 1, 1, 1]} : vector<3x8x8x4xf32> to vector<1x8x8x4xf32>
    %152 = vector.shape_cast %151 : vector<1x8x8x4xf32> to vector<8x8x4xf32>
    "tpu.trace_start"() <{level = 10 : i32, message = "hqd,hkd->hqk"}> : () -> ()
    %cst_42 = arith.constant dense<0.000000e+00> : vector<8x8x8xf32>
    %153 = tpu.matmul %150, %152, %cst_42 {dimension_numbers = #tpu.dot_dimension_numbers<[2], [2], [1], [1], [0, 0, 0, 1, 1, 1], [0], [0]>} : vector<8x8x4xf32>, vector<8x8x4xf32>, vector<8x8x8xf32> -> vector<8x8x8xf32>
    "tpu.trace_stop"() : () -> ()
    %cst_43 = arith.constant 5.000000e-01 : f32
    %154 = vector.broadcast %cst_43 : f32 to vector<8x8x8xf32>
    %155 = arith.mulf %153, %154 : vector<8x8x8xf32>
    %cst_44 = arith.constant dense<0xFF800000> : vector<8x8xf32>
    %156 = vector.multi_reduction <maximumf>, %155, %cst_44 [2] : vector<8x8x8xf32> to vector<8x8xf32>
    %157 = vector.shape_cast %156 : vector<8x8xf32> to vector<8x8x1xf32>
    %158 = vector.broadcast %157 : vector<8x8x1xf32> to vector<8x8x8xf32>
    %159 = arith.subf %155, %158 : vector<8x8x8xf32>
    %160 = math.exp %159 : vector<8x8x8xf32>
    %cst_45 = arith.constant dense<0.000000e+00> : vector<8x8xf32>
    %161 = vector.multi_reduction <add>, %160, %cst_45 [2] : vector<8x8x8xf32> to vector<8x8xf32>
    %162 = vector.shape_cast %161 : vector<8x8xf32> to vector<8x8x1xf32>
    %163 = tpu.reciprocal %162 {approx = true} : vector<8x8x1xf32> -> vector<8x8x1xf32>
    %164 = vector.broadcast %163 : vector<8x8x1xf32> to vector<8x8x8xf32>
    %165 = arith.mulf %160, %164 : vector<8x8x8xf32>
    %166 = vector.extract_strided_slice %15 {offsets = [0, 0, 0, 0], sizes = [1, 8, 8, 4], strides = [1, 1, 1, 1]} : vector<3x8x8x4xf32> to vector<1x8x8x4xf32>
    %167 = vector.shape_cast %166 : vector<1x8x8x4xf32> to vector<8x8x4xf32>
    "tpu.trace_start"() <{level = 10 : i32, message = "hqk,hkd->hqd"}> : () -> ()
    %cst_46 = arith.constant dense<0.000000e+00> : vector<8x8x4xf32>
    %168 = tpu.matmul %165, %167, %cst_46 {dimension_numbers = #tpu.dot_dimension_numbers<[2], [1], [1], [2], [0, 0, 0, 1, 1, 2], [0], [0]>} : vector<8x8x8xf32>, vector<8x8x4xf32>, vector<8x8x4xf32> -> vector<8x8x4xf32>
    "tpu.trace_stop"() : () -> ()
    %169 = arith.addf %148, %168 : vector<8x8x4xf32>
    %170 = vector.extract_strided_slice %11 {offsets = [2, 0, 0, 0], sizes = [1, 8, 8, 4], strides = [1, 1, 1, 1]} : vector<3x8x8x4xf32> to vector<1x8x8x4xf32>
    %171 = vector.shape_cast %170 : vector<1x8x8x4xf32> to vector<8x8x4xf32>
    %172 = vector.extract_strided_slice %13 {offsets = [1, 0, 0, 0], sizes = [1, 8, 8, 4], strides = [1, 1, 1, 1]} : vector<3x8x8x4xf32> to vector<1x8x8x4xf32>
    %173 = vector.shape_cast %172 : vector<1x8x8x4xf32> to vector<8x8x4xf32>
    "tpu.trace_start"() <{level = 10 : i32, message = "hqd,hkd->hqk"}> : () -> ()
    %cst_47 = arith.constant dense<0.000000e+00> : vector<8x8x8xf32>
    %174 = tpu.matmul %171, %173, %cst_47 {dimension_numbers = #tpu.dot_dimension_numbers<[2], [2], [1], [1], [0, 0, 0, 1, 1, 1], [0], [0]>} : vector<8x8x4xf32>, vector<8x8x4xf32>, vector<8x8x8xf32> -> vector<8x8x8xf32>
    "tpu.trace_stop"() : () -> ()
    %cst_48 = arith.constant 5.000000e-01 : f32
    %175 = vector.broadcast %cst_48 : f32 to vector<8x8x8xf32>
    %176 = arith.mulf %174, %175 : vector<8x8x8xf32>
    %cst_49 = arith.constant dense<0xFF800000> : vector<8x8xf32>
    %177 = vector.multi_reduction <maximumf>, %176, %cst_49 [2] : vector<8x8x8xf32> to vector<8x8xf32>
    %178 = vector.shape_cast %177 : vector<8x8xf32> to vector<8x8x1xf32>
    %179 = vector.broadcast %178 : vector<8x8x1xf32> to vector<8x8x8xf32>
    %180 = arith.subf %176, %179 : vector<8x8x8xf32>
    %181 = math.exp %180 : vector<8x8x8xf32>
    %cst_50 = arith.constant dense<0.000000e+00> : vector<8x8xf32>
    %182 = vector.multi_reduction <add>, %181, %cst_50 [2] : vector<8x8x8xf32> to vector<8x8xf32>
    %183 = vector.shape_cast %182 : vector<8x8xf32> to vector<8x8x1xf32>
    %184 = tpu.reciprocal %183 {approx = true} : vector<8x8x1xf32> -> vector<8x8x1xf32>
    %185 = vector.broadcast %184 : vector<8x8x1xf32> to vector<8x8x8xf32>
    %186 = arith.mulf %181, %185 : vector<8x8x8xf32>
    %187 = vector.extract_strided_slice %15 {offsets = [1, 0, 0, 0], sizes = [1, 8, 8, 4], strides = [1, 1, 1, 1]} : vector<3x8x8x4xf32> to vector<1x8x8x4xf32>
    %188 = vector.shape_cast %187 : vector<1x8x8x4xf32> to vector<8x8x4xf32>
    "tpu.trace_start"() <{level = 10 : i32, message = "hqk,hkd->hqd"}> : () -> ()
    %cst_51 = arith.constant dense<0.000000e+00> : vector<8x8x4xf32>
    %189 = tpu.matmul %186, %188, %cst_51 {dimension_numbers = #tpu.dot_dimension_numbers<[2], [1], [1], [2], [0, 0, 0, 1, 1, 2], [0], [0]>} : vector<8x8x8xf32>, vector<8x8x4xf32>, vector<8x8x4xf32> -> vector<8x8x4xf32>
    "tpu.trace_stop"() : () -> ()
    %190 = arith.addf %169, %189 : vector<8x8x4xf32>
    %191 = vector.extract_strided_slice %11 {offsets = [2, 0, 0, 0], sizes = [1, 8, 8, 4], strides = [1, 1, 1, 1]} : vector<3x8x8x4xf32> to vector<1x8x8x4xf32>
    %192 = vector.shape_cast %191 : vector<1x8x8x4xf32> to vector<8x8x4xf32>
    %193 = vector.extract_strided_slice %13 {offsets = [2, 0, 0, 0], sizes = [1, 8, 8, 4], strides = [1, 1, 1, 1]} : vector<3x8x8x4xf32> to vector<1x8x8x4xf32>
    %194 = vector.shape_cast %193 : vector<1x8x8x4xf32> to vector<8x8x4xf32>
    "tpu.trace_start"() <{level = 10 : i32, message = "hqd,hkd->hqk"}> : () -> ()
    %cst_52 = arith.constant dense<0.000000e+00> : vector<8x8x8xf32>
    %195 = tpu.matmul %192, %194, %cst_52 {dimension_numbers = #tpu.dot_dimension_numbers<[2], [2], [1], [1], [0, 0, 0, 1, 1, 1], [0], [0]>} : vector<8x8x4xf32>, vector<8x8x4xf32>, vector<8x8x8xf32> -> vector<8x8x8xf32>
    "tpu.trace_stop"() : () -> ()
    %cst_53 = arith.constant 5.000000e-01 : f32
    %196 = vector.broadcast %cst_53 : f32 to vector<8x8x8xf32>
    %197 = arith.mulf %195, %196 : vector<8x8x8xf32>
    %cst_54 = arith.constant dense<0xFF800000> : vector<8x8xf32>
    %198 = vector.multi_reduction <maximumf>, %197, %cst_54 [2] : vector<8x8x8xf32> to vector<8x8xf32>
    %199 = vector.shape_cast %198 : vector<8x8xf32> to vector<8x8x1xf32>
    %200 = vector.broadcast %199 : vector<8x8x1xf32> to vector<8x8x8xf32>
    %201 = arith.subf %197, %200 : vector<8x8x8xf32>
    %202 = math.exp %201 : vector<8x8x8xf32>
    %cst_55 = arith.constant dense<0.000000e+00> : vector<8x8xf32>
    %203 = vector.multi_reduction <add>, %202, %cst_55 [2] : vector<8x8x8xf32> to vector<8x8xf32>
    %204 = vector.shape_cast %203 : vector<8x8xf32> to vector<8x8x1xf32>
    %205 = tpu.reciprocal %204 {approx = true} : vector<8x8x1xf32> -> vector<8x8x1xf32>
    %206 = vector.broadcast %205 : vector<8x8x1xf32> to vector<8x8x8xf32>
    %207 = arith.mulf %202, %206 : vector<8x8x8xf32>
    %208 = vector.extract_strided_slice %15 {offsets = [2, 0, 0, 0], sizes = [1, 8, 8, 4], strides = [1, 1, 1, 1]} : vector<3x8x8x4xf32> to vector<1x8x8x4xf32>
    %209 = vector.shape_cast %208 : vector<1x8x8x4xf32> to vector<8x8x4xf32>
    "tpu.trace_start"() <{level = 10 : i32, message = "hqk,hkd->hqd"}> : () -> ()
    %cst_56 = arith.constant dense<0.000000e+00> : vector<8x8x4xf32>
    %210 = tpu.matmul %207, %209, %cst_56 {dimension_numbers = #tpu.dot_dimension_numbers<[2], [1], [1], [2], [0, 0, 0, 1, 1, 2], [0], [0]>} : vector<8x8x8xf32>, vector<8x8x4xf32>, vector<8x8x4xf32> -> vector<8x8x4xf32>
    "tpu.trace_stop"() : () -> ()
    %211 = arith.addf %190, %210 : vector<8x8x4xf32>
    %212 = tpu.transpose %211, [1, 0, 2] : vector<8x8x4xf32> -> vector<8x8x4xf32>
    %213 = vector.shape_cast %212 : vector<8x8x4xf32> to vector<8x32xf32>
    %214 = vector.shape_cast %81 : vector<8x32xf32> to vector<1x8x32xf32>
    %215 = vector.shape_cast %147 : vector<8x32xf32> to vector<1x8x32xf32>
    %216 = vector.shape_cast %213 : vector<8x32xf32> to vector<1x8x32xf32>
    %217 = tpu.concatenate %214, %215, %216 in 0 : vector<1x8x32xf32>, vector<1x8x32xf32>, vector<1x8x32xf32> -> vector<3x8x32xf32>
    %218 = vector.shape_cast %217 : vector<3x8x32xf32> to vector<24x32xf32>
    %c0_57 = arith.constant 0 : index
    %c0_58 = arith.constant 0 : index
    %219 = vector.load %arg4[%c0_57, %c0_58] : memref<32x32xf32, #tpu.memory_space<vmem>>, vector<32x32xf32>
    %cst_59 = arith.constant dense<0.000000e+00> : vector<24x32xf32>
    %220 = tpu.matmul %218, %219, %cst_59 {dimension_numbers = #tpu.dot_dimension_numbers<[1], [0], [0], [1], [0, 0, 1, 1], [], []>} : vector<24x32xf32>, vector<32x32xf32>, vector<24x32xf32> -> vector<24x32xf32>
    %221 = vector.shape_cast %220 : vector<24x32xf32> to vector<3x8x32xf32>
    %c0_60 = arith.constant 0 : index
    %c0_61 = arith.constant 0 : index
    %222 = vector.load %arg5[%c0_60, %c0_61] : memref<1x32xf32, #tpu.memory_space<vmem>>, vector<1x32xf32>
    %223 = vector.shape_cast %222 : vector<1x32xf32> to vector<1x1x32xf32>
    %224 = vector.broadcast %223 : vector<1x1x32xf32> to vector<3x8x32xf32>
    %225 = arith.addf %221, %224 : vector<3x8x32xf32>
    %226 = arith.addf %1, %225 : vector<3x8x32xf32>
    %c0_62 = arith.constant 0 : index
    %c0_63 = arith.constant 0 : index
    %c0_64 = arith.constant 0 : index
    %227 = vector.load %arg6[%c0_62, %c0_63, %c0_64] : memref<3x1x32xf32, #tpu.memory_space<vmem>>, vector<3x1x32xf32>
    %c0_65 = arith.constant 0 : index
    %c0_66 = arith.constant 0 : index
    %c0_67 = arith.constant 0 : index
    %228 = vector.load %arg7[%c0_65, %c0_66, %c0_67] : memref<3x1x32xf32, #tpu.memory_space<vmem>>, vector<3x1x32xf32>
    %cst_68 = arith.constant dense<0.000000e+00> : vector<3x8xf32>
    %229 = vector.multi_reduction <add>, %226, %cst_68 [2] : vector<3x8x32xf32> to vector<3x8xf32>
    %230 = vector.shape_cast %229 : vector<3x8xf32> to vector<3x8x1xf32>
    %cst_69 = arith.constant 3.200000e+01 : f32
    %231 = vector.broadcast %cst_69 : f32 to vector<3x8x1xf32>
    %232 = arith.divf %230, %231 : vector<3x8x1xf32>
    %233 = vector.broadcast %232 : vector<3x8x1xf32> to vector<3x8x32xf32>
    %234 = arith.subf %226, %233 : vector<3x8x32xf32>
    %235 = arith.mulf %234, %234 : vector<3x8x32xf32>
    %cst_70 = arith.constant dense<0.000000e+00> : vector<3x8xf32>
    %236 = vector.multi_reduction <add>, %235, %cst_70 [2] : vector<3x8x32xf32> to vector<3x8xf32>
    %237 = vector.shape_cast %236 : vector<3x8xf32> to vector<3x8x1xf32>
    %cst_71 = arith.constant 3.200000e+01 : f32
    %238 = vector.broadcast %cst_71 : f32 to vector<3x8x1xf32>
    %239 = arith.divf %237, %238 : vector<3x8x1xf32>
    %240 = vector.broadcast %232 : vector<3x8x1xf32> to vector<3x8x32xf32>
    %241 = arith.subf %226, %240 : vector<3x8x32xf32>
    %cst_72 = arith.constant 9.99999974E-6 : f32
    %242 = vector.broadcast %cst_72 : f32 to vector<3x8x1xf32>
    %243 = arith.addf %239, %242 : vector<3x8x1xf32>
    %244 = math.rsqrt %243 : vector<3x8x1xf32>
    %245 = vector.broadcast %244 : vector<3x8x1xf32> to vector<3x8x32xf32>
    %246 = arith.mulf %241, %245 : vector<3x8x32xf32>
    %247 = vector.broadcast %227 : vector<3x1x32xf32> to vector<3x8x32xf32>
    %248 = arith.mulf %246, %247 : vector<3x8x32xf32>
    %249 = vector.broadcast %228 : vector<3x1x32xf32> to vector<3x8x32xf32>
    %250 = arith.addf %248, %249 : vector<3x8x32xf32>
    %c0_73 = arith.constant 0 : index
    %c0_74 = arith.constant 0 : index
    %c0_75 = arith.constant 0 : index
    %251 = vector.load %arg8[%c0_73, %c0_74, %c0_75] : memref<3x32x128xf32, #tpu.memory_space<vmem>>, vector<3x32x128xf32>
    %cst_76 = arith.constant dense<0.000000e+00> : vector<3x8x128xf32>
    %252 = tpu.matmul %250, %251, %cst_76 {dimension_numbers = #tpu.dot_dimension_numbers<[2], [1], [1], [2], [0, 0, 0, 1, 1, 2], [0], [0]>} : vector<3x8x32xf32>, vector<3x32x128xf32>, vector<3x8x128xf32> -> vector<3x8x128xf32>
    %c0_77 = arith.constant 0 : index
    %c0_78 = arith.constant 0 : index
    %c0_79 = arith.constant 0 : index
    %253 = vector.load %arg9[%c0_77, %c0_78, %c0_79] : memref<3x1x128xf32, #tpu.memory_space<vmem>>, vector<3x1x128xf32>
    %254 = vector.broadcast %253 : vector<3x1x128xf32> to vector<3x8x128xf32>
    %255 = arith.addf %252, %254 : vector<3x8x128xf32>
    %256 = arith.mulf %255, %255 : vector<3x8x128xf32>
    %257 = arith.mulf %255, %256 : vector<3x8x128xf32>
    %cst_80 = arith.constant 4.471500e-02 : f32
    %258 = vector.broadcast %cst_80 : f32 to vector<3x8x128xf32>
    %259 = arith.mulf %258, %257 : vector<3x8x128xf32>
    %260 = arith.addf %255, %259 : vector<3x8x128xf32>
    %cst_81 = arith.constant 0.797884583 : f32
    %261 = vector.broadcast %cst_81 : f32 to vector<3x8x128xf32>
    %262 = arith.mulf %261, %260 : vector<3x8x128xf32>
    %263 = math.tanh %262 : vector<3x8x128xf32>
    %cst_82 = arith.constant 1.000000e+00 : f32
    %264 = vector.broadcast %cst_82 : f32 to vector<3x8x128xf32>
    %265 = arith.addf %264, %263 : vector<3x8x128xf32>
    %cst_83 = arith.constant 5.000000e-01 : f32
    %266 = vector.broadcast %cst_83 : f32 to vector<3x8x128xf32>
    %267 = arith.mulf %266, %265 : vector<3x8x128xf32>
    %268 = arith.mulf %255, %267 : vector<3x8x128xf32>
    %c0_84 = arith.constant 0 : index
    %c0_85 = arith.constant 0 : index
    %c0_86 = arith.constant 0 : index
    %269 = vector.load %arg10[%c0_84, %c0_85, %c0_86] : memref<3x128x32xf32, #tpu.memory_space<vmem>>, vector<3x128x32xf32>
    %cst_87 = arith.constant dense<0.000000e+00> : vector<3x8x32xf32>
    %270 = tpu.matmul %268, %269, %cst_87 {dimension_numbers = #tpu.dot_dimension_numbers<[2], [1], [1], [2], [0, 0, 0, 1, 1, 2], [0], [0]>} : vector<3x8x128xf32>, vector<3x128x32xf32>, vector<3x8x32xf32> -> vector<3x8x32xf32>
    %c0_88 = arith.constant 0 : index
    %c0_89 = arith.constant 0 : index
    %c0_90 = arith.constant 0 : index
    %271 = vector.load %arg11[%c0_88, %c0_89, %c0_90] : memref<3x1x32xf32, #tpu.memory_space<vmem>>, vector<3x1x32xf32>
    %272 = vector.broadcast %271 : vector<3x1x32xf32> to vector<3x8x32xf32>
    %273 = arith.addf %270, %272 : vector<3x8x32xf32>
    %274 = arith.addf %250, %273 : vector<3x8x32xf32>
    %c0_91 = arith.constant 0 : index
    %c0_92 = arith.constant 0 : index
    %c0_93 = arith.constant 0 : index
    %275 = vector.load %arg12[%c0_91, %c0_92, %c0_93] : memref<3x1x32xf32, #tpu.memory_space<vmem>>, vector<3x1x32xf32>
    %c0_94 = arith.constant 0 : index
    %c0_95 = arith.constant 0 : index
    %c0_96 = arith.constant 0 : index
    %276 = vector.load %arg13[%c0_94, %c0_95, %c0_96] : memref<3x1x32xf32, #tpu.memory_space<vmem>>, vector<3x1x32xf32>
    %cst_97 = arith.constant dense<0.000000e+00> : vector<3x8xf32>
    %277 = vector.multi_reduction <add>, %274, %cst_97 [2] : vector<3x8x32xf32> to vector<3x8xf32>
    %278 = vector.shape_cast %277 : vector<3x8xf32> to vector<3x8x1xf32>
    %cst_98 = arith.constant 3.200000e+01 : f32
    %279 = vector.broadcast %cst_98 : f32 to vector<3x8x1xf32>
    %280 = arith.divf %278, %279 : vector<3x8x1xf32>
    %281 = vector.broadcast %280 : vector<3x8x1xf32> to vector<3x8x32xf32>
    %282 = arith.subf %274, %281 : vector<3x8x32xf32>
    %283 = arith.mulf %282, %282 : vector<3x8x32xf32>
    %cst_99 = arith.constant dense<0.000000e+00> : vector<3x8xf32>
    %284 = vector.multi_reduction <add>, %283, %cst_99 [2] : vector<3x8x32xf32> to vector<3x8xf32>
    %285 = vector.shape_cast %284 : vector<3x8xf32> to vector<3x8x1xf32>
    %cst_100 = arith.constant 3.200000e+01 : f32
    %286 = vector.broadcast %cst_100 : f32 to vector<3x8x1xf32>
    %287 = arith.divf %285, %286 : vector<3x8x1xf32>
    %288 = vector.broadcast %280 : vector<3x8x1xf32> to vector<3x8x32xf32>
    %289 = arith.subf %274, %288 : vector<3x8x32xf32>
    %cst_101 = arith.constant 9.99999974E-6 : f32
    %290 = vector.broadcast %cst_101 : f32 to vector<3x8x1xf32>
    %291 = arith.addf %287, %290 : vector<3x8x1xf32>
    %292 = math.rsqrt %291 : vector<3x8x1xf32>
    %293 = vector.broadcast %292 : vector<3x8x1xf32> to vector<3x8x32xf32>
    %294 = arith.mulf %289, %293 : vector<3x8x32xf32>
    %295 = vector.broadcast %275 : vector<3x1x32xf32> to vector<3x8x32xf32>
    %296 = arith.mulf %294, %295 : vector<3x8x32xf32>
    %297 = vector.broadcast %276 : vector<3x1x32xf32> to vector<3x8x32xf32>
    %298 = arith.addf %296, %297 : vector<3x8x32xf32>
    %c0_102 = arith.constant 0 : index
    %c0_103 = arith.constant 0 : index
    %c0_104 = arith.constant 0 : index
    %c0_105 = arith.constant 0 : index
    %299 = vector.load %arg14[%c0_102, %c0_103, %c0_104, %c0_105] : memref<1x3x8x32xf32, #tpu.memory_space<vmem>>, vector<1x3x8x32xf32>
    %300 = vector.shape_cast %299 : vector<1x3x8x32xf32> to vector<3x8x32xf32>
    %301 = vector.shape_cast %298 : vector<3x8x32xf32> to vector<1x3x8x32xf32>
    tpu.vector_store %arg14[%c0_102, %c0_103, %c0_104, %c0_105], %301 {strides = array<i32>} : memref<1x3x8x32xf32, #tpu.memory_space<vmem>>, vector<1x3x8x32xf32>,
    return
  }
  func.func @transform_0(%arg0: i32) -> (i32, i32, i32, i32) {
    %c0_i32 = arith.constant 0 : i32
    %c0_i32_0 = arith.constant 0 : i32
    %c0_i32_1 = arith.constant 0 : i32
    %c0_i32_2 = arith.constant 0 : i32
    return %arg0, %c0_i32, %c0_i32_0, %c0_i32_1 : i32, i32, i32, i32
  }
  func.func @transform_1(%arg0: i32) -> (i32, i32, i32) {
    %c0_i32 = arith.constant 0 : i32
    %c0_i32_0 = arith.constant 0 : i32
    %c0_i32_1 = arith.constant 0 : i32
    %c0_i32_2 = arith.constant 0 : i32
    return %c0_i32, %c0_i32_0, %c0_i32_1 : i32, i32, i32
  }
  func.func @transform_2(%arg0: i32) -> (i32, i32, i32) {
    %c0_i32 = arith.constant 0 : i32
    %c0_i32_0 = arith.constant 0 : i32
    %c0_i32_1 = arith.constant 0 : i32
    %c0_i32_2 = arith.constant 0 : i32
    return %c0_i32, %c0_i32_0, %c0_i32_1 : i32, i32, i32
  }
  func.func @transform_3(%arg0: i32) -> (i32, i32) {
    %c0_i32 = arith.constant 0 : i32
    %c0_i32_0 = arith.constant 0 : i32
    %c0_i32_1 = arith.constant 0 : i32
    return %c0_i32, %c0_i32_0 : i32, i32
  }
  func.func @transform_4(%arg0: i32) -> (i32, i32) {
    %c0_i32 = arith.constant 0 : i32
    %c0_i32_0 = arith.constant 0 : i32
    %c0_i32_1 = arith.constant 0 : i32
    return %c0_i32, %c0_i32_0 : i32, i32
  }
  func.func @transform_5(%arg0: i32) -> (i32, i32, i32) {
    %c0_i32 = arith.constant 0 : i32
    %c0_i32_0 = arith.constant 0 : i32
    %c0_i32_1 = arith.constant 0 : i32
    %c0_i32_2 = arith.constant 0 : i32
    return %c0_i32, %c0_i32_0, %c0_i32_1 : i32, i32, i32
  }
  func.func @transform_6(%arg0: i32) -> (i32, i32, i32) {
    %c0_i32 = arith.constant 0 : i32
    %c0_i32_0 = arith.constant 0 : i32
    %c0_i32_1 = arith.constant 0 : i32
    %c0_i32_2 = arith.constant 0 : i32
    return %c0_i32, %c0_i32_0, %c0_i32_1 : i32, i32, i32
  }
  func.func @transform_7(%arg0: i32) -> (i32, i32, i32) {
    %c0_i32 = arith.constant 0 : i32
    %c0_i32_0 = arith.constant 0 : i32
    %c0_i32_1 = arith.constant 0 : i32
    %c0_i32_2 = arith.constant 0 : i32
    return %c0_i32, %c0_i32_0, %c0_i32_1 : i32, i32, i32
  }
  func.func @transform_8(%arg0: i32) -> (i32, i32, i32) {
    %c0_i32 = arith.constant 0 : i32
    %c0_i32_0 = arith.constant 0 : i32
    %c0_i32_1 = arith.constant 0 : i32
    %c0_i32_2 = arith.constant 0 : i32
    return %c0_i32, %c0_i32_0, %c0_i32_1 : i32, i32, i32
  }
  func.func @transform_9(%arg0: i32) -> (i32, i32, i32) {
    %c0_i32 = arith.constant 0 : i32
    %c0_i32_0 = arith.constant 0 : i32
    %c0_i32_1 = arith.constant 0 : i32
    %c0_i32_2 = arith.constant 0 : i32
    return %c0_i32, %c0_i32_0, %c0_i32_1 : i32, i32, i32
  }
  func.func @transform_10(%arg0: i32) -> (i32, i32, i32) {
    %c0_i32 = arith.constant 0 : i32
    %c0_i32_0 = arith.constant 0 : i32
    %c0_i32_1 = arith.constant 0 : i32
    %c0_i32_2 = arith.constant 0 : i32
    return %c0_i32, %c0_i32_0, %c0_i32_1 : i32, i32, i32
  }
  func.func @transform_11(%arg0: i32) -> (i32, i32, i32) {
    %c0_i32 = arith.constant 0 : i32
    %c0_i32_0 = arith.constant 0 : i32
    %c0_i32_1 = arith.constant 0 : i32
    %c0_i32_2 = arith.constant 0 : i32
    return %c0_i32, %c0_i32_0, %c0_i32_1 : i32, i32, i32
  }
  func.func @transform_12(%arg0: i32) -> (i32, i32, i32) {
    %c0_i32 = arith.constant 0 : i32
    %c0_i32_0 = arith.constant 0 : i32
    %c0_i32_1 = arith.constant 0 : i32
    %c0_i32_2 = arith.constant 0 : i32
    return %c0_i32, %c0_i32_0, %c0_i32_1 : i32, i32, i32
  }
  func.func @transform_13(%arg0: i32) -> (i32, i32, i32, i32) {
    %c0_i32 = arith.constant 0 : i32
    %c0_i32_0 = arith.constant 0 : i32
    %c0_i32_1 = arith.constant 0 : i32
    %c0_i32_2 = arith.constant 0 : i32
    return %arg0, %c0_i32, %c0_i32_0, %c0_i32_1 : i32, i32, i32, i32
  }
}

</mosaic_0001>

<bundles_post_ra>
// kernel: crypto_transformer_forward.4
= control target key start
LH: loop header
LB: loop body
LE: loop exit
PB: predicated region body
PF: predicated region fallthrough
CT: control target
= control target key end

     0   :  { %s901_s30 = smov 0   ;;  %s1001_s0 = inlined_call_operand.vmem [shape: f32[2,3,8,28], index: 0, kind: input, shape index: {}]   ;;  %s1002_s1 = inlined_call_operand.vmem [shape: f32[2,8,16], index: 1, kind: input, shape index: {}]   ;;  %s1003_s2 = inlined_call_operand.vmem [shape: f32[8,32], index: 2, kind: input, shape index: {}]   ;;  %s1004_s3 = inlined_call_operand.vmem [shape: f32[28,32], index: 3, kind: input, shape index: {}]   ;;  %s1005_s4 = inlined_call_operand.vmem [shape: f32[1,32], index: 4, kind: input, shape index: {}]   ;;  %s1006_s5 = inlined_call_operand.vmem [shape: f32[32,32], index: 5, kind: input, shape index: {}]   ;;  %s1007_s6 = inlined_call_operand.vmem [shape: f32[1,32], index: 6, kind: input, shape index: {}]   ;;  %s1008_s7 = inlined_call_operand.vmem [shape: f32[16,32], index: 7, kind: input, shape index: {}]   ;;  %s1009_s8 = inlined_call_operand.vmem [shape: f32[1,32], index: 8, kind: input, shape index: {}]   ;;  %s1010_s9 = inlined_call_operand.vmem [shape: f32[2,3,8,32], index: 9, kind: output, shape index: {}]  }
   0x1 LB: > { %s745_s10 = sadd.s32 4294967295, %s847_s30   ;;  %p749_p0 = scmp.ge.s32.totalorder %s847_s30, 1  ;;  %s847_s30 = sphi %s901_s30, %s19_s30  }
   0x2   : > { %p296_p1 = scmp.lt.s32.totalorder %s847_s30, 3 }
   0x4   : > { %p297_p2 = pnand %p749_p0, %p296_p1 }
   0x5   : > { %p336_p3 = scmp.lt.s32.totalorder (!%p297_p2), %s745_s10, 1 }
   0x6   : > { %300 = sbr.rel (%p297_p2) target bundleno = 451 (0x1c3), region = 56 }
   0xb   : > { %v356_v0 = vld [vmem:[%s1004_s3 + $0x18] sm:$0xf]  ;;  %vm374_vm0 = vcmask 1043456   ;;  %v849_v1 = vmov 0.0   ;;  %v355_v2 = vld [vmem:[%s1004_s3 + $0x10] sm:$0xff]  ;;  %vm850_vm1 = vmmov 0  }
   0xc   : > { %783 = vmatprep.subr.mxu0 %v849_v1  ;;  %800 = vmatprep.subr.mxu1 %v849_v1  ;;  %v354_v3 = vld [vmem:[%s1004_s3 + $0x8] sm:$0xff]  ;;  %s1012_s10 = smov (!%p336_p3, %s745_s10), 1  ;;  %v353_v4 = vld [vmem:[%s1004_s3] sm:$0xff]  ;;  %vm364_vm2 = vcmask 228352   ;;  %v488_v8 = vld [vmem:[%s1006_s5 + $0x18] sm:$0xff]  ;;  %vm596_vm3 = vcmask 130048  }
   0xd   : > { %784 = vmatpush3.msk.msra.mxu0 %vm374_vm0, %v356_v0  ;;  %791 = vmatprep.mubr.msk.f32.mxu0 %vm850_vm1, %v849_v1  ;;  %s824_s19 = smul.u32 24, %s1012_s10  ;;  %v588_v9 = vld [vmem:[%s1008_s7 + $0x8] sm:$0xff]  ;;  %v487_v10 = vld [vmem:[%s1006_s5 + $0x10] sm:$0xff]  ;;  %s751_s29 = sshll.u32 %s1012_s10, 3  ;;  %v587_v11 = vld [vmem:[%s1008_s7] sm:$0xff]  ;;  %vm496_vm4 = vcmask 261120  }
   0xe   : > { %785 = vmatprep.subr.mxu0 %v849_v1  ;;  %808 = vmatprep.mubr.msk.f32.mxu1 %vm850_vm1, %v849_v1  ;;  %s344_s15 = scalar_lea.vmem %s1002_s1, %s751_s29  ;;  %v486_v12 = vld [vmem:[%s1006_s5 + $0x8] sm:$0xff]  ;;  %v485_v14 = vld [vmem:[%s1006_s5] sm:$0xff] }
   0xf   : > { %786 = vmatpush3.msra.mxu0 %v355_v2  ;;  %s340_s22 = scalar_lea.vmem %s1001_s0, %s824_s19  ;;  %801 = vmatpush3.msra.mxu1 %v488_v8  ;;  %v586_v13 = vld [vmem:[%s344_s15] sm:$0xff]  ;;  %s349_s12 = scalar_lea.vmem %s1010_s9, %s824_s19 }
  0x10   : > { %787 = vmatprep.subr.mxu0 %v849_v1  ;;  %v350_v5 = vld [vmem:[%s340_s22] sm:$0xff]  ;;  %v351_v6 = vld [vmem:[%s340_s22 + $0x8] sm:$0xff]  ;;  %v352_v7 = vld [vmem:[%s340_s22 + $0x10] sm:$0xff]  ;;  %802 = vmatprep.subr.mxu1 %v849_v1 }
  0x11   : > { %788 = vmatpush3.msra.mxu0 %v354_v3  ;;  %803 = vmatpush3.msra.mxu1 %v487_v10  ;;  %v753_v15 = vld [vmem:[%s1005_s4] ss:$0 sm:$0xff] }
  0x12   : > { %789 = vmatprep.subr.mxu0 %v849_v1  ;;  %804 = vmatprep.subr.mxu1 %v849_v1  ;;  %v762_v54 = vld [vmem:[%s1009_s8] ss:$0 sm:$0xff] }
  0x13   : > { %790 = vmatpush3.msra.mxu0 %v353_v4  ;;  %805 = vmatpush3.msra.mxu1 %v486_v12  ;;  %v670_v56 = vld [vmem:[%s1003_s2] sm:$0xff] }
  0x14   : > { %792 = vmatmul.mubr.msk.f32.vlgmr.msra.gmra.mxu0 %vm364_vm2, %v350_v5  ;;  %817 = vmatprep.subr.mxu0 %v849_v1  ;;  %v758_v57 = vld [vmem:[%s1007_s6] ss:$0 sm:$0xff] }
  0x15   : > { %794 = vmatprep.mubr.msk.f32.mxu0 %vm850_vm1, %v849_v1  ;;  %818 = vmatpush3.msra.mxu0 %v588_v9 }
  0x16   : > { %819 = vmatprep.subr.mxu0 %v849_v1  ;;  %806 = vmatprep.subr.mxu1 %v849_v1 }
  0x17   : > { %820 = vmatpush3.msra.mxu0 %v587_v11  ;;  %807 = vmatpush3.msra.mxu1 %v485_v14 }
  0x18   : > { %795 = vmatmul.mubr.msk.f32.gmra.mxu0 %vm364_vm2, %v351_v6 }
  0x19   : > { %797 = vmatprep.mubr.msk.f32.mxu0 %vm850_vm1, %v849_v1 }
  0x1c   : > { %798 = vmatmul.mubr.msk.f32.gmra.mxu0 %vm364_vm2, %v352_v7 }
  0x1d   : > { %821 = vmatprep.mubr.msk.f32.mxu0 %vm850_vm1, %v849_v1 }
  0x20   : > { %822 = vmatmul.mubr.msk.f32.vlgmr.msra.gmra.mxu0 %vm596_vm3, %v586_v13 }
  0xd4   : > { %v444_v16 = vpop.f32.mrf.mxu0 }
  0xd5   : > { %v445_v17 = vadd.f32 %v753_v15, %v444_v16 }
  0xd6   : > { %v793_v18 = vpop.f32.mrf.mxu0 }
  0xd7   : > { %v458_v19 = vmul.f32 %v445_v17, %v445_v17 }
  0xd8   : > { %v449_v20 = vpop.f32.mrf.mxu0 }
  0xd9   : > { %v461_v21 = vmul.f32 %v458_v19, %v445_v17  ;;  %v450_v22 = vadd.f32 %v753_v15, %v449_v20 }
  0xda   : > { %v796_v23 = vpop.f32.mrf.mxu0 }
  0xdb   : > { %v464_v24 = vmul.f32 0.044715, %v461_v21  ;;  %v459_v25 = vmul.f32 %v450_v22, %v450_v22 }
  0xdc   : > { %v454_v26 = vpop.f32.mrf.mxu0 }
  0xdd   : > { %v467_v27 = vadd.f32 %v464_v24, %v445_v17  ;;  %v462_v28 = vmul.f32 %v459_v25, %v450_v22  ;;  %v455_v29 = vadd.f32 %v753_v15, %v454_v26 }
  0xde   : > { %v799_v30 = vpop.f32.mrf.mxu0 }
  0xdf   : > { %v470_v31 = vmul.f32 0.7978846, %v467_v27  ;;  %v465_v32 = vmul.f32 0.044715, %v462_v28  ;;  %v460_v33 = vmul.f32 %v455_v29, %v455_v29 }
  0xe0   : > { %v666_v52 = vpop.f32.mrf.mxu0 }
  0xe1   : > { %835 = vtanh.f32 %v470_v31  ;;  %v468_v34 = vadd.f32 %v465_v32, %v450_v22  ;;  %v463_v35 = vmul.f32 %v460_v33, %v455_v29  ;;  %v667_v55 = vadd.f32 %v762_v54, %v666_v52 }
  0xe2   : > { %v823_v53 = vpop.f32.mrf.mxu0 }
  0xe3   : > { %v471_v36 = vmul.f32 0.7978846, %v468_v34  ;;  %v466_v37 = vmul.f32 0.044715, %v463_v35  ;;  %v671_v58 = vadd.f32 %v670_v56, %v667_v55 }
  0xe5   : > { %837 = vtanh.f32 %v471_v36  ;;  %v469_v38 = vadd.f32 %v466_v37, %v455_v29 }
  0xe7   : > { %v472_v39 = vmul.f32 0.7978846, %v469_v38 }
  0xe9   : > { %839 = vtanh.f32 %v472_v39 }
  0xee   : > { %v836_v40 = vpop.eup %835 }
  0xef   : > { %v476_v41 = vadd.f32 1.0, %v836_v40 }
  0xf1   : > { %v479_v42 = vmul.f32 0.5, %v476_v41 }
  0xf2   : > { %v838_v43 = vpop.eup %837 }
  0xf3   : > { %v482_v44 = vmul.f32 %v479_v42, %v445_v17  ;;  %v477_v45 = vadd.f32 1.0, %v838_v43 }
  0xf5   : > { %809 = vmatmul.mubr.msk.f32.vlgmr.msra.gmra.mxu1 %vm496_vm4, %v482_v44  ;;  %v480_v46 = vmul.f32 0.5, %v477_v45 }
  0xf6   : > { %v840_v47 = vpop.eup %839  ;;  %811 = vmatprep.mubr.msk.f32.mxu1 %vm850_vm1, %v849_v1 }
  0xf7   : > { %v483_v48 = vmul.f32 %v480_v46, %v450_v22  ;;  %v478_v49 = vadd.f32 1.0, %v840_v47 }
  0xf9   : > { %812 = vmatmul.mubr.msk.f32.gmra.mxu1 %vm496_vm4, %v483_v48  ;;  %v481_v50 = vmul.f32 0.5, %v478_v49 }
  0xfa   : > { %814 = vmatprep.mubr.msk.f32.mxu1 %vm850_vm1, %v849_v1 }
  0xfb   : > { %v484_v51 = vmul.f32 %v481_v50, %v455_v29 }
  0xfd   : > { %815 = vmatmul.mubr.msk.f32.gmra.mxu1 %vm496_vm4, %v484_v51 }
 0x1b5   : > { %v572_v59 = vpop.f32.mrf.mxu1 }
 0x1b6   : > { %v573_v60 = vadd.f32 %v758_v57, %v572_v59 }
 0x1b7   : > { %v810_v61 = vpop.f32.mrf.mxu1 }
 0x1b8   : > { %v672_v62 = vadd.f32 %v671_v58, %v573_v60 }
 0x1b9   : > { %v577_v63 = vpop.f32.mrf.mxu1 }
 0x1ba   : > { %675 = vst.msk [vmem:[%s349_s12] sm:$0xff] %vm496_vm4, %v672_v62  ;;  %v578_v0 = vadd.f32 %v758_v57, %v577_v63 }
 0x1bb   : > { %v813_v1 = vpop.f32.mrf.mxu1 }
 0x1bc   : > { %v673_v2 = vadd.f32 %v671_v58, %v578_v0 }
 0x1bd   : > { %v582_v3 = vpop.f32.mrf.mxu1 }
 0x1be   : > { %676 = vst.msk [vmem:[%s349_s12 + $0x8] sm:$0xff] %vm496_vm4, %v673_v2  ;;  %v583_v4 = vadd.f32 %v758_v57, %v582_v3 }
 0x1bf   : > { %v816_v5 = vpop.f32.mrf.mxu1 }
 0x1c0   : > { %v674_v6 = vadd.f32 %v671_v58, %v583_v4 }
 0x1c2   : > { %677 = vst.msk [vmem:[%s349_s12 + $0x10] sm:$0xff] %vm496_vm4, %v674_v6 }
 0x1c3 PF: > { %s19_s30 = sadd.s32 1, %s847_s30  }
 0x1c4   : > { %p16_p4 = scmp.ge.s32.totalorder %s19_s30, 4  }
 0x1c6   :  { %18 = sbr.rel (!%p16_p4) target bundleno = 1 (0x1), region = 89 }

// kernel: crypto_transformer_forward.7
= control target key start
LH: loop header
LB: loop body
LE: loop exit
PB: predicated region body
PF: predicated region fallthrough
CT: control target
= control target key end

     0   :  { %vm32_vm0 = vcmask 261120   ;;  %v562_v0 = vmov 0.0   ;;  %vm563_vm1 = vmmov 0   ;;  %vm99_vm2 = vcmask 1041409   ;;  %s730_s1 = inlined_call_operand.vmem [shape: f32[32,128], index: 1, kind: input, shape index: {}]   ;;  %s731_s0 = inlined_call_operand.vmem [shape: f32[2,3,8,32], index: 0, kind: input, shape index: {}]   ;;  %s732_s3 = inlined_call_operand.vmem [shape: f32[128,64], index: 3, kind: input, shape index: {}]   ;;  %s733_s2 = inlined_call_operand.vmem [shape: f32[1,128], index: 2, kind: input, shape index: {}]   ;;  %s734_s6 = inlined_call_operand.vmem [shape: f32[1,3], index: 6, kind: input, shape index: {}]   ;;  %s735_s4 = inlined_call_operand.vmem [shape: f32[1,64], index: 4, kind: input, shape index: {}]   ;;  %s736_s5 = inlined_call_operand.vmem [shape: f32[3,64], index: 5, kind: input, shape index: {}]   ;;  %s737_s7 = inlined_call_operand.vmem [shape: f32[2,3], index: 7, kind: output, shape index: {}]  }
   0x1   :  { %506 = vmatprep.subr.mxu0 %v562_v0  ;;  %v85_v1 = vld [vmem:[%s730_s1 + $0x18] sm:$0xff]  ;;  %v84_v2 = vld [vmem:[%s730_s1 + $0x10] sm:$0xff]  ;;  %514 = vmatprep.mubr.msk.f32.mxu0 %vm563_vm1, %v562_v0  ;;  %v83_v3 = vld [vmem:[%s730_s1 + $0x8] sm:$0xff]  ;;  %vm101_vm3 = vcmask 1042434   ;;  %vm103_vm4 = vcmask 1043459   ;;  %vm105_vm5 = vcmask 1044484  }
   0x2   :  { %507 = vmatpush3.msra.mxu0 %v85_v1  ;;  %v26_v4 = vld [vmem:[%s731_s0] sm:$0xff]  ;;  %v27_v5 = vld [vmem:[%s731_s0 + $0x8] sm:$0xff]  ;;  %517 = vmatprep.subr.mxu1 %v562_v0  ;;  %v28_v6 = vld [vmem:[%s731_s0 + $0x10] sm:$0xff]  ;;  %vm107_vm6 = vcmask 1045509   ;;  %vm434_vm7 = vcmask 518144   ;;  %vm473_vm8 = vcmask 17408  }
   0x3   :  { %508 = vmatprep.subr.mxu0 %v562_v0  ;;  %v29_v7 = vld [vmem:[%s731_s0 + $0x18] sm:$0xff]  ;;  %v30_v8 = vld [vmem:[%s731_s0 + $0x20] sm:$0xff]  ;;  %v33_v9 = vsel %vm32_vm0, %v26_v4, 0.0  ;;  %v40_v10 = vsel %vm32_vm0, %v27_v5, 0.0  ;;  %549 = vmatprep.mubr.msk.f32.mxu1 %vm563_vm1, %v562_v0  ;;  %v31_v11 = vld [vmem:[%s731_s0 + $0x28] sm:$0xff]  ;;  %v47_v14 = vsel %vm32_vm0, %v28_v6, 0.0 }
   0x4   :  { %509 = vmatpush3.msra.mxu0 %v84_v2  ;;  %v34_v12 = vrot.slane %v33_v9, 4  ;;  %v41_v13 = vrot.slane %v40_v10, 4  ;;  %v54_v15 = vsel %vm32_vm0, %v29_v7, 0.0  ;;  %v82_v16 = vld [vmem:[%s730_s1] sm:$0xff]  ;;  %v48_v17 = vrot.slane %v47_v14, 4  ;;  %v205_v1 = vld [vmem:[%s732_s3 + $0x78] sm:$0xff] }
   0x5   :  { %510 = vmatprep.subr.mxu0 %v562_v0  ;;  %v55_v18 = vrot.slane %v54_v15, 4  ;;  %v61_v19 = vsel %vm32_vm0, %v30_v8, 0.0  ;;  %v68_v20 = vsel %vm32_vm0, %v31_v11, 0.0  ;;  %518 = vmatpush3.msra.mxu1 %v205_v1  ;;  %v204_v2 = vld [vmem:[%s732_s3 + $0x70] sm:$0xff]  ;;  %v202_v4 = vld [vmem:[%s732_s3 + $0x60] sm:$0xff]  ;;  %v201_v5 = vld [vmem:[%s732_s3 + $0x58] sm:$0xff] }
   0x6   :  { %511 = vmatpush3.msra.mxu0 %v83_v3  ;;  %v35_v21 = vadd.f32 %v34_v12, %v33_v9  ;;  %v42_v22 = vadd.f32 %v41_v13, %v40_v10  ;;  %v62_v23 = vrot.slane %v61_v19, 4  ;;  %v69_v24 = vrot.slane %v68_v20, 4  ;;  %519 = vmatprep.subr.mxu1 %v562_v0  ;;  %v203_v3 = vld [vmem:[%s732_s3 + $0x68] sm:$0xff]  ;;  %v200_v6 = vld [vmem:[%s732_s3 + $0x50] sm:$0xff]  ;;  %v198_v8 = vld [vmem:[%s732_s3 + $0x40] sm:$0xff] }
   0x7   :  { %512 = vmatprep.subr.mxu0 %v562_v0  ;;  %v49_v25 = vadd.f32 %v48_v17, %v47_v14  ;;  %v56_v26 = vadd.f32 %v55_v18, %v54_v15  ;;  %520 = vmatpush3.msra.mxu1 %v204_v2  ;;  %v199_v7 = vld [vmem:[%s732_s3 + $0x48] sm:$0xff]  ;;  %v197_v9 = vld [vmem:[%s732_s3 + $0x38] sm:$0xff]  ;;  %v196_v10 = vld [vmem:[%s732_s3 + $0x30] sm:$0xff] }
   0x8   :  { %513 = vmatpush3.msra.mxu0 %v82_v16  ;;  %v36_v27 = vrot.slane %v35_v21, 2  ;;  %v43_v28 = vrot.slane %v42_v22, 2  ;;  %v63_v29 = vadd.f32 %v62_v23, %v61_v19  ;;  %v70_v30 = vadd.f32 %v69_v24, %v68_v20  ;;  %521 = vmatprep.subr.mxu1 %v562_v0  ;;  %v195_v11 = vld [vmem:[%s732_s3 + $0x28] sm:$0xff]  ;;  %v194_v12 = vld [vmem:[%s732_s3 + $0x20] sm:$0xff]  ;;  %v193_v13 = vld [vmem:[%s732_s3 + $0x18] sm:$0xff] }
   0x9   :  { %v50_v31 = vrot.slane %v49_v25, 2  ;;  %v57_v32 = vrot.slane %v56_v26, 2  ;;  %522 = vmatpush3.msra.mxu1 %v203_v3  ;;  %v192_v14 = vld [vmem:[%s732_s3 + $0x10] sm:$0xff]  ;;  %v191_v15 = vld [vmem:[%s732_s3 + $0x8] sm:$0xff]  ;;  %v190_v16 = vld [vmem:[%s732_s3] sm:$0xff] }
   0xa   :  { %v37_v33 = vadd.f32 %v36_v27, %v35_v21  ;;  %v44_v34 = vadd.f32 %v43_v28, %v42_v22  ;;  %v64_v35 = vrot.slane %v63_v29, 2  ;;  %v71_v36 = vrot.slane %v70_v30, 2  ;;  %523 = vmatprep.subr.mxu1 %v562_v0  ;;  %v479_v17 = vld [vmem:[%s733_s2] ss:$0 sm:$0xff] }
   0xb   :  { %v51_v37 = vadd.f32 %v50_v31, %v49_v25  ;;  %v58_v38 = vadd.f32 %v57_v32, %v56_v26  ;;  %524 = vmatpush3.msra.mxu1 %v202_v4 }
   0xc   :  { %v38_v39 = vrot.slane %v37_v33, 1  ;;  %v45_v40 = vrot.slane %v44_v34, 1  ;;  %v65_v41 = vadd.f32 %v64_v35, %v63_v29  ;;  %v72_v42 = vadd.f32 %v71_v36, %v70_v30  ;;  %525 = vmatprep.subr.mxu1 %v562_v0  ;;  %v481_v30 = vld [vmem:[%s735_s4] ss:$0 sm:$0xff] }
   0xd   :  { %v52_v43 = vrot.slane %v51_v37, 1  ;;  %v59_v44 = vrot.slane %v58_v38, 1  ;;  %526 = vmatpush3.msra.mxu1 %v201_v5 }
   0xe   :  { %v39_v45 = vadd.f32 %v38_v39, %v37_v33  ;;  %v46_v46 = vadd.f32 %v45_v40, %v44_v34  ;;  %v66_v47 = vrot.slane %v65_v41, 1  ;;  %v73_v48 = vrot.slane %v72_v42, 1  ;;  %527 = vmatprep.subr.mxu1 %v562_v0 }
   0xf   :  { %v53_v49 = vadd.f32 %v52_v43, %v51_v37  ;;  %v60_v50 = vadd.f32 %v59_v44, %v58_v38  ;;  %528 = vmatpush3.msra.mxu1 %v200_v6  ;;  %v564_v39 = vmov 1966171168  }
  0x10   :  { %v67_v51 = vadd.f32 %v66_v47, %v65_v41  ;;  %v74_v52 = vadd.f32 %v73_v48, %v72_v42  ;;  %v76_v53 = vmul.f32 0.125, %v39_v45  ;;  %v77_v54 = vmul.f32 0.125, %v46_v46  ;;  %529 = vmatprep.subr.mxu1 %v562_v0  ;;  %v482_v46 = vld.sshfl [vmem:[%s736_s5] sm:$0x13 pattern:$0x75316420] }
  0x11   :  { %v78_v55 = vmul.f32 0.125, %v53_v49  ;;  %v79_v56 = vmul.f32 0.125, %v60_v50  ;;  %530 = vmatpush3.msra.mxu1 %v199_v7  ;;  %v295_v40 = vunpack.c.l.s4 %v564_v39  ;;  %v297_v41 = vlaneseq }
  0x12   :  { %v80_v57 = vmul.f32 0.125, %v67_v51  ;;  %v81_v58 = vmul.f32 0.125, %v74_v52  ;;  %v100_v59 = vsel %vm99_vm2, %v77_v54, %v76_v53  ;;  %531 = vmatprep.subr.mxu1 %v562_v0  ;;  %v355_v49 = vcombine.high %v482_v46, %v482_v46 }
  0x13   :  { %v102_v60 = vsel %vm101_vm3, %v78_v55, %v100_v59  ;;  %532 = vmatpush3.msra.mxu1 %v198_v8  ;;  %v296_v42 = vunpack.c.0.s8 %v295_v40  ;;  %v298_v43 = vshrl.u32 %v297_v41, 7 }
  0x14   :  { %v104_v61 = vsel %vm103_vm4, %v79_v56, %v102_v60  ;;  %533 = vmatprep.subr.mxu1 %v562_v0 }
  0x15   :  { %v106_v62 = vsel %vm105_vm5, %v80_v57, %v104_v61  ;;  %534 = vmatpush3.msra.mxu1 %v197_v9  ;;  %v299_v48 = vsub.s32 %v296_v42, %v298_v43 }
  0x16   :  { %v108_v63 = vsel %vm107_vm6, %v81_v58, %v106_v62  ;;  %535 = vmatprep.subr.mxu1 %v562_v0 }
  0x17   :  { %515 = vmatmul.mubr.msk.f32.vlgmr.msra.gmra.mxu0 %vm32_vm0, %v108_v63  ;;  %536 = vmatpush3.msra.mxu1 %v196_v10  ;;  %v362_v51 = vrot.slane %v482_v46, %v299_v48  ;;  %v369_v54 = vrot.slane %v355_v49, %v299_v48 }
  0x18   :  { %537 = vmatprep.subr.mxu1 %v562_v0 }
  0x19   :  { %538 = vmatpush3.msra.mxu1 %v195_v11  ;;  %v370_v58 = vcombine.high %v362_v51, %v362_v51 }
  0x1a   :  { %539 = vmatprep.subr.mxu1 %v562_v0 }
  0x1b   :  { %540 = vmatpush3.msra.mxu1 %v194_v12 }
  0x1c   :  { %541 = vmatprep.subr.mxu1 %v562_v0 }
  0x1d   :  { %542 = vmatpush3.msra.mxu1 %v193_v13 }
  0x1e   :  { %543 = vmatprep.subr.mxu1 %v562_v0 }
  0x1f   :  { %544 = vmatpush3.msra.mxu1 %v192_v14 }
  0x20   :  { %545 = vmatprep.subr.mxu1 %v562_v0 }
  0x21   :  { %546 = vmatpush3.msra.mxu1 %v191_v15 }
  0x22   :  { %547 = vmatprep.subr.mxu1 %v562_v0  ;;  %v483_v0 = vld [vmem:[%s734_s6] ss:$0 sm:$0xff] }
  0x23   :  { %548 = vmatpush3.msra.mxu1 %v190_v16  ;;  %448 = vbcast.lane.b32.xlu1 %v483_v0, 256 }
  0xd7   :  { %v177_v18 = vpop.f32.mrf.mxu0 }
  0xd8   :  { %v178_v19 = vadd.f32 %v479_v17, %v177_v18 }
  0xd9   :  { %v516_v20 = vpop.f32.mrf.mxu0 }
  0xda   :  { %v181_v21 = vmul.f32 %v178_v19, %v178_v19  ;;  %v565_v20 = vmov 0  }
  0xdb   :  { %556 = vset.pattern.permute.xlu1 %v565_v20  ;;  %557 = vset.pattern.permute.xlu0 %v565_v20 }
  0xdc   :  { %v182_v22 = vmul.f32 %v181_v21, %v178_v19  ;;  %v449_v21 = vpop.permute.xlu1 %448 }
  0xde   :  { %v183_v23 = vmul.f32 0.044715, %v182_v22 }
  0xe0   :  { %v184_v24 = vadd.f32 %v183_v23, %v178_v19 }
  0xe2   :  { %v185_v25 = vmul.f32 0.7978846, %v184_v24 }
  0xe4   :  { %558 = vtanh.f32 %v185_v25 }
  0xf1   :  { %v559_v26 = vpop.eup %558 }
  0xf2   :  { %v187_v27 = vadd.f32 1.0, %v559_v26  ;;  %v462_v26 = vand.u32 127, %v297_v41 }
  0xf4   :  { %v188_v28 = vmul.f32 0.5, %v187_v27  ;;  %v465_v27 = vsub.s32 %v462_v26, %v298_v43 }
  0xf6   :  { %v189_v29 = vmul.f32 %v188_v28, %v178_v19 }
  0xf8   :  { %550 = vmatmul.mubr.f32.vlgmr.msra.gmra.mxu1 %v189_v29 }
 0x1b8   :  { %v279_v31 = vpop.f32.mrf.mxu1 }
 0x1b9   :  { %v280_v32 = vadd.f32 %v481_v30, %v279_v31 }
 0x1ba   :  { %v551_v33 = vpop.f32.mrf.mxu1 }
 0x1bb   :  { %v283_v34 = vmul.f32 %v280_v32, %v280_v32 }
 0x1bd   :  { %v284_v35 = vmul.f32 %v283_v34, %v280_v32 }
 0x1bf   :  { %v285_v36 = vmul.f32 0.044715, %v284_v35 }
 0x1c1   :  { %v286_v37 = vadd.f32 %v285_v36, %v280_v32 }
 0x1c3   :  { %v287_v38 = vmul.f32 0.7978846, %v286_v37 }
 0x1c5   :  { %560 = vtanh.f32 %v287_v38 }
 0x1d2   :  { %v561_v44 = vpop.eup %560 }
 0x1d3   :  { %v289_v45 = vadd.f32 1.0, %v561_v44 }
 0x1d5   :  { %v290_v47 = vmul.f32 0.5, %v289_v45 }
 0x1d7   :  { %v291_v50 = vmul.f32 %v290_v47, %v280_v32 }
 0x1d9   :  { %v293_v52 = vcombine.high %v291_v50, %v291_v50  ;;  %v300_v53 = vrot.slane %v291_v50, %v299_v48 }
 0x1db   :  { %v307_v55 = vrot.slane %v293_v52, %v299_v48  ;;  %v308_v56 = vcombine.high %v300_v53, %v300_v53  ;;  %v316_v57 = vrot.slane %v300_v53, %v299_v48 }
 0x1dd   :  { %v330_v59 = vrot.slane %v308_v56, %v299_v48  ;;  %v338_v60 = vcombine.high %v316_v57, %v316_v57  ;;  %v309_v61 = vcombine.high %v307_v55, %v307_v55  ;;  %v374_v62 = vmul.f32 %v362_v51, %v316_v57 }
 0x1de   :  { %v323_v63 = vrot.slane %v307_v55, %v299_v48 }
 0x1df   :  { %v375_v1 = vmul.f32 %v369_v54, %v330_v59  ;;  %v376_v2 = vmul.f32 %v370_v58, %v338_v60  ;;  %v337_v3 = vrot.slane %v309_v61, %v299_v48  ;;  %v339_v4 = vcombine.high %v330_v59, %v330_v59 }
 0x1e0   :  { %v378_v7 = vmul.f32 %v369_v54, %v323_v63 }
 0x1e1   :  { %v386_v5 = vcombine.low %v374_v62, %v375_v1  ;;  %v377_v6 = vmul.f32 %v362_v51, %v339_v4  ;;  %v379_v8 = vmul.f32 %v370_v58, %v337_v3  ;;  %v400_v10 = vrot.slane %v376_v2, %v299_v48 }
 0x1e3   :  { %v393_v9 = vrot.slane %v386_v5, %v299_v48  ;;  %v409_v11 = vcombine.low %v377_v6, %v378_v7  ;;  %v423_v14 = vrot.slane %v379_v8, %v299_v48 }
 0x1e5   :  { %v401_v12 = vcombine.low %v393_v9, %v400_v10  ;;  %v416_v13 = vrot.slane %v409_v11, %v299_v48 }
 0x1e7   :  { %v408_v15 = vrot.slane %v401_v12, %v299_v48  ;;  %v424_v16 = vcombine.low %v416_v13, %v423_v14 }
 0x1e9   :  { %v435_v17 = vsel %vm434_vm7, %v408_v15, 0.0  ;;  %v431_v18 = vrot.slane %v424_v16, %v299_v48 }
 0x1ea   :  { %436 = vadd.xlane.f32.xlu0 %v435_v17 }
 0x1eb   :  { %v438_v19 = vsel %vm434_vm7, %v431_v18, 0.0 }
 0x1ee   :  { %439 = vadd.xlane.f32.xlu0 %v438_v19 }
 0x273   :  { %v437_v22 = vpop.xlane.xlu0 %436 }
 0x274   :  { %v451_v23 = vadd.f32 %v449_v21, %v437_v22 }
 0x276   :  { %456 = vperm.xlu1 %556, %v451_v23  }
 0x277   :  { %v440_v24 = vpop.xlane.xlu0 %439 }
 0x278   :  { %v452_v25 = vadd.f32 %v449_v21, %v440_v24 }
 0x27a   :  { %459 = vperm.xlu0 %557, %v452_v25  }
 0x2f1   :  { %v457_v28 = vpop.permute.xlu1 %456 }
 0x2f2   :  { %v466_v0 = vrot.slane %v457_v28, %v465_v27 }
 0x2f5   :  { %v460_v29 = vpop.permute.xlu0 %459 }
 0x2f6   :  { %v470_v30 = vrot.slane %v460_v29, %v465_v27 }
 0x2f8   :  { %v471_v31 = vsel %vm99_vm2, %v470_v30, %v466_v0 }
 0x2f9   :  { %474 = vst.msk [vmem:[%s737_s7] sm:$0x3] %vm473_vm8, %v471_v31 }

// kernel: crypto_transformer_forward.5
= control target key start
LH: loop header
LB: loop body
LE: loop exit
PB: predicated region body
PF: predicated region fallthrough
CT: control target
= control target key end

     0   :  { %s18583_s25 = smov 0   ;;  %s21762_s0 = inlined_call_operand.vmem [shape: f32[2,3,8,32], index: 0, kind: input, shape index: {}]   ;;  %s21763_s1 = inlined_call_operand.vmem [shape: f32[3,32,96], index: 1, kind: input, shape index: {}]   ;;  %s21764_s2 = inlined_call_operand.vmem [shape: f32[3,1,96], index: 2, kind: input, shape index: {}]   ;;  %s21765_s3 = inlined_call_operand.vmem [shape: f32[32,32], index: 3, kind: input, shape index: {}]   ;;  %s21766_s4 = inlined_call_operand.vmem [shape: f32[1,32], index: 4, kind: input, shape index: {}]   ;;  %s21767_s5 = inlined_call_operand.vmem [shape: f32[3,1,32], index: 5, kind: input, shape index: {}]   ;;  %s21768_s6 = inlined_call_operand.vmem [shape: f32[3,1,32], index: 6, kind: input, shape index: {}]   ;;  %s21769_s7 = inlined_call_operand.vmem [shape: f32[3,32,128], index: 7, kind: input, shape index: {}]   ;;  %s21770_s8 = inlined_call_operand.vmem [shape: f32[3,1,128], index: 8, kind: input, shape index: {}]   ;;  %s21771_s9 = inlined_call_operand.vmem [shape: f32[3,128,32], index: 9, kind: input, shape index: {}]   ;;  %s21772_s10 = inlined_call_operand.vmem [shape: f32[3,1,32], index: 10, kind: input, shape index: {}]   ;;  %s21773_s11 = inlined_call_operand.vmem [shape: f32[3,1,32], index: 11, kind: input, shape index: {}]   ;;  %s21774_s12 = inlined_call_operand.vmem [shape: f32[3,1,32], index: 12, kind: input, shape index: {}]   ;;  %s21775_s13 = inlined_call_operand.vmem [shape: f32[2,3,8,32], index: 13, kind: output, shape index: {}]  }
   0x1 LB: > { %s16511_s26 = sadd.s32 4294967295, %s18491_s25   ;;  %p16515_p0 = scmp.ge.s32.totalorder %s18491_s25, 1  ;;  %s18491_s25 = sphi %s18583_s25, %s23_s25  }
   0x2   : > { %p387_p1 = scmp.lt.s32.totalorder %s18491_s25, 3 }
   0x4   : > { %p388_p2 = pnand %p16515_p0, %p387_p1 }
   0x6   : > { %391 = sbr.rel (%p388_p2) target bundleno = 5346 (0x14e2), region = 72 }
   0xb   : > { %v447_v0 = vld [vmem:[%s21763_s1 + $0x18] sm:$0xff]  ;;  %p431_p3 = scmp.lt.s32.totalorder %s16511_s26, 1  ;;  %v21780_v1 = vmov 0.0   ;;  %v446_v2 = vld [vmem:[%s21763_s1 + $0x10] sm:$0xff]  ;;  %vm18494_vm0 = vmmov 0   ;;  %v445_v3 = vld [vmem:[%s21763_s1 + $0x8] sm:$0xff]  ;;  %v768_v44 = vlaneseq }
   0xc   : > { %17239 = vmatprep.subr.mxu0 %v21780_v1  ;;  %17247 = vmatprep.mubr.msk.f32.mxu0 %vm18494_vm0, %v21780_v1  ;;  %v444_v4 = vld [vmem:[%s21763_s1] sm:$0xff]  ;;  %vm477_vm1 = vcmask 261120   ;;  %v451_v6 = vld [vmem:[%s21763_s1 + $0x38] sm:$0xff]  ;;  %v450_v7 = vld [vmem:[%s21763_s1 + $0x30] sm:$0xff]  ;;  %s18495_s29 = smov 116   ;;  %s18496_s30 = smov 124  }
   0xd   : > { %17240 = vmatpush3.msra.mxu0 %v447_v0  ;;  %s22066_s26 = smov (!%p431_p3, %s16511_s26), 1  ;;  %17277 = vmatprep.subr.mxu1 %v21780_v1  ;;  %v449_v8 = vld [vmem:[%s21763_s1 + $0x28] sm:$0xff]  ;;  %v448_v9 = vld [vmem:[%s21763_s1 + $0x20] sm:$0xff]  ;;  %v455_v11 = vld [vmem:[%s21763_s1 + $0x58] sm:$0xff]  ;;  %s18497_s14 = smov 112   ;;  %v769_v46 = vshrl.u32 %v768_v44, 7 }
   0xe   : > { %17241 = vmatprep.subr.mxu0 %v21780_v1  ;;  %17279 = vmatprep.mubr.msk.f32.mxu1 %vm18494_vm0, %v21780_v1  ;;  %s18147_s16 = smul.u32 24, %s22066_s26  ;;  %v454_v12 = vld [vmem:[%s21763_s1 + $0x50] sm:$0xff]  ;;  %v453_v13 = vld [vmem:[%s21763_s1 + $0x48] sm:$0xff]  ;;  %v452_v14 = vld [vmem:[%s21763_s1 + $0x40] sm:$0xff]  ;;  %s18498_s15 = smov 120   ;;  %vm3355_vm2 = vcmask 31744  }
   0xf   : > { %17242 = vmatpush3.msra.mxu0 %v446_v2  ;;  %v16518_v16 = vld [vmem:[%s21764_s2] ss:$0 sm:$0xff]  ;;  %v16519_v20 = vld [vmem:[%s21764_s2 + $0x1] ss:$0 sm:$0xff]  ;;  %s18499_s19 = smov 104   ;;  %s18500_s20 = smov 108  }
  0x10   : > { %17243 = vmatprep.subr.mxu0 %v21780_v1  ;;  %s18619_s21 = scalar_lea.vmem %s21762_s0, %s18147_s16  ;;  %s18501_s22 = smov 100   ;;  %v16520_v38 = vld [vmem:[%s21764_s2 + $0x2] ss:$0 sm:$0xff]  ;;  %v18504_v42 = vmov 1983009808   ;;  %vm3972_vm3 = vcmask 64512  }
  0x11   : > { %17244 = vmatpush3.msra.mxu0 %v445_v3  ;;  %v441_v5 = vld [vmem:[%s18619_s21] sm:$0xff]  ;;  %v442_v10 = vld [vmem:[%s18619_s21 + $0x8] sm:$0xff]  ;;  %v443_v15 = vld [vmem:[%s18619_s21 + $0x10] sm:$0xff]  ;;  %s18502_s23 = smov 96   ;;  %s18503_s28 = smov 64   ;;  %v766_v43 = vunpack.c.l.s4 %v18504_v42  ;;  %vm15259_vm4 = vcmask 97280  }
  0x12   : > { %17245 = vmatprep.subr.mxu0 %v21780_v1  ;;  %v18505_v47 = vmov 1934713408   ;;  %s18510_s17 = smov 16   ;;  %s18511_s18 = smov 28   ;;  %vm15261_vm5 = vcmask 130048   ;;  %vm15263_vm6 = vcmask 162816  }
  0x13   : > { %17246 = vmatpush3.msra.mxu0 %v444_v4  ;;  %v767_v45 = vunpack.c.0.s8 %v766_v43  ;;  %v830_v48 = vunpack.c.l.s4 %v18505_v47  ;;  %vm15265_vm7 = vcmask 195584   ;;  %vm15267_vm8 = vcmask 228352  }
  0x14   : > { %17248 = vmatmul.mubr.msk.f32.vlgmr.msra.gmra.mxu0 %vm477_vm1, %v441_v5  ;;  %17250 = vmatprep.subr.mxu0 %v21780_v1 }
  0x15   : > { %17251 = vmatpush3.msra.mxu0 %v451_v6  ;;  %17258 = vmatprep.mubr.msk.f32.mxu0 %vm18494_vm0, %v21780_v1  ;;  %v18816_v51 = vsub.s32 %v767_v45, %v769_v46  ;;  %v831_v54 = vunpack.c.0.s8 %v830_v48 }
  0x16   : > { %17252 = vmatprep.subr.mxu0 %v21780_v1 }
  0x17   : > { %17253 = vmatpush3.msra.mxu0 %v450_v7  ;;  %21902 = vst [vmem:[#allocation11_spill] sm:$0xff] %v18816_v51  ;;  %v18826_v59 = vsub.s32 %v831_v54, %v769_v46 }
  0x18   : > { %17254 = vmatprep.subr.mxu0 %v21780_v1 }
  0x19   : > { %17255 = vmatpush3.msra.mxu0 %v449_v8  ;;  %21903 = vst [vmem:[#allocation12_spill] sm:$0xff] %v18826_v59 }
  0x1a   : > { %17256 = vmatprep.subr.mxu0 %v21780_v1 }
  0x1b   : > { %17257 = vmatpush3.msra.mxu0 %v448_v9 }
  0x1c   : > { %17259 = vmatmul.mubr.msk.f32.vlgmr.msra.gmra.mxu0 %vm477_vm1, %v442_v10  ;;  %17261 = vmatprep.subr.mxu0 %v21780_v1 }
  0x1d   : > { %17262 = vmatpush3.msra.mxu0 %v455_v11  ;;  %17269 = vmatprep.mubr.msk.f32.mxu0 %vm18494_vm0, %v21780_v1 }
  0x1e   : > { %17263 = vmatprep.subr.mxu0 %v21780_v1 }
  0x1f   : > { %17264 = vmatpush3.msra.mxu0 %v454_v12 }
  0x20   : > { %17265 = vmatprep.subr.mxu0 %v21780_v1 }
  0x21   : > { %17266 = vmatpush3.msra.mxu0 %v453_v13 }
  0x22   : > { %17267 = vmatprep.subr.mxu0 %v21780_v1 }
  0x23   : > { %17268 = vmatpush3.msra.mxu0 %v452_v14 }
  0x24   : > { %17270 = vmatmul.mubr.msk.f32.vlgmr.msra.gmra.mxu0 %vm477_vm1, %v443_v15  ;;  %17272 = vmatprep.subr.mxu0 %v21780_v1 }
  0x25   : > { %17274 = vmatprep.mubr.msk.f32.mxu0 %vm18494_vm0, %v21780_v1 }
  0xd4   : > { %v547_v17 = vpop.f32.mrf.mxu0 }
  0xd5   : > { %v18670_v18 = vadd.f32 %v16518_v16, %v547_v17 }
  0xd6   : > { %v17249_v19 = vpop.f32.mrf.mxu0 }
  0xd7   : > { %718 = vrot.lane.b32.xlu1 %v18670_v18, %s18495_s29  ;;  %700 = vrot.lane.b32.xlu0 %v18670_v18, %s18496_s30 }
  0xdb   : > { %727 = vrot.lane.b32.xlu1 %v18670_v18, %s18497_s14  ;;  %709 = vrot.lane.b32.xlu0 %v18670_v18, %s18498_s15 }
  0xdc   : > { %v620_v21 = vpop.f32.mrf.mxu0 }
  0xdd   : > { %v18687_v23 = vadd.f32 %v16519_v20, %v620_v21 }
  0xde   : > { %v17260_v22 = vpop.f32.mrf.mxu0 }
  0xdf   : > { %745 = vrot.lane.b32.xlu1 %v18670_v18, %s18499_s19  ;;  %736 = vrot.lane.b32.xlu0 %v18670_v18, %s18500_s20  ;;  %21893 = vst [vmem:[#allocation2_spill] sm:$0xff] %v18687_v23 }
  0xe3   : > { %754 = vrot.lane.b32.xlu0 %v18670_v18, %s18501_s22  ;;  %702 = vrot.lane.b32.xlu1 %v18687_v23, %s18496_s30 }
  0xe4   : > { %v693_v24 = vpop.f32.mrf.mxu0 }
  0xe5   : > { %v18766_v41 = vadd.f32 %v16520_v38, %v693_v24 }
  0xe6   : > { %v17271_v25 = vpop.f32.mrf.mxu0 }
  0xe7   : > { %711 = vrot.lane.b32.xlu0 %v18687_v23, %s18498_s15  ;;  %720 = vrot.lane.b32.xlu1 %v18687_v23, %s18495_s29  ;;  %21901 = vst [vmem:[#allocation10_spill] sm:$0xff] %v18766_v41 }
  0xeb   : > { %729 = vrot.lane.b32.xlu0 %v18687_v23, %s18497_s14  ;;  %738 = vrot.lane.b32.xlu1 %v18687_v23, %s18500_s20 }
  0xef   : > { %747 = vrot.lane.b32.xlu0 %v18687_v23, %s18499_s19  ;;  %756 = vrot.lane.b32.xlu1 %v18687_v23, %s18501_s22 }
  0xf3   : > { %1579 = vrot.lane.b32.xlu0 %v18670_v18, %s18502_s23 }
 0x149   : > { %v18707_v26 = vpop.permute.xlu1 %718  ;;  %v18709_v27 = vpop.permute.xlu0 %700 }
 0x14a   : > { %1581 = vrot.lane.b32.xlu1 %v18709_v27, %s18502_s23  ;;  %v779_v52 = vcombine.low %v18709_v27, %v18707_v26  ;;  %v780_v53 = vcombine.high %v18709_v27, %v18707_v26 }
 0x14c   : > { %v787_v57 = vrot.slane %v779_v52, %v18816_v51  ;;  %v794_v58 = vrot.slane %v780_v53, %v18816_v51 }
 0x14d   : > { %v18713_v28 = vpop.permute.xlu1 %727  ;;  %v18715_v29 = vpop.permute.xlu0 %709 }
 0x14e   : > { %1583 = vrot.lane.b32.xlu0 %v18715_v29, %s18502_s23  ;;  %1585 = vrot.lane.b32.xlu1 %v18707_v26, %s18502_s23  ;;  %v763_v49 = vcombine.low %v18670_v18, %v18715_v29  ;;  %v764_v50 = vcombine.high %v18670_v18, %v18715_v29 }
 0x150   : > { %v771_v55 = vrot.slane %v763_v49, %v18816_v51  ;;  %v778_v56 = vrot.slane %v764_v50, %v18816_v51 }
 0x151   : > { %v18721_v30 = vpop.permute.xlu1 %745  ;;  %v18723_v31 = vpop.permute.xlu0 %736 }
 0x152   : > { %1587 = vrot.lane.b32.xlu0 %v18713_v28, %s18502_s23  ;;  %1589 = vrot.lane.b32.xlu1 %v18723_v31, %s18502_s23  ;;  %v827_v60 = vcombine.low %v771_v55, %v787_v57  ;;  %v828_v61 = vcombine.high %v771_v55, %v787_v57  ;;  %v843_v62 = vcombine.low %v778_v56, %v794_v58 }
 0x153   : > { %v844_v63 = vcombine.high %v778_v56, %v794_v58  ;;  %v795_v6 = vcombine.low %v18713_v28, %v18721_v30  ;;  %v796_v8 = vcombine.high %v18713_v28, %v18721_v30 }
 0x154   : > { %v835_v2 = vrot.slane %v827_v60, %v18826_v59  ;;  %v842_v3 = vrot.slane %v828_v61, %v18826_v59  ;;  %v851_v4 = vrot.slane %v843_v62, %v18826_v59 }
 0x155   : > { %v18729_v32 = vpop.permute.xlu0 %754  ;;  %v18731_v33 = vpop.permute.xlu1 %702  ;;  %v858_v5 = vrot.slane %v844_v63, %v18826_v59  ;;  %v803_v14 = vrot.slane %v795_v6, %v18816_v51  ;;  %v810_v16 = vrot.slane %v796_v8, %v18816_v51 }
 0x156   : > { %21894 = vst [vmem:[#allocation3_spill] sm:$0xff] %v18731_v33  ;;  %1591 = vrot.lane.b32.xlu0 %v18721_v30, %s18502_s23  ;;  %1593 = vrot.lane.b32.xlu1 %v18729_v32, %s18502_s23  ;;  %v811_v0 = vcombine.low %v18723_v31, %v18729_v32  ;;  %v812_v7 = vcombine.high %v18723_v31, %v18729_v32 }
 0x157   : > { %v16524_v10 = vcombine.low %v835_v2, %v842_v3  ;;  %v16526_v11 = vcombine.high %v835_v2, %v842_v3  ;;  %v16528_v12 = vcombine.low %v851_v4, %v858_v5  ;;  %v16530_v13 = vcombine.high %v851_v4, %v858_v5 }
 0x158   : > { %v819_v9 = vrot.slane %v811_v0, %v18816_v51  ;;  %v826_v15 = vrot.slane %v812_v7, %v18816_v51 }
 0x159   : > { %v18737_v34 = vpop.permute.xlu0 %711  ;;  %v18739_v35 = vpop.permute.xlu1 %720  ;;  %v1179_v19 = vrot.slane %v16524_v10, %v18816_v51  ;;  %v1195_v20 = vrot.slane %v16526_v11, %v18816_v51  ;;  %v1211_v24 = vrot.slane %v16528_v12, %v18816_v51  ;;  %v1227_v25 = vrot.slane %v16530_v13, %v18816_v51 }
 0x15a   : > { %21895 = vst [vmem:[#allocation4_spill] sm:$0xff] %v18737_v34  ;;  %21896 = vst [vmem:[#allocation5_spill] sm:$0xff] %v18739_v35  ;;  %1595 = vrot.lane.b32.xlu0 %v18687_v23, %s18502_s23  ;;  %1597 = vrot.lane.b32.xlu1 %v18731_v33, %s18502_s23  ;;  %v859_v17 = vcombine.low %v803_v14, %v819_v9  ;;  %v875_v21 = vcombine.low %v810_v16, %v826_v15 }
 0x15b   : > { %v876_v22 = vcombine.high %v810_v16, %v826_v15  ;;  %v1235_v42 = vcombine.low %v1179_v19, %v1195_v20  ;;  %v1267_v43 = vcombine.low %v1211_v24, %v1227_v25  ;;  %v1236_v48 = vcombine.high %v1179_v19, %v1195_v20 }
 0x15c   : > { %v1268_v49 = vcombine.high %v1211_v24, %v1227_v25 }
 0x15d   : > { %v18747_v36 = vpop.permute.xlu0 %729  ;;  %v18751_v37 = vpop.permute.xlu1 %738  ;;  %v890_v38 = vrot.slane %v876_v22, %v18826_v59  ;;  %v1243_v57 = vrot.slane %v1235_v42, %v18826_v59  ;;  %v1275_v58 = vrot.slane %v1267_v43, %v18826_v59  ;;  %v18859_v2 = vrot.slane %v1236_v48, %v18826_v59 }
 0x15e   : > { %1599 = vrot.lane.b32.xlu0 %v18737_v34, %s18502_s23  ;;  %21897 = vst [vmem:[#allocation6_spill] sm:$0xff] %v18747_v36  ;;  %1601 = vrot.lane.b32.xlu1 %v18739_v35, %s18502_s23  ;;  %21898 = vst [vmem:[#allocation7_spill] sm:$0xff] %v18751_v37  ;;  %v18862_v3 = vrot.slane %v1268_v49, %v18826_v59 }
 0x15f   : > { %v18870_v11 = vcombine.low %v1243_v57, %v1275_v58  ;;  %v18872_v12 = vcombine.high %v1243_v57, %v1275_v58 }
 0x161   : > { %v18760_v39 = vpop.permute.xlu0 %747  ;;  %v18762_v40 = vpop.permute.xlu1 %756 }
 0x162   : > { %1603 = vrot.lane.b32.xlu0 %v18747_v36, %s18502_s23  ;;  %1605 = vrot.lane.b32.xlu1 %v18751_v37, %s18502_s23  ;;  %21899 = vst [vmem:[#allocation8_spill] sm:$0xff] %v18760_v39  ;;  %21900 = vst [vmem:[#allocation9_spill] sm:$0xff] %v18762_v40 }
 0x166   : > { %1607 = vrot.lane.b32.xlu0 %v18760_v39, %s18502_s23  ;;  %1609 = vrot.lane.b32.xlu1 %v18762_v40, %s18502_s23 }
 0x16a   : > { %713 = vrot.lane.b32.xlu0 %v18766_v41, %s18498_s15  ;;  %704 = vrot.lane.b32.xlu1 %v18766_v41, %s18496_s30  ;;  %s18507_s30 = smov 12   ;;  %s18509_s15 = smov 20  }
 0x16e   : > { %740 = vrot.lane.b32.xlu0 %v18766_v41, %s18500_s20  ;;  %722 = vrot.lane.b32.xlu1 %v18766_v41, %s18495_s29  ;;  %s18506_s29 = smov 8   ;;  %s440_s20 = scalar_lea.vmem %s21775_s13, %s18147_s16 }
 0x172   : > { %758 = vrot.lane.b32.xlu0 %v18766_v41, %s18501_s22  ;;  %731 = vrot.lane.b32.xlu1 %v18766_v41, %s18497_s14  ;;  %s18508_s14 = smov 4  }
 0x176   : > { %2483 = vrot.lane.b32.xlu0 %v18687_v23, %s18503_s28  ;;  %749 = vrot.lane.b32.xlu1 %v18766_v41, %s18499_s19  ;;  %s18512_s19 = smov 24  }
 0x17a   : > { %2467 = vrot.lane.b32.xlu0 %v18670_v18, %s18503_s28  ;;  %2469 = vrot.lane.b32.xlu1 %v18709_v27, %s18503_s28  ;;  %v860_v18 = vcombine.high %v803_v14, %v819_v9 }
 0x17c   : > { %v874_v27 = vrot.slane %v860_v18, %v18826_v59  ;;  %v18880_v18 = vcombine.low %v18859_v2, %v18862_v3 }
 0x17e   : > { %2473 = vrot.lane.b32.xlu0 %v18707_v26, %s18503_s28  ;;  %2471 = vrot.lane.b32.xlu1 %v18715_v29, %s18503_s28  ;;  %v867_v26 = vrot.slane %v859_v17, %v18826_v59 }
 0x180   : > { %v16525_v44 = vcombine.low %v867_v26, %v874_v27  ;;  %v16527_v45 = vcombine.high %v867_v26, %v874_v27 }
 0x182   : > { %2475 = vrot.lane.b32.xlu0 %v18713_v28, %s18503_s28  ;;  %2477 = vrot.lane.b32.xlu1 %v18723_v31, %s18503_s28  ;;  %v1580_v28 = vpop.permute.xlu0 %1579  ;;  %v883_v31 = vrot.slane %v875_v21, %v18826_v59  ;;  %v18865_v4 = vrot.slane %v16525_v44, %v18816_v51  ;;  %v18868_v5 = vrot.slane %v16527_v45, %v18816_v51 }
 0x184   : > { %v16529_v55 = vcombine.low %v883_v31, %v890_v38  ;;  %v16531_v56 = vcombine.high %v883_v31, %v890_v38  ;;  %v1251_v21 = vcombine.low %v18865_v4, %v18868_v5 }
 0x186   : > { %2489 = vrot.lane.b32.xlu0 %v18739_v35, %s18503_s28  ;;  %2485 = vrot.lane.b32.xlu1 %v18731_v33, %s18503_s28  ;;  %v18883_v19 = vrot.slane %v16529_v55, %v18816_v51  ;;  %v18886_v20 = vrot.slane %v16531_v56, %v18816_v51 }
 0x18a   : > { %2491 = vrot.lane.b32.xlu0 %v18747_v36, %s18503_s28  ;;  %2487 = vrot.lane.b32.xlu1 %v18737_v34, %s18503_s28 }
 0x18e   : > { %2497 = vrot.lane.b32.xlu0 %v18762_v40, %s18503_s28  ;;  %2493 = vrot.lane.b32.xlu1 %v18751_v37, %s18503_s28 }
 0x192   : > { %2495 = vrot.lane.b32.xlu1 %v18760_v39, %s18503_s28 }
 0x1bc   : > { %v1582_v29 = vpop.permute.xlu1 %1581 }
 0x1c0   : > { %v1584_v46 = vpop.permute.xlu0 %1583  ;;  %v1586_v47 = vpop.permute.xlu1 %1585 }
 0x1c1   : > { %v1651_v50 = vcombine.low %v1580_v28, %v1584_v46  ;;  %v1652_v52 = vcombine.high %v1580_v28, %v1584_v46  ;;  %v1667_v53 = vcombine.low %v1582_v29, %v1586_v47  ;;  %v1668_v54 = vcombine.high %v1582_v29, %v1586_v47 }
 0x1c3   : > { %v1659_v60 = vrot.slane %v1651_v50, %v18816_v51  ;;  %v1666_v61 = vrot.slane %v1652_v52, %v18816_v51  ;;  %v1675_v62 = vrot.slane %v1667_v53, %v18816_v51  ;;  %v1682_v63 = vrot.slane %v1668_v54, %v18816_v51 }
 0x1c4   : > { %v1588_v0 = vpop.permute.xlu0 %1587  ;;  %v1590_v10 = vpop.permute.xlu1 %1589 }
 0x1c5   : > { %v1715_v6 = vcombine.low %v1659_v60, %v1675_v62  ;;  %v1716_v7 = vcombine.high %v1659_v60, %v1675_v62  ;;  %v1731_v8 = vcombine.low %v1666_v61, %v1682_v63  ;;  %v1732_v9 = vcombine.high %v1666_v61, %v1682_v63 }
 0x1c7   : > { %v1723_v13 = vrot.slane %v1715_v6, %v18826_v59  ;;  %v1730_v14 = vrot.slane %v1716_v7, %v18826_v59  ;;  %v1739_v15 = vrot.slane %v1731_v8, %v18826_v59  ;;  %v1746_v16 = vrot.slane %v1732_v9, %v18826_v59 }
 0x1c8   : > { %v1592_v17 = vpop.permute.xlu0 %1591  ;;  %v1594_v27 = vpop.permute.xlu1 %1593 }
 0x1c9   : > { %v16548_v22 = vcombine.low %v1723_v13, %v1730_v14  ;;  %v16550_v24 = vcombine.high %v1723_v13, %v1730_v14  ;;  %v16552_v25 = vcombine.low %v1739_v15, %v1746_v16  ;;  %v16554_v26 = vcombine.high %v1739_v15, %v1746_v16 }
 0x1ca   : > { %v1683_v28 = vcombine.low %v1588_v0, %v1592_v17  ;;  %v1684_v29 = vcombine.high %v1588_v0, %v1592_v17  ;;  %v1699_v31 = vcombine.low %v1590_v10, %v1594_v27  ;;  %v1700_v38 = vcombine.high %v1590_v10, %v1594_v27 }
 0x1cb   : > { %v2067_v42 = vrot.slane %v16548_v22, %v18816_v51  ;;  %v2083_v43 = vrot.slane %v16550_v24, %v18816_v51  ;;  %v2099_v44 = vrot.slane %v16552_v25, %v18816_v51  ;;  %v2115_v45 = vrot.slane %v16554_v26, %v18816_v51 }
 0x1cc   : > { %v1691_v46 = vrot.slane %v1683_v28, %v18816_v51  ;;  %v1698_v47 = vrot.slane %v1684_v29, %v18816_v51  ;;  %v1707_v48 = vrot.slane %v1699_v31, %v18816_v51  ;;  %v1714_v49 = vrot.slane %v1700_v38, %v18816_v51  ;;  %v1596_v50 = vpop.permute.xlu0 %1595  ;;  %v1598_v56 = vpop.permute.xlu1 %1597 }
 0x1cd   : > { %v2123_v52 = vcombine.low %v2067_v42, %v2083_v43  ;;  %v2124_v53 = vcombine.high %v2067_v42, %v2083_v43  ;;  %v2155_v54 = vcombine.low %v2099_v44, %v2115_v45  ;;  %v2156_v55 = vcombine.high %v2099_v44, %v2115_v45 }
 0x1ce   : > { %v1747_v57 = vcombine.low %v1691_v46, %v1707_v48  ;;  %v1748_v58 = vcombine.high %v1691_v46, %v1707_v48  ;;  %v1763_v60 = vcombine.low %v1698_v47, %v1714_v49  ;;  %v1764_v61 = vcombine.high %v1698_v47, %v1714_v49 }
 0x1cf   : > { %v2131_v62 = vrot.slane %v2123_v52, %v18826_v59  ;;  %v2163_v63 = vrot.slane %v2155_v54, %v18826_v59  ;;  %v2138_v0 = vrot.slane %v2124_v53, %v18826_v59  ;;  %v2170_v6 = vrot.slane %v2156_v55, %v18826_v59 }
 0x1d0   : > { %v1755_v7 = vrot.slane %v1747_v57, %v18826_v59  ;;  %v1762_v8 = vrot.slane %v1748_v58, %v18826_v59  ;;  %v1771_v9 = vrot.slane %v1763_v60, %v18826_v59  ;;  %v1778_v10 = vrot.slane %v1764_v61, %v18826_v59  ;;  %v1600_v13 = vpop.permute.xlu0 %1599  ;;  %v1602_v16 = vpop.permute.xlu1 %1601 }
 0x1d1   : > { %v1787_v14 = vcombine.low %v1596_v50, %v1600_v13  ;;  %v1788_v15 = vcombine.high %v1596_v50, %v1600_v13  ;;  %v18906_v17 = vcombine.low %v2131_v62, %v2163_v63  ;;  %v18908_v22 = vcombine.high %v2131_v62, %v2163_v63 }
 0x1d2   : > { %v16549_v24 = vcombine.low %v1755_v7, %v1762_v8  ;;  %v16551_v25 = vcombine.high %v1755_v7, %v1762_v8  ;;  %v16553_v26 = vcombine.low %v1771_v9, %v1778_v10  ;;  %v16555_v27 = vcombine.high %v1771_v9, %v1778_v10 }
 0x1d3   : > { %21904 = vst [vmem:[#allocation13_spill] sm:$0xff] %v18906_v17  ;;  %21905 = vst [vmem:[#allocation14_spill] sm:$0xff] %v18908_v22  ;;  %v1795_v28 = vrot.slane %v1787_v14, %v18816_v51  ;;  %v1802_v29 = vrot.slane %v1788_v15, %v18816_v51  ;;  %v1803_v31 = vcombine.low %v1598_v56, %v1602_v16  ;;  %17273 = vmatpush3.xpose.msk.msra.mxu0 %vm3355_vm2, %v18906_v17 }
 0x1d4   : > { %v1804_v38 = vcombine.high %v1598_v56, %v1602_v16  ;;  %v18915_v42 = vrot.slane %v16549_v24, %v18816_v51  ;;  %v18918_v43 = vrot.slane %v16551_v25, %v18816_v51  ;;  %v18921_v44 = vrot.slane %v16553_v26, %v18816_v51  ;;  %17278 = vmatpush3.xpose.msk.msra.mxu1 %vm3355_vm2, %v18908_v22  ;;  %v1604_v46 = vpop.permute.xlu0 %1603  ;;  %v1606_v49 = vpop.permute.xlu1 %1605 }
 0x1d5   : > { %v18924_v45 = vrot.slane %v16555_v27, %v18816_v51  ;;  %v1811_v47 = vrot.slane %v1803_v31, %v18816_v51  ;;  %17282 = vmatprep.subr.mxu0 %v21780_v1  ;;  %17287 = vmatprep.subr.mxu1 %v21780_v1  ;;  %v18934_v50 = vcombine.high %v18859_v2, %v18862_v3 }
 0x1d6   : > { %v1818_v48 = vrot.slane %v1804_v38, %v18816_v51  ;;  %17275 = vmatmul.mubr.msk.f32.vlgmr.msra.gmra.mxu0 %vm3355_vm2, %v18870_v11  ;;  %v18938_v52 = vcombine.low %v2138_v0, %v2170_v6  ;;  %v18944_v53 = vrot.slane %v1251_v21, %v18826_v59  ;;  %v1283_v54 = vcombine.low %v18883_v19, %v18886_v20 }
 0x1d7   : > { %21906 = vst [vmem:[#allocation15_spill] sm:$0xff] %v18934_v50  ;;  %v1252_v55 = vcombine.high %v18865_v4, %v18868_v5  ;;  %v1851_v56 = vcombine.low %v1795_v28, %v1811_v47  ;;  %v1852_v2 = vcombine.high %v1795_v28, %v1811_v47  ;;  %17280 = vmatmul.mubr.msk.f32.vlgmr.msra.gmra.mxu1 %vm3355_vm2, %v18872_v12 }
 0x1d8   : > { %21907 = vst [vmem:[#allocation16_spill] sm:$0xff] %v18938_v52  ;;  %v1867_v3 = vcombine.low %v1802_v29, %v1818_v48  ;;  %v1868_v57 = vcombine.high %v1802_v29, %v1818_v48  ;;  %v2139_v58 = vcombine.low %v18915_v42, %v18918_v43  ;;  %v2171_v21 = vcombine.low %v18921_v44, %v18924_v45  ;;  %v1608_v61 = vpop.permute.xlu0 %1607  ;;  %v1610_v9 = vpop.permute.xlu1 %1609 }
 0x1d9   : > { %17283 = vmatpush3.xpose.msk.msra.mxu0 %vm3355_vm2, %v18938_v52  ;;  %v18958_v60 = vcombine.high %v2138_v0, %v2170_v6  ;;  %17284 = vmatprep.mubr.msk.f32.mxu0 %vm18494_vm0, %v21780_v1  ;;  %v1859_v62 = vrot.slane %v1851_v56, %v18826_v59  ;;  %v1866_v63 = vrot.slane %v1852_v2, %v18826_v59 }
 0x1da   : > { %v1875_v7 = vrot.slane %v1867_v3, %v18826_v59  ;;  %v1882_v8 = vrot.slane %v1868_v57, %v18826_v59  ;;  %17289 = vmatprep.mubr.msk.f32.mxu1 %vm18494_vm0, %v21780_v1  ;;  %v1819_v0 = vcombine.low %v1604_v46, %v1608_v61  ;;  %v1820_v6 = vcombine.high %v1604_v46, %v1608_v61 }
 0x1db   : > { %21908 = vst [vmem:[#allocation17_spill] sm:$0xff] %v18958_v60  ;;  %17288 = vmatpush3.xpose.msk.msra.mxu1 %vm3355_vm2, %v18958_v60  ;;  %v1835_v10 = vcombine.low %v1606_v49, %v1610_v9  ;;  %v1836_v13 = vcombine.high %v1606_v49, %v1610_v9  ;;  %v16556_v14 = vcombine.low %v1859_v62, %v1866_v63 }
 0x1dc   : > { %v16558_v15 = vcombine.high %v1859_v62, %v1866_v63  ;;  %v16560_v16 = vcombine.low %v1875_v7, %v1882_v8  ;;  %v16562_v24 = vcombine.high %v1875_v7, %v1882_v8  ;;  %17285 = vmatmul.mubr.msk.f32.vlgmr.msra.gmra.mxu0 %vm3355_vm2, %v18880_v18  ;;  %v1827_v25 = vrot.slane %v1819_v0, %v18816_v51  ;;  %v18977_v29 = vpop.permute.xlu0 %713  ;;  %v18989_v48 = vpop.permute.xlu1 %704 }
 0x1dd   : > { %v1834_v26 = vrot.slane %v1820_v6, %v18816_v51  ;;  %v1843_v27 = vrot.slane %v1835_v10, %v18816_v51  ;;  %v1850_v28 = vrot.slane %v1836_v13, %v18816_v51  ;;  %17292 = vmatprep.subr.mxu0 %v21780_v1  ;;  %21909 = vst [vmem:[#allocation18_spill] sm:$0xff] %v18977_v29  ;;  %21910 = vst [vmem:[#allocation19_spill] sm:$0xff] %v18989_v48 }
 0x1de   : > { %v18980_v31 = vrot.slane %v16556_v14, %v18816_v51  ;;  %v18983_v38 = vrot.slane %v16558_v15, %v18816_v51  ;;  %17290 = vmatmul.mubr.msk.f32.vlgmr.msra.gmra.mxu1 %vm3355_vm2, %v18934_v50  ;;  %v2147_v46 = vrot.slane %v2139_v58, %v18826_v59  ;;  %v2179_v47 = vrot.slane %v2171_v21, %v18826_v59 }
 0x1df   : > { %v1883_v49 = vcombine.low %v1827_v25, %v1843_v27  ;;  %v1884_v56 = vcombine.high %v1827_v25, %v1843_v27  ;;  %v1899_v2 = vcombine.low %v1834_v26, %v1850_v28  ;;  %v1900_v3 = vcombine.high %v1834_v26, %v1850_v28  ;;  %17297 = vmatprep.subr.mxu1 %v21780_v1 }
 0x1e0   : > { %v2140_v57 = vcombine.high %v18915_v42, %v18918_v43  ;;  %v18995_v61 = vrot.slane %v16560_v16, %v18816_v51  ;;  %v18998_v62 = vrot.slane %v16562_v24, %v18816_v51  ;;  %17294 = vmatprep.mubr.msk.f32.mxu0 %vm18494_vm0, %v21780_v1  ;;  %v1291_v58 = vrot.slane %v1283_v54, %v18826_v59  ;;  %v19009_v42 = vpop.permute.xlu0 %740  ;;  %v19017_v54 = vpop.permute.xlu1 %722 }
 0x1e1   : > { %v1891_v21 = vrot.slane %v1883_v49, %v18826_v59  ;;  %v1898_v63 = vrot.slane %v1884_v56, %v18826_v59  ;;  %v1907_v7 = vrot.slane %v1899_v2, %v18826_v59  ;;  %v1914_v8 = vrot.slane %v1900_v3, %v18826_v59  ;;  %17299 = vmatprep.mubr.msk.f32.mxu1 %vm18494_vm0, %v21780_v1 }
 0x1e2   : > { %21911 = vst [vmem:[#allocation20_spill] sm:$0xff] %v19009_v42  ;;  %v2172_v43 = vcombine.high %v18921_v44, %v18924_v45  ;;  %v19013_v9 = vcombine.low %v2147_v46, %v2179_v47  ;;  %v19015_v0 = vcombine.high %v2147_v46, %v2179_v47  ;;  %21914 = vst [vmem:[#allocation23_spill] sm:$0xff] %v19017_v54 }
 0x1e3   : > { %v1284_v6 = vcombine.high %v18883_v19, %v18886_v20  ;;  %v2259_v10 = vcombine.low %v18980_v31, %v18983_v38  ;;  %v16557_v13 = vcombine.low %v1891_v21, %v1898_v63  ;;  %v16559_v14 = vcombine.high %v1891_v21, %v1898_v63 }
 0x1e4   : > { %21912 = vst [vmem:[#allocation21_spill] sm:$0xff] %v19013_v9  ;;  %21913 = vst [vmem:[#allocation22_spill] sm:$0xff] %v19015_v0  ;;  %17293 = vmatpush3.xpose.msk.msra.mxu0 %vm3355_vm2, %v19013_v9  ;;  %17298 = vmatpush3.xpose.msk.msra.mxu1 %vm3355_vm2, %v19015_v0  ;;  %v2154_v44 = vrot.slane %v2140_v57, %v18826_v59  ;;  %v2291_v45 = vcombine.low %v18995_v61, %v18998_v62  ;;  %v19034_v20 = vpop.permute.xlu0 %758  ;;  %v19046_v28 = vpop.permute.xlu1 %731 }
 0x1e5   : > { %v16561_v15 = vcombine.low %v1907_v7, %v1914_v8  ;;  %v16563_v16 = vcombine.high %v1907_v7, %v1914_v8  ;;  %v19031_v19 = vcombine.low %v18944_v53, %v1291_v58  ;;  %17302 = vmatprep.subr.mxu0 %v21780_v1  ;;  %21916 = vst [vmem:[#allocation25_spill] sm:$0xff] %v19034_v20  ;;  %21918 = vst [vmem:[#allocation27_spill] sm:$0xff] %v19046_v28 }
 0x1e6   : > { %v19037_v24 = vcombine.high %v18944_v53, %v1291_v58  ;;  %17307 = vmatprep.subr.mxu1 %v21780_v1  ;;  %v2186_v25 = vrot.slane %v2172_v43, %v18826_v59  ;;  %v1266_v26 = vrot.slane %v1252_v55, %v18826_v59  ;;  %v1298_v27 = vrot.slane %v1284_v6, %v18826_v59 }
 0x1e7   : > { %21915 = vst [vmem:[#allocation24_spill] sm:$0xff] %v19031_v19  ;;  %v2260_v46 = vcombine.high %v18980_v31, %v18983_v38  ;;  %17295 = vmatmul.mubr.msk.f32.vlgmr.msra.gmra.mxu0 %vm3355_vm2, %v19031_v19  ;;  %v2267_v53 = vrot.slane %v2259_v10, %v18826_v59  ;;  %v2210_v47 = vrot.slane %v16557_v13, %v18816_v51 }
 0x1e8   : > { %21917 = vst [vmem:[#allocation26_spill] sm:$0xff] %v19037_v24  ;;  %v2226_v49 = vrot.slane %v16559_v14, %v18816_v51  ;;  %17300 = vmatmul.mubr.msk.f32.vlgmr.msra.gmra.mxu1 %vm3355_vm2, %v19037_v24  ;;  %v19057_v4 = vcombine.low %v2154_v44, %v2186_v25  ;;  %v19059_v5 = vcombine.high %v2154_v44, %v2186_v25  ;;  %v19068_v56 = vpop.permute.xlu0 %2483  ;;  %v19078_v57 = vpop.permute.xlu1 %749 }
 0x1e9   : > { %v2242_v55 = vrot.slane %v16561_v15, %v18816_v51  ;;  %v2258_v31 = vrot.slane %v16563_v16, %v18816_v51  ;;  %17304 = vmatprep.mubr.msk.f32.mxu0 %vm18494_vm0, %v21780_v1  ;;  %17309 = vmatprep.mubr.msk.f32.mxu1 %vm18494_vm0, %v21780_v1  ;;  %v2299_v38 = vrot.slane %v2291_v45, %v18826_v59 }
 0x1ea   : > { %21919 = vst [vmem:[#allocation28_spill] sm:$0xff] %v19057_v4  ;;  %21920 = vst [vmem:[#allocation29_spill] sm:$0xff] %v19059_v5  ;;  %v2292_v2 = vcombine.high %v18995_v61, %v18998_v62  ;;  %17303 = vmatpush3.xpose.msk.msra.mxu0 %vm3355_vm2, %v19057_v4  ;;  %17308 = vmatpush3.xpose.msk.msra.mxu1 %vm3355_vm2, %v19059_v5  ;;  %v19076_v3 = vcombine.low %v1266_v26, %v1298_v27 }
 0x1eb   : > { %21922 = vst [vmem:[#allocation31_spill] sm:$0xff] %v19078_v57  ;;  %v19080_v58 = vcombine.high %v1266_v26, %v1298_v27  ;;  %17312 = vmatprep.subr.mxu0 %v21780_v1  ;;  %17317 = vmatprep.subr.mxu1 %v21780_v1  ;;  %v19084_v21 = vcombine.low %v2267_v53, %v2299_v38 }
 0x1ec   : > { %21921 = vst [vmem:[#allocation30_spill] sm:$0xff] %v19076_v3  ;;  %v19086_v63 = vcombine.high %v2267_v53, %v2299_v38  ;;  %v2275_v61 = vcombine.low %v2210_v47, %v2226_v49  ;;  %v2307_v62 = vcombine.low %v2242_v55, %v2258_v31  ;;  %v2274_v7 = vrot.slane %v2260_v46, %v18826_v59  ;;  %v19093_v8 = vpop.permute.xlu0 %2467  ;;  %v19100_v6 = vpop.permute.xlu1 %2469 }
 0x1ed   : > { %21923 = vst [vmem:[#allocation32_spill] sm:$0xff] %v19080_v58  ;;  %21924 = vst [vmem:[#allocation33_spill] sm:$0xff] %v19084_v21  ;;  %17305 = vmatmul.mubr.msk.f32.vlgmr.msra.gmra.mxu0 %vm3355_vm2, %v19076_v3  ;;  %17310 = vmatmul.mubr.msk.f32.vlgmr.msra.gmra.mxu1 %vm3355_vm2, %v19080_v58  ;;  %v2306_v43 = vrot.slane %v2292_v2, %v18826_v59  ;;  %v2276_v10 = vcombine.high %v2210_v47, %v2226_v49 }
 0x1ee   : > { %21925 = vst [vmem:[#allocation34_spill] sm:$0xff] %v19086_v63  ;;  %17313 = vmatpush3.xpose.msk.msra.mxu0 %vm3355_vm2, %v19084_v21  ;;  %17318 = vmatpush3.xpose.msk.msra.mxu1 %vm3355_vm2, %v19086_v63  ;;  %v2308_v13 = vcombine.high %v2242_v55, %v2258_v31  ;;  %v2283_v45 = vrot.slane %v2275_v61, %v18826_v59 }
 0x1ef   : > { %17314 = vmatprep.mubr.msk.f32.mxu0 %vm18494_vm0, %v21780_v1  ;;  %17319 = vmatprep.mubr.msk.f32.mxu1 %vm18494_vm0, %v21780_v1  ;;  %v19108_v14 = vcombine.low %v2274_v7, %v2306_v43  ;;  %v19110_v44 = vcombine.high %v2274_v7, %v2306_v43  ;;  %v2315_v15 = vrot.slane %v2307_v62, %v18826_v59 }
 0x1f0   : > { %17322 = vmatprep.subr.mxu0 %v21780_v1  ;;  %17327 = vmatprep.subr.mxu1 %v21780_v1  ;;  %v19118_v16 = vpop.permute.xlu0 %2473  ;;  %v19124_v25 = vpop.permute.xlu1 %2471  ;;  %v2290_v46 = vrot.slane %v2276_v10, %v18826_v59  ;;  %v2322_v53 = vrot.slane %v2308_v13, %v18826_v59 }
 0x1f1   : > { %21926 = vst [vmem:[#allocation35_spill] sm:$0xff] %v19108_v14  ;;  %21927 = vst [vmem:[#allocation36_spill] sm:$0xff] %v19110_v44  ;;  %17315 = vmatmul.mubr.msk.f32.vlgmr.msra.gmra.mxu0 %vm3355_vm2, %v18870_v11  ;;  %17320 = vmatmul.mubr.msk.f32.vlgmr.msra.gmra.mxu1 %vm3355_vm2, %v18872_v12  ;;  %v19130_v26 = vcombine.low %v2283_v45, %v2315_v15  ;;  %v19134_v27 = vcombine.high %v2283_v45, %v2315_v15 }
 0x1f2   : > { %17323 = vmatpush3.xpose.msk.msra.mxu0 %vm3355_vm2, %v19108_v14  ;;  %17328 = vmatpush3.xpose.msk.msra.mxu1 %vm3355_vm2, %v19110_v44  ;;  %v19156_v55 = vcombine.low %v2290_v46, %v2322_v53  ;;  %v19158_v31 = vcombine.high %v2290_v46, %v2322_v53 }
 0x1f3   : > { %17324 = vmatprep.mubr.msk.f32.mxu0 %vm18494_vm0, %v21780_v1  ;;  %17329 = vmatprep.mubr.msk.f32.mxu1 %vm18494_vm0, %v21780_v1  ;;  %21928 = vst [vmem:[#allocation37_spill] sm:$0xff] %v19130_v26  ;;  %21929 = vst [vmem:[#allocation38_spill] sm:$0xff] %v19134_v27 }
 0x1f4   : > { %17332 = vmatprep.subr.mxu0 %v21780_v1  ;;  %17337 = vmatprep.subr.mxu1 %v21780_v1  ;;  %v19142_v47 = vpop.permute.xlu0 %2475  ;;  %v19148_v49 = vpop.permute.xlu1 %2477  ;;  %21930 = vst [vmem:[#allocation39_spill] sm:$0xff] %v19156_v55  ;;  %21931 = vst [vmem:[#allocation40_spill] sm:$0xff] %v19158_v31 }
 0x1f5   : > { %17325 = vmatmul.mubr.msk.f32.vlgmr.msra.gmra.mxu0 %vm3355_vm2, %v18880_v18  ;;  %17330 = vmatmul.mubr.msk.f32.vlgmr.msra.gmra.mxu1 %vm3355_vm2, %v18934_v50 }
 0x1f6   : > { %17333 = vmatpush3.xpose.msk.msra.mxu0 %vm3355_vm2, %v19130_v26  ;;  %17338 = vmatpush3.xpose.msk.msra.mxu1 %vm3355_vm2, %v19134_v27 }
 0x1f7   : > { %17334 = vmatprep.mubr.msk.f32.mxu0 %vm18494_vm0, %v21780_v1  ;;  %17339 = vmatprep.mubr.msk.f32.mxu1 %vm18494_vm0, %v21780_v1 }
 0x1f8   : > { %17342 = vmatprep.subr.mxu0 %v21780_v1  ;;  %17347 = vmatprep.subr.mxu1 %v21780_v1  ;;  %v2486_v38 = vpop.permute.xlu1 %2485  ;;  %v2490_v2 = vpop.permute.xlu0 %2489 }
 0x1f9   : > { %17335 = vmatmul.mubr.msk.f32.vlgmr.msra.gmra.mxu0 %vm3355_vm2, %v19031_v19  ;;  %17340 = vmatmul.mubr.msk.f32.vlgmr.msra.gmra.mxu1 %vm3355_vm2, %v19037_v24  ;;  %v2691_v61 = vcombine.low %v2486_v38, %v2490_v2  ;;  %v2692_v62 = vcombine.high %v2486_v38, %v2490_v2 }
 0x1fa   : > { %17343 = vmatpush3.xpose.msk.msra.mxu0 %vm3355_vm2, %v19156_v55  ;;  %17348 = vmatpush3.xpose.msk.msra.mxu1 %vm3355_vm2, %v19158_v31 }
 0x1fb   : > { %17344 = vmatprep.mubr.msk.f32.mxu0 %vm18494_vm0, %v21780_v1  ;;  %17349 = vmatprep.mubr.msk.f32.mxu1 %vm18494_vm0, %v21780_v1  ;;  %v2699_v13 = vrot.slane %v2691_v61, %v18816_v51  ;;  %v2706_v45 = vrot.slane %v2692_v62, %v18816_v51 }
 0x1fc   : > { %17352 = vmatprep.subr.mxu0 %v21780_v1  ;;  %17357 = vmatprep.subr.mxu1 %v21780_v1  ;;  %v2488_v7 = vpop.permute.xlu1 %2487 }
 0x1fd   : > { %17345 = vmatmul.mubr.msk.f32.vlgmr.msra.gmra.mxu0 %vm3355_vm2, %v19076_v3  ;;  %17350 = vmatmul.mubr.msk.f32.vlgmr.msra.gmra.mxu1 %vm3355_vm2, %v19080_v58  ;;  %v2675_v43 = vcombine.low %v19068_v56, %v2488_v7  ;;  %v2676_v10 = vcombine.high %v19068_v56, %v2488_v7 }
 0x1fe   : > { %17354 = vmatprep.mubr.msk.f32.mxu0 %vm18494_vm0, %v21780_v1  ;;  %17359 = vmatprep.mubr.msk.f32.mxu1 %vm18494_vm0, %v21780_v1 }
 0x1ff   : > { %v2683_v15 = vrot.slane %v2675_v43, %v18816_v51  ;;  %v2690_v46 = vrot.slane %v2676_v10, %v18816_v51 }
 0x201   : > { %v2739_v53 = vcombine.low %v2683_v15, %v2699_v13  ;;  %v2740_v38 = vcombine.high %v2683_v15, %v2699_v13  ;;  %v2755_v2 = vcombine.low %v2690_v46, %v2706_v45  ;;  %v2756_v31 = vcombine.high %v2690_v46, %v2706_v45 }
 0x203   : > { %v2747_v55 = vrot.slane %v2739_v53, %v18826_v59  ;;  %v2754_v1 = vrot.slane %v2740_v38, %v18826_v59  ;;  %v2763_v27 = vrot.slane %v2755_v2, %v18826_v59  ;;  %v2770_v56 = vrot.slane %v2756_v31, %v18826_v59 }
 0x205   : > { %v16580_v7 = vcombine.low %v2747_v55, %v2754_v1  ;;  %v16582_v61 = vcombine.high %v2747_v55, %v2754_v1  ;;  %v16584_v26 = vcombine.low %v2763_v27, %v2770_v56  ;;  %v16586_v62 = vcombine.high %v2763_v27, %v2770_v56 }
 0x207   : > { %v3091_v43 = vrot.slane %v16580_v7, %v18816_v51  ;;  %v3107_v10 = vrot.slane %v16582_v61, %v18816_v51  ;;  %v3123_v13 = vrot.slane %v16584_v26, %v18816_v51  ;;  %v3139_v45 = vrot.slane %v16586_v62, %v18816_v51 }
 0x208   : > { %v21934_v61 = vmov 0.0  }
 0x209   : > { %v3147_v15 = vcombine.low %v3091_v43, %v3107_v10  ;;  %v3179_v46 = vcombine.low %v3123_v13, %v3139_v45  ;;  %v3148_v53 = vcombine.high %v3091_v43, %v3107_v10  ;;  %v3180_v38 = vcombine.high %v3123_v13, %v3139_v45 }
 0x20b   : > { %v3155_v2 = vrot.slane %v3147_v15, %v18826_v59  ;;  %v3187_v31 = vrot.slane %v3179_v46, %v18826_v59  ;;  %v3162_v1 = vrot.slane %v3148_v53, %v18826_v59  ;;  %v3194_v27 = vrot.slane %v3180_v38, %v18826_v59 }
 0x20d   : > { %v19200_v55 = vcombine.low %v3155_v2, %v3187_v31  ;;  %v19202_v56 = vcombine.high %v3155_v2, %v3187_v31  ;;  %v19204_v7 = vcombine.low %v3162_v1, %v3194_v27  ;;  %v19206_v26 = vcombine.high %v3162_v1, %v3194_v27 }
 0x20f   : > { %21932 = vst [vmem:[#allocation41_spill] sm:$0xff] %v19200_v55  ;;  %21933 = vst [vmem:[#allocation42_spill] sm:$0xff] %v19202_v56  ;;  %17353 = vmatpush3.msra.mxu0 %v19200_v55  ;;  %17358 = vmatpush3.msra.mxu1 %v19202_v56 }
 0x210   : > { %17362 = vmatprep.subr.mxu0 %v21934_v61  ;;  %17367 = vmatprep.subr.mxu1 %v21934_v61 }
 0x296   : > { %v3428_v62 = vpop.f32.mrf.mxu0 }
 0x297   : > { %v19212_v43 = vmul.f32 0.5, %v3428_v62  ;;  %v3504_v10 = vpop.f32.mrf.mxu1 }
 0x298   : > { %v19214_v13 = vmul.f32 0.5, %v3504_v10  ;;  %v17276_v45 = vpop.f32.mrf.mxu0 }
 0x299   : > { %v17281_v15 = vpop.f32.mrf.mxu1  ;;  %v3973_v46 = vsel %vm3972_vm3, %v19212_v43, -inf }
 0x29a   : > { %v3976_v53 = vsel %vm3972_vm3, %v19214_v13, -inf  ;;  %3974 = vmax.xlane.f32.xlu1 %v3973_v46 }
 0x29b   : > { %3977 = vmax.xlane.f32.xlu0 %v3976_v53 }
 0x29c   : > { %v3580_v38 = vpop.f32.mrf.mxu0 }
 0x29d   : > { %v19220_v2 = vmul.f32 0.5, %v3580_v38 }
 0x29e   : > { %v3656_v31 = vpop.f32.mrf.mxu1  ;;  %v17286_v1 = vpop.f32.mrf.mxu0 }
 0x29f   : > { %v19222_v27 = vmul.f32 0.5, %v3656_v31  ;;  %v3979_v62 = vsel %vm3972_vm3, %v19220_v2, -inf }
 0x2a0   : > { %v17291_v10 = vpop.f32.mrf.mxu1  ;;  %3980 = vmax.xlane.f32.xlu1 %v3979_v62 }
 0x2a1   : > { %v3982_v45 = vsel %vm3972_vm3, %v19222_v27, -inf }
 0x2a2   : > { %3983 = vmax.xlane.f32.xlu0 %v3982_v45 }
 0x2a7   : > { %v3732_v15 = vpop.f32.mrf.mxu0 }
 0x2a8   : > { %v3808_v56 = vpop.f32.mrf.mxu1  ;;  %v19228_v46 = vmul.f32 0.5, %v3732_v15 }
 0x2a9   : > { %v19230_v53 = vmul.f32 0.5, %v3808_v56  ;;  %v17296_v38 = vpop.f32.mrf.mxu0 }
 0x2aa   : > { %v17301_v55 = vpop.f32.mrf.mxu1  ;;  %v3985_v31 = vsel %vm3972_vm3, %v19228_v46, -inf }
 0x2ab   : > { %v3988_v1 = vsel %vm3972_vm3, %v19230_v53, -inf  ;;  %3986 = vmax.xlane.f32.xlu1 %v3985_v31 }
 0x2ac   : > { %3989 = vmax.xlane.f32.xlu0 %v3988_v1 }
 0x2ad   : > { %v3960_v62 = vpop.f32.mrf.mxu1  ;;  %v3884_v10 = vpop.f32.mrf.mxu0 }
 0x2ae   : > { %v19236_v44 = vmul.f32 0.5, %v3960_v62  ;;  %v19238_v45 = vmul.f32 0.5, %v3884_v10 }
 0x2af   : > { %v17306_v15 = vpop.f32.mrf.mxu0  ;;  %v17311_v14 = vpop.f32.mrf.mxu1 }
 0x2b0   : > { %v3994_v56 = vsel %vm3972_vm3, %v19236_v44, -inf  ;;  %v3991_v55 = vsel %vm3972_vm3, %v19238_v45, -inf }
 0x2b1   : > { %v4203_v38 = vpop.f32.mrf.mxu1  ;;  %3995 = vmax.xlane.f32.xlu0 %v3994_v56  ;;  %3992 = vmax.xlane.f32.xlu1 %v3991_v55  ;;  %v4130_v63 = vpop.f32.mrf.mxu0 }
 0x2b2   : > { %v19244_v31 = vmul.f32 0.5, %v4203_v38  ;;  %v19246_v1 = vmul.f32 0.5, %v4130_v63 }
 0x2b3   : > { %v17316_v62 = vpop.f32.mrf.mxu0  ;;  %v17321_v21 = vpop.f32.mrf.mxu1 }
 0x2b4   : > { %v4656_v10 = vsel %vm3972_vm3, %v19244_v31, -inf  ;;  %v4653_v14 = vsel %vm3972_vm3, %v19246_v1, -inf }
 0x2b5   : > { %v4349_v15 = vpop.f32.mrf.mxu1  ;;  %4657 = vmax.xlane.f32.xlu1 %v4656_v10  ;;  %4654 = vmax.xlane.f32.xlu0 %v4653_v14  ;;  %v4276_v5 = vpop.f32.mrf.mxu0 }
 0x2b6   : > { %v19252_v4 = vmul.f32 0.5, %v4276_v5  ;;  %v19254_v38 = vmul.f32 0.5, %v4349_v15 }
 0x2b7   : > { %v17326_v56 = vpop.f32.mrf.mxu0  ;;  %v17331_v55 = vpop.f32.mrf.mxu1 }
 0x2b8   : > { %v4659_v63 = vsel %vm3972_vm3, %v19252_v4, -inf  ;;  %v4662_v10 = vsel %vm3972_vm3, %v19254_v38, -inf }
 0x2b9   : > { %v4495_v21 = vpop.f32.mrf.mxu1  ;;  %4660 = vmax.xlane.f32.xlu0 %v4659_v63  ;;  %v4422_v62 = vpop.f32.mrf.mxu0 }
 0x2ba   : > { %v19258_v60 = vmul.f32 0.5, %v4495_v21  ;;  %v19292_v21 = vpop.permute.xlu0 %2491 }
 0x2bb   : > { %v17336_v0 = vpop.f32.mrf.mxu0  ;;  %v17341_v9 = vpop.f32.mrf.mxu1 }
 0x2bc   : > { %v4668_v52 = vsel %vm3972_vm3, %v19258_v60, -inf  ;;  %v19276_v9 = vmul.f32 0.5, %v4422_v62 }
 0x2bd   : > { %4663 = vmax.xlane.f32.xlu0 %v4662_v10  ;;  %v4568_v5 = vpop.f32.mrf.mxu0  ;;  %v4641_v14 = vpop.f32.mrf.mxu1 }
 0x2be   : > { %v19262_v55 = vmul.f32 0.5, %v4641_v14  ;;  %v19278_v63 = vmul.f32 0.5, %v4568_v5  ;;  %v19296_v10 = vpop.permute.xlu0 %2497 }
 0x2bf   : > { %v17346_v56 = vpop.f32.mrf.mxu0  ;;  %v17351_v15 = vpop.f32.mrf.mxu1 }
 0x2c0   : > { %v4674_v0 = vsel %vm3972_vm3, %v19262_v55, -inf }
 0x2c1   : > { %4669 = vmax.xlane.f32.xlu0 %v4668_v52  ;;  %v4665_v52 = vsel %vm3972_vm3, %v19276_v9, -inf }
 0x2c5   : > { %4675 = vmax.xlane.f32.xlu0 %v4674_v0 }
 0x2c6   : > { %2479 = vrot.lane.b32.xlu1 %v18721_v30, %s18503_s28  ;;  %v4671_v30 = vsel %vm3972_vm3, %v19278_v63, -inf }
 0x2db   : > { %2481 = vrot.lane.b32.xlu0 %v18729_v32, %s18503_s28  ;;  %v19290_v32 = vpop.permute.xlu1 %2493 }
 0x2df   : > { %1613 = vrot.lane.b32.xlu0 %v18989_v48, %s18502_s23  ;;  %v19294_v62 = vpop.permute.xlu1 %2495 }
 0x2e3   : > { %1617 = vrot.lane.b32.xlu0 %v19017_v54, %s18502_s23 }
 0x2ea   : > { %4666 = vmax.xlane.f32.xlu1 %v4665_v52 }
 0x2ee   : > { %4672 = vmax.xlane.f32.xlu1 %v4671_v30 }
 0x2ff   : > { %1611 = vrot.lane.b32.xlu1 %v18766_v41, %s18502_s23 }
 0x303   : > { %1615 = vrot.lane.b32.xlu1 %v18977_v29, %s18502_s23 }
 0x307   : > { %1619 = vrot.lane.b32.xlu1 %v19046_v28, %s18502_s23 }
 0x323   : > { %v3975_v5 = vpop.xlane.xlu1 %3974 }
 0x324   : > { %v3978_v14 = vpop.xlane.xlu0 %3977  ;;  %v3997_v56 = vsub.f32 %v19212_v43, %v3975_v5 }
 0x325   : > { %v3998_v15 = vsub.f32 %v19214_v13, %v3978_v14 }
 0x326   : > { %v4005_v0 = vmul.f32 1.442695, %v3997_v56 }
 0x327   : > { %v4007_v52 = vmul.f32 1.442695, %v3998_v15 }
 0x328   : > { %18176 = vpow2.f32 %v4005_v0 }
 0x329   : > { %v3981_v30 = vpop.xlane.xlu1 %3980  ;;  %18178 = vpow2.f32 %v4007_v52 }
 0x32a   : > { %v3999_v22 = vsub.f32 %v19220_v2, %v3981_v30 }
 0x32b   : > { %v3984_v17 = vpop.xlane.xlu0 %3983 }
 0x32c   : > { %v4000_v37 = vsub.f32 %v19222_v27, %v3984_v17  ;;  %v4009_v40 = vmul.f32 1.442695, %v3999_v22 }
 0x32e   : > { %v4011_v36 = vmul.f32 1.442695, %v4000_v37  ;;  %18180 = vpow2.f32 %v4009_v40 }
 0x330   : > { %18182 = vpow2.f32 %v4011_v36 }
 0x334   : > { %v3987_v39 = vpop.xlane.xlu1 %3986 }
 0x335   : > { %v3990_v33 = vpop.xlane.xlu0 %3989  ;;  %v4001_v43 = vsub.f32 %v19228_v46, %v3987_v39  ;;  %v19303_v5 = vpop.eup %18176 }
 0x336   : > { %v4002_v13 = vsub.f32 %v19230_v53, %v3990_v33  ;;  %v19306_v14 = vpop.eup %18178  ;;  %v4021_v2 = vsel %vm3972_vm3, %v19303_v5, 0.0 }
 0x337   : > { %v4013_v56 = vmul.f32 1.442695, %v4001_v43  ;;  %4022 = vadd.xlane.f32.xlu0 %v4021_v2  ;;  %v4024_v37 = vsel %vm3972_vm3, %v19306_v14, 0.0 }
 0x338   : > { %v4015_v15 = vmul.f32 1.442695, %v4002_v13  ;;  %4025 = vadd.xlane.f32.xlu1 %v4024_v37 }
 0x339   : > { %18184 = vpow2.f32 %v4013_v56 }
 0x33a   : > { %18186 = vpow2.f32 %v4015_v15  ;;  %v3996_v36 = vpop.xlane.xlu0 %3995  ;;  %v3993_v39 = vpop.xlane.xlu1 %3992 }
 0x33b   : > { %v19312_v40 = vpop.eup %18180  ;;  %v4004_v33 = vsub.f32 %v19236_v44, %v3996_v36  ;;  %v4003_v17 = vsub.f32 %v19238_v45, %v3993_v39 }
 0x33c   : > { %v4027_v22 = vsel %vm3972_vm3, %v19312_v40, 0.0 }
 0x33d   : > { %v19318_v27 = vpop.eup %18182  ;;  %v4019_v46 = vmul.f32 1.442695, %v4004_v33  ;;  %v4017_v53 = vmul.f32 1.442695, %v4003_v17  ;;  %4028 = vadd.xlane.f32.xlu1 %v4027_v22 }
 0x33e   : > { %v4658_v0 = vpop.xlane.xlu1 %4657  ;;  %v4655_v52 = vpop.xlane.xlu0 %4654  ;;  %v4030_v30 = vsel %vm3972_vm3, %v19318_v27, 0.0 }
 0x33f   : > { %18188 = vpow2.f32 %v4019_v46  ;;  %v4678_v43 = vsub.f32 %v19244_v31, %v4658_v0  ;;  %v4677_v44 = vsub.f32 %v19246_v1, %v4655_v52  ;;  %4031 = vadd.xlane.f32.xlu0 %v4030_v30 }
 0x340   : > { %18190 = vpow2.f32 %v4017_v53 }
 0x341   : > { %v4687_v45 = vmul.f32 1.442695, %v4678_v43  ;;  %v4685_v13 = vmul.f32 1.442695, %v4677_v44 }
 0x342   : > { %v4661_v56 = vpop.xlane.xlu0 %4660 }
 0x343   : > { %18192 = vpow2.f32 %v4687_v45  ;;  %v4679_v2 = vsub.f32 %v19252_v4, %v4661_v56 }
 0x344   : > { %18194 = vpow2.f32 %v4685_v13 }
 0x345   : > { %v4689_v15 = vmul.f32 1.442695, %v4679_v2 }
 0x346   : > { %v19325_v37 = vpop.eup %18184  ;;  %v4664_v36 = vpop.xlane.xlu0 %4663 }
 0x347   : > { %v19327_v39 = vpop.eup %18186  ;;  %18196 = vpow2.f32 %v4689_v15  ;;  %v4680_v31 = vsub.f32 %v19254_v38, %v4664_v36  ;;  %v4033_v1 = vsel %vm3972_vm3, %v19325_v37, 0.0 }
 0x348   : > { %4034 = vadd.xlane.f32.xlu0 %v4033_v1  ;;  %v4036_v33 = vsel %vm3972_vm3, %v19327_v39, 0.0 }
 0x349   : > { %v4691_v17 = vmul.f32 1.442695, %v4680_v31  ;;  %4037 = vadd.xlane.f32.xlu1 %v4036_v33  ;;  %v19363_v31 = vpop.permute.xlu1 %2479 }
 0x34a   : > { %v4670_v4 = vpop.xlane.xlu0 %4669 }
 0x34b   : > { %18198 = vpow2.f32 %v4691_v17  ;;  %v4682_v22 = vsub.f32 %v19258_v60, %v4670_v4 }
 0x34c   : > { %v19335_v46 = vpop.eup %18188 }
 0x34d   : > { %v19337_v53 = vpop.eup %18190  ;;  %v4695_v0 = vmul.f32 1.442695, %v4682_v22  ;;  %v4042_v38 = vsel %vm3972_vm3, %v19335_v46, 0.0 }
 0x34e   : > { %4043 = vadd.xlane.f32.xlu0 %v4042_v38  ;;  %v4039_v52 = vsel %vm3972_vm3, %v19337_v53, 0.0  ;;  %v4676_v1 = vpop.xlane.xlu0 %4675 }
 0x34f   : > { %18200 = vpow2.f32 %v4695_v0  ;;  %4040 = vadd.xlane.f32.xlu1 %v4039_v52  ;;  %v4684_v33 = vsub.f32 %v19262_v55, %v4676_v1 }
 0x350   : > { %v19343_v30 = vpop.eup %18192 }
 0x351   : > { %v19345_v43 = vpop.eup %18194  ;;  %v4704_v60 = vsel %vm3972_vm3, %v19343_v30, 0.0  ;;  %v4699_v0 = vmul.f32 1.442695, %v4684_v33 }
 0x352   : > { %4705 = vadd.xlane.f32.xlu0 %v4704_v60  ;;  %v4701_v44 = vsel %vm3972_vm3, %v19345_v43, 0.0 }
 0x353   : > { %4702 = vadd.xlane.f32.xlu1 %v4701_v44 }
 0x354   : > { %v19351_v45 = vpop.eup %18196 }
 0x355   : > { %v4707_v13 = vsel %vm3972_vm3, %v19351_v45, 0.0 }
 0x356   : > { %4708 = vadd.xlane.f32.xlu0 %v4707_v13 }
 0x358   : > { %v19355_v56 = vpop.eup %18198 }
 0x359   : > { %v4710_v2 = vsel %vm3972_vm3, %v19355_v56, 0.0 }
 0x35a   : > { %4711 = vadd.xlane.f32.xlu1 %v4710_v2 }
 0x35c   : > { %v19359_v15 = vpop.eup %18200 }
 0x35d   : > { %v4716_v36 = vsel %vm3972_vm3, %v19359_v15, 0.0 }
 0x35e   : > { %4717 = vadd.xlane.f32.xlu1 %v4716_v36 }
 0x373   : > { %v4667_v17 = vpop.xlane.xlu1 %4666 }
 0x374   : > { %v4681_v4 = vsub.f32 %v19276_v9, %v4667_v17 }
 0x376   : > { %v4693_v22 = vmul.f32 1.442695, %v4681_v4 }
 0x377   : > { %v4673_v38 = vpop.xlane.xlu1 %4672 }
 0x378   : > { %18202 = vpow2.f32 %v4693_v22  ;;  %v4683_v52 = vsub.f32 %v19278_v63, %v4673_v38  ;;  %v19394_v63 = vpop.permute.xlu0 %2481 }
 0x379   : > { %18204 = vpow2.f32 %v4699_v0 }
 0x37a   : > { %v4697_v60 = vmul.f32 1.442695, %v4683_v52 }
 0x37b   : > { %v19396_v1 = vpop.permute.xlu1 %1611 }
 0x37c   : > { %18206 = vpow2.f32 %v4697_v60  ;;  %v19398_v33 = vpop.permute.xlu0 %1613 }
 0x37f   : > { %v19400_v17 = vpop.permute.xlu1 %1615 }
 0x380   : > { %v19402_v4 = vpop.permute.xlu0 %1617 }
 0x383   : > { %v19404_v22 = vpop.permute.xlu1 %1619 }
 0x385   : > { %v19368_v44 = vpop.eup %18202 }
 0x386   : > { %v4713_v13 = vsel %vm3972_vm3, %v19368_v44, 0.0  ;;  %v19372_v2 = vpop.eup %18204 }
 0x387   : > { %4714 = vadd.xlane.f32.xlu0 %v4713_v13  ;;  %v4722_v9 = vsel %vm3972_vm3, %v19372_v2, 0.0  ;;  %v2707_v13 = vcombine.low %v19292_v21, %v19294_v62 }
 0x389   : > { %v19374_v55 = vpop.eup %18206 }
 0x38a   : > { %v4719_v36 = vsel %vm3972_vm3, %v19374_v55, 0.0 }
 0x38b   : > { %4723 = vadd.xlane.f32.xlu0 %v4722_v9  ;;  %4720 = vadd.xlane.f32.xlu1 %v4719_v36  ;;  %v2708_v9 = vcombine.high %v19292_v21, %v19294_v62  ;;  %v2723_v36 = vcombine.low %v19290_v32, %v19296_v10 }
 0x38d   : > { %v2722_v35 = vrot.slane %v2708_v9, %v18816_v51  ;;  %v2731_v23 = vrot.slane %v2723_v36, %v18816_v51 }
 0x39c   : > { %1623 = vrot.lane.b32.xlu1 %v19078_v57, %s18502_s23 }
 0x3a0   : > { %2501 = vrot.lane.b32.xlu1 %v18989_v48, %s18503_s28 }
 0x3a1   : > { %1621 = vrot.lane.b32.xlu0 %v19009_v42, %s18502_s23 }
 0x3a4   : > { %2503 = vrot.lane.b32.xlu1 %v18977_v29, %s18503_s28  ;;  %v2715_v29 = vrot.slane %v2707_v13, %v18816_v51 }
 0x3a5   : > { %1625 = vrot.lane.b32.xlu0 %v19034_v20, %s18502_s23 }
 0x3a6   : > { %v2771_v20 = vcombine.low %v2715_v29, %v2731_v23  ;;  %v2772_v21 = vcombine.high %v2715_v29, %v2731_v23 }
 0x3a9   : > { %2499 = vrot.lane.b32.xlu0 %v18766_v41, %s18503_s28 }
 0x3ad   : > { %2505 = vrot.lane.b32.xlu0 %v19017_v54, %s18503_s28  ;;  %v2724_v54 = vcombine.high %v19290_v32, %v19296_v10  ;;  %v2779_v32 = vrot.slane %v2771_v20, %v18826_v59  ;;  %v2786_v10 = vrot.slane %v2772_v21, %v18826_v59 }
 0x3af   : > { %v2738_v34 = vrot.slane %v2724_v54, %v18816_v51  ;;  %v16581_v54 = vcombine.low %v2779_v32, %v2786_v10  ;;  %v16583_v29 = vcombine.high %v2779_v32, %v2786_v10 }
 0x3b1   : > { %v2787_v57 = vcombine.low %v2722_v35, %v2738_v34  ;;  %v2788_v28 = vcombine.high %v2722_v35, %v2738_v34  ;;  %v3098_v35 = vrot.slane %v16581_v54, %v18816_v51  ;;  %v3114_v20 = vrot.slane %v16583_v29, %v18816_v51 }
 0x3b3   : > { %v2795_v13 = vrot.slane %v2787_v57, %v18826_v59  ;;  %v2802_v9 = vrot.slane %v2788_v28, %v18826_v59 }
 0x3b5   : > { %v16585_v3 = vcombine.low %v2795_v13, %v2802_v9  ;;  %v16587_v24 = vcombine.high %v2795_v13, %v2802_v9 }
 0x3b7   : > { %v3130_v21 = vrot.slane %v16585_v3, %v18816_v51  ;;  %v3146_v57 = vrot.slane %v16587_v24, %v18816_v51 }
 0x3b9   : > { %v3195_v19 = vcombine.low %v3130_v21, %v3146_v57 }
 0x3bb   : > { %v3203_v9 = vrot.slane %v3195_v19, %v18826_v59  ;;  %v3164_v19 = vcombine.high %v3098_v35, %v3114_v20 }
 0x3c0   : > { %v19406_v0 = vpop.xlane.xlu0 %4022 }
 0x3c1   : > { %v19408_v38 = vpop.xlane.xlu1 %4025 }
 0x3c6   : > { %v19412_v60 = vpop.xlane.xlu1 %4028 }
 0x3c8   : > { %v19410_v52 = vpop.xlane.xlu0 %4031 }
 0x3d1   : > { %v19420_v48 = vpop.xlane.xlu0 %4034 }
 0x3d2   : > { %v19424_v41 = vpop.xlane.xlu1 %4037 }
 0x3d7   : > { %v19430_v62 = vpop.xlane.xlu0 %4043 }
 0x3d8   : > { %v19432_v42 = vpop.xlane.xlu1 %4040 }
 0x3db   : > { %v4706_v58 = vpop.xlane.xlu0 %4705 }
 0x3dc   : > { %18208 = vrcp.f32 %v4706_v58  ;;  %v4703_v36 = vpop.xlane.xlu1 %4702  ;;  %v3163_v58 = vcombine.low %v3098_v35, %v3114_v20  ;;  %v2555_v20 = vcombine.low %v19100_v6, %v19118_v16 }
 0x3dd   : > { %18210 = vrcp.f32 %v4703_v36 }
 0x3de   : > { %v3171_v13 = vrot.slane %v3163_v58, %v18826_v59 }
 0x3df   : > { %v4709_v23 = vpop.xlane.xlu0 %4708 }
 0x3e0   : > { %18212 = vrcp.f32 %v4709_v23  ;;  %v19465_v54 = vcombine.high %v3171_v13, %v3203_v9  ;;  %v19468_v23 = vrot.slane %v3164_v19, %v18826_v59 }
 0x3e3   : > { %v4712_v34 = vpop.xlane.xlu1 %4711 }
 0x3e4   : > { %18214 = vrcp.f32 %v4712_v34 }
 0x3e7   : > { %v4718_v28 = vpop.xlane.xlu1 %4717 }
 0x3e8   : > { %18216 = vrcp.f32 %v4718_v28  ;;  %v2540_v28 = vcombine.high %v19093_v8, %v19124_v25 }
 0x3e9   : > { %v18209_v36 = vpop.eup %18208 }
 0x3ea   : > { %v18211_v50 = vpop.eup %18210  ;;  %v4734_v32 = vmul.f32 %v18209_v36, %v19343_v30  ;;  %v3196_v30 = vcombine.high %v3130_v21, %v3146_v57  ;;  %v2539_v21 = vcombine.low %v19093_v8, %v19124_v25  ;;  %v2556_v57 = vcombine.high %v19100_v6, %v19118_v16 }
 0x3eb   : > { %v4733_v10 = vmul.f32 %v18211_v50, %v19345_v43  ;;  %v19456_v50 = vcombine.low %v3171_v13, %v3203_v9  ;;  %v2587_v6 = vcombine.low %v19148_v49, %v19394_v63  ;;  %v2588_v8 = vcombine.high %v19148_v49, %v19394_v63 }
 0x3ec   : > { %17360 = vmatmul.mubr.msk.f32.vlgmr.msra.gmra.mxu1 %vm3972_vm3, %v4734_v32  ;;  %v19471_v29 = vrot.slane %v3196_v30, %v18826_v59  ;;  %v2547_v58 = vrot.slane %v2539_v21, %v18816_v51  ;;  %v2570_v36 = vrot.slane %v2556_v57, %v18816_v51  ;;  %v2554_v32 = vrot.slane %v2540_v28, %v18816_v51 }
 0x3ed   : > { %v18213_v3 = vpop.eup %18212  ;;  %17355 = vmatmul.mubr.msk.f32.vlgmr.msra.gmra.mxu0 %vm3972_vm3, %v4733_v10  ;;  %17368 = vmatpush3.msra.mxu1 %v19206_v26  ;;  %v2571_v9 = vcombine.low %v19142_v47, %v19363_v31  ;;  %v2602_v19 = vrot.slane %v2588_v8, %v18816_v51  ;;  %v1923_v8 = vcombine.low %v19396_v1, %v19400_v17 }
 0x3ee   : > { %17363 = vmatpush3.msra.mxu0 %v19204_v7  ;;  %17364 = vmatprep.mubr.msk.f32.mxu0 %vm18494_vm0, %v21934_v61  ;;  %v4735_v24 = vmul.f32 %v18213_v3, %v19351_v45  ;;  %v19481_v35 = vcombine.high %v19468_v23, %v19471_v29  ;;  %v2619_v10 = vcombine.low %v2554_v32, %v2570_v36 }
 0x3ef   : > { %17372 = vmatprep.subr.mxu0 %v21934_v61  ;;  %17369 = vmatprep.mubr.msk.f32.mxu1 %vm18494_vm0, %v21934_v61  ;;  %v2620_v13 = vcombine.high %v2554_v32, %v2570_v36  ;;  %v2572_v3 = vcombine.high %v19142_v47, %v19363_v31 }
 0x3f0   : > { %17377 = vmatprep.subr.mxu1 %v21934_v61  ;;  %v2627_v49 = vrot.slane %v2619_v10, %v18826_v59 }
 0x3f1   : > { %17365 = vmatmul.mubr.msk.f32.vlgmr.msra.gmra.mxu0 %vm3972_vm3, %v4735_v24  ;;  %v18215_v43 = vpop.eup %18214  ;;  %v2595_v24 = vrot.slane %v2587_v6, %v18816_v51  ;;  %v2634_v63 = vrot.slane %v2620_v13, %v18826_v59 }
 0x3f2   : > { %17373 = vmatpush3.msra.mxu0 %v19456_v50  ;;  %17374 = vmatprep.mubr.msk.f32.mxu0 %vm18494_vm0, %v21934_v61  ;;  %v4736_v45 = vmul.f32 %v18215_v43, %v19355_v56 }
 0x3f3   : > { %17382 = vmatprep.subr.mxu0 %v21934_v61  ;;  %v16576_v28 = vcombine.low %v2627_v49, %v2634_v63 }
 0x3f4   : > { %17370 = vmatmul.mubr.msk.f32.vlgmr.msra.gmra.mxu1 %vm3972_vm3, %v4736_v45  ;;  %v2579_v45 = vrot.slane %v2571_v9, %v18816_v51  ;;  %v1939_v9 = vcombine.low %v19398_v33, %v19402_v4 }
 0x3f5   : > { %v18217_v34 = vpop.eup %18216  ;;  %17378 = vmatpush3.msra.mxu1 %v19465_v54  ;;  %17379 = vmatprep.mubr.msk.f32.mxu1 %vm18494_vm0, %v21934_v61  ;;  %v2987_v10 = vrot.slane %v16576_v28, %v18816_v51 }
 0x3f6   : > { %17387 = vmatprep.subr.mxu1 %v21934_v61  ;;  %v4738_v56 = vmul.f32 %v18217_v34, %v19359_v15  ;;  %v2563_v15 = vrot.slane %v2555_v20, %v18816_v51  ;;  %v2586_v34 = vrot.slane %v2572_v3, %v18816_v51  ;;  %v2636_v20 = vcombine.high %v2579_v45, %v2595_v24 }
 0x3f7   : > { %v1924_v3 = vcombine.high %v19396_v1, %v19400_v17 }
 0x3f8   : > { %17380 = vmatmul.mubr.msk.f32.vlgmr.msra.gmra.mxu1 %vm3972_vm3, %v4738_v56  ;;  %v2603_v16 = vcombine.low %v2547_v58, %v2563_v15  ;;  %v2604_v25 = vcombine.high %v2547_v58, %v2563_v15  ;;  %v2635_v56 = vcombine.low %v2579_v45, %v2595_v24  ;;  %v2651_v21 = vcombine.low %v2586_v34, %v2602_v19 }
 0x3f9   : > { %17388 = vmatpush3.msra.mxu1 %v19481_v35  ;;  %17389 = vmatprep.mubr.msk.f32.mxu1 %vm18494_vm0, %v21934_v61  ;;  %v2652_v47 = vcombine.high %v2586_v34, %v2602_v19  ;;  %v16578_v15 = vcombine.high %v2627_v49, %v2634_v63  ;;  %v2650_v36 = vrot.slane %v2636_v20, %v18826_v59 }
 0x3fa   : > { %17397 = vmatprep.subr.mxu1 %v21934_v61  ;;  %v2611_v30 = vrot.slane %v2603_v16, %v18826_v59  ;;  %v2618_v43 = vrot.slane %v2604_v25, %v18826_v59  ;;  %v2643_v58 = vrot.slane %v2635_v56, %v18826_v59  ;;  %v2659_v32 = vrot.slane %v2651_v21, %v18826_v59 }
 0x3fb   : > { %v2666_v6 = vrot.slane %v2652_v47, %v18826_v59  ;;  %v3003_v13 = vrot.slane %v16578_v15, %v18816_v51  ;;  %v1940_v49 = vcombine.high %v19398_v33, %v19402_v4  ;;  %v1931_v63 = vrot.slane %v1923_v8, %v18816_v51 }
 0x3fc   : > { %v16572_v31 = vcombine.low %v2611_v30, %v2618_v43  ;;  %v16574_v57 = vcombine.high %v2611_v30, %v2618_v43  ;;  %v16573_v24 = vcombine.low %v2643_v58, %v2650_v36  ;;  %v16575_v19 = vcombine.high %v2643_v58, %v2650_v36 }
 0x3fd   : > { %v16577_v30 = vcombine.low %v2659_v32, %v2666_v6  ;;  %v16579_v43 = vcombine.high %v2659_v32, %v2666_v6  ;;  %v3043_v56 = vcombine.low %v2987_v10, %v3003_v13  ;;  %v1947_v20 = vrot.slane %v1939_v9, %v18816_v51 }
 0x3fe   : > { %v2955_v16 = vrot.slane %v16572_v31, %v18816_v51  ;;  %v2971_v25 = vrot.slane %v16574_v57, %v18816_v51  ;;  %v1938_v21 = vrot.slane %v1924_v3, %v18816_v51  ;;  %v2962_v47 = vrot.slane %v16573_v24, %v18816_v51 }
 0x3ff   : > { %v2978_v1 = vrot.slane %v16575_v19, %v18816_v51  ;;  %v2994_v17 = vrot.slane %v16577_v30, %v18816_v51  ;;  %v1954_v31 = vrot.slane %v1940_v49, %v18816_v51  ;;  %v1987_v57 = vcombine.low %v1931_v63, %v1947_v20 }
 0x400   : > { %v3011_v34 = vcombine.low %v2955_v16, %v2971_v25  ;;  %v1988_v33 = vcombine.high %v1931_v63, %v1947_v20  ;;  %v3010_v28 = vrot.slane %v16579_v43, %v18816_v51  ;;  %v3051_v36 = vrot.slane %v3043_v56, %v18826_v59 }
 0x401   : > { %v3012_v32 = vcombine.high %v2955_v16, %v2971_v25  ;;  %v2003_v6 = vcombine.low %v1938_v21, %v1954_v31  ;;  %v2004_v8 = vcombine.high %v1938_v21, %v1954_v31  ;;  %v3044_v9 = vcombine.high %v2987_v10, %v3003_v13 }
 0x402   : > { %v3019_v58 = vrot.slane %v3011_v34, %v18826_v59  ;;  %v3027_v3 = vcombine.low %v2962_v47, %v2978_v1  ;;  %v1995_v24 = vrot.slane %v1987_v57, %v18826_v59  ;;  %v2002_v19 = vrot.slane %v1988_v33, %v18826_v59 }
 0x403   : > { %v3059_v43 = vcombine.low %v2994_v17, %v3010_v28  ;;  %v2011_v16 = vrot.slane %v2003_v6, %v18826_v59  ;;  %v2018_v25 = vrot.slane %v2004_v8, %v18826_v59  ;;  %v3026_v10 = vrot.slane %v3012_v32, %v18826_v59 }
 0x404   : > { %v19546_v63 = vcombine.low %v3019_v58, %v3051_v36  ;;  %v3058_v13 = vrot.slane %v3044_v9, %v18826_v59  ;;  %v16564_v34 = vcombine.low %v1995_v24, %v2002_v19  ;;  %v3035_v20 = vrot.slane %v3027_v3, %v18826_v59 }
 0x405   : > { %v3067_v21 = vrot.slane %v3059_v43, %v18826_v59  ;;  %v3060_v31 = vcombine.high %v2994_v17, %v3010_v28  ;;  %v16566_v57 = vcombine.high %v1995_v24, %v2002_v19  ;;  %v16568_v6 = vcombine.low %v2011_v16, %v2018_v25 }
 0x406   : > { %v19580_v9 = vrot.slane %v16564_v34, %v18816_v51 }
 0x407   : > { %v19589_v19 = vrot.slane %v16568_v6, %v18816_v51  ;;  %v19598_v43 = vcombine.high %v3035_v20, %v3067_v21 }
 0x410   : > { %v4715_v45 = vpop.xlane.xlu0 %4714 }
 0x411   : > { %18218 = vrcp.f32 %v4715_v45  ;;  %v19557_v45 = vcombine.high %v3019_v58, %v3051_v36  ;;  %v19569_v58 = vcombine.high %v3026_v10, %v3058_v13  ;;  %v19571_v36 = vcombine.low %v3035_v20, %v3067_v21 }
 0x414   : > { %v4724_v4 = vpop.xlane.xlu0 %4723  ;;  %v4721_v15 = vpop.xlane.xlu1 %4720 }
 0x415   : > { %18220 = vrcp.f32 %v4724_v4 }
 0x416   : > { %18222 = vrcp.f32 %v4721_v15 }
 0x417   : > { %18224 = vrcp.f32 %v19406_v0  ;;  %v19555_v0 = vcombine.low %v19468_v23, %v19471_v29  ;;  %v16570_v23 = vcombine.high %v2011_v16, %v2018_v25  ;;  %v19563_v29 = vcombine.low %v3026_v10, %v3058_v13 }
 0x418   : > { %v1622_v30 = vpop.permute.xlu0 %1621  ;;  %18226 = vrcp.f32 %v19408_v38  ;;  %v1624_v49 = vpop.permute.xlu1 %1623  ;;  %v3028_v38 = vcombine.high %v2962_v47, %v2978_v1 }
 0x419   : > { %18228 = vrcp.f32 %v19412_v60  ;;  %v1955_v33 = vcombine.low %v19404_v22, %v1624_v49  ;;  %v1956_v47 = vcombine.high %v19404_v22, %v1624_v49 }
 0x41a   : > { %18230 = vrcp.f32 %v19410_v52  ;;  %v19574_v8 = vrot.slane %v3028_v38, %v18826_v59  ;;  %v19577_v52 = vrot.slane %v3060_v31, %v18826_v59 }
 0x41b   : > { %18232 = vrcp.f32 %v19420_v48  ;;  %v19583_v48 = vrot.slane %v16566_v57, %v18816_v51  ;;  %v1963_v22 = vrot.slane %v1955_v33, %v18816_v51  ;;  %v1970_v16 = vrot.slane %v1956_v47, %v18816_v51 }
 0x41c   : > { %v1626_v56 = vpop.permute.xlu0 %1625  ;;  %v2502_v60 = vpop.permute.xlu1 %2501  ;;  %18234 = vrcp.f32 %v19424_v41  ;;  %v19606_v31 = vcombine.low %v19574_v8, %v19577_v52 }
 0x41d   : > { %v1971_v4 = vcombine.low %v1622_v30, %v1626_v56  ;;  %v1972_v15 = vcombine.high %v1622_v30, %v1626_v56  ;;  %v19592_v30 = vrot.slane %v16570_v23, %v18816_v51  ;;  %v2395_v21 = vcombine.low %v19580_v9, %v19583_v48 }
 0x41e   : > { %v18219_v32 = vpop.eup %18218  ;;  %v2396_v57 = vcombine.high %v19580_v9, %v19583_v48  ;;  %18236 = vrcp.f32 %v19432_v42 }
 0x41f   : > { %v1979_v1 = vrot.slane %v1971_v4, %v18816_v51  ;;  %v4737_v17 = vmul.f32 %v18219_v32, %v19368_v44  ;;  %v1986_v44 = vrot.slane %v1972_v15, %v18816_v51  ;;  %v2427_v32 = vcombine.low %v19589_v19, %v19592_v30 }
 0x420   : > { %v2500_v28 = vpop.permute.xlu0 %2499  ;;  %v2504_v3 = vpop.permute.xlu1 %2503  ;;  %18238 = vrcp.f32 %v19430_v62 }
 0x421   : > { %17375 = vmatmul.mubr.msk.f32.vlgmr.msra.gmra.mxu0 %vm3972_vm3, %v4737_v17  ;;  %v2019_v25 = vcombine.low %v1963_v22, %v1979_v1  ;;  %v2020_v10 = vcombine.high %v1963_v22, %v1979_v1  ;;  %v2811_v13 = vcombine.low %v2500_v28, %v2504_v3  ;;  %v2812_v38 = vcombine.high %v2500_v28, %v2504_v3 }
 0x422   : > { %v18221_v24 = vpop.eup %18220  ;;  %17383 = vmatpush3.msra.mxu0 %v19555_v0  ;;  %17384 = vmatprep.mubr.msk.f32.mxu0 %vm18494_vm0, %v21934_v61  ;;  %v2035_v33 = vcombine.low %v1970_v16, %v1986_v44  ;;  %v2036_v4 = vcombine.high %v1970_v16, %v1986_v44 }
 0x423   : > { %v18223_v49 = vpop.eup %18222  ;;  %17392 = vmatprep.subr.mxu0 %v21934_v61  ;;  %v4740_v41 = vmul.f32 %v18221_v24, %v19372_v2  ;;  %v2027_v6 = vrot.slane %v2019_v25, %v18826_v59  ;;  %v2034_v23 = vrot.slane %v2020_v10, %v18826_v59  ;;  %v2819_v47 = vrot.slane %v2811_v13, %v18816_v51 }
 0x424   : > { %v2506_v34 = vpop.permute.xlu0 %2505  ;;  %v4739_v56 = vmul.f32 %v18223_v49, %v19374_v55  ;;  %v18225_v20 = vpop.eup %18224  ;;  %v2826_v17 = vrot.slane %v2812_v38, %v18816_v51  ;;  %v2043_v62 = vrot.slane %v2035_v33, %v18826_v59  ;;  %v2050_v28 = vrot.slane %v2036_v4, %v18826_v59 }
 0x425   : > { %v18227_v15 = vpop.eup %18226  ;;  %v2827_v2 = vcombine.low %v2502_v60, %v2506_v34  ;;  %v2828_v55 = vcombine.high %v2502_v60, %v2506_v34  ;;  %17390 = vmatmul.mubr.msk.f32.vlgmr.msra.gmra.mxu1 %vm3972_vm3, %v4740_v41  ;;  %v4053_v22 = vmul.f32 %v18225_v20, %v19303_v5  ;;  %v2428_v10 = vcombine.high %v19589_v19, %v19592_v30 }
 0x426   : > { %17385 = vmatmul.mubr.msk.f32.vlgmr.msra.gmra.mxu0 %vm3972_vm3, %v4739_v56  ;;  %v18229_v1 = vpop.eup %18228  ;;  %17398 = vmatpush3.msra.mxu1 %v19557_v45  ;;  %v4054_v44 = vmul.f32 %v18227_v15, %v19306_v14  ;;  %v16565_v13 = vcombine.low %v2027_v6, %v2034_v23  ;;  %v16567_v20 = vcombine.high %v2027_v6, %v2034_v23 }
 0x427   : > { %17393 = vmatpush3.msra.mxu0 %v19546_v63  ;;  %v2835_v42 = vrot.slane %v2827_v2, %v18816_v51  ;;  %v2842_v60 = vrot.slane %v2828_v55, %v18816_v51  ;;  %17394 = vmatprep.mubr.msk.f32.mxu0 %vm18494_vm0, %v21934_v61  ;;  %v18231_v25 = vpop.eup %18230  ;;  %v4055_v38 = vmul.f32 %v18229_v1, %v19312_v40 }
 0x428   : > { %17399 = vmatprep.mubr.msk.f32.mxu1 %vm18494_vm0, %v21934_v61  ;;  %17402 = vmatprep.subr.mxu0 %v21934_v61  ;;  %v18233_v5 = vpop.eup %18232  ;;  %v16569_v33 = vcombine.low %v2043_v62, %v2050_v28  ;;  %v16571_v4 = vcombine.high %v2043_v62, %v2050_v28  ;;  %v4056_v6 = vmul.f32 %v18231_v25, %v19318_v27 }
 0x429   : > { %v2875_v3 = vcombine.low %v2819_v47, %v2835_v42  ;;  %v2876_v24 = vcombine.high %v2819_v47, %v2835_v42  ;;  %v2891_v49 = vcombine.low %v2826_v17, %v2842_v60  ;;  %v2892_v16 = vcombine.high %v2826_v17, %v2842_v60  ;;  %17407 = vmatprep.subr.mxu1 %v21934_v61  ;;  %v18235_v47 = vpop.eup %18234 }
 0x42a   : > { %17395 = vmatmul.mubr.msk.f32.vlgmr.msra.gmra.mxu0 %vm3972_vm3, %v4053_v22  ;;  %17400 = vmatmul.mubr.msk.f32.vlgmr.msra.gmra.mxu1 %vm3972_vm3, %v4054_v44  ;;  %v4057_v23 = vmul.f32 %v18233_v5, %v19325_v37  ;;  %v2403_v1 = vrot.slane %v2395_v21, %v18826_v59  ;;  %v2346_v62 = vrot.slane %v16565_v13, %v18816_v51 }
 0x42b   : > { %v2883_v14 = vrot.slane %v2875_v3, %v18826_v59  ;;  %v2890_v34 = vrot.slane %v2876_v24, %v18826_v59  ;;  %v2899_v56 = vrot.slane %v2891_v49, %v18826_v59  ;;  %v2906_v41 = vrot.slane %v2892_v16, %v18826_v59  ;;  %17403 = vmatpush3.msra.mxu0 %v19563_v29  ;;  %v18237_v44 = vpop.eup %18236 }
 0x42c   : > { %17408 = vmatpush3.msra.mxu1 %v19569_v58  ;;  %17404 = vmatprep.mubr.msk.f32.mxu0 %vm18494_vm0, %v21934_v61  ;;  %v2362_v27 = vrot.slane %v16567_v20, %v18816_v51  ;;  %v2378_v21 = vrot.slane %v16569_v33, %v18816_v51  ;;  %v2394_v28 = vrot.slane %v16571_v4, %v18816_v51 }
 0x42d   : > { %v16588_v15 = vcombine.low %v2883_v14, %v2890_v34  ;;  %v16590_v40 = vcombine.high %v2883_v14, %v2890_v34  ;;  %v16592_v2 = vcombine.low %v2899_v56, %v2906_v41  ;;  %v16594_v55 = vcombine.high %v2899_v56, %v2906_v41  ;;  %17409 = vmatprep.mubr.msk.f32.mxu1 %vm18494_vm0, %v21934_v61  ;;  %v18239_v16 = vpop.eup %18238 }
 0x42e   : > { %17412 = vmatprep.subr.mxu0 %v21934_v61  ;;  %17417 = vmatprep.subr.mxu1 %v21934_v61  ;;  %v4058_v3 = vmul.f32 %v18235_v47, %v19327_v39  ;;  %v2435_v24 = vrot.slane %v2427_v32, %v18826_v59  ;;  %v19694_v25 = vcombine.high %v19574_v8, %v19577_v52 }
 0x42f   : > { %17405 = vmatmul.mubr.msk.f32.vlgmr.msra.gmra.mxu0 %vm3972_vm3, %v4055_v38  ;;  %v19658_v17 = vrot.slane %v16588_v15, %v18816_v51  ;;  %v19661_v42 = vrot.slane %v16590_v40, %v18816_v51  ;;  %v19664_v60 = vrot.slane %v16592_v2, %v18816_v51  ;;  %17410 = vmatmul.mubr.msk.f32.vlgmr.msra.gmra.mxu1 %vm3972_vm3, %v4056_v6  ;;  %v21940_v15 = vld [vmem:[#allocation15_spill] sm:$0xff]  ;;  %v21944_v6 = vld [vmem:[#allocation26_spill] sm:$0xff] }
 0x430   : > { %17413 = vmatpush3.msra.mxu0 %v19571_v36  ;;  %v19671_v37 = vrot.slane %v16594_v55, %v18816_v51  ;;  %17418 = vmatpush3.msra.mxu1 %v19598_v43  ;;  %v2410_v39 = vrot.slane %v2396_v57, %v18826_v59  ;;  %v2442_v19 = vrot.slane %v2428_v10, %v18826_v59  ;;  %v21942_v55 = vld [vmem:[#allocation24_spill] sm:$0xff] }
 0x431   : > { %17414 = vmatprep.mubr.msk.f32.mxu0 %vm18494_vm0, %v21934_v61  ;;  %v3284_v22 = vcombine.high %v19658_v17, %v19661_v42  ;;  %17419 = vmatprep.mubr.msk.f32.mxu1 %vm18494_vm0, %v21934_v61  ;;  %v2411_v32 = vcombine.low %v2346_v62, %v2362_v27  ;;  %v2443_v38 = vcombine.low %v2378_v21, %v2394_v28 }
 0x432   : > { %17422 = vmatprep.subr.mxu0 %v21934_v61  ;;  %v3316_v49 = vcombine.high %v19664_v60, %v19671_v37  ;;  %17427 = vmatprep.subr.mxu1 %v21934_v61  ;;  %v4059_v8 = vmul.f32 %v18237_v44, %v19337_v53  ;;  %v4060_v52 = vmul.f32 %v18239_v16, %v19335_v46 }
 0x433   : > { %17415 = vmatmul.mubr.msk.f32.vlgmr.msra.gmra.mxu0 %vm3972_vm3, %v4057_v23  ;;  %v3298_v13 = vrot.slane %v3284_v22, %v18826_v59  ;;  %17420 = vmatmul.mubr.msk.f32.vlgmr.msra.gmra.mxu1 %vm3972_vm3, %v4058_v3  ;;  %v19713_v9 = vcombine.low %v2403_v1, %v2435_v24  ;;  %v19719_v57 = vcombine.high %v2403_v1, %v2435_v24  ;;  %v21946_v1 = vld [vmem:[#allocation30_spill] sm:$0xff] }
 0x434   : > { %17423 = vmatpush3.msra.mxu0 %v19606_v31  ;;  %v3330_v30 = vrot.slane %v3316_v49, %v18826_v59  ;;  %17428 = vmatpush3.msra.mxu1 %v19694_v25  ;;  %v2412_v53 = vcombine.high %v2346_v62, %v2362_v27  ;;  %v2419_v46 = vrot.slane %v2411_v32, %v18826_v59 }
 0x435   : > { %17424 = vmatprep.mubr.msk.f32.mxu0 %vm18494_vm0, %v21934_v61  ;;  %17429 = vmatprep.mubr.msk.f32.mxu1 %vm18494_vm0, %v21934_v61  ;;  %v2451_v5 = vrot.slane %v2443_v38, %v18826_v59  ;;  %v2444_v14 = vcombine.high %v2378_v21, %v2394_v28  ;;  %v19735_v34 = vcombine.low %v2410_v39, %v2442_v19 }
 0x436   : > { %17432 = vmatprep.subr.mxu0 %v21934_v61  ;;  %v19715_v48 = vcombine.low %v3298_v13, %v3330_v30  ;;  %17437 = vmatprep.subr.mxu1 %v21934_v61  ;;  %v19721_v10 = vcombine.high %v3298_v13, %v3330_v30  ;;  %v19740_v56 = vcombine.high %v2410_v39, %v2442_v19 }
 0x437   : > { %17425 = vmatmul.mubr.msk.f32.vlgmr.msra.gmra.mxu0 %vm3972_vm3, %v4059_v8  ;;  %17430 = vmatmul.mubr.msk.f32.vlgmr.msra.gmra.mxu1 %vm3972_vm3, %v4060_v52  ;;  %21936 = vst [vmem:[#allocation44_spill] sm:$0xff] %v19735_v34  ;;  %v19750_v41 = vcombine.low %v2419_v46, %v2451_v5  ;;  %v2426_v20 = vrot.slane %v2412_v53, %v18826_v59 }
 0x438   : > { %21935 = vst [vmem:[#allocation43_spill] sm:$0xff] %v19715_v48  ;;  %17433 = vmatpush3.xpose.msk.msra.mxu0 %vm3355_vm2, %v19713_v9  ;;  %17438 = vmatpush3.xpose.msk.msra.mxu1 %vm3355_vm2, %v19719_v57  ;;  %21937 = vst [vmem:[#allocation45_spill] sm:$0xff] %v19740_v56  ;;  %v3315_v33 = vcombine.low %v19664_v60, %v19671_v37  ;;  %v19764_v4 = vcombine.high %v2419_v46, %v2451_v5 }
 0x439   : > { %17434 = vmatprep.mubr.msk.f32.mxu0 %vm18494_vm0, %v21934_v61  ;;  %17439 = vmatprep.mubr.msk.f32.mxu1 %vm18494_vm0, %v21934_v61  ;;  %21938 = vst [vmem:[#allocation46_spill] sm:$0xff] %v19750_v41 }
 0x43a   : > { %17442 = vmatprep.subr.mxu0 %v21934_v61  ;;  %17447 = vmatprep.subr.mxu1 %v21934_v61  ;;  %21939 = vst [vmem:[#allocation47_spill] sm:$0xff] %v19764_v4  ;;  %v3323_v2 = vrot.slane %v3315_v33, %v18826_v59 }
 0x43b   : > { %17435 = vmatmul.mubr.msk.f32.vlgmr.msra.gmra.mxu0 %vm3355_vm2, %v18870_v11  ;;  %17440 = vmatmul.mubr.msk.f32.vlgmr.msra.gmra.mxu1 %vm3355_vm2, %v18872_v12  ;;  %v2458_v11 = vrot.slane %v2444_v14, %v18826_v59  ;;  %v3283_v12 = vcombine.low %v19658_v17, %v19661_v42  ;;  %v21948_v42 = vld [vmem:[#allocation32_spill] sm:$0xff] }
 0x43c   : > { %17443 = vmatpush3.xpose.msk.msra.mxu0 %vm3355_vm2, %v19735_v34  ;;  %17448 = vmatpush3.xpose.msk.msra.mxu1 %vm3355_vm2, %v19740_v56 }
 0x43d   : > { %17444 = vmatprep.mubr.msk.f32.mxu0 %vm18494_vm0, %v21934_v61  ;;  %17449 = vmatprep.mubr.msk.f32.mxu1 %vm18494_vm0, %v21934_v61  ;;  %v3291_v40 = vrot.slane %v3283_v12, %v18826_v59  ;;  %v19784_v47 = vcombine.high %v2426_v20, %v2458_v11 }
 0x43e   : > { %17452 = vmatprep.subr.mxu0 %v21934_v61  ;;  %17457 = vmatprep.subr.mxu1 %v21934_v61 }
 0x43f   : > { %17445 = vmatmul.mubr.msk.f32.vlgmr.msra.gmra.mxu0 %vm3355_vm2, %v18880_v18  ;;  %17450 = vmatmul.mubr.msk.f32.vlgmr.msra.gmra.mxu1 %vm3355_vm2, %v21940_v15  ;;  %v19777_v18 = vcombine.low %v2426_v20, %v2458_v11  ;;  %21943 = vst [vmem:[#allocation24_spill] sm:$0xff] %v19784_v47  ;;  %v19797_v23 = vcombine.low %v3291_v40, %v3323_v2 }
 0x440   : > { %17453 = vmatpush3.xpose.msk.msra.mxu0 %vm3355_vm2, %v19750_v41  ;;  %17458 = vmatpush3.xpose.msk.msra.mxu1 %vm3355_vm2, %v19764_v4  ;;  %v19802_v17 = vcombine.high %v3291_v40, %v3323_v2  ;;  %v21960_v4 = vld [vmem:[#allocation7_spill] sm:$0xff] }
 0x441   : > { %17454 = vmatprep.mubr.msk.f32.mxu0 %vm18494_vm0, %v21934_v61  ;;  %17459 = vmatprep.mubr.msk.f32.mxu1 %vm18494_vm0, %v21934_v61  ;;  %21941 = vst [vmem:[#allocation15_spill] sm:$0xff] %v19777_v18  ;;  %21945 = vst [vmem:[#allocation26_spill] sm:$0xff] %v19797_v23 }
 0x442   : > { %17462 = vmatprep.subr.mxu0 %v21934_v61  ;;  %17467 = vmatprep.subr.mxu1 %v21934_v61  ;;  %21947 = vst [vmem:[#allocation30_spill] sm:$0xff] %v19802_v17 }
 0x443   : > { %17455 = vmatmul.mubr.msk.f32.vlgmr.msra.gmra.mxu0 %vm3355_vm2, %v21942_v55  ;;  %17460 = vmatmul.mubr.msk.f32.vlgmr.msra.gmra.mxu1 %vm3355_vm2, %v21944_v6 }
 0x444   : > { %17463 = vmatpush3.xpose.msk.msra.mxu0 %vm3355_vm2, %v19777_v18  ;;  %17468 = vmatpush3.xpose.msk.msra.mxu1 %vm3355_vm2, %v19784_v47 }
 0x445   : > { %17464 = vmatprep.mubr.msk.f32.mxu0 %vm18494_vm0, %v21934_v61  ;;  %17469 = vmatprep.mubr.msk.f32.mxu1 %vm18494_vm0, %v21934_v61 }
 0x446   : > { %17472 = vmatprep.subr.mxu0 %v21934_v61  ;;  %17477 = vmatprep.subr.mxu1 %v21934_v61 }
 0x447   : > { %17465 = vmatmul.mubr.msk.f32.vlgmr.msra.gmra.mxu0 %vm3355_vm2, %v21946_v1  ;;  %17470 = vmatmul.mubr.msk.f32.vlgmr.msra.gmra.mxu1 %vm3355_vm2, %v21948_v42 }
 0x448   : > { %17473 = vmatpush3.msra.mxu0 %v19797_v23  ;;  %17478 = vmatpush3.msra.mxu1 %v19802_v17 }
 0x449   : > { %17474 = vmatprep.mubr.msk.f32.mxu0 %vm18494_vm0, %v21934_v61  ;;  %17479 = vmatprep.mubr.msk.f32.mxu1 %vm18494_vm0, %v21934_v61 }
 0x44a   : > { %17482 = vmatprep.subr.mxu0 %v21934_v61  ;;  %17487 = vmatprep.subr.mxu1 %v21934_v61 }
 0x4ac   : > { %v4883_v60 = vpop.f32.mrf.mxu1 }
 0x4ad   : > { %v4810_v62 = vpop.f32.mrf.mxu0 }
 0x4ae   : > { %v17361_v27 = vpop.f32.mrf.mxu1 }
 0x4af   : > { %v17356_v37 = vpop.f32.mrf.mxu0 }
 0x4b1   : > { %v4956_v21 = vpop.f32.mrf.mxu0 }
 0x4b3   : > { %v17366_v28 = vpop.f32.mrf.mxu0 }
 0x4b4   : > { %v5029_v22 = vpop.f32.mrf.mxu1 }
 0x4b6   : > { %v17371_v44 = vpop.f32.mrf.mxu1 }
 0x4b8   : > { %v5175_v3 = vpop.f32.mrf.mxu1 }
 0x4ba   : > { %v17381_v24 = vpop.f32.mrf.mxu1 }
 0x4e1   : > { %v5102_v49 = vpop.f32.mrf.mxu0 }
 0x4e3   : > { %v17376_v16 = vpop.f32.mrf.mxu0 }
 0x4e5   : > { %v5321_v39 = vpop.f32.mrf.mxu1 }
 0x4e6   : > { %v5248_v13 = vpop.f32.mrf.mxu0 }
 0x4e7   : > { %v17391_v30 = vpop.f32.mrf.mxu1 }
 0x4e8   : > { %v17386_v19 = vpop.f32.mrf.mxu0 }
 0x4ea   : > { %v5394_v32 = vpop.f32.mrf.mxu0  ;;  %v5467_v8 = vpop.f32.mrf.mxu1 }
 0x4eb   : > { %v19814_v38 = vadd.f32 %v5394_v32, %v4810_v62  ;;  %v19816_v52 = vadd.f32 %v5467_v8, %v4883_v60 }
 0x4ec   : > { %v17396_v53 = vpop.f32.mrf.mxu0  ;;  %v17401_v46 = vpop.f32.mrf.mxu1 }
 0x4ef   : > { %v5540_v5 = vpop.f32.mrf.mxu0  ;;  %v5613_v20 = vpop.f32.mrf.mxu1 }
 0x4f0   : > { %v19818_v14 = vadd.f32 %v5540_v5, %v4956_v21  ;;  %v19820_v11 = vadd.f32 %v5613_v20, %v5029_v22 }
 0x4f1   : > { %v17406_v12 = vpop.f32.mrf.mxu0  ;;  %v17411_v33 = vpop.f32.mrf.mxu1 }
 0x4f3   : > { %v5686_v15 = vpop.f32.mrf.mxu0  ;;  %v5759_v2 = vpop.f32.mrf.mxu1 }
 0x4f4   : > { %v19822_v40 = vadd.f32 %v5686_v15, %v5102_v49  ;;  %v19824_v55 = vadd.f32 %v5759_v2, %v5175_v3 }
 0x4f5   : > { %v17416_v6 = vpop.f32.mrf.mxu0  ;;  %v17421_v1 = vpop.f32.mrf.mxu1 }
 0x4f7   : > { %v5832_v42 = vpop.f32.mrf.mxu0  ;;  %v5905_v62 = vpop.f32.mrf.mxu1 }
 0x4f8   : > { %v19826_v60 = vadd.f32 %v5832_v42, %v5248_v13  ;;  %v19828_v27 = vadd.f32 %v5905_v62, %v5321_v39 }
 0x4f9   : > { %v17426_v37 = vpop.f32.mrf.mxu0  ;;  %v17431_v21 = vpop.f32.mrf.mxu1 }
 0x4fb   : > { %v5978_v28 = vpop.f32.mrf.mxu0  ;;  %v6051_v44 = vpop.f32.mrf.mxu1 }
 0x4fc   : > { %v6493_v22 = vmul.f32 0.5, %v5978_v28  ;;  %v6494_v24 = vmul.f32 0.5, %v6051_v44 }
 0x4fd   : > { %v17436_v16 = vpop.f32.mrf.mxu0  ;;  %v17441_v49 = vpop.f32.mrf.mxu1 }
 0x4fe   : > { %v6501_v19 = vsel %vm3972_vm3, %v6493_v22, -inf  ;;  %v6504_v3 = vsel %vm3972_vm3, %v6494_v24, -inf }
 0x4ff   : > { %6502 = vmax.xlane.f32.xlu1 %v6501_v19  ;;  %v6124_v30 = vpop.f32.mrf.mxu0  ;;  %6505 = vmax.xlane.f32.xlu0 %v6504_v3  ;;  %v6197_v13 = vpop.f32.mrf.mxu1  ;;  %v21949_v3 = vld [vmem:[#allocation20_spill] sm:$0xff] }
 0x500   : > { %v6495_v32 = vmul.f32 0.5, %v6124_v30  ;;  %v6496_v8 = vmul.f32 0.5, %v6197_v13  ;;  %v21950_v30 = vld [vmem:[#allocation27_spill] sm:$0xff] }
 0x501   : > { %v17446_v39 = vpop.f32.mrf.mxu0  ;;  %v17451_v53 = vpop.f32.mrf.mxu1 }
 0x502   : > { %v6507_v46 = vsel %vm3972_vm3, %v6495_v32, -inf  ;;  %v6510_v5 = vsel %vm3972_vm3, %v6496_v8, -inf }
 0x503   : > { %v6270_v20 = vpop.f32.mrf.mxu0  ;;  %v6343_v12 = vpop.f32.mrf.mxu1  ;;  %6511 = vmax.xlane.f32.xlu1 %v6510_v5  ;;  %6508 = vmax.xlane.f32.xlu0 %v6507_v46 }
 0x504   : > { %v6497_v33 = vmul.f32 0.5, %v6270_v20  ;;  %v6498_v15 = vmul.f32 0.5, %v6343_v12 }
 0x505   : > { %v17456_v2 = vpop.f32.mrf.mxu0  ;;  %v17461_v6 = vpop.f32.mrf.mxu1 }
 0x506   : > { %v6513_v1 = vsel %vm3972_vm3, %v6497_v33, -inf  ;;  %v6516_v42 = vsel %vm3972_vm3, %v6498_v15, -inf }
 0x507   : > { %v6416_v62 = vpop.f32.mrf.mxu0  ;;  %v6489_v37 = vpop.f32.mrf.mxu1  ;;  %6517 = vmax.xlane.f32.xlu1 %v6516_v42  ;;  %6514 = vmax.xlane.f32.xlu0 %v6513_v1 }
 0x508   : > { %v6499_v21 = vmul.f32 0.5, %v6416_v62  ;;  %v6500_v28 = vmul.f32 0.5, %v6489_v37 }
 0x509   : > { %v17466_v44 = vpop.f32.mrf.mxu0  ;;  %v17471_v16 = vpop.f32.mrf.mxu1 }
 0x50a   : > { %v6519_v49 = vsel %vm3972_vm3, %v6499_v21, -inf  ;;  %v6522_v19 = vsel %vm3972_vm3, %v6500_v28, -inf }
 0x50b   : > { %6523 = vmax.xlane.f32.xlu1 %v6522_v19  ;;  %6520 = vmax.xlane.f32.xlu0 %v6519_v49 }
 0x51c   : > { %2509 = vrot.lane.b32.xlu1 %v21949_v3, %s18503_s28 }
 0x521   : > { %2507 = vrot.lane.b32.xlu0 %v21950_v30, %s18503_s28 }
 0x588   : > { %v6503_v13 = vpop.xlane.xlu1 %6502  ;;  %v6506_v39 = vpop.xlane.xlu0 %6505 }
 0x589   : > { %v6525_v53 = vsub.f32 %v6493_v22, %v6503_v13  ;;  %v6526_v46 = vsub.f32 %v6494_v24, %v6506_v39 }
 0x58b   : > { %v6533_v5 = vmul.f32 1.442695, %v6525_v53  ;;  %v6535_v20 = vmul.f32 1.442695, %v6526_v46 }
 0x58c   : > { %v6512_v12 = vpop.xlane.xlu1 %6511  ;;  %v6509_v2 = vpop.xlane.xlu0 %6508 }
 0x58d   : > { %18240 = vpow2.f32 %v6533_v5  ;;  %v6528_v6 = vsub.f32 %v6496_v8, %v6512_v12  ;;  %v6527_v1 = vsub.f32 %v6495_v32, %v6509_v2 }
 0x58e   : > { %18242 = vpow2.f32 %v6535_v20 }
 0x58f   : > { %v6539_v42 = vmul.f32 1.442695, %v6528_v6  ;;  %v6537_v62 = vmul.f32 1.442695, %v6527_v1 }
 0x590   : > { %v6518_v37 = vpop.xlane.xlu1 %6517  ;;  %v6515_v44 = vpop.xlane.xlu0 %6514 }
 0x591   : > { %18244 = vpow2.f32 %v6539_v42  ;;  %v6530_v16 = vsub.f32 %v6498_v15, %v6518_v37  ;;  %v6529_v49 = vsub.f32 %v6497_v33, %v6515_v44  ;;  %v21951_v44 = vld [vmem:[#allocation31_spill] sm:$0xff] }
 0x592   : > { %18246 = vpow2.f32 %v6537_v62 }
 0x593   : > { %v6543_v19 = vmul.f32 1.442695, %v6530_v16  ;;  %v6541_v30 = vmul.f32 1.442695, %v6529_v49  ;;  %v21952_v16 = vld [vmem:[#allocation25_spill] sm:$0xff] }
 0x594   : > { %v6524_v22 = vpop.xlane.xlu1 %6523  ;;  %v6521_v24 = vpop.xlane.xlu0 %6520 }
 0x595   : > { %18248 = vpow2.f32 %v6543_v19  ;;  %v6532_v13 = vsub.f32 %v6500_v28, %v6524_v22  ;;  %v6531_v39 = vsub.f32 %v6499_v21, %v6521_v24 }
 0x596   : > { %18250 = vpow2.f32 %v6541_v30 }
 0x597   : > { %v6547_v53 = vmul.f32 1.442695, %v6532_v13  ;;  %v6545_v46 = vmul.f32 1.442695, %v6531_v39  ;;  %v21953_v39 = vld [vmem:[#allocation4_spill] sm:$0xff] }
 0x598   : > { %v2508_v49 = vpop.permute.xlu0 %2507  ;;  %v2510_v19 = vpop.permute.xlu1 %2509 }
 0x599   : > { %18252 = vpow2.f32 %v6547_v53  ;;  %v21954_v53 = vld [vmem:[#allocation2_spill] sm:$0xff] }
 0x59a   : > { %v18241_v8 = vpop.eup %18240  ;;  %18254 = vpow2.f32 %v6545_v46  ;;  %v899_v46 = vcombine.low %v21954_v53, %v21953_v39 }
 0x59b   : > { %v18243_v32 = vpop.eup %18242  ;;  %v6549_v5 = vsel %vm3972_vm3, %v18241_v8, 0.0 }
 0x59c   : > { %v6552_v15 = vsel %vm3972_vm3, %v18243_v32, 0.0  ;;  %6550 = vadd.xlane.f32.xlu0 %v6549_v5  ;;  %v21955_v5 = vld [vmem:[#allocation5_spill] sm:$0xff] }
 0x59d   : > { %6553 = vadd.xlane.f32.xlu1 %v6552_v15  ;;  %v21956_v15 = vld [vmem:[#allocation3_spill] sm:$0xff] }
 0x59e   : > { %v19844_v33 = vpop.eup %18244 }
 0x59f   : > { %v19846_v20 = vpop.eup %18246  ;;  %v6558_v21 = vsel %vm3972_vm3, %v19844_v33, 0.0 }
 0x5a0   : > { %v6555_v28 = vsel %vm3972_vm3, %v19846_v20, 0.0 }
 0x5a1   : > { %6559 = vadd.xlane.f32.xlu1 %v6558_v21  ;;  %6556 = vadd.xlane.f32.xlu0 %v6555_v28  ;;  %v915_v21 = vcombine.low %v21956_v15, %v21955_v5 }
 0x5a2   : > { %v19852_v30 = vpop.eup %18248 }
 0x5a3   : > { %v19854_v12 = vpop.eup %18250  ;;  %v6564_v2 = vsel %vm3972_vm3, %v19852_v30, 0.0 }
 0x5a4   : > { %v6561_v6 = vsel %vm3972_vm3, %v19854_v12, 0.0 }
 0x5a5   : > { %6565 = vadd.xlane.f32.xlu1 %v6564_v2  ;;  %6562 = vadd.xlane.f32.xlu0 %v6561_v6  ;;  %v900_v2 = vcombine.high %v21954_v53, %v21953_v39  ;;  %v916_v6 = vcombine.high %v21956_v15, %v21955_v5  ;;  %v21957_v39 = vld [vmem:[#allocation8_spill] sm:$0xff]  ;;  %v21958_v53 = vld [vmem:[#allocation6_spill] sm:$0xff] }
 0x5a6   : > { %v19860_v1 = vpop.eup %18252  ;;  %v931_v47 = vcombine.low %v21958_v53, %v21957_v39  ;;  %v932_v5 = vcombine.high %v21958_v53, %v21957_v39 }
 0x5a7   : > { %v19862_v42 = vpop.eup %18254  ;;  %v6570_v62 = vsel %vm3972_vm3, %v19860_v1, 0.0  ;;  %v930_v3 = vrot.slane %v916_v6, %v18816_v51  ;;  %v21959_v6 = vld [vmem:[#allocation9_spill] sm:$0xff] }
 0x5a8   : > { %v6567_v37 = vsel %vm3972_vm3, %v19862_v42, 0.0  ;;  %v947_v34 = vcombine.low %v21960_v4, %v21959_v6 }
 0x5a9   : > { %6571 = vadd.xlane.f32.xlu0 %v6570_v62  ;;  %6568 = vadd.xlane.f32.xlu1 %v6567_v37  ;;  %v907_v37 = vrot.slane %v899_v46, %v18816_v51 }
 0x5ba   : > { %2511 = vrot.lane.b32.xlu1 %v21951_v44, %s18503_s28  ;;  %v914_v44 = vrot.slane %v900_v2, %v18816_v51 }
 0x5bc   : > { %v980_v41 = vcombine.high %v914_v44, %v930_v3 }
 0x5bf   : > { %2513 = vrot.lane.b32.xlu0 %v21952_v16, %s18503_s28 }
 0x625   : > { %v6551_v22 = vpop.xlane.xlu0 %6550 }
 0x626   : > { %v6554_v24 = vpop.xlane.xlu1 %6553  ;;  %18256 = vrcp.f32 %v6551_v22  ;;  %v923_v22 = vrot.slane %v915_v21, %v18816_v51  ;;  %v979_v21 = vcombine.low %v914_v44, %v930_v3 }
 0x627   : > { %18258 = vrcp.f32 %v6554_v24 }
 0x628   : > { %v964_v15 = vcombine.high %v907_v37, %v923_v22 }
 0x62a   : > { %v6560_v13 = vpop.xlane.xlu1 %6559  ;;  %v6557_v28 = vpop.xlane.xlu0 %6556 }
 0x62b   : > { %18260 = vrcp.f32 %v6560_v13  ;;  %v963_v13 = vcombine.low %v907_v37, %v923_v22  ;;  %v939_v22 = vrot.slane %v931_v47, %v18816_v51  ;;  %v955_v47 = vrot.slane %v947_v34, %v18816_v51 }
 0x62c   : > { %18262 = vrcp.f32 %v6557_v28  ;;  %v987_v34 = vrot.slane %v979_v21, %v18826_v59 }
 0x62d   : > { %v19890_v2 = vrot.slane %v963_v13, %v18826_v59  ;;  %v946_v13 = vrot.slane %v932_v5, %v18816_v51 }
 0x62e   : > { %v6566_v62 = vpop.xlane.xlu1 %6565  ;;  %v6563_v24 = vpop.xlane.xlu0 %6562 }
 0x62f   : > { %18264 = vrcp.f32 %v6566_v62 }
 0x630   : > { %18266 = vrcp.f32 %v6563_v24 }
 0x632   : > { %v6569_v23 = vpop.xlane.xlu1 %6568  ;;  %v6572_v28 = vpop.xlane.xlu0 %6571 }
 0x633   : > { %v18257_v16 = vpop.eup %18256  ;;  %18268 = vrcp.f32 %v6569_v23 }
 0x634   : > { %v18259_v17 = vpop.eup %18258  ;;  %v6581_v18 = vmul.f32 %v18257_v16, %v18241_v8  ;;  %v948_v8 = vcombine.high %v21960_v4, %v21959_v6  ;;  %v978_v6 = vrot.slane %v964_v15, %v18826_v59  ;;  %18270 = vrcp.f32 %v6572_v28 }
 0x635   : > { %v6582_v46 = vmul.f32 %v18259_v17, %v18243_v32  ;;  %v996_v15 = vcombine.high %v939_v22, %v955_v47 }
 0x636   : > { %17475 = vmatmul.mubr.msk.f32.vlgmr.msra.gmra.mxu0 %vm3972_vm3, %v6581_v18  ;;  %v2512_v16 = vpop.permute.xlu1 %2511  ;;  %v2514_v56 = vpop.permute.xlu0 %2513  ;;  %v962_v24 = vrot.slane %v948_v8, %v18816_v51  ;;  %v994_v8 = vrot.slane %v980_v41, %v18826_v59 }
 0x637   : > { %17480 = vmatmul.mubr.msk.f32.vlgmr.msra.gmra.mxu1 %vm3972_vm3, %v6582_v46  ;;  %17483 = vmatpush3.msra.mxu0 %v19715_v48  ;;  %v2843_v3 = vcombine.low %v2508_v49, %v2512_v16  ;;  %v2844_v32 = vcombine.high %v2508_v49, %v2512_v16  ;;  %v2859_v18 = vcombine.low %v2510_v19, %v2514_v56 }
 0x638   : > { %v18261_v17 = vpop.eup %18260  ;;  %v2860_v44 = vcombine.high %v2510_v19, %v2514_v56  ;;  %17488 = vmatpush3.msra.mxu1 %v19721_v10  ;;  %17484 = vmatprep.mubr.msk.f32.mxu0 %vm18494_vm0, %v21934_v61  ;;  %v1012_v21 = vcombine.high %v946_v13, %v962_v24 }
 0x639   : > { %v18263_v37 = vpop.eup %18262  ;;  %17489 = vmatprep.mubr.msk.f32.mxu1 %vm18494_vm0, %v21934_v61  ;;  %v6584_v4 = vmul.f32 %v18261_v17, %v19844_v33  ;;  %v2851_v49 = vrot.slane %v2843_v3, %v18816_v51  ;;  %v2858_v56 = vrot.slane %v2844_v32, %v18816_v51  ;;  %v2867_v19 = vrot.slane %v2859_v18, %v18816_v51 }
 0x63a   : > { %v2874_v62 = vrot.slane %v2860_v44, %v18816_v51  ;;  %17492 = vmatprep.subr.mxu0 %v21934_v61  ;;  %v6583_v39 = vmul.f32 %v18263_v37, %v19846_v20  ;;  %17497 = vmatprep.subr.mxu1 %v21934_v61  ;;  %v995_v3 = vcombine.low %v939_v22, %v955_v47 }
 0x63b   : > { %17490 = vmatmul.mubr.msk.f32.vlgmr.msra.gmra.mxu1 %vm3972_vm3, %v6584_v4  ;;  %v2907_v33 = vcombine.low %v2851_v49, %v2867_v19  ;;  %v2908_v53 = vcombine.high %v2851_v49, %v2867_v19  ;;  %v1011_v32 = vcombine.low %v946_v13, %v962_v24  ;;  %v16532_v37 = vcombine.low %v19890_v2, %v978_v6 }
 0x63c   : > { %v2923_v5 = vcombine.low %v2858_v56, %v2874_v62  ;;  %v2924_v46 = vcombine.high %v2858_v56, %v2874_v62  ;;  %17499 = vmatprep.mubr.msk.f32.mxu1 %vm18494_vm0, %v21934_v61  ;;  %17485 = vmatmul.mubr.msk.f32.vlgmr.msra.gmra.mxu0 %vm3972_vm3, %v6583_v39  ;;  %v16534_v4 = vcombine.high %v19890_v2, %v978_v6 }
 0x63d   : > { %v2915_v23 = vrot.slane %v2907_v33, %v18826_v59  ;;  %v2922_v20 = vrot.slane %v2908_v53, %v18826_v59  ;;  %17494 = vmatprep.mubr.msk.f32.mxu0 %vm18494_vm0, %v21934_v61  ;;  %v16536_v49 = vcombine.low %v987_v34, %v994_v8  ;;  %v16538_v56 = vcombine.high %v987_v34, %v994_v8  ;;  %v18265_v53 = vpop.eup %18264 }
 0x63e   : > { %v2931_v16 = vrot.slane %v2923_v5, %v18826_v59  ;;  %v2938_v17 = vrot.slane %v2924_v46, %v18826_v59  ;;  %v1003_v13 = vrot.slane %v995_v3, %v18826_v59  ;;  %v1010_v47 = vrot.slane %v996_v15, %v18826_v59 }
 0x63f   : > { %v16589_v18 = vcombine.low %v2915_v23, %v2922_v20  ;;  %v16591_v41 = vcombine.high %v2915_v23, %v2922_v20  ;;  %v1019_v24 = vrot.slane %v1011_v32, %v18826_v59  ;;  %v1026_v33 = vrot.slane %v1012_v21, %v18826_v59  ;;  %v18267_v23 = vpop.eup %18266 }
 0x640   : > { %v16593_v28 = vcombine.low %v2931_v16, %v2938_v17  ;;  %v16595_v44 = vcombine.high %v2931_v16, %v2938_v17  ;;  %v1315_v34 = vrot.slane %v16532_v37, %v18816_v51  ;;  %v1331_v8 = vrot.slane %v16534_v4, %v18816_v51 }
 0x641   : > { %v3234_v19 = vrot.slane %v16589_v18, %v18816_v51  ;;  %v3250_v62 = vrot.slane %v16591_v41, %v18816_v51  ;;  %v1347_v17 = vrot.slane %v16536_v49, %v18816_v51  ;;  %v1363_v3 = vrot.slane %v16538_v56, %v18816_v51  ;;  %v18269_v18 = vpop.eup %18268 }
 0x642   : > { %v3266_v39 = vrot.slane %v16593_v28, %v18816_v51  ;;  %v3282_v22 = vrot.slane %v16595_v44, %v18816_v51  ;;  %v16533_v15 = vcombine.low %v1003_v13, %v1010_v47  ;;  %v16535_v41 = vcombine.high %v1003_v13, %v1010_v47 }
 0x643   : > { %v3299_v2 = vcombine.low %v3234_v19, %v3250_v62  ;;  %v3300_v46 = vcombine.high %v3234_v19, %v3250_v62  ;;  %v16537_v28 = vcombine.low %v1019_v24, %v1026_v33  ;;  %v16539_v4 = vcombine.high %v1019_v24, %v1026_v33 }
 0x644   : > { %v3331_v5 = vcombine.low %v3266_v39, %v3282_v22  ;;  %v3332_v6 = vcombine.high %v3266_v39, %v3282_v22  ;;  %v6585_v19 = vmul.f32 %v18267_v23, %v19854_v12  ;;  %v6586_v62 = vmul.f32 %v18265_v53, %v19852_v30  ;;  %v18271_v39 = vpop.eup %18270 }
 0x645   : > { %v3307_v20 = vrot.slane %v3299_v2, %v18826_v59  ;;  %v3314_v32 = vrot.slane %v3300_v46, %v18826_v59  ;;  %v1371_v49 = vcombine.low %v1315_v34, %v1331_v8  ;;  %v1403_v56 = vcombine.low %v1347_v17, %v1363_v3 }
 0x646   : > { %v3339_v16 = vrot.slane %v3331_v5, %v18826_v59  ;;  %v3346_v21 = vrot.slane %v3332_v6, %v18826_v59  ;;  %v1372_v47 = vcombine.high %v1315_v34, %v1331_v8  ;;  %v1404_v30 = vcombine.high %v1347_v17, %v1363_v3  ;;  %v21965_v34 = vld [vmem:[#allocation13_spill] sm:$0xff]  ;;  %v21966_v8 = vld [vmem:[#allocation14_spill] sm:$0xff]  ;;  %v21967_v3 = vld [vmem:[#allocation16_spill] sm:$0xff] }
 0x647   : > { %v1322_v12 = vrot.slane %v16533_v15, %v18816_v51  ;;  %v1338_v24 = vrot.slane %v16535_v41, %v18816_v51  ;;  %v1379_v33 = vrot.slane %v1371_v49, %v18826_v59  ;;  %v1354_v53 = vrot.slane %v16537_v28, %v18816_v51  ;;  %v21968_v15 = vld [vmem:[#allocation17_spill] sm:$0xff] }
 0x648   : > { %v19946_v44 = vcombine.low %v3307_v20, %v3339_v16  ;;  %v19948_v37 = vcombine.high %v3307_v20, %v3339_v16  ;;  %v19956_v22 = vcombine.low %v3314_v32, %v3346_v21  ;;  %v19958_v13 = vcombine.high %v3314_v32, %v3346_v21 }
 0x649   : > { %v1370_v2 = vrot.slane %v16539_v4, %v18816_v51  ;;  %v6587_v5 = vmul.f32 %v18269_v18, %v19862_v42  ;;  %v6588_v46 = vmul.f32 %v18271_v39, %v19860_v1  ;;  %v1411_v6 = vrot.slane %v1403_v56, %v18826_v59 }
 0x64a   : > { %21961 = vst [vmem:[#allocation32_spill] sm:$0xff] %v19946_v44  ;;  %21962 = vst [vmem:[#allocation4_spill] sm:$0xff] %v19948_v37  ;;  %17493 = vmatpush3.msra.mxu0 %v19946_v44  ;;  %17498 = vmatpush3.msra.mxu1 %v19948_v37  ;;  %v1386_v42 = vrot.slane %v1372_v47, %v18826_v59  ;;  %v1418_v1 = vrot.slane %v1404_v30, %v18826_v59  ;;  %v21971_v30 = vld [vmem:[#allocation28_spill] sm:$0xff] }
 0x64b   : > { %17495 = vmatmul.mubr.msk.f32.vlgmr.msra.gmra.mxu0 %vm3972_vm3, %v6585_v19  ;;  %17500 = vmatmul.mubr.msk.f32.vlgmr.msra.gmra.mxu1 %vm3972_vm3, %v6586_v62  ;;  %21963 = vst [vmem:[#allocation2_spill] sm:$0xff] %v19956_v22  ;;  %21964 = vst [vmem:[#allocation5_spill] sm:$0xff] %v19958_v13  ;;  %v1387_v23 = vcombine.low %v1322_v12, %v1338_v24  ;;  %v19990_v20 = vcombine.low %v1379_v33, %v1411_v6  ;;  %v21969_v19 = vld [vmem:[#allocation21_spill] sm:$0xff]  ;;  %v21970_v62 = vld [vmem:[#allocation22_spill] sm:$0xff] }
 0x64c   : > { %17502 = vmatprep.subr.mxu0 %v21934_v61  ;;  %17507 = vmatprep.subr.mxu1 %v21934_v61  ;;  %v19992_v16 = vcombine.high %v1379_v33, %v1411_v6  ;;  %v1419_v17 = vcombine.low %v1354_v53, %v1370_v2  ;;  %v20004_v32 = vcombine.low %v1386_v42, %v1418_v1  ;;  %v21977_v6 = vld [vmem:[#allocation37_spill] sm:$0xff] }
 0x64d   : > { %17503 = vmatpush3.msra.mxu0 %v19956_v22  ;;  %17508 = vmatpush3.msra.mxu1 %v19958_v13  ;;  %v1388_v21 = vcombine.high %v1322_v12, %v1338_v24  ;;  %v1420_v18 = vcombine.high %v1354_v53, %v1370_v2  ;;  %v20010_v41 = vcombine.high %v1386_v42, %v1418_v1  ;;  %v21972_v12 = vld [vmem:[#allocation29_spill] sm:$0xff]  ;;  %v21974_v2 = vld [vmem:[#allocation34_spill] sm:$0xff]  ;;  %v21979_v1 = vld [vmem:[#allocation39_spill] sm:$0xff] }
 0x64e   : > { %17504 = vmatprep.mubr.msk.f32.mxu0 %vm18494_vm0, %v21934_v61  ;;  %17509 = vmatprep.mubr.msk.f32.mxu1 %vm18494_vm0, %v21934_v61  ;;  %v1395_v28 = vrot.slane %v1387_v23, %v18826_v59  ;;  %v1427_v4 = vrot.slane %v1419_v17, %v18826_v59  ;;  %v21973_v53 = vld [vmem:[#allocation33_spill] sm:$0xff]  ;;  %v21978_v42 = vld [vmem:[#allocation38_spill] sm:$0xff]  ;;  %v21980_v23 = vld [vmem:[#allocation40_spill] sm:$0xff] }
 0x64f   : > { %17512 = vmatprep.subr.mxu0 %v21934_v61  ;;  %17517 = vmatprep.subr.mxu1 %v21934_v61  ;;  %v1402_v49 = vrot.slane %v1388_v21, %v18826_v59  ;;  %v1434_v47 = vrot.slane %v1420_v18, %v18826_v59  ;;  %v21981_v17 = vld [vmem:[#allocation41_spill] sm:$0xff]  ;;  %v21982_v21 = vld [vmem:[#allocation42_spill] sm:$0xff] }
 0x650   : > { %17505 = vmatmul.mubr.msk.f32.vlgmr.msra.gmra.mxu0 %vm3972_vm3, %v6587_v5  ;;  %17510 = vmatmul.mubr.msk.f32.vlgmr.msra.gmra.mxu1 %vm3972_vm3, %v6588_v46  ;;  %v20029_v39 = vcombine.low %v1395_v28, %v1427_v4  ;;  %v20031_v56 = vcombine.high %v1395_v28, %v1427_v4  ;;  %v21975_v5 = vld [vmem:[#allocation35_spill] sm:$0xff]  ;;  %v21976_v46 = vld [vmem:[#allocation36_spill] sm:$0xff] }
 0x651   : > { %17513 = vmatpush3.xpose.msk.msra.mxu0 %vm3355_vm2, %v21965_v34  ;;  %17518 = vmatpush3.xpose.msk.msra.mxu1 %vm3355_vm2, %v21966_v8  ;;  %v20048_v24 = vcombine.low %v1402_v49, %v1434_v47  ;;  %v20050_v33 = vcombine.high %v1402_v49, %v1434_v47 }
 0x652   : > { %17514 = vmatprep.mubr.msk.f32.mxu0 %vm18494_vm0, %v21934_v61  ;;  %17519 = vmatprep.mubr.msk.f32.mxu1 %vm18494_vm0, %v21934_v61 }
 0x653   : > { %17522 = vmatprep.subr.mxu0 %v21934_v61  ;;  %17527 = vmatprep.subr.mxu1 %v21934_v61 }
 0x654   : > { %17515 = vmatmul.mubr.msk.f32.vlgmr.msra.gmra.mxu0 %vm3355_vm2, %v19990_v20  ;;  %17520 = vmatmul.mubr.msk.f32.vlgmr.msra.gmra.mxu1 %vm3355_vm2, %v19992_v16 }
 0x655   : > { %17523 = vmatpush3.xpose.msk.msra.mxu0 %vm3355_vm2, %v21967_v3  ;;  %17528 = vmatpush3.xpose.msk.msra.mxu1 %vm3355_vm2, %v21968_v15 }
 0x656   : > { %17524 = vmatprep.mubr.msk.f32.mxu0 %vm18494_vm0, %v21934_v61  ;;  %17529 = vmatprep.mubr.msk.f32.mxu1 %vm18494_vm0, %v21934_v61 }
 0x657   : > { %17532 = vmatprep.subr.mxu0 %v21934_v61  ;;  %17537 = vmatprep.subr.mxu1 %v21934_v61 }
 0x658   : > { %17525 = vmatmul.mubr.msk.f32.vlgmr.msra.gmra.mxu0 %vm3355_vm2, %v20004_v32  ;;  %17530 = vmatmul.mubr.msk.f32.vlgmr.msra.gmra.mxu1 %vm3355_vm2, %v20010_v41 }
 0x659   : > { %17533 = vmatpush3.xpose.msk.msra.mxu0 %vm3355_vm2, %v21969_v19  ;;  %17538 = vmatpush3.xpose.msk.msra.mxu1 %vm3355_vm2, %v21970_v62 }
 0x65a   : > { %17534 = vmatprep.mubr.msk.f32.mxu0 %vm18494_vm0, %v21934_v61  ;;  %17539 = vmatprep.mubr.msk.f32.mxu1 %vm18494_vm0, %v21934_v61 }
 0x65b   : > { %17542 = vmatprep.subr.mxu0 %v21934_v61  ;;  %17547 = vmatprep.subr.mxu1 %v21934_v61 }
 0x65c   : > { %17535 = vmatmul.mubr.msk.f32.vlgmr.msra.gmra.mxu0 %vm3355_vm2, %v20029_v39  ;;  %17540 = vmatmul.mubr.msk.f32.vlgmr.msra.gmra.mxu1 %vm3355_vm2, %v20031_v56 }
 0x65d   : > { %17543 = vmatpush3.xpose.msk.msra.mxu0 %vm3355_vm2, %v21971_v30  ;;  %17548 = vmatpush3.xpose.msk.msra.mxu1 %vm3355_vm2, %v21972_v12 }
 0x65e   : > { %17544 = vmatprep.mubr.msk.f32.mxu0 %vm18494_vm0, %v21934_v61  ;;  %17549 = vmatprep.mubr.msk.f32.mxu1 %vm18494_vm0, %v21934_v61 }
 0x65f   : > { %17552 = vmatprep.subr.mxu0 %v21934_v61  ;;  %17557 = vmatprep.subr.mxu1 %v21934_v61 }
 0x660   : > { %17545 = vmatmul.mubr.msk.f32.vlgmr.msra.gmra.mxu0 %vm3355_vm2, %v20048_v24  ;;  %17550 = vmatmul.mubr.msk.f32.vlgmr.msra.gmra.mxu1 %vm3355_vm2, %v20050_v33 }
 0x661   : > { %17553 = vmatpush3.xpose.msk.msra.mxu0 %vm3355_vm2, %v21973_v53  ;;  %17558 = vmatpush3.xpose.msk.msra.mxu1 %vm3355_vm2, %v21974_v2 }
 0x662   : > { %17554 = vmatprep.mubr.msk.f32.mxu0 %vm18494_vm0, %v21934_v61  ;;  %17559 = vmatprep.mubr.msk.f32.mxu1 %vm18494_vm0, %v21934_v61 }
 0x663   : > { %17562 = vmatprep.subr.mxu0 %v21934_v61  ;;  %17567 = vmatprep.subr.mxu1 %v21934_v61 }
 0x664   : > { %17555 = vmatmul.mubr.msk.f32.vlgmr.msra.gmra.mxu0 %vm3355_vm2, %v19990_v20  ;;  %17560 = vmatmul.mubr.msk.f32.vlgmr.msra.gmra.mxu1 %vm3355_vm2, %v19992_v16 }
 0x665   : > { %17563 = vmatpush3.xpose.msk.msra.mxu0 %vm3355_vm2, %v21975_v5  ;;  %17568 = vmatpush3.xpose.msk.msra.mxu1 %vm3355_vm2, %v21976_v46 }
 0x666   : > { %17564 = vmatprep.mubr.msk.f32.mxu0 %vm18494_vm0, %v21934_v61  ;;  %17569 = vmatprep.mubr.msk.f32.mxu1 %vm18494_vm0, %v21934_v61 }
 0x667   : > { %17572 = vmatprep.subr.mxu0 %v21934_v61  ;;  %17577 = vmatprep.subr.mxu1 %v21934_v61 }
 0x668   : > { %17565 = vmatmul.mubr.msk.f32.vlgmr.msra.gmra.mxu0 %vm3355_vm2, %v20004_v32  ;;  %17570 = vmatmul.mubr.msk.f32.vlgmr.msra.gmra.mxu1 %vm3355_vm2, %v20010_v41 }
 0x669   : > { %17573 = vmatpush3.xpose.msk.msra.mxu0 %vm3355_vm2, %v21977_v6  ;;  %17578 = vmatpush3.xpose.msk.msra.mxu1 %vm3355_vm2, %v21978_v42 }
 0x66a   : > { %17574 = vmatprep.mubr.msk.f32.mxu0 %vm18494_vm0, %v21934_v61  ;;  %17579 = vmatprep.mubr.msk.f32.mxu1 %vm18494_vm0, %v21934_v61 }
 0x66b   : > { %17582 = vmatprep.subr.mxu0 %v21934_v61  ;;  %17587 = vmatprep.subr.mxu1 %v21934_v61 }
 0x66c   : > { %17575 = vmatmul.mubr.msk.f32.vlgmr.msra.gmra.mxu0 %vm3355_vm2, %v20029_v39  ;;  %17580 = vmatmul.mubr.msk.f32.vlgmr.msra.gmra.mxu1 %vm3355_vm2, %v20031_v56 }
 0x66d   : > { %17583 = vmatpush3.xpose.msk.msra.mxu0 %vm3355_vm2, %v21979_v1  ;;  %17588 = vmatpush3.xpose.msk.msra.mxu1 %vm3355_vm2, %v21980_v23 }
 0x66e   : > { %17584 = vmatprep.mubr.msk.f32.mxu0 %vm18494_vm0, %v21934_v61  ;;  %17589 = vmatprep.mubr.msk.f32.mxu1 %vm18494_vm0, %v21934_v61 }
 0x66f   : > { %17592 = vmatprep.subr.mxu0 %v21934_v61  ;;  %17597 = vmatprep.subr.mxu1 %v21934_v61 }
 0x670   : > { %17585 = vmatmul.mubr.msk.f32.vlgmr.msra.gmra.mxu0 %vm3355_vm2, %v20048_v24  ;;  %17590 = vmatmul.mubr.msk.f32.vlgmr.msra.gmra.mxu1 %vm3355_vm2, %v20050_v33 }
 0x671   : > { %17593 = vmatpush3.msra.mxu0 %v21981_v17  ;;  %17598 = vmatpush3.msra.mxu1 %v21982_v21 }
 0x672   : > { %17594 = vmatprep.mubr.msk.f32.mxu0 %vm18494_vm0, %v21934_v61  ;;  %17599 = vmatprep.mubr.msk.f32.mxu1 %vm18494_vm0, %v21934_v61 }
 0x673   : > { %17602 = vmatprep.subr.mxu0 %v21934_v61  ;;  %17607 = vmatprep.subr.mxu1 %v21934_v61 }
 0x6f6   : > { %v6658_v18 = vpop.f32.mrf.mxu0 }
 0x6f7   : > { %v7173_v28 = vadd.f32 %v6658_v18, %v19814_v38  ;;  %v6731_v4 = vpop.f32.mrf.mxu1 }
 0x6f8   : > { %v7174_v49 = vadd.f32 %v6731_v4, %v19816_v52  ;;  %v17476_v47 = vpop.f32.mrf.mxu0 }
 0x6f9   : > { %v17481_v17 = vpop.f32.mrf.mxu1 }
 0x6fb   : > { %v6877_v1 = vpop.f32.mrf.mxu1 }
 0x6fc   : > { %v7176_v21 = vadd.f32 %v6877_v1, %v19820_v11  ;;  %v6804_v23 = vpop.f32.mrf.mxu0 }
 0x6fd   : > { %v17491_v6 = vpop.f32.mrf.mxu1  ;;  %v7175_v42 = vadd.f32 %v6804_v23, %v19818_v14 }
 0x6fe   : > { %v7197_v5 = vcombine.low %v7174_v49, %v7176_v21  ;;  %v7198_v46 = vcombine.high %v7174_v49, %v7176_v21  ;;  %v17486_v53 = vpop.f32.mrf.mxu0 }
 0x6ff   : > { %v7181_v2 = vcombine.low %v7173_v28, %v7175_v42  ;;  %v7182_v30 = vcombine.high %v7173_v28, %v7175_v42 }
 0x700   : > { %v7205_v12 = vrot.slane %v7197_v5, %v18816_v51  ;;  %v7212_v38 = vrot.slane %v7198_v46, %v18816_v51 }
 0x701   : > { %v7189_v52 = vrot.slane %v7181_v2, %v18816_v51  ;;  %v7196_v17 = vrot.slane %v7182_v30, %v18816_v51 }
 0x703   : > { %v7245_v18 = vcombine.low %v7189_v52, %v7205_v12  ;;  %v7246_v4 = vcombine.high %v7189_v52, %v7205_v12  ;;  %v7261_v11 = vcombine.low %v7196_v17, %v7212_v38  ;;  %v7262_v1 = vcombine.high %v7196_v17, %v7212_v38 }
 0x705   : > { %v7253_v6 = vrot.slane %v7245_v18, %v18826_v59  ;;  %v7260_v14 = vrot.slane %v7246_v4, %v18826_v59  ;;  %v7269_v53 = vrot.slane %v7261_v11, %v18826_v59  ;;  %v7276_v42 = vrot.slane %v7262_v1, %v18826_v59 }
 0x707   : > { %v16812_v23 = vcombine.low %v7253_v6, %v7260_v14  ;;  %v16814_v5 = vcombine.high %v7253_v6, %v7260_v14  ;;  %v16816_v21 = vcombine.low %v7269_v53, %v7276_v42  ;;  %v16818_v46 = vcombine.high %v7269_v53, %v7276_v42 }
 0x709   : > { %v15101_v2 = vrot.slane %v16812_v23, %v18816_v51  ;;  %v15117_v30 = vrot.slane %v16814_v5, %v18816_v51  ;;  %v15133_v12 = vrot.slane %v16816_v21, %v18816_v51  ;;  %v15149_v28 = vrot.slane %v16818_v46, %v18816_v51 }
 0x70b   : > { %v6950_v49 = vpop.f32.mrf.mxu0  ;;  %v7023_v47 = vpop.f32.mrf.mxu1  ;;  %v15158_v17 = vcombine.high %v15101_v2, %v15117_v30  ;;  %v15190_v18 = vcombine.high %v15133_v12, %v15149_v28  ;;  %v15157_v1 = vcombine.low %v15101_v2, %v15117_v30  ;;  %v15189_v6 = vcombine.low %v15133_v12, %v15149_v28 }
 0x70c   : > { %v7177_v38 = vadd.f32 %v6950_v49, %v19822_v40  ;;  %v7178_v52 = vadd.f32 %v7023_v47, %v19824_v55 }
 0x70d   : > { %v17496_v4 = vpop.f32.mrf.mxu0  ;;  %v17501_v11 = vpop.f32.mrf.mxu1  ;;  %v20141_v14 = vrot.slane %v15158_v17, %v18826_v59  ;;  %v20144_v53 = vrot.slane %v15190_v18, %v18826_v59  ;;  %v20147_v42 = vrot.slane %v15157_v1, %v18826_v59  ;;  %v20150_v23 = vrot.slane %v15189_v6, %v18826_v59 }
 0x70f   : > { %21983 = vst [vmem:[#allocation3_spill] sm:$0xff] %v20141_v14  ;;  %21984 = vst [vmem:[#allocation8_spill] sm:$0xff] %v20144_v53 }
 0x710   : > { %21985 = vst [vmem:[#allocation6_spill] sm:$0xff] %v20147_v42  ;;  %21986 = vst [vmem:[#allocation9_spill] sm:$0xff] %v20150_v23  ;;  %v7096_v40 = vpop.f32.mrf.mxu0  ;;  %v7169_v55 = vpop.f32.mrf.mxu1 }
 0x711   : > { %v7179_v46 = vadd.f32 %v7096_v40, %v19826_v60  ;;  %v7180_v2 = vadd.f32 %v7169_v55, %v19828_v27 }
 0x712   : > { %v17506_v28 = vpop.f32.mrf.mxu0  ;;  %v17511_v49 = vpop.f32.mrf.mxu1 }
 0x713   : > { %v7213_v47 = vcombine.low %v7177_v38, %v7179_v46  ;;  %v7214_v17 = vcombine.high %v7177_v38, %v7179_v46  ;;  %v7229_v18 = vcombine.low %v7178_v52, %v7180_v2  ;;  %v7230_v4 = vcombine.high %v7178_v52, %v7180_v2 }
 0x714   : > { %v20162_v11 = vpop.f32.mrf.mxu0  ;;  %v20164_v1 = vpop.f32.mrf.mxu1 }
 0x715   : > { %v7221_v60 = vrot.slane %v7213_v47, %v18816_v51  ;;  %v7228_v27 = vrot.slane %v7214_v17, %v18816_v51  ;;  %v7237_v6 = vrot.slane %v7229_v18, %v18816_v51  ;;  %v7244_v40 = vrot.slane %v7230_v4, %v18816_v51 }
 0x716   : > { %v17516_v55 = vpop.f32.mrf.mxu0  ;;  %v17521_v12 = vpop.f32.mrf.mxu1 }
 0x717   : > { %v7277_v28 = vcombine.low %v7221_v60, %v7237_v6  ;;  %v7278_v49 = vcombine.high %v7221_v60, %v7237_v6  ;;  %v7293_v30 = vcombine.low %v7228_v27, %v7244_v40  ;;  %v7294_v38 = vcombine.high %v7228_v27, %v7244_v40 }
 0x718   : > { %v20170_v46 = vpop.f32.mrf.mxu0  ;;  %v20172_v52 = vpop.f32.mrf.mxu1 }
 0x719   : > { %v7285_v2 = vrot.slane %v7277_v28, %v18826_v59  ;;  %v7292_v47 = vrot.slane %v7278_v49, %v18826_v59  ;;  %v7301_v17 = vrot.slane %v7293_v30, %v18826_v59  ;;  %v7308_v18 = vrot.slane %v7294_v38, %v18826_v59 }
 0x71a   : > { %v17526_v21 = vpop.f32.mrf.mxu0  ;;  %v17531_v4 = vpop.f32.mrf.mxu1 }
 0x71b   : > { %v16813_v55 = vcombine.low %v7285_v2, %v7292_v47  ;;  %v16815_v12 = vcombine.high %v7285_v2, %v7292_v47  ;;  %v16817_v5 = vcombine.low %v7301_v17, %v7308_v18  ;;  %v16819_v60 = vcombine.high %v7301_v17, %v7308_v18 }
 0x71c   : > { %v20178_v6 = vpop.f32.mrf.mxu0  ;;  %v20180_v27 = vpop.f32.mrf.mxu1 }
 0x71d   : > { %v15108_v40 = vrot.slane %v16813_v55, %v18816_v51  ;;  %v15124_v28 = vrot.slane %v16815_v12, %v18816_v51  ;;  %v15140_v49 = vrot.slane %v16817_v5, %v18816_v51  ;;  %v15156_v30 = vrot.slane %v16819_v60, %v18816_v51 }
 0x71e   : > { %v17536_v23 = vpop.f32.mrf.mxu0  ;;  %v17541_v38 = vpop.f32.mrf.mxu1 }
 0x71f   : > { %v15173_v21 = vcombine.low %v15108_v40, %v15124_v28  ;;  %v15205_v4 = vcombine.low %v15140_v49, %v15156_v30  ;;  %v15174_v42 = vcombine.high %v15108_v40, %v15124_v28  ;;  %v15206_v2 = vcombine.high %v15140_v49, %v15156_v30 }
 0x720   : > { %v20186_v47 = vpop.f32.mrf.mxu0  ;;  %v20188_v17 = vpop.f32.mrf.mxu1 }
 0x721   : > { %v20191_v18 = vrot.slane %v15173_v21, %v18826_v59  ;;  %v20194_v55 = vrot.slane %v15205_v4, %v18826_v59  ;;  %v20197_v60 = vrot.slane %v15174_v42, %v18826_v59  ;;  %v20200_v23 = vrot.slane %v15206_v2, %v18826_v59 }
 0x722   : > { %v17546_v12 = vpop.f32.mrf.mxu0  ;;  %v17551_v5 = vpop.f32.mrf.mxu1 }
 0x723   : > { %21987 = vst [vmem:[#allocation7_spill] sm:$0xff] %v20191_v18  ;;  %21988 = vst [vmem:[#allocation48_spill] sm:$0xff] %v20194_v55 }
 0x724   : > { %21989 = vst [vmem:[#allocation49_spill] sm:$0xff] %v20197_v60  ;;  %21990 = vst [vmem:[#allocation50_spill] sm:$0xff] %v20200_v23  ;;  %v8063_v49 = vpop.f32.mrf.mxu0  ;;  %v8133_v30 = vpop.f32.mrf.mxu1 }
 0x725   : > { %v20210_v4 = vmul.f32 0.5, %v8063_v49  ;;  %v20212_v42 = vmul.f32 0.5, %v8133_v30 }
 0x726   : > { %v17556_v2 = vpop.f32.mrf.mxu0  ;;  %v17561_v12 = vpop.f32.mrf.mxu1 }
 0x727   : > { %v8568_v5 = vsel %vm3972_vm3, %v20212_v42, -inf  ;;  %v8565_v28 = vsel %vm3972_vm3, %v20210_v4, -inf }
 0x728   : > { %8569 = vmax.xlane.f32.xlu0 %v8568_v5  ;;  %v8273_v40 = vpop.f32.mrf.mxu1  ;;  %8566 = vmax.xlane.f32.xlu1 %v8565_v28  ;;  %v8203_v55 = vpop.f32.mrf.mxu0 }
 0x729   : > { %v20218_v38 = vmul.f32 0.5, %v8273_v40  ;;  %v20220_v18 = vmul.f32 0.5, %v8203_v55 }
 0x72a   : > { %v17566_v49 = vpop.f32.mrf.mxu0  ;;  %v17571_v21 = vpop.f32.mrf.mxu1 }
 0x72b   : > { %v8574_v30 = vsel %vm3972_vm3, %v20218_v38, -inf  ;;  %v8571_v2 = vsel %vm3972_vm3, %v20220_v18, -inf }
 0x72c   : > { %v8413_v12 = vpop.f32.mrf.mxu1  ;;  %8575 = vmax.xlane.f32.xlu1 %v8574_v30  ;;  %8572 = vmax.xlane.f32.xlu0 %v8571_v2  ;;  %v8343_v23 = vpop.f32.mrf.mxu0  ;;  %v20229_v30 = vmul.f32 0.5, %v20162_v11  ;;  %v20232_v2 = vmul.f32 0.5, %v20164_v1  ;;  %v20247_v11 = vmul.f32 0.5, %v20178_v6  ;;  %v20250_v1 = vmul.f32 0.5, %v20180_v27 }
 0x72d   : > { %v8562_v5 = vmul.f32 0.5, %v8413_v12  ;;  %v8561_v60 = vmul.f32 0.5, %v8343_v23  ;;  %v20237_v12 = vmul.f32 0.5, %v20170_v46 }
 0x72e   : > { %v17576_v28 = vpop.f32.mrf.mxu0  ;;  %v17581_v53 = vpop.f32.mrf.mxu1  ;;  %v7924_v6 = vsel %vm3972_vm3, %v20250_v1, -inf  ;;  %v7921_v27 = vsel %vm3972_vm3, %v20247_v11, -inf }
 0x72f   : > { %v8580_v40 = vsel %vm3972_vm3, %v8562_v5, -inf  ;;  %v8577_v55 = vsel %vm3972_vm3, %v8561_v60, -inf  ;;  %v20240_v28 = vmul.f32 0.5, %v20172_v52  ;;  %v7915_v52 = vsel %vm3972_vm3, %v20237_v12, -inf }
 0x730   : > { %v8553_v49 = vpop.f32.mrf.mxu1  ;;  %8581 = vmax.xlane.f32.xlu1 %v8580_v40  ;;  %8578 = vmax.xlane.f32.xlu0 %v8577_v55  ;;  %v8483_v21 = vpop.f32.mrf.mxu0  ;;  %v20257_v40 = vmul.f32 0.5, %v20186_v47  ;;  %v20260_v55 = vmul.f32 0.5, %v20188_v17 }
 0x731   : > { %v8564_v14 = vmul.f32 0.5, %v8553_v49  ;;  %v8563_v19 = vmul.f32 0.5, %v8483_v21  ;;  %v7918_v46 = vsel %vm3972_vm3, %v20240_v28, -inf }
 0x732   : > { %v17586_v62 = vpop.f32.mrf.mxu0  ;;  %v17591_v3 = vpop.f32.mrf.mxu1  ;;  %v7930_v49 = vsel %vm3972_vm3, %v20260_v55, -inf  ;;  %v7927_v21 = vsel %vm3972_vm3, %v20257_v40, -inf }
 0x733   : > { %v8586_v53 = vsel %vm3972_vm3, %v8564_v14, -inf  ;;  %v8583_v23 = vsel %vm3972_vm3, %v8563_v19, -inf  ;;  %v7912_v3 = vsel %vm3972_vm3, %v20232_v2, -inf  ;;  %v7909_v62 = vsel %vm3972_vm3, %v20229_v30, -inf }
 0x734   : > { %8587 = vmax.xlane.f32.xlu1 %v8586_v53  ;;  %8584 = vmax.xlane.f32.xlu0 %v8583_v23 }
 0x738   : > { %7913 = vmax.xlane.f32.xlu1 %v7912_v3  ;;  %7910 = vmax.xlane.f32.xlu0 %v7909_v62 }
 0x73c   : > { %7919 = vmax.xlane.f32.xlu1 %v7918_v46  ;;  %7916 = vmax.xlane.f32.xlu0 %v7915_v52 }
 0x740   : > { %7925 = vmax.xlane.f32.xlu1 %v7924_v6  ;;  %7922 = vmax.xlane.f32.xlu0 %v7921_v27 }
 0x744   : > { %7931 = vmax.xlane.f32.xlu1 %v7930_v49  ;;  %7928 = vmax.xlane.f32.xlu0 %v7927_v21 }
 0x7b1   : > { %v8570_v47 = vpop.xlane.xlu0 %8569  ;;  %v8567_v53 = vpop.xlane.xlu1 %8566 }
 0x7b2   : > { %v8590_v17 = vsub.f32 %v20212_v42, %v8570_v47  ;;  %v8589_v23 = vsub.f32 %v20210_v4, %v8567_v53 }
 0x7b4   : > { %v8599_v3 = vmul.f32 1.442695, %v8590_v17  ;;  %v8597_v62 = vmul.f32 1.442695, %v8589_v23 }
 0x7b5   : > { %v8576_v46 = vpop.xlane.xlu1 %8575  ;;  %v8573_v52 = vpop.xlane.xlu0 %8572 }
 0x7b6   : > { %18272 = vpow2.f32 %v8599_v3  ;;  %v8592_v6 = vsub.f32 %v20218_v38, %v8576_v46  ;;  %v8591_v27 = vsub.f32 %v20220_v18, %v8573_v52 }
 0x7b7   : > { %18274 = vpow2.f32 %v8597_v62 }
 0x7b8   : > { %v8603_v15 = vmul.f32 1.442695, %v8592_v6  ;;  %v8601_v34 = vmul.f32 1.442695, %v8591_v27 }
 0x7b9   : > { %v8582_v49 = vpop.xlane.xlu1 %8581  ;;  %v8579_v21 = vpop.xlane.xlu0 %8578 }
 0x7ba   : > { %18276 = vpow2.f32 %v8603_v15  ;;  %v8594_v8 = vsub.f32 %v8562_v5, %v8582_v49  ;;  %v8593_v22 = vsub.f32 %v8561_v60, %v8579_v21 }
 0x7bb   : > { %18278 = vpow2.f32 %v8601_v34 }
 0x7bc   : > { %v8607_v42 = vmul.f32 1.442695, %v8594_v8  ;;  %v8605_v4 = vmul.f32 1.442695, %v8593_v22 }
 0x7bd   : > { %v8588_v47 = vpop.xlane.xlu1 %8587  ;;  %v8585_v53 = vpop.xlane.xlu0 %8584 }
 0x7be   : > { %18280 = vpow2.f32 %v8607_v42  ;;  %v8596_v17 = vsub.f32 %v8564_v14, %v8588_v47  ;;  %v8595_v23 = vsub.f32 %v8563_v19, %v8585_v53 }
 0x7bf   : > { %18282 = vpow2.f32 %v8605_v4 }
 0x7c0   : > { %v8611_v38 = vmul.f32 1.442695, %v8596_v17  ;;  %v8609_v3 = vmul.f32 1.442695, %v8595_v23 }
 0x7c1   : > { %v7914_v18 = vpop.xlane.xlu1 %7913  ;;  %v7911_v62 = vpop.xlane.xlu0 %7910 }
 0x7c2   : > { %18284 = vpow2.f32 %v8611_v38  ;;  %v7934_v46 = vsub.f32 %v20232_v2, %v7914_v18  ;;  %v7933_v15 = vsub.f32 %v20229_v30, %v7911_v62 }
 0x7c3   : > { %v20276_v5 = vpop.eup %18272  ;;  %18286 = vpow2.f32 %v8609_v3 }
 0x7c4   : > { %v20278_v34 = vpop.eup %18274  ;;  %v7943_v22 = vmul.f32 1.442695, %v7934_v46  ;;  %v7941_v8 = vmul.f32 1.442695, %v7933_v15  ;;  %v8616_v19 = vsel %vm3972_vm3, %v20276_v5, 0.0 }
 0x7c5   : > { %8617 = vadd.xlane.f32.xlu1 %v8616_v19  ;;  %v7920_v14 = vpop.xlane.xlu1 %7919  ;;  %v8613_v60 = vsel %vm3972_vm3, %v20278_v34, 0.0  ;;  %v7917_v52 = vpop.xlane.xlu0 %7916 }
 0x7c6   : > { %18288 = vpow2.f32 %v7943_v22  ;;  %v7936_v2 = vsub.f32 %v20240_v28, %v7920_v14  ;;  %8614 = vadd.xlane.f32.xlu0 %v8613_v60  ;;  %v7935_v30 = vsub.f32 %v20237_v12, %v7917_v52 }
 0x7c7   : > { %v20286_v6 = vpop.eup %18276  ;;  %18290 = vpow2.f32 %v7941_v8 }
 0x7c8   : > { %v20288_v27 = vpop.eup %18278  ;;  %v7947_v49 = vmul.f32 1.442695, %v7936_v2  ;;  %v7945_v21 = vmul.f32 1.442695, %v7935_v30  ;;  %v8622_v42 = vsel %vm3972_vm3, %v20286_v6, 0.0 }
 0x7c9   : > { %8623 = vadd.xlane.f32.xlu1 %v8622_v42  ;;  %v7926_v4 = vpop.xlane.xlu1 %7925  ;;  %v8619_v47 = vsel %vm3972_vm3, %v20288_v27, 0.0  ;;  %v7923_v53 = vpop.xlane.xlu0 %7922 }
 0x7ca   : > { %18292 = vpow2.f32 %v7947_v49  ;;  %v7938_v28 = vsub.f32 %v20250_v1, %v7926_v4  ;;  %8620 = vadd.xlane.f32.xlu0 %v8619_v47  ;;  %v7937_v12 = vsub.f32 %v20247_v11, %v7923_v53 }
 0x7cb   : > { %v20296_v17 = vpop.eup %18280  ;;  %18294 = vpow2.f32 %v7945_v21 }
 0x7cc   : > { %v20298_v23 = vpop.eup %18282  ;;  %v7951_v38 = vmul.f32 1.442695, %v7938_v28  ;;  %v7949_v3 = vmul.f32 1.442695, %v7937_v12  ;;  %v8628_v18 = vsel %vm3972_vm3, %v20296_v17, 0.0 }
 0x7cd   : > { %8629 = vadd.xlane.f32.xlu1 %v8628_v18  ;;  %v7932_v62 = vpop.xlane.xlu1 %7931  ;;  %v8625_v46 = vsel %vm3972_vm3, %v20298_v23, 0.0  ;;  %v7929_v15 = vpop.xlane.xlu0 %7928 }
 0x7ce   : > { %18296 = vpow2.f32 %v7951_v38  ;;  %v7940_v1 = vsub.f32 %v20260_v55, %v7932_v62  ;;  %8626 = vadd.xlane.f32.xlu0 %v8625_v46  ;;  %v7939_v11 = vsub.f32 %v20257_v40, %v7929_v15 }
 0x7cf   : > { %v20306_v22 = vpop.eup %18284  ;;  %18298 = vpow2.f32 %v7949_v3 }
 0x7d0   : > { %v20308_v8 = vpop.eup %18286  ;;  %v7955_v19 = vmul.f32 1.442695, %v7940_v1  ;;  %v7953_v14 = vmul.f32 1.442695, %v7939_v11  ;;  %v8634_v60 = vsel %vm3972_vm3, %v20306_v22, 0.0 }
 0x7d1   : > { %8635 = vadd.xlane.f32.xlu1 %v8634_v60  ;;  %v8631_v52 = vsel %vm3972_vm3, %v20308_v8, 0.0 }
 0x7d2   : > { %18300 = vpow2.f32 %v7955_v19  ;;  %8632 = vadd.xlane.f32.xlu0 %v8631_v52 }
 0x7d3   : > { %v20314_v55 = vpop.eup %18288  ;;  %18302 = vpow2.f32 %v7953_v14 }
 0x7d4   : > { %v20316_v40 = vpop.eup %18290  ;;  %v7960_v2 = vsel %vm3972_vm3, %v20314_v55, 0.0 }
 0x7d5   : > { %7961 = vadd.xlane.f32.xlu1 %v7960_v2  ;;  %v7957_v30 = vsel %vm3972_vm3, %v20316_v40, 0.0 }
 0x7d6   : > { %7958 = vadd.xlane.f32.xlu0 %v7957_v30 }
 0x7d7   : > { %v20322_v49 = vpop.eup %18292 }
 0x7d8   : > { %v20324_v21 = vpop.eup %18294  ;;  %v7966_v42 = vsel %vm3972_vm3, %v20322_v49, 0.0 }
 0x7d9   : > { %7967 = vadd.xlane.f32.xlu1 %v7966_v42  ;;  %v7963_v4 = vsel %vm3972_vm3, %v20324_v21, 0.0 }
 0x7da   : > { %7964 = vadd.xlane.f32.xlu0 %v7963_v4 }
 0x7db   : > { %v20330_v47 = vpop.eup %18296 }
 0x7dc   : > { %v20332_v53 = vpop.eup %18298  ;;  %v7972_v28 = vsel %vm3972_vm3, %v20330_v47, 0.0 }
 0x7dd   : > { %7973 = vadd.xlane.f32.xlu1 %v7972_v28  ;;  %v7969_v12 = vsel %vm3972_vm3, %v20332_v53, 0.0 }
 0x7de   : > { %7970 = vadd.xlane.f32.xlu0 %v7969_v12 }
 0x7df   : > { %v20338_v38 = vpop.eup %18300 }
 0x7e0   : > { %v20340_v3 = vpop.eup %18302  ;;  %v7978_v18 = vsel %vm3972_vm3, %v20338_v38, 0.0 }
 0x7e1   : > { %7979 = vadd.xlane.f32.xlu1 %v7978_v18  ;;  %v7975_v62 = vsel %vm3972_vm3, %v20340_v3, 0.0 }
 0x7e2   : > { %7976 = vadd.xlane.f32.xlu0 %v7975_v62 }
 0x84e   : > { %v8618_v46 = vpop.xlane.xlu1 %8617 }
 0x84f   : > { %18304 = vrcp.f32 %v8618_v46  ;;  %v8615_v15 = vpop.xlane.xlu0 %8614 }
 0x850   : > { %18306 = vrcp.f32 %v8615_v15 }
 0x852   : > { %v8624_v1 = vpop.xlane.xlu1 %8623 }
 0x853   : > { %18308 = vrcp.f32 %v8624_v1  ;;  %v8621_v11 = vpop.xlane.xlu0 %8620 }
 0x854   : > { %18310 = vrcp.f32 %v8621_v11 }
 0x856   : > { %v8630_v19 = vpop.xlane.xlu1 %8629 }
 0x857   : > { %18312 = vrcp.f32 %v8630_v19  ;;  %v8627_v14 = vpop.xlane.xlu0 %8626 }
 0x858   : > { %18314 = vrcp.f32 %v8627_v14 }
 0x85a   : > { %v8636_v60 = vpop.xlane.xlu1 %8635 }
 0x85b   : > { %18316 = vrcp.f32 %v8636_v60  ;;  %v8633_v52 = vpop.xlane.xlu0 %8632 }
 0x85c   : > { %v18305_v2 = vpop.eup %18304  ;;  %18318 = vrcp.f32 %v8633_v52 }
 0x85d   : > { %v18307_v30 = vpop.eup %18306  ;;  %v8646_v42 = vmul.f32 %v18305_v2, %v20276_v5 }
 0x85e   : > { %v7962_v4 = vpop.xlane.xlu1 %7961  ;;  %v8645_v28 = vmul.f32 %v18307_v30, %v20278_v34 }
 0x85f   : > { %18320 = vrcp.f32 %v7962_v4  ;;  %v7959_v12 = vpop.xlane.xlu0 %7958  ;;  %17600 = vmatmul.mubr.msk.f32.vlgmr.msra.gmra.mxu1 %vm3972_vm3, %v8646_v42 }
 0x860   : > { %v18309_v18 = vpop.eup %18308  ;;  %18322 = vrcp.f32 %v7959_v12  ;;  %17595 = vmatmul.mubr.msk.f32.vlgmr.msra.gmra.mxu0 %vm3972_vm3, %v8645_v28  ;;  %17608 = vmatpush3.msra.mxu1 %v19206_v26 }
 0x861   : > { %v18311_v62 = vpop.eup %18310  ;;  %17603 = vmatpush3.msra.mxu0 %v19204_v7  ;;  %17609 = vmatprep.mubr.msk.f32.mxu1 %vm18494_vm0, %v21934_v61  ;;  %v8648_v5 = vmul.f32 %v18309_v18, %v20286_v6 }
 0x862   : > { %17617 = vmatprep.subr.mxu1 %v21934_v61  ;;  %v7968_v34 = vpop.xlane.xlu1 %7967  ;;  %17604 = vmatprep.mubr.msk.f32.mxu0 %vm18494_vm0, %v21934_v61  ;;  %v8647_v46 = vmul.f32 %v18311_v62, %v20288_v27 }
 0x863   : > { %18324 = vrcp.f32 %v7968_v34  ;;  %17612 = vmatprep.subr.mxu0 %v21934_v61  ;;  %v7965_v15 = vpop.xlane.xlu0 %7964  ;;  %17610 = vmatmul.mubr.msk.f32.vlgmr.msra.gmra.mxu1 %vm3972_vm3, %v8648_v5 }
 0x864   : > { %v18313_v1 = vpop.eup %18312  ;;  %18326 = vrcp.f32 %v7965_v15  ;;  %17605 = vmatmul.mubr.msk.f32.vlgmr.msra.gmra.mxu0 %vm3972_vm3, %v8647_v46  ;;  %17618 = vmatpush3.msra.mxu1 %v19465_v54 }
 0x865   : > { %v18315_v6 = vpop.eup %18314  ;;  %17613 = vmatpush3.msra.mxu0 %v19456_v50  ;;  %17619 = vmatprep.mubr.msk.f32.mxu1 %vm18494_vm0, %v21934_v61  ;;  %v8650_v27 = vmul.f32 %v18313_v1, %v20296_v17 }
 0x866   : > { %17627 = vmatprep.subr.mxu1 %v21934_v61  ;;  %v7974_v11 = vpop.xlane.xlu1 %7973  ;;  %17614 = vmatprep.mubr.msk.f32.mxu0 %vm18494_vm0, %v21934_v61  ;;  %v8649_v19 = vmul.f32 %v18315_v6, %v20298_v23 }
 0x867   : > { %18328 = vrcp.f32 %v7974_v11  ;;  %17622 = vmatprep.subr.mxu0 %v21934_v61  ;;  %v7971_v14 = vpop.xlane.xlu0 %7970  ;;  %17620 = vmatmul.mubr.msk.f32.vlgmr.msra.gmra.mxu1 %vm3972_vm3, %v8650_v27 }
 0x868   : > { %v18317_v60 = vpop.eup %18316  ;;  %18330 = vrcp.f32 %v7971_v14  ;;  %17615 = vmatmul.mubr.msk.f32.vlgmr.msra.gmra.mxu0 %vm3972_vm3, %v8649_v19  ;;  %17628 = vmatpush3.msra.mxu1 %v19481_v35 }
 0x869   : > { %v18319_v17 = vpop.eup %18318  ;;  %17623 = vmatpush3.msra.mxu0 %v19555_v0  ;;  %17629 = vmatprep.mubr.msk.f32.mxu1 %vm18494_vm0, %v21934_v61  ;;  %v8652_v23 = vmul.f32 %v18317_v60, %v20306_v22 }
 0x86a   : > { %17637 = vmatprep.subr.mxu1 %v21934_v61  ;;  %v7980_v52 = vpop.xlane.xlu1 %7979  ;;  %17624 = vmatprep.mubr.msk.f32.mxu0 %vm18494_vm0, %v21934_v61  ;;  %v8651_v2 = vmul.f32 %v18319_v17, %v20308_v8 }
 0x86b   : > { %18332 = vrcp.f32 %v7980_v52  ;;  %17632 = vmatprep.subr.mxu0 %v21934_v61  ;;  %v7977_v30 = vpop.xlane.xlu0 %7976  ;;  %17630 = vmatmul.mubr.msk.f32.vlgmr.msra.gmra.mxu1 %vm3972_vm3, %v8652_v23 }
 0x86c   : > { %v18321_v42 = vpop.eup %18320  ;;  %18334 = vrcp.f32 %v7977_v30  ;;  %17625 = vmatmul.mubr.msk.f32.vlgmr.msra.gmra.mxu0 %vm3972_vm3, %v8651_v2  ;;  %17638 = vmatpush3.msra.mxu1 %v19557_v45 }
 0x86d   : > { %v18323_v22 = vpop.eup %18322  ;;  %17633 = vmatpush3.msra.mxu0 %v19546_v63  ;;  %17634 = vmatprep.mubr.msk.f32.mxu0 %vm18494_vm0, %v21934_v61  ;;  %v7990_v8 = vmul.f32 %v18321_v42, %v20314_v55 }
 0x86e   : > { %17639 = vmatprep.mubr.msk.f32.mxu1 %vm18494_vm0, %v21934_v61  ;;  %17642 = vmatprep.subr.mxu0 %v21934_v61  ;;  %v7989_v4 = vmul.f32 %v18323_v22, %v20316_v40 }
 0x86f   : > { %17647 = vmatprep.subr.mxu1 %v21934_v61  ;;  %17640 = vmatmul.mubr.msk.f32.vlgmr.msra.gmra.mxu1 %vm3972_vm3, %v7990_v8 }
 0x870   : > { %v18325_v28 = vpop.eup %18324  ;;  %17635 = vmatmul.mubr.msk.f32.vlgmr.msra.gmra.mxu0 %vm3972_vm3, %v7989_v4  ;;  %17648 = vmatpush3.msra.mxu1 %v19569_v58 }
 0x871   : > { %v18327_v12 = vpop.eup %18326  ;;  %17643 = vmatpush3.msra.mxu0 %v19563_v29  ;;  %17644 = vmatprep.mubr.msk.f32.mxu0 %vm18494_vm0, %v21934_v61  ;;  %v7992_v55 = vmul.f32 %v18325_v28, %v20322_v49 }
 0x872   : > { %17649 = vmatprep.mubr.msk.f32.mxu1 %vm18494_vm0, %v21934_v61  ;;  %17652 = vmatprep.subr.mxu0 %v21934_v61  ;;  %v7991_v40 = vmul.f32 %v18327_v12, %v20324_v21 }
 0x873   : > { %17657 = vmatprep.subr.mxu1 %v21934_v61  ;;  %17650 = vmatmul.mubr.msk.f32.vlgmr.msra.gmra.mxu1 %vm3972_vm3, %v7992_v55 }
 0x874   : > { %v18329_v18 = vpop.eup %18328  ;;  %17645 = vmatmul.mubr.msk.f32.vlgmr.msra.gmra.mxu0 %vm3972_vm3, %v7991_v40  ;;  %17658 = vmatpush3.msra.mxu1 %v19598_v43 }
 0x875   : > { %v18331_v62 = vpop.eup %18330  ;;  %17653 = vmatpush3.msra.mxu0 %v19571_v36  ;;  %17654 = vmatprep.mubr.msk.f32.mxu0 %vm18494_vm0, %v21934_v61  ;;  %v7994_v49 = vmul.f32 %v18329_v18, %v20330_v47 }
 0x876   : > { %17659 = vmatprep.mubr.msk.f32.mxu1 %vm18494_vm0, %v21934_v61  ;;  %17662 = vmatprep.subr.mxu0 %v21934_v61  ;;  %v7993_v21 = vmul.f32 %v18331_v62, %v20332_v53 }
 0x877   : > { %17667 = vmatprep.subr.mxu1 %v21934_v61  ;;  %17660 = vmatmul.mubr.msk.f32.vlgmr.msra.gmra.mxu1 %vm3972_vm3, %v7994_v49 }
 0x878   : > { %v18333_v5 = vpop.eup %18332  ;;  %17655 = vmatmul.mubr.msk.f32.vlgmr.msra.gmra.mxu0 %vm3972_vm3, %v7993_v21  ;;  %17668 = vmatpush3.msra.mxu1 %v19694_v25 }
 0x879   : > { %v18335_v34 = vpop.eup %18334  ;;  %17663 = vmatpush3.msra.mxu0 %v19606_v31  ;;  %17664 = vmatprep.mubr.msk.f32.mxu0 %vm18494_vm0, %v21934_v61  ;;  %v7996_v47 = vmul.f32 %v18333_v5, %v20338_v38  ;;  %v21991_v38 = vld [vmem:[#allocation45_spill] sm:$0xff] }
 0x87a   : > { %17669 = vmatprep.mubr.msk.f32.mxu1 %vm18494_vm0, %v21934_v61  ;;  %17672 = vmatprep.subr.mxu0 %v21934_v61  ;;  %v7995_v53 = vmul.f32 %v18335_v34, %v20340_v3  ;;  %v21992_v3 = vld [vmem:[#allocation44_spill] sm:$0xff] }
 0x87b   : > { %17677 = vmatprep.subr.mxu1 %v21934_v61  ;;  %17670 = vmatmul.mubr.msk.f32.vlgmr.msra.gmra.mxu1 %vm3972_vm3, %v7996_v47 }
 0x87c   : > { %17665 = vmatmul.mubr.msk.f32.vlgmr.msra.gmra.mxu0 %vm3972_vm3, %v7995_v53  ;;  %17678 = vmatpush3.xpose.msk.msra.mxu1 %vm3355_vm2, %v19719_v57 }
 0x87d   : > { %17673 = vmatpush3.xpose.msk.msra.mxu0 %vm3355_vm2, %v19713_v9  ;;  %17674 = vmatprep.mubr.msk.f32.mxu0 %vm18494_vm0, %v21934_v61 }
 0x87e   : > { %17679 = vmatprep.mubr.msk.f32.mxu1 %vm18494_vm0, %v21934_v61  ;;  %17682 = vmatprep.subr.mxu0 %v21934_v61 }
 0x87f   : > { %17687 = vmatprep.subr.mxu1 %v21934_v61  ;;  %17680 = vmatmul.mubr.msk.f32.vlgmr.msra.gmra.mxu1 %vm3355_vm2, %v19992_v16  ;;  %v21994_v16 = vld [vmem:[#allocation46_spill] sm:$0xff] }
 0x880   : > { %17675 = vmatmul.mubr.msk.f32.vlgmr.msra.gmra.mxu0 %vm3355_vm2, %v19990_v20  ;;  %17688 = vmatpush3.xpose.msk.msra.mxu1 %vm3355_vm2, %v21991_v38  ;;  %v21993_v20 = vld [vmem:[#allocation47_spill] sm:$0xff] }
 0x881   : > { %17683 = vmatpush3.xpose.msk.msra.mxu0 %vm3355_vm2, %v21992_v3  ;;  %17684 = vmatprep.mubr.msk.f32.mxu0 %vm18494_vm0, %v21934_v61 }
 0x882   : > { %17689 = vmatprep.mubr.msk.f32.mxu1 %vm18494_vm0, %v21934_v61  ;;  %17692 = vmatprep.subr.mxu0 %v21934_v61 }
 0x883   : > { %17697 = vmatprep.subr.mxu1 %v21934_v61  ;;  %17690 = vmatmul.mubr.msk.f32.vlgmr.msra.gmra.mxu1 %vm3355_vm2, %v20010_v41  ;;  %v21996_v41 = vld [vmem:[#allocation15_spill] sm:$0xff] }
 0x884   : > { %17685 = vmatmul.mubr.msk.f32.vlgmr.msra.gmra.mxu0 %vm3355_vm2, %v20004_v32  ;;  %17698 = vmatpush3.xpose.msk.msra.mxu1 %vm3355_vm2, %v21993_v20  ;;  %v21995_v32 = vld [vmem:[#allocation24_spill] sm:$0xff] }
 0x885   : > { %17693 = vmatpush3.xpose.msk.msra.mxu0 %vm3355_vm2, %v21994_v16  ;;  %17694 = vmatprep.mubr.msk.f32.mxu0 %vm18494_vm0, %v21934_v61 }
 0x886   : > { %17699 = vmatprep.mubr.msk.f32.mxu1 %vm18494_vm0, %v21934_v61  ;;  %17702 = vmatprep.subr.mxu0 %v21934_v61 }
 0x887   : > { %17707 = vmatprep.subr.mxu1 %v21934_v61  ;;  %17700 = vmatmul.mubr.msk.f32.vlgmr.msra.gmra.mxu1 %vm3355_vm2, %v20031_v56  ;;  %v21998_v56 = vld [vmem:[#allocation26_spill] sm:$0xff] }
 0x888   : > { %17695 = vmatmul.mubr.msk.f32.vlgmr.msra.gmra.mxu0 %vm3355_vm2, %v20029_v39  ;;  %17708 = vmatpush3.xpose.msk.msra.mxu1 %vm3355_vm2, %v21995_v32  ;;  %v21997_v39 = vld [vmem:[#allocation30_spill] sm:$0xff] }
 0x889   : > { %17703 = vmatpush3.xpose.msk.msra.mxu0 %vm3355_vm2, %v21996_v41  ;;  %17704 = vmatprep.mubr.msk.f32.mxu0 %vm18494_vm0, %v21934_v61  ;;  %v22005_v41 = vld [vmem:[#allocation31_spill] sm:$0xff] }
 0x88a   : > { %17709 = vmatprep.mubr.msk.f32.mxu1 %vm18494_vm0, %v21934_v61  ;;  %17712 = vmatprep.subr.mxu0 %v21934_v61 }
 0x88b   : > { %17717 = vmatprep.subr.mxu1 %v21934_v61  ;;  %17710 = vmatmul.mubr.msk.f32.vlgmr.msra.gmra.mxu1 %vm3355_vm2, %v20050_v33 }
 0x88c   : > { %17705 = vmatmul.mubr.msk.f32.vlgmr.msra.gmra.mxu0 %vm3355_vm2, %v20048_v24  ;;  %17718 = vmatpush3.msra.mxu1 %v21997_v39 }
 0x88d   : > { %17713 = vmatpush3.msra.mxu0 %v21998_v56  ;;  %17714 = vmatprep.mubr.msk.f32.mxu0 %vm18494_vm0, %v21934_v61 }
 0x88e   : > { %17719 = vmatprep.mubr.msk.f32.mxu1 %vm18494_vm0, %v21934_v61  ;;  %17722 = vmatprep.subr.mxu0 %v21934_v61 }
 0x88f   : > { %17727 = vmatprep.subr.mxu1 %v21934_v61 }
 0x91f   : > { %v8795_v46 = vpop.f32.mrf.mxu1 }
 0x920   : > { %v8722_v15 = vpop.f32.mrf.mxu0 }
 0x921   : > { %v17601_v33 = vpop.f32.mrf.mxu1 }
 0x922   : > { %v17596_v1 = vpop.f32.mrf.mxu0 }
 0x923   : > { %v8941_v6 = vpop.f32.mrf.mxu1 }
 0x924   : > { %v8868_v24 = vpop.f32.mrf.mxu0 }
 0x925   : > { %v17611_v27 = vpop.f32.mrf.mxu1 }
 0x926   : > { %v17606_v11 = vpop.f32.mrf.mxu0 }
 0x927   : > { %v9087_v19 = vpop.f32.mrf.mxu1 }
 0x928   : > { %v9014_v14 = vpop.f32.mrf.mxu0 }
 0x929   : > { %v17621_v60 = vpop.f32.mrf.mxu1 }
 0x92a   : > { %v17616_v17 = vpop.f32.mrf.mxu0 }
 0x92b   : > { %v9233_v23 = vpop.f32.mrf.mxu1 }
 0x92c   : > { %v9160_v52 = vpop.f32.mrf.mxu0 }
 0x92d   : > { %v17631_v2 = vpop.f32.mrf.mxu1 }
 0x92e   : > { %v17626_v30 = vpop.f32.mrf.mxu0 }
 0x92f   : > { %v9379_v42 = vpop.f32.mrf.mxu1 }
 0x930   : > { %v9306_v22 = vpop.f32.mrf.mxu0  ;;  %v20498_v8 = vadd.f32 %v9379_v42, %v8795_v46 }
 0x931   : > { %v20500_v4 = vadd.f32 %v9306_v22, %v8722_v15  ;;  %v17641_v28 = vpop.f32.mrf.mxu1 }
 0x932   : > { %v17636_v12 = vpop.f32.mrf.mxu0 }
 0x933   : > { %v9525_v55 = vpop.f32.mrf.mxu1 }
 0x934   : > { %v9452_v40 = vpop.f32.mrf.mxu0  ;;  %v20502_v18 = vadd.f32 %v9525_v55, %v8941_v6 }
 0x935   : > { %v20504_v62 = vadd.f32 %v9452_v40, %v8868_v24  ;;  %v17651_v49 = vpop.f32.mrf.mxu1 }
 0x936   : > { %v17646_v21 = vpop.f32.mrf.mxu0 }
 0x937   : > { %v9671_v5 = vpop.f32.mrf.mxu1 }
 0x938   : > { %v9598_v34 = vpop.f32.mrf.mxu0  ;;  %v20506_v47 = vadd.f32 %v9671_v5, %v9087_v19 }
 0x939   : > { %v20508_v53 = vadd.f32 %v9598_v34, %v9014_v14  ;;  %v17661_v46 = vpop.f32.mrf.mxu1 }
 0x93a   : > { %v17656_v33 = vpop.f32.mrf.mxu0 }
 0x93b   : > { %v9817_v15 = vpop.f32.mrf.mxu1 }
 0x93c   : > { %v9744_v1 = vpop.f32.mrf.mxu0  ;;  %v20510_v27 = vadd.f32 %v9817_v15, %v9233_v23 }
 0x93d   : > { %v20512_v11 = vadd.f32 %v9744_v1, %v9160_v52  ;;  %v17671_v6 = vpop.f32.mrf.mxu1 }
 0x93e   : > { %v17666_v60 = vpop.f32.mrf.mxu0 }
 0x93f   : > { %v9957_v24 = vpop.f32.mrf.mxu1 }
 0x940   : > { %v9887_v17 = vpop.f32.mrf.mxu0  ;;  %v10382_v2 = vmul.f32 0.5, %v9957_v24 }
 0x941   : > { %v10381_v30 = vmul.f32 0.5, %v9887_v17  ;;  %v17681_v42 = vpop.f32.mrf.mxu1 }
 0x942   : > { %v17676_v22 = vpop.f32.mrf.mxu0  ;;  %v10392_v19 = vsel %vm3972_vm3, %v10382_v2, -inf }
 0x943   : > { %10393 = vmax.xlane.f32.xlu1 %v10392_v19  ;;  %v10097_v14 = vpop.f32.mrf.mxu1  ;;  %v10389_v28 = vsel %vm3972_vm3, %v10381_v30, -inf }
 0x944   : > { %v10384_v12 = vmul.f32 0.5, %v10097_v14  ;;  %10390 = vmax.xlane.f32.xlu0 %v10389_v28  ;;  %v10027_v23 = vpop.f32.mrf.mxu0 }
 0x945   : > { %v10383_v55 = vmul.f32 0.5, %v10027_v23  ;;  %v17691_v52 = vpop.f32.mrf.mxu1 }
 0x946   : > { %v17686_v40 = vpop.f32.mrf.mxu0  ;;  %v10398_v49 = vsel %vm3972_vm3, %v10384_v12, -inf }
 0x947   : > { %10399 = vmax.xlane.f32.xlu1 %v10398_v49  ;;  %v10237_v21 = vpop.f32.mrf.mxu1  ;;  %v10395_v5 = vsel %vm3972_vm3, %v10383_v55, -inf }
 0x948   : > { %v10386_v34 = vmul.f32 0.5, %v10237_v21  ;;  %10396 = vmax.xlane.f32.xlu0 %v10395_v5  ;;  %v10167_v46 = vpop.f32.mrf.mxu0 }
 0x949   : > { %v10385_v33 = vmul.f32 0.5, %v10167_v46  ;;  %v17701_v15 = vpop.f32.mrf.mxu1 }
 0x94a   : > { %v17696_v1 = vpop.f32.mrf.mxu0  ;;  %v10404_v6 = vsel %vm3972_vm3, %v10386_v34, -inf }
 0x94b   : > { %10405 = vmax.xlane.f32.xlu1 %v10404_v6  ;;  %v10377_v60 = vpop.f32.mrf.mxu1  ;;  %v10401_v24 = vsel %vm3972_vm3, %v10385_v33, -inf }
 0x94c   : > { %v10388_v17 = vmul.f32 0.5, %v10377_v60  ;;  %10402 = vmax.xlane.f32.xlu0 %v10401_v24  ;;  %v10307_v42 = vpop.f32.mrf.mxu0 }
 0x94d   : > { %v10387_v22 = vmul.f32 0.5, %v10307_v42  ;;  %v17711_v19 = vpop.f32.mrf.mxu1 }
 0x94e   : > { %v17706_v14 = vpop.f32.mrf.mxu0  ;;  %v10410_v28 = vsel %vm3972_vm3, %v10388_v17, -inf }
 0x94f   : > { %10411 = vmax.xlane.f32.xlu1 %v10410_v28  ;;  %v10407_v23 = vsel %vm3972_vm3, %v10387_v22, -inf }
 0x950   : > { %10408 = vmax.xlane.f32.xlu0 %v10407_v23 }
 0x9cc   : > { %v10394_v52 = vpop.xlane.xlu1 %10393 }
 0x9cd   : > { %v10414_v40 = vsub.f32 %v10382_v2, %v10394_v52  ;;  %v10391_v49 = vpop.xlane.xlu0 %10390 }
 0x9ce   : > { %v10413_v21 = vsub.f32 %v10381_v30, %v10391_v49 }
 0x9cf   : > { %v10423_v5 = vmul.f32 1.442695, %v10414_v40 }
 0x9d0   : > { %v10421_v46 = vmul.f32 1.442695, %v10413_v21  ;;  %v10400_v15 = vpop.xlane.xlu1 %10399 }
 0x9d1   : > { %18336 = vpow2.f32 %v10423_v5  ;;  %v10416_v1 = vsub.f32 %v10384_v12, %v10400_v15  ;;  %v10397_v6 = vpop.xlane.xlu0 %10396 }
 0x9d2   : > { %18338 = vpow2.f32 %v10421_v46  ;;  %v10415_v60 = vsub.f32 %v10383_v55, %v10397_v6 }
 0x9d3   : > { %v10427_v24 = vmul.f32 1.442695, %v10416_v1 }
 0x9d4   : > { %v10425_v42 = vmul.f32 1.442695, %v10415_v60  ;;  %v10406_v19 = vpop.xlane.xlu1 %10405 }
 0x9d5   : > { %18340 = vpow2.f32 %v10427_v24  ;;  %v10418_v14 = vsub.f32 %v10386_v34, %v10406_v19  ;;  %v10403_v28 = vpop.xlane.xlu0 %10402 }
 0x9d6   : > { %18342 = vpow2.f32 %v10425_v42  ;;  %v10417_v23 = vsub.f32 %v10385_v33, %v10403_v28  ;;  %v21999_v28 = vld [vmem:[#allocation18_spill] sm:$0xff] }
 0x9d7   : > { %v10431_v56 = vmul.f32 1.442695, %v10418_v14 }
 0x9d8   : > { %v10429_v2 = vmul.f32 1.442695, %v10417_v23  ;;  %v10412_v52 = vpop.xlane.xlu1 %10411  ;;  %v22000_v23 = vld [vmem:[#allocation10_spill] sm:$0xff] }
 0x9d9   : > { %18344 = vpow2.f32 %v10431_v56  ;;  %v10420_v30 = vsub.f32 %v10388_v17, %v10412_v52  ;;  %v10409_v40 = vpop.xlane.xlu0 %10408  ;;  %v22001_v52 = vld [vmem:[#allocation23_spill] sm:$0xff] }
 0x9da   : > { %18346 = vpow2.f32 %v10429_v2  ;;  %v10419_v49 = vsub.f32 %v10387_v22, %v10409_v40  ;;  %v1035_v2 = vcombine.low %v22000_v23, %v21999_v28 }
 0x9db   : > { %v10435_v12 = vmul.f32 1.442695, %v10420_v30  ;;  %v22002_v30 = vld [vmem:[#allocation19_spill] sm:$0xff] }
 0x9dc   : > { %v10433_v21 = vmul.f32 1.442695, %v10419_v49  ;;  %v1051_v40 = vcombine.low %v22002_v30, %v22001_v52  ;;  %v1036_v49 = vcombine.high %v22000_v23, %v21999_v28 }
 0x9dd   : > { %18348 = vpow2.f32 %v10435_v12  ;;  %v1052_v12 = vcombine.high %v22002_v30, %v22001_v52  ;;  %v22003_v52 = vld [vmem:[#allocation25_spill] sm:$0xff]  ;;  %v22004_v30 = vld [vmem:[#allocation20_spill] sm:$0xff] }
 0x9de   : > { %v20522_v55 = vpop.eup %18336  ;;  %18350 = vpow2.f32 %v10433_v21  ;;  %v1043_v21 = vrot.slane %v1035_v2, %v18816_v51  ;;  %v1083_v2 = vcombine.low %v22004_v30, %v22003_v52 }
 0x9df   : > { %v20524_v5 = vpop.eup %18338  ;;  %v10440_v34 = vsel %vm3972_vm3, %v20522_v55, 0.0 }
 0x9e0   : > { %10441 = vadd.xlane.f32.xlu1 %v10440_v34  ;;  %v10437_v33 = vsel %vm3972_vm3, %v20524_v5, 0.0  ;;  %v1059_v34 = vrot.slane %v1051_v40, %v18816_v51  ;;  %v22006_v40 = vld [vmem:[#allocation27_spill] sm:$0xff] }
 0x9e1   : > { %10438 = vadd.xlane.f32.xlu0 %v10437_v33  ;;  %v1067_v32 = vcombine.low %v22006_v40, %v22005_v41 }
 0x9e2   : > { %v20530_v56 = vpop.eup %18340 }
 0x9e3   : > { %v20532_v17 = vpop.eup %18342  ;;  %v10446_v22 = vsel %vm3972_vm3, %v20530_v56, 0.0 }
 0x9e4   : > { %10447 = vadd.xlane.f32.xlu1 %v10446_v22  ;;  %v10443_v46 = vsel %vm3972_vm3, %v20532_v17, 0.0  ;;  %v1050_v22 = vrot.slane %v1036_v49, %v18816_v51  ;;  %v1084_v49 = vcombine.high %v22004_v30, %v22003_v52 }
 0x9e5   : > { %10444 = vadd.xlane.f32.xlu0 %v10443_v46  ;;  %v1066_v46 = vrot.slane %v1052_v12, %v18816_v51  ;;  %v1068_v12 = vcombine.high %v22006_v40, %v22005_v41 }
 0x9e6   : > { %v20538_v15 = vpop.eup %18344  ;;  %v1098_v52 = vrot.slane %v1084_v49, %v18816_v51 }
 0x9e7   : > { %v20540_v1 = vpop.eup %18346  ;;  %v10452_v6 = vsel %vm3972_vm3, %v20538_v15, 0.0  ;;  %v1115_v39 = vcombine.low %v1050_v22, %v1066_v46  ;;  %v1116_v28 = vcombine.high %v1050_v22, %v1066_v46  ;;  %v1082_v41 = vrot.slane %v1068_v12, %v18816_v51 }
 0x9e8   : > { %10453 = vadd.xlane.f32.xlu1 %v10452_v6  ;;  %v10449_v60 = vsel %vm3972_vm3, %v20540_v1, 0.0 }
 0x9e9   : > { %10450 = vadd.xlane.f32.xlu0 %v10449_v60  ;;  %v1099_v60 = vcombine.low %v1043_v21, %v1059_v34  ;;  %v1123_v22 = vrot.slane %v1115_v39, %v18826_v59  ;;  %v1130_v46 = vrot.slane %v1116_v28, %v18826_v59  ;;  %v1148_v38 = vcombine.high %v1082_v41, %v1098_v52 }
 0x9ea   : > { %v20546_v24 = vpop.eup %18348 }
 0x9eb   : > { %v20548_v42 = vpop.eup %18350  ;;  %v10458_v19 = vsel %vm3972_vm3, %v20546_v24, 0.0  ;;  %v16546_v16 = vcombine.high %v1123_v22, %v1130_v46 }
 0x9ec   : > { %10459 = vadd.xlane.f32.xlu1 %v10458_v19  ;;  %v10455_v14 = vsel %vm3972_vm3, %v20548_v42, 0.0  ;;  %v1100_v19 = vcombine.high %v1043_v21, %v1059_v34  ;;  %v1107_v21 = vrot.slane %v1099_v60, %v18826_v59 }
 0x9ed   : > { %10456 = vadd.xlane.f32.xlu0 %v10455_v14 }
 0x9ee   : > { %v1114_v34 = vrot.slane %v1100_v19, %v18826_v59  ;;  %v16544_v19 = vcombine.low %v1123_v22, %v1130_v46  ;;  %v1499_v22 = vrot.slane %v16546_v16, %v18816_v51 }
 0x9f0   : > { %v16540_v30 = vcombine.low %v1107_v21, %v1114_v34  ;;  %v16542_v40 = vcombine.high %v1107_v21, %v1114_v34  ;;  %v1483_v34 = vrot.slane %v16544_v19, %v18816_v51 }
 0x9f2   : > { %v1451_v12 = vrot.slane %v16540_v30, %v18816_v51  ;;  %v1467_v21 = vrot.slane %v16542_v40, %v18816_v51 }
 0xa69   : > { %v10442_v33 = vpop.xlane.xlu1 %10441 }
 0xa6a   : > { %18352 = vrcp.f32 %v10442_v33  ;;  %v10439_v6 = vpop.xlane.xlu0 %10438 }
 0xa6b   : > { %18354 = vrcp.f32 %v10439_v6 }
 0xa6d   : > { %v10448_v14 = vpop.xlane.xlu1 %10447 }
 0xa6e   : > { %18356 = vrcp.f32 %v10448_v14  ;;  %v10445_v23 = vpop.xlane.xlu0 %10444  ;;  %v1091_v14 = vrot.slane %v1083_v2, %v18816_v51  ;;  %v1147_v2 = vcombine.low %v1082_v41, %v1098_v52 }
 0xa6f   : > { %18358 = vrcp.f32 %v10445_v23  ;;  %v1075_v23 = vrot.slane %v1067_v32, %v18816_v51 }
 0xa71   : > { %v10454_v33 = vpop.xlane.xlu1 %10453  ;;  %v1131_v28 = vcombine.low %v1075_v23, %v1091_v14 }
 0xa72   : > { %18360 = vrcp.f32 %v10454_v33  ;;  %v10451_v6 = vpop.xlane.xlu0 %10450  ;;  %v1132_v33 = vcombine.high %v1075_v23, %v1091_v14  ;;  %v1507_v23 = vcombine.low %v1451_v12, %v1467_v21 }
 0xa73   : > { %18362 = vrcp.f32 %v10451_v6  ;;  %v1139_v6 = vrot.slane %v1131_v28, %v18826_v59 }
 0xa74   : > { %v1146_v14 = vrot.slane %v1132_v33, %v18826_v59  ;;  %v1508_v33 = vcombine.high %v1451_v12, %v1467_v21 }
 0xa75   : > { %v10460_v60 = vpop.xlane.xlu1 %10459 }
 0xa76   : > { %18364 = vrcp.f32 %v10460_v60  ;;  %v10457_v39 = vpop.xlane.xlu0 %10456  ;;  %v16541_v41 = vcombine.low %v1139_v6, %v1146_v14  ;;  %v16543_v30 = vcombine.high %v1139_v6, %v1146_v14 }
 0xa77   : > { %v18353_v20 = vpop.eup %18352  ;;  %18366 = vrcp.f32 %v10457_v39  ;;  %v1515_v39 = vrot.slane %v1507_v23, %v18826_v59 }
 0xa78   : > { %v18355_v3 = vpop.eup %18354  ;;  %v10470_v32 = vmul.f32 %v18353_v20, %v20522_v55  ;;  %v1155_v20 = vrot.slane %v1147_v2, %v18826_v59  ;;  %v1162_v55 = vrot.slane %v1148_v38, %v18826_v59  ;;  %v1539_v38 = vcombine.low %v1483_v34, %v1499_v22 }
 0xa79   : > { %v10469_v49 = vmul.f32 %v18355_v3, %v20524_v5 }
 0xa7a   : > { %17720 = vmatmul.mubr.msk.f32.vlgmr.msra.gmra.mxu1 %vm3972_vm3, %v10470_v32  ;;  %v16545_v60 = vcombine.low %v1155_v20, %v1162_v55  ;;  %v16547_v40 = vcombine.high %v1155_v20, %v1162_v55  ;;  %v1547_v28 = vrot.slane %v1539_v38, %v18826_v59  ;;  %v1458_v32 = vrot.slane %v16541_v41, %v18816_v51 }
 0xa7b   : > { %v18357_v46 = vpop.eup %18356  ;;  %17715 = vmatmul.mubr.msk.f32.vlgmr.msra.gmra.mxu0 %vm3972_vm3, %v10469_v49  ;;  %17728 = vmatpush3.msra.mxu1 %v19721_v10  ;;  %v1474_v49 = vrot.slane %v16543_v30, %v18816_v51 }
 0xa7c   : > { %v18359_v3 = vpop.eup %18358  ;;  %17723 = vmatpush3.msra.mxu0 %v19715_v48  ;;  %17724 = vmatprep.mubr.msk.f32.mxu0 %vm18494_vm0, %v21934_v61  ;;  %v10472_v16 = vmul.f32 %v18357_v46, %v20530_v56  ;;  %v22007_v46 = vld [vmem:[#allocation2_spill] sm:$0xff]  ;;  %v1490_v12 = vrot.slane %v16545_v60, %v18816_v51  ;;  %v1506_v21 = vrot.slane %v16547_v40, %v18816_v51 }
 0xa7d   : > { %17729 = vmatprep.mubr.msk.f32.mxu1 %vm18494_vm0, %v21934_v61  ;;  %17732 = vmatprep.subr.mxu0 %v21934_v61  ;;  %v10471_v5 = vmul.f32 %v18359_v3, %v20532_v17  ;;  %v22009_v3 = vld [vmem:[#allocation13_spill] sm:$0xff]  ;;  %v1523_v20 = vcombine.low %v1458_v32, %v1474_v49  ;;  %v1524_v38 = vcombine.high %v1458_v32, %v1474_v49  ;;  %v22012_v40 = vld [vmem:[#allocation22_spill] sm:$0xff] }
 0xa7e   : > { %17737 = vmatprep.subr.mxu1 %v21934_v61  ;;  %17730 = vmatmul.mubr.msk.f32.vlgmr.msra.gmra.mxu1 %vm3972_vm3, %v10472_v16  ;;  %v1555_v55 = vcombine.low %v1490_v12, %v1506_v21  ;;  %v20649_v16 = vcombine.low %v1515_v39, %v1547_v28 }
 0xa7f   : > { %v18361_v52 = vpop.eup %18360  ;;  %17725 = vmatmul.mubr.msk.f32.vlgmr.msra.gmra.mxu0 %vm3972_vm3, %v10471_v5  ;;  %17738 = vmatpush3.msra.mxu1 %v19948_v37  ;;  %v22010_v5 = vld [vmem:[#allocation17_spill] sm:$0xff]  ;;  %v1531_v41 = vrot.slane %v1523_v20, %v18826_v59 }
 0xa80   : > { %v18363_v56 = vpop.eup %18362  ;;  %17733 = vmatpush3.msra.mxu0 %v19946_v44  ;;  %17734 = vmatprep.mubr.msk.f32.mxu0 %vm18494_vm0, %v21934_v61  ;;  %v10474_v17 = vmul.f32 %v18361_v52, %v20538_v15  ;;  %v1540_v15 = vcombine.high %v1483_v34, %v1499_v22  ;;  %v22008_v22 = vld [vmem:[#allocation14_spill] sm:$0xff]  ;;  %v22011_v52 = vld [vmem:[#allocation16_spill] sm:$0xff]  ;;  %v1563_v30 = vrot.slane %v1555_v55, %v18826_v59  ;;  %v22025_v20 = vld [vmem:[#allocation41_spill] sm:$0xff] }
 0xa81   : > { %17739 = vmatprep.mubr.msk.f32.mxu1 %vm18494_vm0, %v21934_v61  ;;  %17742 = vmatprep.subr.mxu0 %v21934_v61  ;;  %v10473_v19 = vmul.f32 %v18363_v56, %v20540_v1  ;;  %v1556_v56 = vcombine.high %v1490_v12, %v1506_v21  ;;  %v22018_v12 = vld [vmem:[#allocation36_spill] sm:$0xff]  ;;  %v22019_v21 = vld [vmem:[#allocation35_spill] sm:$0xff] }
 0xa82   : > { %17747 = vmatprep.subr.mxu1 %v21934_v61  ;;  %17740 = vmatmul.mubr.msk.f32.vlgmr.msra.gmra.mxu1 %vm3972_vm3, %v10474_v17  ;;  %v1554_v14 = vrot.slane %v1540_v15, %v18826_v59  ;;  %v22013_v17 = vld [vmem:[#allocation21_spill] sm:$0xff]  ;;  %v22015_v15 = vld [vmem:[#allocation28_spill] sm:$0xff] }
 0xa83   : > { %v18365_v2 = vpop.eup %18364  ;;  %17735 = vmatmul.mubr.msk.f32.vlgmr.msra.gmra.mxu0 %vm3972_vm3, %v10473_v19  ;;  %17748 = vmatpush3.msra.mxu1 %v19958_v13  ;;  %v20682_v19 = vcombine.high %v1531_v41, %v1563_v30 }
 0xa84   : > { %v18367_v1 = vpop.eup %18366  ;;  %17743 = vmatpush3.msra.mxu0 %v22007_v46  ;;  %17744 = vmatprep.mubr.msk.f32.mxu0 %vm18494_vm0, %v21934_v61  ;;  %v10476_v6 = vmul.f32 %v18365_v2, %v20546_v24  ;;  %v1522_v24 = vrot.slane %v1508_v33, %v18826_v59  ;;  %v20689_v33 = vcombine.low %v1531_v41, %v1563_v30  ;;  %v22014_v2 = vld [vmem:[#allocation29_spill] sm:$0xff] }
 0xa85   : > { %17749 = vmatprep.mubr.msk.f32.mxu1 %vm18494_vm0, %v21934_v61  ;;  %17752 = vmatprep.subr.mxu0 %v21934_v61  ;;  %v10475_v34 = vmul.f32 %v18367_v1, %v20548_v42  ;;  %v20644_v42 = vcombine.high %v1515_v39, %v1547_v28  ;;  %v1538_v39 = vrot.slane %v1524_v38, %v18826_v59  ;;  %v22016_v1 = vld [vmem:[#allocation34_spill] sm:$0xff] }
 0xa86   : > { %17757 = vmatprep.subr.mxu1 %v21934_v61  ;;  %17750 = vmatmul.mubr.msk.f32.vlgmr.msra.gmra.mxu1 %vm3972_vm3, %v10476_v6  ;;  %v20658_v23 = vcombine.high %v1522_v24, %v1554_v14  ;;  %v20669_v60 = vcombine.low %v1522_v24, %v1554_v14  ;;  %v1570_v28 = vrot.slane %v1556_v56, %v18826_v59  ;;  %v22017_v6 = vld [vmem:[#allocation33_spill] sm:$0xff]  ;;  %v22022_v24 = vld [vmem:[#allocation40_spill] sm:$0xff]  ;;  %v22023_v14 = vld [vmem:[#allocation39_spill] sm:$0xff] }
 0xa87   : > { %17745 = vmatmul.mubr.msk.f32.vlgmr.msra.gmra.mxu0 %vm3972_vm3, %v10475_v34  ;;  %17758 = vmatpush3.xpose.msk.msra.mxu1 %vm3355_vm2, %v22008_v22  ;;  %v22020_v34 = vld [vmem:[#allocation38_spill] sm:$0xff]  ;;  %v22021_v22 = vld [vmem:[#allocation37_spill] sm:$0xff] }
 0xa88   : > { %17753 = vmatpush3.xpose.msk.msra.mxu0 %vm3355_vm2, %v22009_v3  ;;  %17754 = vmatprep.mubr.msk.f32.mxu0 %vm18494_vm0, %v21934_v61  ;;  %v20702_v32 = vcombine.high %v1538_v39, %v1570_v28  ;;  %v20707_v49 = vcombine.low %v1538_v39, %v1570_v28  ;;  %v22024_v3 = vld [vmem:[#allocation42_spill] sm:$0xff] }
 0xa89   : > { %17759 = vmatprep.mubr.msk.f32.mxu1 %vm18494_vm0, %v21934_v61  ;;  %17762 = vmatprep.subr.mxu0 %v21934_v61 }
 0xa8a   : > { %17767 = vmatprep.subr.mxu1 %v21934_v61  ;;  %17760 = vmatmul.mubr.msk.f32.vlgmr.msra.gmra.mxu1 %vm3355_vm2, %v20644_v42 }
 0xa8b   : > { %17755 = vmatmul.mubr.msk.f32.vlgmr.msra.gmra.mxu0 %vm3355_vm2, %v20649_v16  ;;  %17768 = vmatpush3.xpose.msk.msra.mxu1 %vm3355_vm2, %v22010_v5 }
 0xa8c   : > { %17763 = vmatpush3.xpose.msk.msra.mxu0 %vm3355_vm2, %v22011_v52  ;;  %17764 = vmatprep.mubr.msk.f32.mxu0 %vm18494_vm0, %v21934_v61 }
 0xa8d   : > { %17769 = vmatprep.mubr.msk.f32.mxu1 %vm18494_vm0, %v21934_v61  ;;  %17772 = vmatprep.subr.mxu0 %v21934_v61 }
 0xa8e   : > { %17777 = vmatprep.subr.mxu1 %v21934_v61  ;;  %17770 = vmatmul.mubr.msk.f32.vlgmr.msra.gmra.mxu1 %vm3355_vm2, %v20658_v23 }
 0xa8f   : > { %17765 = vmatmul.mubr.msk.f32.vlgmr.msra.gmra.mxu0 %vm3355_vm2, %v20669_v60  ;;  %17778 = vmatpush3.xpose.msk.msra.mxu1 %vm3355_vm2, %v22012_v40 }
 0xa90   : > { %17773 = vmatpush3.xpose.msk.msra.mxu0 %vm3355_vm2, %v22013_v17  ;;  %17774 = vmatprep.mubr.msk.f32.mxu0 %vm18494_vm0, %v21934_v61 }
 0xa91   : > { %17779 = vmatprep.mubr.msk.f32.mxu1 %vm18494_vm0, %v21934_v61  ;;  %17782 = vmatprep.subr.mxu0 %v21934_v61 }
 0xa92   : > { %17787 = vmatprep.subr.mxu1 %v21934_v61  ;;  %17780 = vmatmul.mubr.msk.f32.vlgmr.msra.gmra.mxu1 %vm3355_vm2, %v20682_v19 }
 0xa93   : > { %17775 = vmatmul.mubr.msk.f32.vlgmr.msra.gmra.mxu0 %vm3355_vm2, %v20689_v33  ;;  %17788 = vmatpush3.xpose.msk.msra.mxu1 %vm3355_vm2, %v22014_v2 }
 0xa94   : > { %17783 = vmatpush3.xpose.msk.msra.mxu0 %vm3355_vm2, %v22015_v15  ;;  %17784 = vmatprep.mubr.msk.f32.mxu0 %vm18494_vm0, %v21934_v61 }
 0xa95   : > { %17789 = vmatprep.mubr.msk.f32.mxu1 %vm18494_vm0, %v21934_v61  ;;  %17792 = vmatprep.subr.mxu0 %v21934_v61 }
 0xa96   : > { %17797 = vmatprep.subr.mxu1 %v21934_v61  ;;  %17790 = vmatmul.mubr.msk.f32.vlgmr.msra.gmra.mxu1 %vm3355_vm2, %v20702_v32 }
 0xa97   : > { %17785 = vmatmul.mubr.msk.f32.vlgmr.msra.gmra.mxu0 %vm3355_vm2, %v20707_v49  ;;  %17798 = vmatpush3.xpose.msk.msra.mxu1 %vm3355_vm2, %v22016_v1 }
 0xa98   : > { %17793 = vmatpush3.xpose.msk.msra.mxu0 %vm3355_vm2, %v22017_v6  ;;  %17794 = vmatprep.mubr.msk.f32.mxu0 %vm18494_vm0, %v21934_v61 }
 0xa99   : > { %17799 = vmatprep.mubr.msk.f32.mxu1 %vm18494_vm0, %v21934_v61  ;;  %17802 = vmatprep.subr.mxu0 %v21934_v61 }
 0xa9a   : > { %17807 = vmatprep.subr.mxu1 %v21934_v61  ;;  %17800 = vmatmul.mubr.msk.f32.vlgmr.msra.gmra.mxu1 %vm3355_vm2, %v20644_v42 }
 0xa9b   : > { %17795 = vmatmul.mubr.msk.f32.vlgmr.msra.gmra.mxu0 %vm3355_vm2, %v20649_v16  ;;  %17808 = vmatpush3.xpose.msk.msra.mxu1 %vm3355_vm2, %v22018_v12 }
 0xa9c   : > { %17803 = vmatpush3.xpose.msk.msra.mxu0 %vm3355_vm2, %v22019_v21  ;;  %17804 = vmatprep.mubr.msk.f32.mxu0 %vm18494_vm0, %v21934_v61 }
 0xa9d   : > { %17809 = vmatprep.mubr.msk.f32.mxu1 %vm18494_vm0, %v21934_v61  ;;  %17812 = vmatprep.subr.mxu0 %v21934_v61 }
 0xa9e   : > { %17817 = vmatprep.subr.mxu1 %v21934_v61  ;;  %17810 = vmatmul.mubr.msk.f32.vlgmr.msra.gmra.mxu1 %vm3355_vm2, %v20658_v23 }
 0xa9f   : > { %17805 = vmatmul.mubr.msk.f32.vlgmr.msra.gmra.mxu0 %vm3355_vm2, %v20669_v60  ;;  %17818 = vmatpush3.xpose.msk.msra.mxu1 %vm3355_vm2, %v22020_v34 }
 0xaa0   : > { %17813 = vmatpush3.xpose.msk.msra.mxu0 %vm3355_vm2, %v22021_v22  ;;  %17814 = vmatprep.mubr.msk.f32.mxu0 %vm18494_vm0, %v21934_v61 }
 0xaa1   : > { %17819 = vmatprep.mubr.msk.f32.mxu1 %vm18494_vm0, %v21934_v61  ;;  %17822 = vmatprep.subr.mxu0 %v21934_v61 }
 0xaa2   : > { %17827 = vmatprep.subr.mxu1 %v21934_v61  ;;  %17820 = vmatmul.mubr.msk.f32.vlgmr.msra.gmra.mxu1 %vm3355_vm2, %v20682_v19 }
 0xaa3   : > { %17815 = vmatmul.mubr.msk.f32.vlgmr.msra.gmra.mxu0 %vm3355_vm2, %v20689_v33  ;;  %17828 = vmatpush3.xpose.msk.msra.mxu1 %vm3355_vm2, %v22022_v24 }
 0xaa4   : > { %17823 = vmatpush3.xpose.msk.msra.mxu0 %vm3355_vm2, %v22023_v14  ;;  %17824 = vmatprep.mubr.msk.f32.mxu0 %vm18494_vm0, %v21934_v61 }
 0xaa5   : > { %17829 = vmatprep.mubr.msk.f32.mxu1 %vm18494_vm0, %v21934_v61  ;;  %17832 = vmatprep.subr.mxu0 %v21934_v61 }
 0xaa6   : > { %17837 = vmatprep.subr.mxu1 %v21934_v61  ;;  %17830 = vmatmul.mubr.msk.f32.vlgmr.msra.gmra.mxu1 %vm3355_vm2, %v20702_v32 }
 0xaa7   : > { %17825 = vmatmul.mubr.msk.f32.vlgmr.msra.gmra.mxu0 %vm3355_vm2, %v20707_v49  ;;  %17838 = vmatpush3.msra.mxu1 %v22024_v3 }
 0xaa8   : > { %17833 = vmatpush3.msra.mxu0 %v22025_v20  ;;  %17839 = vmatprep.mubr.msk.f32.mxu1 %vm18494_vm0, %v21934_v61 }
 0xaa9   : > { %17847 = vmatprep.subr.mxu1 %v21934_v61  ;;  %17834 = vmatprep.mubr.msk.f32.mxu0 %vm18494_vm0, %v21934_v61 }
 0xaaa   : > { %17842 = vmatprep.subr.mxu0 %v21934_v61 }
 0xb3a   : > { %v10619_v55 = vpop.f32.mrf.mxu1 }
 0xb3b   : > { %v10546_v5 = vpop.f32.mrf.mxu0  ;;  %v11062_v38 = vadd.f32 %v10619_v55, %v20498_v8 }
 0xb3c   : > { %v11061_v52 = vadd.f32 %v10546_v5, %v20500_v4  ;;  %v17721_v41 = vpop.f32.mrf.mxu1 }
 0xb3d   : > { %v17716_v30 = vpop.f32.mrf.mxu0 }
 0xb3e   : > { %v10765_v56 = vpop.f32.mrf.mxu1 }
 0xb3f   : > { %v10692_v40 = vpop.f32.mrf.mxu0  ;;  %v11064_v17 = vadd.f32 %v10765_v56, %v20502_v18 }
 0xb40   : > { %v11063_v39 = vadd.f32 %v10692_v40, %v20504_v62  ;;  %v17731_v28 = vpop.f32.mrf.mxu1 }
 0xb41   : > { %v11085_v2 = vcombine.low %v11062_v38, %v11064_v17  ;;  %v11086_v15 = vcombine.high %v11062_v38, %v11064_v17  ;;  %v17726_v1 = vpop.f32.mrf.mxu0 }
 0xb42   : > { %v11069_v6 = vcombine.low %v11061_v52, %v11063_v39  ;;  %v11070_v12 = vcombine.high %v11061_v52, %v11063_v39  ;;  %v10911_v21 = vpop.f32.mrf.mxu1 }
 0xb43   : > { %v11093_v34 = vrot.slane %v11085_v2, %v18816_v51  ;;  %v11100_v8 = vrot.slane %v11086_v15, %v18816_v51  ;;  %v10838_v4 = vpop.f32.mrf.mxu0  ;;  %v11066_v22 = vadd.f32 %v10911_v21, %v20506_v47 }
 0xb44   : > { %v11077_v24 = vrot.slane %v11069_v6, %v18816_v51  ;;  %v11084_v18 = vrot.slane %v11070_v12, %v18816_v51  ;;  %v11065_v62 = vadd.f32 %v10838_v4, %v20508_v53  ;;  %v17741_v14 = vpop.f32.mrf.mxu1 }
 0xb45   : > { %v17736_v3 = vpop.f32.mrf.mxu0 }
 0xb46   : > { %v11133_v20 = vcombine.low %v11077_v24, %v11093_v34  ;;  %v11134_v55 = vcombine.high %v11077_v24, %v11093_v34  ;;  %v11149_v5 = vcombine.low %v11084_v18, %v11100_v8  ;;  %v11150_v38 = vcombine.high %v11084_v18, %v11100_v8  ;;  %v11057_v52 = vpop.f32.mrf.mxu1 }
 0xb47   : > { %v10984_v41 = vpop.f32.mrf.mxu0  ;;  %v11068_v30 = vadd.f32 %v11057_v52, %v20510_v27 }
 0xb48   : > { %v11141_v56 = vrot.slane %v11133_v20, %v18826_v59  ;;  %v11148_v47 = vrot.slane %v11134_v55, %v18826_v59  ;;  %v11157_v40 = vrot.slane %v11149_v5, %v18826_v59  ;;  %v11164_v17 = vrot.slane %v11150_v38, %v18826_v59  ;;  %v17751_v39 = vpop.f32.mrf.mxu1 }
 0xb49   : > { %v11067_v53 = vadd.f32 %v10984_v41, %v20512_v11  ;;  %v11117_v28 = vcombine.low %v11066_v22, %v11068_v30  ;;  %v11118_v2 = vcombine.high %v11066_v22, %v11068_v30  ;;  %v17746_v15 = vpop.f32.mrf.mxu0 }
 0xb4a   : > { %v16820_v1 = vcombine.low %v11141_v56, %v11148_v47  ;;  %v16822_v6 = vcombine.high %v11141_v56, %v11148_v47  ;;  %v16824_v12 = vcombine.low %v11157_v40, %v11164_v17  ;;  %v16826_v21 = vcombine.high %v11157_v40, %v11164_v17  ;;  %v20794_v34 = vpop.f32.mrf.mxu1 }
 0xb4b   : > { %v11101_v27 = vcombine.low %v11065_v62, %v11067_v53  ;;  %v11102_v8 = vcombine.high %v11065_v62, %v11067_v53  ;;  %v11125_v4 = vrot.slane %v11117_v28, %v18816_v51  ;;  %v11132_v24 = vrot.slane %v11118_v2, %v18816_v51  ;;  %v20798_v18 = vpop.f32.mrf.mxu0 }
 0xb4c   : > { %v15277_v14 = vrot.slane %v16820_v1, %v18816_v51  ;;  %v15293_v11 = vrot.slane %v16822_v6, %v18816_v51  ;;  %v15309_v22 = vrot.slane %v16824_v12, %v18816_v51  ;;  %v15325_v3 = vrot.slane %v16826_v21, %v18816_v51  ;;  %v17761_v20 = vpop.f32.mrf.mxu1 }
 0xb4d   : > { %v11109_v55 = vrot.slane %v11101_v27, %v18816_v51  ;;  %v11116_v5 = vrot.slane %v11102_v8, %v18816_v51  ;;  %v17756_v62 = vpop.f32.mrf.mxu0 }
 0xb4e   : > { %v20806_v38 = vpop.f32.mrf.mxu1  ;;  %v15334_v52 = vcombine.high %v15277_v14, %v15293_v11  ;;  %v15366_v41 = vcombine.high %v15309_v22, %v15325_v3  ;;  %v15333_v30 = vcombine.low %v15277_v14, %v15293_v11  ;;  %v15365_v56 = vcombine.low %v15309_v22, %v15325_v3 }
 0xb4f   : > { %v11165_v47 = vcombine.low %v11109_v55, %v11125_v4  ;;  %v11166_v40 = vcombine.high %v11109_v55, %v11125_v4  ;;  %v11181_v17 = vcombine.low %v11116_v5, %v11132_v24  ;;  %v11182_v39 = vcombine.high %v11116_v5, %v11132_v24  ;;  %v20808_v53 = vpop.f32.mrf.mxu0 }
 0xb50   : > { %v17771_v28 = vpop.f32.mrf.mxu1  ;;  %v20817_v27 = vrot.slane %v15334_v52, %v18826_v59  ;;  %v20820_v8 = vrot.slane %v15366_v41, %v18826_v59  ;;  %v20827_v55 = vrot.slane %v15333_v30, %v18826_v59 }
 0xb51   : > { %v11173_v2 = vrot.slane %v11165_v47, %v18826_v59  ;;  %v11180_v15 = vrot.slane %v11166_v40, %v18826_v59  ;;  %v11189_v1 = vrot.slane %v11181_v17, %v18826_v59  ;;  %v11196_v6 = vrot.slane %v11182_v39, %v18826_v59  ;;  %v17766_v12 = vpop.f32.mrf.mxu0 }
 0xb52   : > { %v20814_v21 = vpop.f32.mrf.mxu1  ;;  %v20836_v17 = vrot.slane %v15365_v56, %v18826_v59 }
 0xb53   : > { %v16821_v4 = vcombine.low %v11173_v2, %v11180_v15  ;;  %v16823_v24 = vcombine.high %v11173_v2, %v11180_v15  ;;  %v16825_v14 = vcombine.low %v11189_v1, %v11196_v6  ;;  %v16827_v11 = vcombine.high %v11189_v1, %v11196_v6  ;;  %v20822_v22 = vpop.f32.mrf.mxu0 }
 0xb54   : > { %v17781_v3 = vpop.f32.mrf.mxu1 }
 0xb55   : > { %v15284_v5 = vrot.slane %v16821_v4, %v18816_v51  ;;  %v15300_v62 = vrot.slane %v16823_v24, %v18816_v51  ;;  %v15316_v52 = vrot.slane %v16825_v14, %v18816_v51  ;;  %v15332_v41 = vrot.slane %v16827_v11, %v18816_v51  ;;  %v17776_v47 = vpop.f32.mrf.mxu0 }
 0xb56   : > { %v20833_v40 = vpop.f32.mrf.mxu1 }
 0xb57   : > { %v20840_v28 = vpop.f32.mrf.mxu0  ;;  %v15349_v30 = vcombine.low %v15284_v5, %v15300_v62  ;;  %v15381_v2 = vcombine.low %v15316_v52, %v15332_v41  ;;  %v15350_v15 = vcombine.high %v15284_v5, %v15300_v62  ;;  %v15382_v12 = vcombine.high %v15316_v52, %v15332_v41 }
 0xb58   : > { %v17791_v1 = vpop.f32.mrf.mxu1 }
 0xb59   : > { %v17786_v24 = vpop.f32.mrf.mxu0  ;;  %v20847_v56 = vrot.slane %v15349_v30, %v18826_v59  ;;  %v20850_v14 = vrot.slane %v15381_v2, %v18826_v59  ;;  %v20853_v11 = vrot.slane %v15350_v15, %v18826_v59  ;;  %v20856_v5 = vrot.slane %v15382_v12, %v18826_v59 }
 0xb5a   : > { %v12021_v3 = vpop.f32.mrf.mxu1 }
 0xb5b   : > { %v11951_v62 = vpop.f32.mrf.mxu0  ;;  %v20858_v47 = vmul.f32 0.5, %v12021_v3 }
 0xb5c   : > { %v20864_v30 = vmul.f32 0.5, %v11951_v62  ;;  %v17801_v2 = vpop.f32.mrf.mxu1 }
 0xb5d   : > { %v17796_v12 = vpop.f32.mrf.mxu0  ;;  %v12456_v24 = vsel %vm3972_vm3, %v20858_v47, -inf }
 0xb5e   : > { %12457 = vmax.xlane.f32.xlu1 %v12456_v24  ;;  %v12161_v3 = vpop.f32.mrf.mxu1  ;;  %v12453_v4 = vsel %vm3972_vm3, %v20864_v30, -inf }
 0xb5f   : > { %v20874_v39 = vmul.f32 0.5, %v12161_v3  ;;  %12454 = vmax.xlane.f32.xlu0 %v12453_v4  ;;  %v12091_v62 = vpop.f32.mrf.mxu0 }
 0xb60   : > { %v20876_v2 = vmul.f32 0.5, %v12091_v62  ;;  %v17811_v41 = vpop.f32.mrf.mxu1 }
 0xb61   : > { %v17806_v15 = vpop.f32.mrf.mxu0  ;;  %v12462_v1 = vsel %vm3972_vm3, %v20874_v39, -inf }
 0xb62   : > { %12463 = vmax.xlane.f32.xlu1 %v12462_v1  ;;  %v12301_v12 = vpop.f32.mrf.mxu1  ;;  %v12459_v24 = vsel %vm3972_vm3, %v20876_v2, -inf }
 0xb63   : > { %v20882_v52 = vmul.f32 0.5, %v12301_v12  ;;  %12460 = vmax.xlane.f32.xlu0 %v12459_v24  ;;  %v12231_v6 = vpop.f32.mrf.mxu0  ;;  %v20888_v12 = vmul.f32 0.5, %v20794_v34 }
 0xb64   : > { %v12449_v3 = vmul.f32 0.5, %v12231_v6  ;;  %v17821_v20 = vpop.f32.mrf.mxu1 }
 0xb65   : > { %v17816_v4 = vpop.f32.mrf.mxu0  ;;  %v12468_v62 = vsel %vm3972_vm3, %v20882_v52, -inf  ;;  %v20892_v20 = vmul.f32 0.5, %v20798_v18  ;;  %v20906_v18 = vmul.f32 0.5, %v20814_v21  ;;  %v20921_v21 = vmul.f32 0.5, %v20840_v28 }
 0xb66   : > { %12469 = vmax.xlane.f32.xlu1 %v12468_v62  ;;  %v12441_v41 = vpop.f32.mrf.mxu1  ;;  %v12465_v15 = vsel %vm3972_vm3, %v12449_v3, -inf  ;;  %v20896_v62 = vmul.f32 0.5, %v20806_v38  ;;  %v20911_v38 = vmul.f32 0.5, %v20822_v22 }
 0xb67   : > { %v12452_v59 = vmul.f32 0.5, %v12441_v41  ;;  %12466 = vmax.xlane.f32.xlu0 %v12465_v15  ;;  %v12371_v1 = vpop.f32.mrf.mxu0  ;;  %v11800_v41 = vsel %vm3972_vm3, %v20888_v12, -inf  ;;  %v11797_v34 = vsel %vm3972_vm3, %v20892_v20, -inf }
 0xb68   : > { %v12451_v51 = vmul.f32 0.5, %v12371_v1  ;;  %v17831_v46 = vpop.f32.mrf.mxu1  ;;  %v11806_v15 = vsel %vm3972_vm3, %v20896_v62, -inf }
 0xb69   : > { %v17826_v24 = vpop.f32.mrf.mxu0  ;;  %v12474_v6 = vsel %vm3972_vm3, %v12452_v59, -inf  ;;  %v20901_v46 = vmul.f32 0.5, %v20808_v53  ;;  %v20916_v53 = vmul.f32 0.5, %v20833_v40 }
 0xb6a   : > { %12475 = vmax.xlane.f32.xlu1 %v12474_v6  ;;  %v12471_v4 = vsel %vm3972_vm3, %v12451_v51, -inf  ;;  %v11812_v24 = vsel %vm3972_vm3, %v20906_v18, -inf  ;;  %v11809_v6 = vsel %vm3972_vm3, %v20911_v38, -inf }
 0xb6b   : > { %12472 = vmax.xlane.f32.xlu0 %v12471_v4  ;;  %v11803_v1 = vsel %vm3972_vm3, %v20901_v46, -inf  ;;  %v11818_v22 = vsel %vm3972_vm3, %v20916_v53, -inf  ;;  %v11815_v4 = vsel %vm3972_vm3, %v20921_v21, -inf }
 0xb6e   : > { %11801 = vmax.xlane.f32.xlu1 %v11800_v41 }
 0xb6f   : > { %11798 = vmax.xlane.f32.xlu0 %v11797_v34 }
 0xb72   : > { %11807 = vmax.xlane.f32.xlu1 %v11806_v15 }
 0xb73   : > { %11804 = vmax.xlane.f32.xlu0 %v11803_v1 }
 0xb76   : > { %11813 = vmax.xlane.f32.xlu1 %v11812_v24 }
 0xb77   : > { %11810 = vmax.xlane.f32.xlu0 %v11809_v6 }
 0xb7a   : > { %11819 = vmax.xlane.f32.xlu1 %v11818_v22 }
 0xb7b   : > { %11816 = vmax.xlane.f32.xlu0 %v11815_v4 }
 0xbe7   : > { %v12458_v40 = vpop.xlane.xlu1 %12457 }
 0xbe8   : > { %v12478_v41 = vsub.f32 %v20858_v47, %v12458_v40  ;;  %v12455_v34 = vpop.xlane.xlu0 %12454 }
 0xbe9   : > { %v12477_v28 = vsub.f32 %v20864_v30, %v12455_v34 }
 0xbea   : > { %v12487_v15 = vmul.f32 1.442695, %v12478_v41 }
 0xbeb   : > { %v12485_v1 = vmul.f32 1.442695, %v12477_v28  ;;  %v12464_v24 = vpop.xlane.xlu1 %12463 }
 0xbec   : > { %18368 = vpow2.f32 %v12487_v15  ;;  %v12480_v6 = vsub.f32 %v20874_v39, %v12464_v24  ;;  %v12461_v13 = vpop.xlane.xlu0 %12460 }
 0xbed   : > { %18370 = vpow2.f32 %v12485_v1  ;;  %v12479_v22 = vsub.f32 %v20876_v2, %v12461_v13 }
 0xbee   : > { %v12491_v44 = vmul.f32 1.442695, %v12480_v6 }
 0xbef   : > { %v12489_v37 = vmul.f32 1.442695, %v12479_v22  ;;  %v12470_v48 = vpop.xlane.xlu1 %12469 }
 0xbf0   : > { %18372 = vpow2.f32 %v12491_v44  ;;  %v12482_v4 = vsub.f32 %v20882_v52, %v12470_v48  ;;  %v12467_v47 = vpop.xlane.xlu0 %12466 }
 0xbf1   : > { %18374 = vpow2.f32 %v12489_v37  ;;  %v12481_v40 = vsub.f32 %v12449_v3, %v12467_v47 }
 0xbf2   : > { %v12495_v30 = vmul.f32 1.442695, %v12482_v4 }
 0xbf3   : > { %v12493_v41 = vmul.f32 1.442695, %v12481_v40  ;;  %v12476_v34 = vpop.xlane.xlu1 %12475 }
 0xbf4   : > { %18376 = vpow2.f32 %v12495_v30  ;;  %v12484_v28 = vsub.f32 %v12452_v59, %v12476_v34  ;;  %v12473_v15 = vpop.xlane.xlu0 %12472 }
 0xbf5   : > { %18378 = vpow2.f32 %v12493_v41  ;;  %v12483_v39 = vsub.f32 %v12451_v51, %v12473_v15 }
 0xbf6   : > { %v12499_v1 = vmul.f32 1.442695, %v12484_v28 }
 0xbf7   : > { %v12497_v24 = vmul.f32 1.442695, %v12483_v39  ;;  %v11802_v13 = vpop.xlane.xlu1 %11801 }
 0xbf8   : > { %18380 = vpow2.f32 %v12499_v1  ;;  %v11822_v2 = vsub.f32 %v20888_v12, %v11802_v13  ;;  %v11799_v44 = vpop.xlane.xlu0 %11798 }
 0xbf9   : > { %v20935_v6 = vpop.eup %18368  ;;  %18382 = vpow2.f32 %v12497_v24  ;;  %v11821_v48 = vsub.f32 %v20892_v20, %v11799_v44 }
 0xbfa   : > { %v20938_v37 = vpop.eup %18370  ;;  %v11831_v52 = vmul.f32 1.442695, %v11822_v2  ;;  %v12504_v59 = vsel %vm3972_vm3, %v20935_v6, 0.0 }
 0xbfb   : > { %v11829_v3 = vmul.f32 1.442695, %v11821_v48  ;;  %12505 = vadd.xlane.f32.xlu1 %v12504_v59  ;;  %v11808_v51 = vpop.xlane.xlu1 %11807  ;;  %v12501_v22 = vsel %vm3972_vm3, %v20938_v37, 0.0 }
 0xbfc   : > { %18384 = vpow2.f32 %v11831_v52  ;;  %v11824_v12 = vsub.f32 %v20896_v62, %v11808_v51  ;;  %12502 = vadd.xlane.f32.xlu0 %v12501_v22  ;;  %v11805_v4 = vpop.xlane.xlu0 %11804 }
 0xbfd   : > { %v20945_v47 = vpop.eup %18372  ;;  %18386 = vpow2.f32 %v11829_v3  ;;  %v11823_v20 = vsub.f32 %v20901_v46, %v11805_v4 }
 0xbfe   : > { %v20948_v40 = vpop.eup %18374  ;;  %v11835_v30 = vmul.f32 1.442695, %v11824_v12  ;;  %v12510_v41 = vsel %vm3972_vm3, %v20945_v47, 0.0 }
 0xbff   : > { %v11833_v34 = vmul.f32 1.442695, %v11823_v20  ;;  %12511 = vadd.xlane.f32.xlu1 %v12510_v41  ;;  %v11814_v28 = vpop.xlane.xlu1 %11813  ;;  %v12507_v15 = vsel %vm3972_vm3, %v20948_v40, 0.0 }
 0xc00   : > { %18388 = vpow2.f32 %v11835_v30  ;;  %v11826_v62 = vsub.f32 %v20906_v18, %v11814_v28  ;;  %12508 = vadd.xlane.f32.xlu0 %v12507_v15  ;;  %v11811_v39 = vpop.xlane.xlu0 %11810 }
 0xc01   : > { %v20955_v1 = vpop.eup %18376  ;;  %18390 = vpow2.f32 %v11833_v34  ;;  %v11825_v46 = vsub.f32 %v20911_v38, %v11811_v39 }
 0xc02   : > { %v20958_v24 = vpop.eup %18378  ;;  %v11839_v13 = vmul.f32 1.442695, %v11826_v62  ;;  %v12516_v2 = vsel %vm3972_vm3, %v20955_v1, 0.0 }
 0xc03   : > { %v11837_v44 = vmul.f32 1.442695, %v11825_v46  ;;  %12517 = vadd.xlane.f32.xlu1 %v12516_v2  ;;  %v11820_v48 = vpop.xlane.xlu1 %11819  ;;  %v12513_v52 = vsel %vm3972_vm3, %v20958_v24, 0.0 }
 0xc04   : > { %18392 = vpow2.f32 %v11839_v13  ;;  %v11828_v18 = vsub.f32 %v20916_v53, %v11820_v48  ;;  %12514 = vadd.xlane.f32.xlu0 %v12513_v52  ;;  %v11817_v59 = vpop.xlane.xlu0 %11816 }
 0xc05   : > { %v20965_v3 = vpop.eup %18380  ;;  %18394 = vpow2.f32 %v11837_v44  ;;  %v11827_v38 = vsub.f32 %v20921_v21, %v11817_v59 }
 0xc06   : > { %v20968_v51 = vpop.eup %18382  ;;  %v11843_v22 = vmul.f32 1.442695, %v11828_v18  ;;  %v12522_v12 = vsel %vm3972_vm3, %v20965_v3, 0.0 }
 0xc07   : > { %v11841_v4 = vmul.f32 1.442695, %v11827_v38  ;;  %12523 = vadd.xlane.f32.xlu1 %v12522_v12  ;;  %v12519_v20 = vsel %vm3972_vm3, %v20968_v51, 0.0 }
 0xc08   : > { %18396 = vpow2.f32 %v11843_v22  ;;  %12520 = vadd.xlane.f32.xlu0 %v12519_v20 }
 0xc09   : > { %v20974_v53 = vpop.eup %18384  ;;  %18398 = vpow2.f32 %v11841_v4 }
 0xc0a   : > { %v20976_v30 = vpop.eup %18386  ;;  %v11848_v21 = vsel %vm3972_vm3, %v20974_v53, 0.0 }
 0xc0b   : > { %11849 = vadd.xlane.f32.xlu1 %v11848_v21  ;;  %v11845_v41 = vsel %vm3972_vm3, %v20976_v30, 0.0 }
 0xc0c   : > { %11846 = vadd.xlane.f32.xlu0 %v11845_v41 }
 0xc0d   : > { %v20982_v34 = vpop.eup %18388 }
 0xc0e   : > { %v20984_v28 = vpop.eup %18390  ;;  %v11854_v15 = vsel %vm3972_vm3, %v20982_v34, 0.0 }
 0xc0f   : > { %11855 = vadd.xlane.f32.xlu1 %v11854_v15  ;;  %v11851_v62 = vsel %vm3972_vm3, %v20984_v28, 0.0 }
 0xc10   : > { %11852 = vadd.xlane.f32.xlu0 %v11851_v62 }
 0xc11   : > { %v20990_v39 = vpop.eup %18392 }
 0xc12   : > { %v20992_v46 = vpop.eup %18394  ;;  %v11860_v13 = vsel %vm3972_vm3, %v20990_v39, 0.0 }
 0xc13   : > { %11861 = vadd.xlane.f32.xlu1 %v11860_v13  ;;  %v11857_v2 = vsel %vm3972_vm3, %v20992_v46, 0.0 }
 0xc14   : > { %11858 = vadd.xlane.f32.xlu0 %v11857_v2 }
 0xc15   : > { %v20998_v44 = vpop.eup %18396 }
 0xc16   : > { %v21000_v48 = vpop.eup %18398  ;;  %v11866_v52 = vsel %vm3972_vm3, %v20998_v44, 0.0 }
 0xc17   : > { %11867 = vadd.xlane.f32.xlu1 %v11866_v52  ;;  %v11863_v18 = vsel %vm3972_vm3, %v21000_v48, 0.0 }
 0xc18   : > { %11864 = vadd.xlane.f32.xlu0 %v11863_v18 }
 0xc84   : > { %v12506_v59 = vpop.xlane.xlu1 %12505 }
 0xc85   : > { %18400 = vrcp.f32 %v12506_v59  ;;  %v12503_v38 = vpop.xlane.xlu0 %12502 }
 0xc86   : > { %18402 = vrcp.f32 %v12503_v38 }
 0xc88   : > { %v12512_v22 = vpop.xlane.xlu1 %12511 }
 0xc89   : > { %18404 = vrcp.f32 %v12512_v22  ;;  %v12509_v12 = vpop.xlane.xlu0 %12508 }
 0xc8a   : > { %18406 = vrcp.f32 %v12509_v12 }
 0xc8c   : > { %v12518_v4 = vpop.xlane.xlu1 %12517 }
 0xc8d   : > { %18408 = vrcp.f32 %v12518_v4  ;;  %v12515_v20 = vpop.xlane.xlu0 %12514 }
 0xc8e   : > { %18410 = vrcp.f32 %v12515_v20 }
 0xc90   : > { %v12524_v21 = vpop.xlane.xlu1 %12523 }
 0xc91   : > { %18412 = vrcp.f32 %v12524_v21  ;;  %v12521_v41 = vpop.xlane.xlu0 %12520 }
 0xc92   : > { %v18401_v15 = vpop.eup %18400  ;;  %18414 = vrcp.f32 %v12521_v41 }
 0xc93   : > { %v18403_v62 = vpop.eup %18402  ;;  %v12534_v13 = vmul.f32 %v18401_v15, %v20935_v6 }
 0xc94   : > { %v12533_v2 = vmul.f32 %v18403_v62, %v20938_v37  ;;  %v11850_v52 = vpop.xlane.xlu1 %11849 }
 0xc95   : > { %18416 = vrcp.f32 %v11850_v52  ;;  %v11847_v18 = vpop.xlane.xlu0 %11846  ;;  %17840 = vmatmul.mubr.msk.f32.vlgmr.msra.gmra.mxu1 %vm3972_vm3, %v12534_v13 }
 0xc96   : > { %v18405_v59 = vpop.eup %18404  ;;  %18418 = vrcp.f32 %v11847_v18  ;;  %17835 = vmatmul.mubr.msk.f32.vlgmr.msra.gmra.mxu0 %vm3972_vm3, %v12533_v2  ;;  %17848 = vmatpush3.msra.mxu1 %v19206_v26 }
 0xc97   : > { %v18407_v38 = vpop.eup %18406  ;;  %v12536_v22 = vmul.f32 %v18405_v59, %v20945_v47  ;;  %17843 = vmatpush3.msra.mxu0 %v19204_v7  ;;  %17849 = vmatprep.mubr.msk.f32.mxu1 %vm18494_vm0, %v21934_v61 }
 0xc98   : > { %v12535_v6 = vmul.f32 %v18407_v38, %v20948_v40  ;;  %17857 = vmatprep.subr.mxu1 %v21934_v61  ;;  %v11856_v37 = vpop.xlane.xlu1 %11855  ;;  %17844 = vmatprep.mubr.msk.f32.mxu0 %vm18494_vm0, %v21934_v61 }
 0xc99   : > { %18420 = vrcp.f32 %v11856_v37  ;;  %17852 = vmatprep.subr.mxu0 %v21934_v61  ;;  %v11853_v26 = vpop.xlane.xlu0 %11852  ;;  %17850 = vmatmul.mubr.msk.f32.vlgmr.msra.gmra.mxu1 %vm3972_vm3, %v12536_v22 }
 0xc9a   : > { %v18409_v47 = vpop.eup %18408  ;;  %18422 = vrcp.f32 %v11853_v26  ;;  %17845 = vmatmul.mubr.msk.f32.vlgmr.msra.gmra.mxu0 %vm3972_vm3, %v12535_v6  ;;  %17858 = vmatpush3.msra.mxu1 %v19465_v54 }
 0xc9b   : > { %v18411_v7 = vpop.eup %18410  ;;  %v12538_v40 = vmul.f32 %v18409_v47, %v20955_v1  ;;  %17853 = vmatpush3.msra.mxu0 %v19456_v50  ;;  %17859 = vmatprep.mubr.msk.f32.mxu1 %vm18494_vm0, %v21934_v61 }
 0xc9c   : > { %v12537_v12 = vmul.f32 %v18411_v7, %v20958_v24  ;;  %17867 = vmatprep.subr.mxu1 %v21934_v61  ;;  %v11862_v4 = vpop.xlane.xlu1 %11861  ;;  %17854 = vmatprep.mubr.msk.f32.mxu0 %vm18494_vm0, %v21934_v61 }
 0xc9d   : > { %18424 = vrcp.f32 %v11862_v4  ;;  %17862 = vmatprep.subr.mxu0 %v21934_v61  ;;  %v11859_v54 = vpop.xlane.xlu0 %11858  ;;  %17860 = vmatmul.mubr.msk.f32.vlgmr.msra.gmra.mxu1 %vm3972_vm3, %v12538_v40 }
 0xc9e   : > { %v18413_v1 = vpop.eup %18412  ;;  %18426 = vrcp.f32 %v11859_v54  ;;  %17855 = vmatmul.mubr.msk.f32.vlgmr.msra.gmra.mxu0 %vm3972_vm3, %v12537_v12  ;;  %17868 = vmatpush3.msra.mxu1 %v19481_v35 }
 0xc9f   : > { %v18415_v50 = vpop.eup %18414  ;;  %v12540_v24 = vmul.f32 %v18413_v1, %v20965_v3  ;;  %17863 = vmatpush3.msra.mxu0 %v19555_v0  ;;  %17869 = vmatprep.mubr.msk.f32.mxu1 %vm18494_vm0, %v21934_v61 }
 0xca0   : > { %v12539_v20 = vmul.f32 %v18415_v50, %v20968_v51  ;;  %17877 = vmatprep.subr.mxu1 %v21934_v61  ;;  %v11868_v21 = vpop.xlane.xlu1 %11867  ;;  %17864 = vmatprep.mubr.msk.f32.mxu0 %vm18494_vm0, %v21934_v61 }
 0xca1   : > { %18428 = vrcp.f32 %v11868_v21  ;;  %17872 = vmatprep.subr.mxu0 %v21934_v61  ;;  %v11865_v35 = vpop.xlane.xlu0 %11864  ;;  %17870 = vmatmul.mubr.msk.f32.vlgmr.msra.gmra.mxu1 %vm3972_vm3, %v12540_v24 }
 0xca2   : > { %v18417_v3 = vpop.eup %18416  ;;  %18430 = vrcp.f32 %v11865_v35  ;;  %17865 = vmatmul.mubr.msk.f32.vlgmr.msra.gmra.mxu0 %vm3972_vm3, %v12539_v20  ;;  %17878 = vmatpush3.msra.mxu1 %v19557_v45 }
 0xca3   : > { %v18419_v0 = vpop.eup %18418  ;;  %v11878_v51 = vmul.f32 %v18417_v3, %v20974_v53  ;;  %17873 = vmatpush3.msra.mxu0 %v19546_v63  ;;  %17874 = vmatprep.mubr.msk.f32.mxu0 %vm18494_vm0, %v21934_v61 }
 0xca4   : > { %v11877_v41 = vmul.f32 %v18419_v0, %v20976_v30  ;;  %17879 = vmatprep.mubr.msk.f32.mxu1 %vm18494_vm0, %v21934_v61  ;;  %17882 = vmatprep.subr.mxu0 %v21934_v61 }
 0xca5   : > { %17887 = vmatprep.subr.mxu1 %v21934_v61  ;;  %17880 = vmatmul.mubr.msk.f32.vlgmr.msra.gmra.mxu1 %vm3972_vm3, %v11878_v51 }
 0xca6   : > { %v18421_v45 = vpop.eup %18420  ;;  %17875 = vmatmul.mubr.msk.f32.vlgmr.msra.gmra.mxu0 %vm3972_vm3, %v11877_v41  ;;  %17888 = vmatpush3.msra.mxu1 %v19569_v58 }
 0xca7   : > { %v18423_v63 = vpop.eup %18422  ;;  %v11880_v53 = vmul.f32 %v18421_v45, %v20982_v34  ;;  %17883 = vmatpush3.msra.mxu0 %v19563_v29  ;;  %17884 = vmatprep.mubr.msk.f32.mxu0 %vm18494_vm0, %v21934_v61 }
 0xca8   : > { %v11879_v30 = vmul.f32 %v18423_v63, %v20984_v28  ;;  %17889 = vmatprep.mubr.msk.f32.mxu1 %vm18494_vm0, %v21934_v61  ;;  %17892 = vmatprep.subr.mxu0 %v21934_v61 }
 0xca9   : > { %17897 = vmatprep.subr.mxu1 %v21934_v61  ;;  %17890 = vmatmul.mubr.msk.f32.vlgmr.msra.gmra.mxu1 %vm3972_vm3, %v11880_v53 }
 0xcaa   : > { %v18425_v58 = vpop.eup %18424  ;;  %17885 = vmatmul.mubr.msk.f32.vlgmr.msra.gmra.mxu0 %vm3972_vm3, %v11879_v30  ;;  %17898 = vmatpush3.msra.mxu1 %v19598_v43 }
 0xcab   : > { %v18427_v29 = vpop.eup %18426  ;;  %v11882_v34 = vmul.f32 %v18425_v58, %v20990_v39  ;;  %17893 = vmatpush3.msra.mxu0 %v19571_v36  ;;  %17894 = vmatprep.mubr.msk.f32.mxu0 %vm18494_vm0, %v21934_v61 }
 0xcac   : > { %v11881_v28 = vmul.f32 %v18427_v29, %v20992_v46  ;;  %17899 = vmatprep.mubr.msk.f32.mxu1 %vm18494_vm0, %v21934_v61  ;;  %17902 = vmatprep.subr.mxu0 %v21934_v61 }
 0xcad   : > { %17907 = vmatprep.subr.mxu1 %v21934_v61  ;;  %17900 = vmatmul.mubr.msk.f32.vlgmr.msra.gmra.mxu1 %vm3972_vm3, %v11882_v34 }
 0xcae   : > { %v18429_v43 = vpop.eup %18428  ;;  %17895 = vmatmul.mubr.msk.f32.vlgmr.msra.gmra.mxu0 %vm3972_vm3, %v11881_v28  ;;  %17908 = vmatpush3.msra.mxu1 %v19694_v25  ;;  %v22027_v25 = vld [vmem:[#allocation44_spill] sm:$0xff] }
 0xcaf   : > { %v18431_v36 = vpop.eup %18430  ;;  %v11884_v39 = vmul.f32 %v18429_v43, %v20998_v44  ;;  %17903 = vmatpush3.msra.mxu0 %v19606_v31  ;;  %17904 = vmatprep.mubr.msk.f32.mxu0 %vm18494_vm0, %v21934_v61  ;;  %v22026_v31 = vld [vmem:[#allocation45_spill] sm:$0xff] }
 0xcb0   : > { %v11883_v46 = vmul.f32 %v18431_v36, %v21000_v48  ;;  %17909 = vmatprep.mubr.msk.f32.mxu1 %vm18494_vm0, %v21934_v61  ;;  %17912 = vmatprep.subr.mxu0 %v21934_v61 }
 0xcb1   : > { %17917 = vmatprep.subr.mxu1 %v21934_v61  ;;  %17910 = vmatmul.mubr.msk.f32.vlgmr.msra.gmra.mxu1 %vm3972_vm3, %v11884_v39 }
 0xcb2   : > { %17905 = vmatmul.mubr.msk.f32.vlgmr.msra.gmra.mxu0 %vm3972_vm3, %v11883_v46  ;;  %17918 = vmatpush3.xpose.msk.msra.mxu1 %vm3355_vm2, %v19719_v57  ;;  %v22029_v57 = vld [vmem:[#allocation46_spill] sm:$0xff] }
 0xcb3   : > { %17913 = vmatpush3.xpose.msk.msra.mxu0 %vm3355_vm2, %v19713_v9  ;;  %17914 = vmatprep.mubr.msk.f32.mxu0 %vm18494_vm0, %v21934_v61  ;;  %v22028_v9 = vld [vmem:[#allocation47_spill] sm:$0xff] }
 0xcb4   : > { %17919 = vmatprep.mubr.msk.f32.mxu1 %vm18494_vm0, %v21934_v61  ;;  %17922 = vmatprep.subr.mxu0 %v21934_v61 }
 0xcb5   : > { %17927 = vmatprep.subr.mxu1 %v21934_v61  ;;  %17920 = vmatmul.mubr.msk.f32.vlgmr.msra.gmra.mxu1 %vm3355_vm2, %v20644_v42  ;;  %v22030_v42 = vld [vmem:[#allocation24_spill] sm:$0xff] }
 0xcb6   : > { %17915 = vmatmul.mubr.msk.f32.vlgmr.msra.gmra.mxu0 %vm3355_vm2, %v20649_v16  ;;  %17928 = vmatpush3.xpose.msk.msra.mxu1 %vm3355_vm2, %v22026_v31  ;;  %v22031_v16 = vld [vmem:[#allocation15_spill] sm:$0xff] }
 0xcb7   : > { %17923 = vmatpush3.xpose.msk.msra.mxu0 %vm3355_vm2, %v22027_v25  ;;  %17924 = vmatprep.mubr.msk.f32.mxu0 %vm18494_vm0, %v21934_v61 }
 0xcb8   : > { %17929 = vmatprep.mubr.msk.f32.mxu1 %vm18494_vm0, %v21934_v61  ;;  %17932 = vmatprep.subr.mxu0 %v21934_v61 }
 0xcb9   : > { %17937 = vmatprep.subr.mxu1 %v21934_v61  ;;  %17930 = vmatmul.mubr.msk.f32.vlgmr.msra.gmra.mxu1 %vm3355_vm2, %v20658_v23  ;;  %v22032_v23 = vld [vmem:[#allocation30_spill] sm:$0xff] }
 0xcba   : > { %17925 = vmatmul.mubr.msk.f32.vlgmr.msra.gmra.mxu0 %vm3355_vm2, %v20669_v60  ;;  %17938 = vmatpush3.xpose.msk.msra.mxu1 %vm3355_vm2, %v22028_v9  ;;  %v22033_v60 = vld [vmem:[#allocation26_spill] sm:$0xff] }
 0xcbb   : > { %17933 = vmatpush3.xpose.msk.msra.mxu0 %vm3355_vm2, %v22029_v57  ;;  %17934 = vmatprep.mubr.msk.f32.mxu0 %vm18494_vm0, %v21934_v61 }
 0xcbc   : > { %17939 = vmatprep.mubr.msk.f32.mxu1 %vm18494_vm0, %v21934_v61  ;;  %17942 = vmatprep.subr.mxu0 %v21934_v61 }
 0xcbd   : > { %17947 = vmatprep.subr.mxu1 %v21934_v61  ;;  %17940 = vmatmul.mubr.msk.f32.vlgmr.msra.gmra.mxu1 %vm3355_vm2, %v20682_v19 }
 0xcbe   : > { %17935 = vmatmul.mubr.msk.f32.vlgmr.msra.gmra.mxu0 %vm3355_vm2, %v20689_v33  ;;  %17948 = vmatpush3.xpose.msk.msra.mxu1 %vm3355_vm2, %v22030_v42 }
 0xcbf   : > { %17943 = vmatpush3.xpose.msk.msra.mxu0 %vm3355_vm2, %v22031_v16  ;;  %17944 = vmatprep.mubr.msk.f32.mxu0 %vm18494_vm0, %v21934_v61 }
 0xcc0   : > { %17949 = vmatprep.mubr.msk.f32.mxu1 %vm18494_vm0, %v21934_v61  ;;  %17952 = vmatprep.subr.mxu0 %v21934_v61 }
 0xcc1   : > { %17957 = vmatprep.subr.mxu1 %v21934_v61  ;;  %17950 = vmatmul.mubr.msk.f32.vlgmr.msra.gmra.mxu1 %vm3355_vm2, %v20702_v32 }
 0xcc2   : > { %17945 = vmatmul.mubr.msk.f32.vlgmr.msra.gmra.mxu0 %vm3355_vm2, %v20707_v49  ;;  %17958 = vmatpush3.msra.mxu1 %v22032_v23 }
 0xcc3   : > { %17953 = vmatpush3.msra.mxu0 %v22033_v60  ;;  %17959 = vmatprep.mubr.msk.f32.mxu1 %vm18494_vm0, %v21934_v61 }
 0xcc4   : > { %17967 = vmatprep.subr.mxu1 %v21934_v61  ;;  %17954 = vmatprep.mubr.msk.f32.mxu0 %vm18494_vm0, %v21934_v61 }
 0xcc5   : > { %17962 = vmatprep.subr.mxu0 %v21934_v61 }
 0xd55   : > { %v12683_v19 = vpop.f32.mrf.mxu1 }
 0xd56   : > { %v12610_v33 = vpop.f32.mrf.mxu0 }
 0xd57   : > { %v17841_v32 = vpop.f32.mrf.mxu1 }
 0xd58   : > { %v17836_v44 = vpop.f32.mrf.mxu0 }
 0xd59   : > { %v12829_v48 = vpop.f32.mrf.mxu1 }
 0xd5a   : > { %v12756_v49 = vpop.f32.mrf.mxu0 }
 0xd5b   : > { %v17851_v15 = vpop.f32.mrf.mxu1 }
 0xd5c   : > { %v17846_v62 = vpop.f32.mrf.mxu0 }
 0xd5d   : > { %v12975_v13 = vpop.f32.mrf.mxu1 }
 0xd5e   : > { %v12902_v2 = vpop.f32.mrf.mxu0 }
 0xd5f   : > { %v17861_v52 = vpop.f32.mrf.mxu1 }
 0xd60   : > { %v17856_v18 = vpop.f32.mrf.mxu0 }
 0xd61   : > { %v13121_v59 = vpop.f32.mrf.mxu1 }
 0xd62   : > { %v13048_v38 = vpop.f32.mrf.mxu0 }
 0xd63   : > { %v17871_v22 = vpop.f32.mrf.mxu1 }
 0xd64   : > { %v17866_v6 = vpop.f32.mrf.mxu0 }
 0xd65   : > { %v13267_v37 = vpop.f32.mrf.mxu1 }
 0xd66   : > { %v13194_v26 = vpop.f32.mrf.mxu0  ;;  %v21158_v47 = vadd.f32 %v13267_v37, %v12683_v19 }
 0xd67   : > { %v21160_v7 = vadd.f32 %v13194_v26, %v12610_v33  ;;  %v17881_v40 = vpop.f32.mrf.mxu1 }
 0xd68   : > { %v17876_v12 = vpop.f32.mrf.mxu0 }
 0xd69   : > { %v13413_v4 = vpop.f32.mrf.mxu1 }
 0xd6a   : > { %v13340_v54 = vpop.f32.mrf.mxu0  ;;  %v21162_v1 = vadd.f32 %v13413_v4, %v12829_v48 }
 0xd6b   : > { %v21164_v50 = vadd.f32 %v13340_v54, %v12756_v49  ;;  %v17891_v24 = vpop.f32.mrf.mxu1 }
 0xd6c   : > { %v17886_v20 = vpop.f32.mrf.mxu0 }
 0xd6d   : > { %v13559_v21 = vpop.f32.mrf.mxu1 }
 0xd6e   : > { %v13486_v35 = vpop.f32.mrf.mxu0  ;;  %v21166_v3 = vadd.f32 %v13559_v21, %v12975_v13 }
 0xd6f   : > { %v21168_v0 = vadd.f32 %v13486_v35, %v12902_v2  ;;  %v17901_v51 = vpop.f32.mrf.mxu1 }
 0xd70   : > { %v17896_v41 = vpop.f32.mrf.mxu0 }
 0xd71   : > { %v13705_v45 = vpop.f32.mrf.mxu1 }
 0xd72   : > { %v13632_v63 = vpop.f32.mrf.mxu0  ;;  %v21170_v53 = vadd.f32 %v13705_v45, %v13121_v59 }
 0xd73   : > { %v21172_v30 = vadd.f32 %v13632_v63, %v13048_v38  ;;  %v17911_v58 = vpop.f32.mrf.mxu1 }
 0xd74   : > { %v17906_v29 = vpop.f32.mrf.mxu0 }
 0xd75   : > { %v13845_v34 = vpop.f32.mrf.mxu1 }
 0xd76   : > { %v13775_v28 = vpop.f32.mrf.mxu0  ;;  %v14270_v43 = vmul.f32 0.5, %v13845_v34 }
 0xd77   : > { %v14269_v36 = vmul.f32 0.5, %v13775_v28  ;;  %v17921_v39 = vpop.f32.mrf.mxu1 }
 0xd78   : > { %v17916_v46 = vpop.f32.mrf.mxu0  ;;  %v14280_v31 = vsel %vm3972_vm3, %v14270_v43, -inf }
 0xd79   : > { %14281 = vmax.xlane.f32.xlu1 %v14280_v31  ;;  %v13985_v25 = vpop.f32.mrf.mxu1  ;;  %v14277_v9 = vsel %vm3972_vm3, %v14269_v36, -inf }
 0xd7a   : > { %v14272_v57 = vmul.f32 0.5, %v13985_v25  ;;  %14278 = vmax.xlane.f32.xlu0 %v14277_v9  ;;  %v13915_v42 = vpop.f32.mrf.mxu0 }
 0xd7b   : > { %v14271_v16 = vmul.f32 0.5, %v13915_v42  ;;  %v17931_v23 = vpop.f32.mrf.mxu1 }
 0xd7c   : > { %v17926_v60 = vpop.f32.mrf.mxu0  ;;  %v14286_v19 = vsel %vm3972_vm3, %v14272_v57, -inf }
 0xd7d   : > { %14287 = vmax.xlane.f32.xlu1 %v14286_v19  ;;  %v14125_v33 = vpop.f32.mrf.mxu1  ;;  %v14283_v32 = vsel %vm3972_vm3, %v14271_v16, -inf }
 0xd7e   : > { %v14274_v44 = vmul.f32 0.5, %v14125_v33  ;;  %14284 = vmax.xlane.f32.xlu0 %v14283_v32  ;;  %v14055_v48 = vpop.f32.mrf.mxu0 }
 0xd7f   : > { %v14273_v49 = vmul.f32 0.5, %v14055_v48  ;;  %v17941_v15 = vpop.f32.mrf.mxu1 }
 0xd80   : > { %v17936_v62 = vpop.f32.mrf.mxu0  ;;  %v14292_v13 = vsel %vm3972_vm3, %v14274_v44, -inf }
 0xd81   : > { %14293 = vmax.xlane.f32.xlu1 %v14292_v13  ;;  %v14265_v2 = vpop.f32.mrf.mxu1  ;;  %v14289_v52 = vsel %vm3972_vm3, %v14273_v49, -inf }
 0xd82   : > { %v14276_v18 = vmul.f32 0.5, %v14265_v2  ;;  %14290 = vmax.xlane.f32.xlu0 %v14289_v52  ;;  %v14195_v59 = vpop.f32.mrf.mxu0 }
 0xd83   : > { %v14275_v38 = vmul.f32 0.5, %v14195_v59  ;;  %v17951_v22 = vpop.f32.mrf.mxu1  ;;  %v22034_v59 = vld [vmem:[#allocation3_spill] sm:$0xff] }
 0xd84   : > { %v17946_v6 = vpop.f32.mrf.mxu0  ;;  %v14298_v37 = vsel %vm3972_vm3, %v14276_v18, -inf }
 0xd85   : > { %14299 = vmax.xlane.f32.xlu1 %v14298_v37  ;;  %v14295_v26 = vsel %vm3972_vm3, %v14275_v38, -inf  ;;  %v22038_v37 = vld [vmem:[#allocation6_spill] sm:$0xff] }
 0xd86   : > { %14296 = vmax.xlane.f32.xlu0 %v14295_v26  ;;  %v22039_v26 = vld [vmem:[#allocation9_spill] sm:$0xff] }
 0xe02   : > { %v14282_v40 = vpop.xlane.xlu1 %14281 }
 0xe03   : > { %v14302_v12 = vsub.f32 %v14270_v43, %v14282_v40  ;;  %v14279_v4 = vpop.xlane.xlu0 %14278  ;;  %v22040_v40 = vcombine.high %v22038_v37, %v22039_v26 }
 0xe04   : > { %v14301_v54 = vsub.f32 %v14269_v36, %v14279_v4  ;;  %v22042_v4 = vld [vmem:[#allocation48_spill] sm:$0xff] }
 0xe05   : > { %v14311_v24 = vmul.f32 1.442695, %v14302_v12  ;;  %v22041_v12 = vld [vmem:[#allocation7_spill] sm:$0xff] }
 0xe06   : > { %v14309_v20 = vmul.f32 1.442695, %v14301_v54  ;;  %v14288_v21 = vpop.xlane.xlu1 %14287  ;;  %v22043_v54 = vcombine.high %v22041_v12, %v22042_v4 }
 0xe07   : > { %18432 = vpow2.f32 %v14311_v24  ;;  %v14304_v35 = vsub.f32 %v14272_v57, %v14288_v21  ;;  %v14285_v51 = vpop.xlane.xlu0 %14284  ;;  %v22044_v24 = vcombine.low %v22041_v12, %v22042_v4  ;;  %v22046_v21 = vld [vmem:[#allocation50_spill] sm:$0xff] }
 0xe08   : > { %18434 = vpow2.f32 %v14309_v20  ;;  %v14303_v41 = vsub.f32 %v14271_v16, %v14285_v51  ;;  %v22045_v20 = vld [vmem:[#allocation49_spill] sm:$0xff]  ;;  %v22061_v4 = vld [vmem:[#allocation2_spill] sm:$0xff] }
 0xe09   : > { %v14315_v45 = vmul.f32 1.442695, %v14304_v35  ;;  %v22047_v35 = vcombine.high %v22045_v20, %v22046_v21  ;;  %v22048_v51 = vcombine.low %v22045_v20, %v22046_v21 }
 0xe0a   : > { %v14313_v63 = vmul.f32 1.442695, %v14303_v41  ;;  %v14294_v58 = vpop.xlane.xlu1 %14293  ;;  %v22049_v41 = vcombine.low %v20817_v27, %v20820_v8 }
 0xe0b   : > { %18436 = vpow2.f32 %v14315_v45  ;;  %v14306_v29 = vsub.f32 %v14274_v44, %v14294_v58  ;;  %v14291_v34 = vpop.xlane.xlu0 %14290  ;;  %v22050_v45 = vcombine.high %v20827_v55, %v20836_v17  ;;  %v22052_v58 = vcombine.high %v20817_v27, %v20820_v8 }
 0xe0c   : > { %18438 = vpow2.f32 %v14313_v63  ;;  %v14305_v28 = vsub.f32 %v14273_v49, %v14291_v34  ;;  %v22051_v63 = vcombine.low %v20847_v56, %v20850_v14  ;;  %v22054_v34 = vcombine.low %v20853_v11, %v20856_v5 }
 0xe0d   : > { %v14319_v39 = vmul.f32 1.442695, %v14306_v29  ;;  %v22053_v29 = vcombine.high %v20847_v56, %v20850_v14 }
 0xe0e   : > { %v14317_v43 = vmul.f32 1.442695, %v14305_v28  ;;  %v14300_v46 = vpop.xlane.xlu1 %14299  ;;  %v22055_v28 = vcombine.high %v20853_v11, %v20856_v5 }
 0xe0f   : > { %18440 = vpow2.f32 %v14319_v39  ;;  %v14308_v36 = vsub.f32 %v14276_v18, %v14300_v46  ;;  %v14297_v31 = vpop.xlane.xlu0 %14296 }
 0xe10   : > { %18442 = vpow2.f32 %v14317_v43  ;;  %v14307_v25 = vsub.f32 %v14275_v38, %v14297_v31  ;;  %v22035_v38 = vld [vmem:[#allocation8_spill] sm:$0xff] }
 0xe11   : > { %v14323_v9 = vmul.f32 1.442695, %v14308_v36  ;;  %v22036_v22 = vcombine.low %v22034_v59, %v22035_v38  ;;  %v22037_v6 = vcombine.high %v22034_v59, %v22035_v38  ;;  %v22059_v38 = vcombine.low %v22038_v37, %v22039_v26 }
 0xe12   : > { %v14321_v57 = vmul.f32 1.442695, %v14307_v25 }
 0xe13   : > { %18444 = vpow2.f32 %v14323_v9 }
 0xe14   : > { %v21182_v42 = vpop.eup %18432  ;;  %18446 = vpow2.f32 %v14321_v57 }
 0xe15   : > { %v21184_v16 = vpop.eup %18434  ;;  %v14328_v23 = vsel %vm3972_vm3, %v21182_v42, 0.0 }
 0xe16   : > { %14329 = vadd.xlane.f32.xlu1 %v14328_v23  ;;  %v14325_v60 = vsel %vm3972_vm3, %v21184_v16, 0.0 }
 0xe17   : > { %14326 = vadd.xlane.f32.xlu0 %v14325_v60 }
 0xe18   : > { %v21190_v19 = vpop.eup %18436 }
 0xe19   : > { %v21192_v33 = vpop.eup %18438  ;;  %v14334_v32 = vsel %vm3972_vm3, %v21190_v19, 0.0 }
 0xe1a   : > { %14335 = vadd.xlane.f32.xlu1 %v14334_v32  ;;  %v14331_v44 = vsel %vm3972_vm3, %v21192_v33, 0.0 }
 0xe1b   : > { %14332 = vadd.xlane.f32.xlu0 %v14331_v44  ;;  %v22056_v44 = vld [vmem:[#allocation43_spill] sm:$0xff] }
 0xe1c   : > { %v21198_v48 = vpop.eup %18440 }
 0xe1d   : > { %v21200_v49 = vpop.eup %18442  ;;  %v14340_v15 = vsel %vm3972_vm3, %v21198_v48, 0.0 }
 0xe1e   : > { %14341 = vadd.xlane.f32.xlu1 %v14340_v15  ;;  %v14337_v62 = vsel %vm3972_vm3, %v21200_v49, 0.0 }
 0xe1f   : > { %14338 = vadd.xlane.f32.xlu0 %v14337_v62 }
 0xe20   : > { %v21206_v13 = vpop.eup %18444 }
 0xe21   : > { %v21208_v2 = vpop.eup %18446  ;;  %v14346_v52 = vsel %vm3972_vm3, %v21206_v13, 0.0 }
 0xe22   : > { %14347 = vadd.xlane.f32.xlu1 %v14346_v52  ;;  %v14343_v18 = vsel %vm3972_vm3, %v21208_v2, 0.0 }
 0xe23   : > { %14344 = vadd.xlane.f32.xlu0 %v14343_v18 }
 0xe33   : > { %15234 = vrot.lane.b32.xlu1 %v22036_v22, %s18506_s29 }
 0xe37   : > { %15238 = vrot.lane.b32.xlu1 %v22037_v6, %s18507_s30 }
 0xe39   : > { %15230 = vrot.lane.b32.xlu0 %v22040_v40, %s18508_s14 }
 0xe3b   : > { %15246 = vrot.lane.b32.xlu1 %v22043_v54, %s18509_s15 }
 0xe3d   : > { %15242 = vrot.lane.b32.xlu0 %v22044_v24, %s18510_s17  ;;  %v15614_v24 = vld [vmem:[%s21765_s3 + $0x18] sm:$0xff] }
 0xe3f   : > { %15254 = vrot.lane.b32.xlu1 %v22047_v35, %s18511_s18 }
 0xe41   : > { %15250 = vrot.lane.b32.xlu0 %v22048_v51, %s18512_s19  ;;  %v15612_v51 = vld [vmem:[%s21765_s3 + $0x8] sm:$0xff] }
 0xe43   : > { %15410 = vrot.lane.b32.xlu1 %v22049_v41, %s18506_s29 }
 0xe45   : > { %15406 = vrot.lane.b32.xlu0 %v22050_v45, %s18508_s14 }
 0xe47   : > { %15418 = vrot.lane.b32.xlu1 %v22051_v63, %s18510_s17  ;;  %v15611_v63 = vld [vmem:[%s21765_s3] sm:$0xff] }
 0xe49   : > { %15414 = vrot.lane.b32.xlu0 %v22052_v58, %s18507_s30 }
 0xe4d   : > { %15422 = vrot.lane.b32.xlu0 %v22053_v29, %s18509_s15  ;;  %v22062_v29 = vcombine.low %v20827_v55, %v20836_v17 }
 0xe51   : > { %15426 = vrot.lane.b32.xlu0 %v22054_v34, %s18512_s19 }
 0xe55   : > { %15430 = vrot.lane.b32.xlu0 %v22055_v28, %s18511_s18 }
 0xe9f   : > { %v14330_v39 = vpop.xlane.xlu1 %14329 }
 0xea0   : > { %18448 = vrcp.f32 %v14330_v39  ;;  %v14327_v43 = vpop.xlane.xlu0 %14326 }
 0xea1   : > { %18450 = vrcp.f32 %v14327_v43 }
 0xea3   : > { %v14336_v27 = vpop.xlane.xlu1 %14335 }
 0xea4   : > { %18452 = vrcp.f32 %v14336_v27  ;;  %v14333_v8 = vpop.xlane.xlu0 %14332 }
 0xea5   : > { %18454 = vrcp.f32 %v14333_v8 }
 0xea7   : > { %v14342_v56 = vpop.xlane.xlu1 %14341 }
 0xea8   : > { %18456 = vrcp.f32 %v14342_v56  ;;  %v14339_v14 = vpop.xlane.xlu0 %14338 }
 0xea9   : > { %18458 = vrcp.f32 %v14339_v14 }
 0xeab   : > { %v14348_v46 = vpop.xlane.xlu1 %14347 }
 0xeac   : > { %18460 = vrcp.f32 %v14348_v46  ;;  %v14345_v36 = vpop.xlane.xlu0 %14344 }
 0xead   : > { %v18449_v31 = vpop.eup %18448  ;;  %18462 = vrcp.f32 %v14345_v36 }
 0xeae   : > { %v18451_v25 = vpop.eup %18450  ;;  %v14358_v11 = vmul.f32 %v18449_v31, %v21182_v42 }
 0xeaf   : > { %v14357_v5 = vmul.f32 %v18451_v25, %v21184_v16  ;;  %v15235_v9 = vpop.permute.xlu1 %15234 }
 0xeb0   : > { %v15231_v57 = vpop.permute.xlu0 %15230  ;;  %17960 = vmatmul.mubr.msk.f32.vlgmr.msra.gmra.mxu1 %vm3972_vm3, %v14358_v11 }
 0xeb1   : > { %v18453_v23 = vpop.eup %18452  ;;  %17955 = vmatmul.mubr.msk.f32.vlgmr.msra.gmra.mxu0 %vm3972_vm3, %v14357_v5  ;;  %17968 = vmatpush3.msra.mxu1 %v19721_v10  ;;  %v15257_v22 = vsel %vm3355_vm2, %v22059_v38, %v15231_v57 }
 0xeb2   : > { %v18455_v60 = vpop.eup %18454  ;;  %v14360_v32 = vmul.f32 %v18453_v23, %v21190_v19  ;;  %17963 = vmatpush3.msra.mxu0 %v22056_v44  ;;  %17969 = vmatprep.mubr.msk.f32.mxu1 %vm18494_vm0, %v21934_v61  ;;  %v22057_v19 = vld [vmem:[#allocation4_spill] sm:$0xff]  ;;  %v15258_v26 = vsel %vm3972_vm3, %v15257_v22, %v15235_v9 }
 0xeb3   : > { %v14359_v42 = vmul.f32 %v18455_v60, %v21192_v33  ;;  %17977 = vmatprep.subr.mxu1 %v21934_v61  ;;  %v15239_v16 = vpop.permute.xlu1 %15238  ;;  %17964 = vmatprep.mubr.msk.f32.mxu0 %vm18494_vm0, %v21934_v61  ;;  %v22058_v33 = vld [vmem:[#allocation32_spill] sm:$0xff] }
 0xeb4   : > { %17972 = vmatprep.subr.mxu0 %v21934_v61  ;;  %v15243_v15 = vpop.permute.xlu0 %15242  ;;  %17970 = vmatmul.mubr.msk.f32.vlgmr.msra.gmra.mxu1 %vm3972_vm3, %v14360_v32 }
 0xeb5   : > { %v18457_v10 = vpop.eup %18456  ;;  %17965 = vmatmul.mubr.msk.f32.vlgmr.msra.gmra.mxu0 %vm3972_vm3, %v14359_v42  ;;  %17978 = vmatpush3.msra.mxu1 %v22057_v19 }
 0xeb6   : > { %v18459_v62 = vpop.eup %18458  ;;  %v14362_v52 = vmul.f32 %v18457_v10, %v21198_v48  ;;  %17973 = vmatpush3.msra.mxu0 %v22058_v33  ;;  %17979 = vmatprep.mubr.msk.f32.mxu1 %vm18494_vm0, %v21934_v61  ;;  %v22063_v33 = vld [vmem:[#allocation11_spill] sm:$0xff] }
 0xeb7   : > { %v14361_v18 = vmul.f32 %v18459_v62, %v21200_v49  ;;  %17987 = vmatprep.subr.mxu1 %v21934_v61  ;;  %v15247_v59 = vpop.permute.xlu1 %15246  ;;  %17974 = vmatprep.mubr.msk.f32.mxu0 %vm18494_vm0, %v21934_v61  ;;  %v22060_v49 = vld [vmem:[#allocation5_spill] sm:$0xff] }
 0xeb8   : > { %17982 = vmatprep.subr.mxu0 %v21934_v61  ;;  %v15251_v48 = vpop.permute.xlu0 %15250  ;;  %17980 = vmatmul.mubr.msk.f32.vlgmr.msra.gmra.mxu1 %vm3972_vm3, %v14362_v52 }
 0xeb9   : > { %v18461_v6 = vpop.eup %18460  ;;  %17975 = vmatmul.mubr.msk.f32.vlgmr.msra.gmra.mxu0 %vm3972_vm3, %v14361_v18  ;;  %17988 = vmatpush3.msra.mxu1 %v22060_v49 }
 0xeba   : > { %v18463_v40 = vpop.eup %18462  ;;  %v14364_v12 = vmul.f32 %v18461_v6, %v21206_v13  ;;  %17983 = vmatpush3.msra.mxu0 %v22061_v4  ;;  %17989 = vmatprep.mubr.msk.f32.mxu1 %vm18494_vm0, %v21934_v61  ;;  %v15260_v13 = vsel %vm15259_vm4, %v15258_v26, %v15239_v16  ;;  %v22064_v26 = vld [vmem:[#allocation12_spill] sm:$0xff] }
 0xebb   : > { %v14363_v37 = vmul.f32 %v18463_v40, %v21208_v2  ;;  %v15255_v54 = vpop.permute.xlu1 %15254  ;;  %17984 = vmatprep.mubr.msk.f32.mxu0 %vm18494_vm0, %v21934_v61  ;;  %17992 = vmatprep.subr.mxu0 %v21934_v61  ;;  %v15613_v2 = vld [vmem:[%s21765_s3 + $0x10] sm:$0xff]  ;;  %v15262_v21 = vsel %vm15261_vm5, %v15260_v13, %v15243_v15 }
 0xebc   : > { %v15407_v20 = vpop.permute.xlu0 %15406  ;;  %17990 = vmatmul.mubr.msk.f32.vlgmr.msra.gmra.mxu1 %vm3972_vm3, %v14364_v12  ;;  %18009 = vmatprep.subr.mxu1 %v21934_v61  ;;  %v15264_v41 = vsel %vm15263_vm6, %v15262_v21, %v15247_v59 }
 0xebd   : > { %17985 = vmatmul.mubr.msk.f32.vlgmr.msra.gmra.mxu0 %vm3972_vm3, %v14363_v37  ;;  %18017 = vmatprep.mubr.msk.f32.mxu1 %vm18494_vm0, %v21934_v61  ;;  %v15266_v58 = vsel %vm15265_vm7, %v15264_v41, %v15251_v48  ;;  %v15433_v34 = vsel %vm3355_vm2, %v22062_v29, %v15407_v20 }
 0xebe   : > { %17993 = vmatpush3.msra.mxu0 %v15614_v24  ;;  %18000 = vmatprep.mubr.msk.f32.mxu0 %vm18494_vm0, %v21934_v61  ;;  %v15268_v28 = vsel %vm15267_vm8, %v15266_v58, %v15255_v54 }
 0xebf   : > { %17994 = vmatprep.subr.mxu0 %v21934_v61  ;;  %v15411_v35 = vpop.permute.xlu1 %15410 }
 0xec0   : > { %17995 = vmatpush3.msra.mxu0 %v15613_v2  ;;  %v15415_v45 = vpop.permute.xlu0 %15414  ;;  %v15434_v39 = vsel %vm3972_vm3, %v15433_v34, %v15411_v35 }
 0xec1   : > { %17996 = vmatprep.subr.mxu0 %v21934_v61  ;;  %v15435_v55 = vsel %vm15259_vm4, %v15434_v39, %v15415_v45 }
 0xec2   : > { %17997 = vmatpush3.msra.mxu0 %v15612_v51 }
 0xec3   : > { %17998 = vmatprep.subr.mxu0 %v21934_v61  ;;  %v15419_v27 = vpop.permute.xlu1 %15418 }
 0xec4   : > { %17999 = vmatpush3.msra.mxu0 %v15611_v63  ;;  %v15423_v43 = vpop.permute.xlu0 %15422  ;;  %v15436_v17 = vsel %vm15261_vm5, %v15435_v55, %v15419_v27 }
 0xec5   : > { %18001 = vmatmul.mubr.msk.f32.vlgmr.msra.gmra.mxu0 %vm477_vm1, %v15268_v28  ;;  %18031 = vmatprep.subr.mxu0 %v21934_v61  ;;  %v15437_v56 = vsel %vm15263_vm6, %v15436_v17, %v15423_v43 }
 0xec6   : > { %18003 = vmatprep.mubr.msk.f32.mxu0 %vm18494_vm0, %v21934_v61 }
 0xec8   : > { %v15427_v8 = vpop.permute.xlu0 %15426 }
 0xec9   : > { %v15438_v14 = vsel %vm15265_vm7, %v15437_v56, %v15427_v8 }
 0xecc   : > { %v15431_v46 = vpop.permute.xlu0 %15430 }
 0xecd   : > { %v15439_v36 = vsel %vm15267_vm8, %v15438_v14, %v15431_v46 }
 0xece   : > { %18004 = vmatmul.mubr.msk.f32.gmra.mxu0 %vm477_vm1, %v15439_v36 }
 0xecf   : > { %18006 = vmatprep.mubr.msk.f32.mxu0 %vm18494_vm0, %v21934_v61 }
 0xf70   : > { %v14507_v31 = vpop.f32.mrf.mxu1 }
 0xf71   : > { %v14434_v25 = vpop.f32.mrf.mxu0  ;;  %v14950_v57 = vadd.f32 %v14507_v31, %v21158_v47 }
 0xf72   : > { %v17961_v11 = vpop.f32.mrf.mxu1  ;;  %v14949_v32 = vadd.f32 %v14434_v25, %v21160_v7 }
 0xf73   : > { %v17956_v5 = vpop.f32.mrf.mxu0 }
 0xf74   : > { %v14653_v9 = vpop.f32.mrf.mxu1 }
 0xf75   : > { %v14580_v23 = vpop.f32.mrf.mxu0  ;;  %v14952_v60 = vadd.f32 %v14653_v9, %v21162_v1 }
 0xf76   : > { %v14951_v44 = vadd.f32 %v14580_v23, %v21164_v50  ;;  %v17971_v42 = vpop.f32.mrf.mxu1 }
 0xf77   : > { %v14973_v16 = vcombine.low %v14950_v57, %v14952_v60  ;;  %v14974_v15 = vcombine.high %v14950_v57, %v14952_v60  ;;  %v17966_v10 = vpop.f32.mrf.mxu0 }
 0xf78   : > { %v14957_v19 = vcombine.low %v14949_v32, %v14951_v44  ;;  %v14958_v62 = vcombine.high %v14949_v32, %v14951_v44  ;;  %v14799_v52 = vpop.f32.mrf.mxu1 }
 0xf79   : > { %v14981_v18 = vrot.slane %v14973_v16, %v22063_v33  ;;  %v14988_v59 = vrot.slane %v14974_v15, %v22063_v33  ;;  %v14726_v38 = vpop.f32.mrf.mxu0  ;;  %v14954_v12 = vadd.f32 %v14799_v52, %v21166_v3 }
 0xf7a   : > { %v14965_v47 = vrot.slane %v14957_v19, %v22063_v33  ;;  %v14972_v1 = vrot.slane %v14958_v62, %v22063_v33  ;;  %v17981_v22 = vpop.f32.mrf.mxu1  ;;  %v14953_v21 = vadd.f32 %v14726_v38, %v21168_v0 }
 0xf7b   : > { %v17976_v7 = vpop.f32.mrf.mxu0 }
 0xf7c   : > { %v15021_v48 = vcombine.low %v14965_v47, %v14981_v18  ;;  %v15022_v50 = vcombine.high %v14965_v47, %v14981_v18  ;;  %v15037_v6 = vcombine.low %v14972_v1, %v14988_v59  ;;  %v15038_v49 = vcombine.high %v14972_v1, %v14988_v59  ;;  %v14945_v40 = vpop.f32.mrf.mxu1 }
 0xf7d   : > { %v14872_v4 = vpop.f32.mrf.mxu0  ;;  %v14956_v37 = vadd.f32 %v14945_v40, %v21170_v53 }
 0xf7e   : > { %v15029_v54 = vrot.slane %v15021_v48, %v22064_v26  ;;  %v15036_v24 = vrot.slane %v15022_v50, %v22064_v26  ;;  %v15045_v13 = vrot.slane %v15037_v6, %v22064_v26  ;;  %v15052_v20 = vrot.slane %v15038_v49, %v22064_v26  ;;  %v17991_v2 = vpop.f32.mrf.mxu1 }
 0xf7f   : > { %v14955_v35 = vadd.f32 %v14872_v4, %v21172_v30  ;;  %v15005_v51 = vcombine.low %v14954_v12, %v14956_v37  ;;  %v15006_v41 = vcombine.high %v14954_v12, %v14956_v37  ;;  %v17986_v45 = vpop.f32.mrf.mxu0 }
 0xf80   : > { %v16828_v3 = vcombine.low %v15029_v54, %v15036_v24  ;;  %v16830_v63 = vcombine.high %v15029_v54, %v15036_v24  ;;  %v16832_v58 = vcombine.low %v15045_v13, %v15052_v20  ;;  %v16834_v53 = vcombine.high %v15045_v13, %v15052_v20 }
 0xf81   : > { %v14989_v29 = vcombine.low %v14953_v21, %v14955_v35  ;;  %v14990_v34 = vcombine.high %v14953_v21, %v14955_v35  ;;  %v15013_v28 = vrot.slane %v15005_v51, %v22063_v33  ;;  %v15020_v39 = vrot.slane %v15006_v41, %v22063_v33  ;;  %v16839_v35 = vld [vmem:[%s21766_s4] ss:$0 sm:$0xff] }
 0xf82   : > { %v15448_v43 = vrot.slane %v16828_v3, %v22063_v33  ;;  %v15464_v27 = vrot.slane %v16830_v63, %v22063_v33  ;;  %v15480_v0 = vrot.slane %v16832_v58, %v22063_v33  ;;  %v15496_v30 = vrot.slane %v16834_v53, %v22063_v33  ;;  %v18482_v51 = vld [vmem:[%s18619_s21] sm:$0xff]  ;;  %v18483_v63 = vld [vmem:[%s18619_s21 + $0x8] sm:$0xff] }
 0xf83   : > { %v14997_v55 = vrot.slane %v14989_v29, %v22063_v33  ;;  %v15004_v17 = vrot.slane %v14990_v34, %v22063_v33 }
 0xf84   : > { %v15504_v8 = vcombine.low %v15448_v43, %v15464_v27  ;;  %v15536_v56 = vcombine.low %v15480_v0, %v15496_v30  ;;  %v15505_v14 = vcombine.high %v15448_v43, %v15464_v27  ;;  %v15537_v46 = vcombine.high %v15480_v0, %v15496_v30 }
 0xf85   : > { %v15053_v36 = vcombine.low %v14997_v55, %v15013_v28  ;;  %v15054_v31 = vcombine.high %v14997_v55, %v15013_v28  ;;  %v15069_v25 = vcombine.low %v15004_v17, %v15020_v39  ;;  %v15070_v11 = vcombine.high %v15004_v17, %v15020_v39  ;;  %v15690_v5 = vpop.f32.mrf.mxu0 }
 0xf86   : > { %v15512_v9 = vrot.slane %v15504_v8, %v22064_v26  ;;  %v15544_v57 = vrot.slane %v15536_v56, %v22064_v26  ;;  %v15519_v23 = vrot.slane %v15505_v14, %v22064_v26  ;;  %v15551_v10 = vrot.slane %v15537_v46, %v22064_v26 }
 0xf87   : > { %v15061_v60 = vrot.slane %v15053_v36, %v22064_v26  ;;  %v15068_v32 = vrot.slane %v15054_v31, %v22064_v26  ;;  %v15077_v44 = vrot.slane %v15069_v25, %v22064_v26  ;;  %v15084_v42 = vrot.slane %v15070_v11, %v22064_v26  ;;  %v18002_v16 = vpop.f32.mrf.mxu0 }
 0xf88   : > { %v15569_v15 = vcombine.high %v15512_v9, %v15544_v57  ;;  %v15568_v19 = vcombine.low %v15512_v9, %v15544_v57  ;;  %v15570_v38 = vcombine.low %v15519_v23, %v15551_v10  ;;  %v15571_v47 = vcombine.high %v15519_v23, %v15551_v10 }
 0xf89   : > { %v16829_v62 = vcombine.low %v15061_v60, %v15068_v32  ;;  %v16831_v52 = vcombine.high %v15061_v60, %v15068_v32  ;;  %v16833_v18 = vcombine.low %v15077_v44, %v15084_v42  ;;  %v16835_v59 = vcombine.high %v15077_v44, %v15084_v42  ;;  %v18484_v42 = vld [vmem:[%s18619_s21 + $0x10] sm:$0xff] }
 0xf8a   : > { %15577 = vrot.lane.b32.xlu1 %v15569_v15, %s18508_s14 }
 0xf8b   : > { %v15455_v1 = vrot.slane %v16829_v62, %v22063_v33  ;;  %v15471_v22 = vrot.slane %v16831_v52, %v22063_v33  ;;  %v15487_v7 = vrot.slane %v16833_v18, %v22063_v33  ;;  %v15503_v48 = vrot.slane %v16835_v59, %v22063_v33  ;;  %v15808_v62 = vld [vmem:[%s21769_s7 + $0x18] sm:$0xff]  ;;  %v15807_v52 = vld [vmem:[%s21769_s7 + $0x10] sm:$0xff]  ;;  %v15806_v18 = vld [vmem:[%s21769_s7 + $0x8] sm:$0xff] }
 0xf8c   : > { %18010 = vmatpush3.msra.mxu1 %v15808_v62  ;;  %v15805_v59 = vld [vmem:[%s21769_s7] sm:$0xff] }
 0xf8d   : > { %v15520_v50 = vcombine.low %v15455_v1, %v15471_v22  ;;  %v15552_v6 = vcombine.low %v15487_v7, %v15503_v48  ;;  %v15521_v49 = vcombine.high %v15455_v1, %v15471_v22  ;;  %v15553_v40 = vcombine.high %v15487_v7, %v15503_v48  ;;  %18011 = vmatprep.subr.mxu1 %v21934_v61  ;;  %v16112_v62 = vld [vmem:[%s21771_s9 + $0xe0] sm:$0xff] }
 0xf8e   : > { %15581 = vrot.lane.b32.xlu1 %v15570_v38, %s18506_s29  ;;  %v15695_v12 = vpop.f32.mrf.mxu0  ;;  %18012 = vmatpush3.msra.mxu1 %v15807_v52  ;;  %v16111_v52 = vld [vmem:[%s21771_s9 + $0xd8] sm:$0xff] }
 0xf8f   : > { %v15528_v4 = vrot.slane %v15520_v50, %v22064_v26  ;;  %v15560_v37 = vrot.slane %v15552_v6, %v22064_v26  ;;  %v15535_v54 = vrot.slane %v15521_v49, %v22064_v26  ;;  %v15567_v13 = vrot.slane %v15553_v40, %v22064_v26  ;;  %18013 = vmatprep.subr.mxu1 %v21934_v61 }
 0xf90   : > { %v18005_v24 = vpop.f32.mrf.mxu0  ;;  %v15711_v26 = vadd.f32 %v16839_v35, %v15690_v5  ;;  %v15712_v45 = vadd.f32 %v16839_v35, %v15695_v12  ;;  %18014 = vmatpush3.msra.mxu1 %v15806_v18  ;;  %v16110_v18 = vld [vmem:[%s21771_s9 + $0xd0] sm:$0xff] }
 0xf91   : > { %v15572_v20 = vcombine.low %v15528_v4, %v15560_v37  ;;  %v15573_v33 = vcombine.high %v15528_v4, %v15560_v37  ;;  %v15574_v2 = vcombine.low %v15535_v54, %v15567_v13  ;;  %v15575_v21 = vcombine.high %v15535_v54, %v15567_v13  ;;  %18015 = vmatprep.subr.mxu1 %v21934_v61  ;;  %v16840_v37 = vld [vmem:[%s21767_s5] ss:$0 sm:$0xff] }
 0xf92   : > { %15585 = vrot.lane.b32.xlu1 %v15571_v47, %s18507_s30  ;;  %v15714_v41 = vadd.f32 %v18482_v51, %v15711_v26  ;;  %v15715_v58 = vadd.f32 %v18483_v63, %v15712_v45  ;;  %18016 = vmatpush3.msra.mxu1 %v15805_v59  ;;  %v16843_v13 = vld [vmem:[%s21768_s6] ss:$0 sm:$0xff]  ;;  %v15811_v26 = vld [vmem:[%s21769_s7 + $0x30] sm:$0xff]  ;;  %v16844_v45 = vld [vmem:[%s21768_s6 + $0x1] ss:$0 sm:$0xff] }
 0xf93   : > { %15589 = vrot.lane.b32.xlu0 %v15572_v20, %s18510_s17  ;;  %18020 = vmatprep.subr.mxu1 %v21934_v61  ;;  %v16109_v59 = vld [vmem:[%s21771_s9 + $0xc8] sm:$0xff] }
 0xf94   : > { %v15723_v3 = vsel %vm477_vm1, %v15714_v41, 0.0  ;;  %v15726_v53 = vsel %vm477_vm1, %v15715_v58, 0.0 }
 0xf96   : > { %15593 = vrot.lane.b32.xlu1 %v15573_v33, %s18509_s15 }
 0xf97   : > { %15597 = vrot.lane.b32.xlu0 %v15574_v2, %s18512_s19 }
 0xf9a   : > { %15601 = vrot.lane.b32.xlu1 %v15575_v21, %s18511_s18  ;;  %v15812_v21 = vld [vmem:[%s21769_s7 + $0x38] sm:$0xff] }
 0xfb6   : > { %15724 = vadd.xlane.f32.xlu0 %v15723_v3  ;;  %v15809_v3 = vld [vmem:[%s21769_s7 + $0x20] sm:$0xff] }
 0xfbe   : > { %15727 = vadd.xlane.f32.xlu1 %v15726_v53  ;;  %v15815_v53 = vld [vmem:[%s21769_s7 + $0x50] sm:$0xff] }
 0xffc   : > { %v15578_v29 = vpop.permute.xlu1 %15577 }
 0xffd   : > { %v15604_v28 = vsel %vm3355_vm2, %v15568_v19, %v15578_v29  ;;  %v15814_v29 = vld [vmem:[%s21769_s7 + $0x48] sm:$0xff] }
0x1000   : > { %v15582_v34 = vpop.permute.xlu1 %15581 }
0x1001   : > { %v15605_v39 = vsel %vm3972_vm3, %v15604_v28, %v15582_v34  ;;  %v15813_v34 = vld [vmem:[%s21769_s7 + $0x40] sm:$0xff]  ;;  %v16099_v28 = vld [vmem:[%s21771_s9 + $0x78] sm:$0xff] }
0x1004   : > { %v15586_v43 = vpop.permute.xlu1 %15585 }
0x1005   : > { %v15606_v27 = vsel %vm15259_vm4, %v15605_v39, %v15586_v43  ;;  %v15590_v0 = vpop.permute.xlu0 %15589  ;;  %v16098_v39 = vld [vmem:[%s21771_s9 + $0x70] sm:$0xff]  ;;  %v16097_v43 = vld [vmem:[%s21771_s9 + $0x68] sm:$0xff] }
0x1006   : > { %v15607_v30 = vsel %vm15261_vm5, %v15606_v27, %v15590_v0  ;;  %v16096_v27 = vld [vmem:[%s21771_s9 + $0x60] sm:$0xff]  ;;  %v16095_v0 = vld [vmem:[%s21771_s9 + $0x58] sm:$0xff] }
0x1008   : > { %v15594_v55 = vpop.permute.xlu1 %15593 }
0x1009   : > { %v15608_v17 = vsel %vm15263_vm6, %v15607_v30, %v15594_v55  ;;  %v15598_v8 = vpop.permute.xlu0 %15597  ;;  %v16094_v30 = vld [vmem:[%s21771_s9 + $0x50] sm:$0xff]  ;;  %v16093_v55 = vld [vmem:[%s21771_s9 + $0x48] sm:$0xff] }
0x100a   : > { %v15609_v56 = vsel %vm15265_vm7, %v15608_v17, %v15598_v8  ;;  %v16092_v17 = vld [vmem:[%s21771_s9 + $0x40] sm:$0xff]  ;;  %v16091_v8 = vld [vmem:[%s21771_s9 + $0x38] sm:$0xff] }
0x100c   : > { %v15602_v14 = vpop.permute.xlu1 %15601 }
0x100d   : > { %v15610_v46 = vsel %vm15267_vm8, %v15609_v56, %v15602_v14  ;;  %v16090_v56 = vld [vmem:[%s21771_s9 + $0x30] sm:$0xff]  ;;  %v16089_v14 = vld [vmem:[%s21771_s9 + $0x28] sm:$0xff] }
0x100e   : > { %18007 = vmatmul.mubr.msk.f32.gmra.mxu0 %vm477_vm1, %v15610_v46  ;;  %v16088_v46 = vld [vmem:[%s21771_s9 + $0x20] sm:$0xff] }
0x100f   : > { %18039 = vmatprep.mubr.msk.f32.mxu0 %vm18494_vm0, %v21934_v61 }
0x103f   : > { %v15725_v9 = vpop.xlane.xlu0 %15724 }
0x1040   : > { %v15733_v57 = vmul.f32 0.03125, %v15725_v9 }
0x1042   : > { %v15736_v60 = vsub.f32 %v15714_v41, %v15733_v57  ;;  %v15810_v41 = vld [vmem:[%s21769_s7 + $0x28] sm:$0xff] }
0x1044   : > { %v15739_v10 = vmul.f32 %v15736_v60, %v15736_v60 }
0x1046   : > { %v15742_v19 = vsel %vm477_vm1, %v15739_v10, 0.0  ;;  %v16114_v10 = vld [vmem:[%s21771_s9 + $0xf0] sm:$0xff] }
0x1047   : > { %v15728_v36 = vpop.xlane.xlu1 %15727 }
0x1048   : > { %v15734_v31 = vmul.f32 0.03125, %v15728_v36  ;;  %v16087_v36 = vld [vmem:[%s21771_s9 + $0x18] sm:$0xff] }
0x104a   : > { %v15737_v25 = vsub.f32 %v15715_v58, %v15734_v31  ;;  %v15816_v58 = vld [vmem:[%s21769_s7 + $0x58] sm:$0xff]  ;;  %v16086_v31 = vld [vmem:[%s21771_s9 + $0x10] sm:$0xff] }
0x104b   : > { %18032 = vmatpush3.msra.mxu0 %v15816_v58 }
0x104c   : > { %v15740_v11 = vmul.f32 %v15737_v25, %v15737_v25  ;;  %18033 = vmatprep.subr.mxu0 %v21934_v61 }
0x104d   : > { %18034 = vmatpush3.msra.mxu0 %v15815_v53 }
0x104e   : > { %v15745_v5 = vsel %vm477_vm1, %v15740_v11, 0.0  ;;  %18035 = vmatprep.subr.mxu0 %v21934_v61  ;;  %v16084_v11 = vld [vmem:[%s21771_s9] sm:$0xff] }
0x104f   : > { %15746 = vadd.xlane.f32.xlu1 %v15745_v5  ;;  %18036 = vmatpush3.msra.mxu0 %v15814_v29 }
0x1050   : > { %18037 = vmatprep.subr.mxu0 %v21934_v61 }
0x1051   : > { %18038 = vmatpush3.msra.mxu0 %v15813_v34 }
0x1052   : > { %18077 = vmatprep.subr.mxu0 %v21934_v61 }
0x10ce   : > { %v15700_v23 = vpop.f32.mrf.mxu0 }
0x10cf   : > { %v15713_v32 = vadd.f32 %v16839_v35, %v15700_v23  ;;  %v16841_v35 = vld [vmem:[%s21767_s5 + $0x1] ss:$0 sm:$0xff] }
0x10d0   : > { %v18008_v44 = vpop.f32.mrf.mxu0 }
0x10d1   : > { %v15716_v16 = vadd.f32 %v18484_v42, %v15713_v32  ;;  %v16845_v44 = vld [vmem:[%s21768_s6 + $0x2] ss:$0 sm:$0xff] }
0x10d3   : > { %v15729_v15 = vsel %vm477_vm1, %v15716_v16, 0.0 }
0x10d4   : > { %15730 = vadd.xlane.f32.xlu0 %v15729_v15  ;;  %v16115_v15 = vld [vmem:[%s21771_s9 + $0xf8] sm:$0xff] }
0x10d8   : > { %15743 = vadd.xlane.f32.xlu0 %v15742_v19  ;;  %v15747_v38 = vpop.xlane.xlu1 %15746  ;;  %v16113_v19 = vld [vmem:[%s21771_s9 + $0xe8] sm:$0xff] }
0x10d9   : > { %v15752_v22 = vmul.f32 0.03125, %v15747_v38  ;;  %v16108_v38 = vld [vmem:[%s21771_s9 + $0xc0] sm:$0xff] }
0x10db   : > { %v15755_v49 = vadd.f32 1e-05, %v15752_v22  ;;  %v16105_v22 = vld [vmem:[%s21771_s9 + $0xa8] sm:$0xff] }
0x115d   : > { %v15731_v47 = vpop.xlane.xlu0 %15730 }
0x115e   : > { %v15735_v1 = vmul.f32 0.03125, %v15731_v47  ;;  %v16107_v47 = vld [vmem:[%s21771_s9 + $0xb8] sm:$0xff] }
0x1160   : > { %v21440_v7 = vsub.f32 %v15716_v16, %v15735_v1  ;;  %v16106_v1 = vld [vmem:[%s21771_s9 + $0xb0] sm:$0xff] }
0x1161   : > { %v15744_v48 = vpop.xlane.xlu0 %15743 }
0x1162   : > { %v15751_v50 = vmul.f32 0.03125, %v15744_v48  ;;  %v15741_v6 = vmul.f32 %v21440_v7, %v21440_v7  ;;  %v16103_v48 = vld [vmem:[%s21771_s9 + $0x98] sm:$0xff] }
0x1164   : > { %v15754_v40 = vadd.f32 1e-05, %v15751_v50  ;;  %v15748_v12 = vsel %vm477_vm1, %v15741_v6, 0.0  ;;  %v16102_v50 = vld [vmem:[%s21771_s9 + $0x90] sm:$0xff]  ;;  %v16101_v6 = vld [vmem:[%s21771_s9 + $0x88] sm:$0xff] }
0x1165   : > { %15749 = vadd.xlane.f32.xlu0 %v15748_v12 }
0x1166   : > { %18464 = vrsqrt.f32 %v15754_v40  ;;  %v16846_v40 = vld [vmem:[%s21770_s8] ss:$0 sm:$0xff] }
0x1167   : > { %18466 = vrsqrt.f32 %v15755_v49  ;;  %v16100_v49 = vld [vmem:[%s21771_s9 + $0x80] sm:$0xff] }
0x1173   : > { %v18465_v4 = vpop.eup %18464 }
0x1174   : > { %v15760_v54 = vmul.f32 %v18465_v4, %v15736_v60  ;;  %v18467_v24 = vpop.eup %18466  ;;  %v16842_v60 = vld [vmem:[%s21767_s5 + $0x2] ss:$0 sm:$0xff] }
0x1175   : > { %v15761_v33 = vmul.f32 %v18467_v24, %v15737_v25  ;;  %v16085_v25 = vld [vmem:[%s21771_s9 + $0x8] sm:$0xff] }
0x1176   : > { %v15781_v20 = vmul.f32 %v16840_v37, %v15760_v54 }
0x1177   : > { %v15782_v51 = vmul.f32 %v16841_v35, %v15761_v33 }
0x1178   : > { %v21451_v2 = vadd.f32 %v16843_v13, %v15781_v20  ;;  %v16847_v13 = vld [vmem:[%s21770_s8 + $0x1] ss:$0 sm:$0xff] }
0x1179   : > { %v21478_v63 = vadd.f32 %v16844_v45, %v15782_v51 }
0x117a   : > { %18018 = vmatmul.mubr.msk.f32.vlgmr.msra.gmra.mxu1 %vm477_vm1, %v21451_v2 }
0x117b   : > { %18021 = vmatpush3.msra.mxu1 %v15812_v21  ;;  %18028 = vmatprep.mubr.msk.f32.mxu1 %vm18494_vm0, %v21934_v61 }
0x117c   : > { %18022 = vmatprep.subr.mxu1 %v21934_v61 }
0x117d   : > { %18023 = vmatpush3.msra.mxu1 %v15811_v26 }
0x117e   : > { %18024 = vmatprep.subr.mxu1 %v21934_v61 }
0x117f   : > { %18025 = vmatpush3.msra.mxu1 %v15810_v41 }
0x1180   : > { %18026 = vmatprep.subr.mxu1 %v21934_v61 }
0x1181   : > { %18027 = vmatpush3.msra.mxu1 %v15809_v3 }
0x1182   : > { %18029 = vmatmul.mubr.msk.f32.vlgmr.msra.gmra.mxu1 %vm477_vm1, %v21478_v63  ;;  %18042 = vmatprep.subr.mxu1 %v21934_v61 }
0x1183   : > { %18074 = vmatprep.mubr.msk.f32.mxu1 %vm18494_vm0, %v21934_v61  ;;  %18043 = vmatpush3.msra.mxu1 %v16099_v28 }
0x1184   : > { %18044 = vmatprep.subr.mxu1 %v21934_v61 }
0x1185   : > { %18045 = vmatpush3.msra.mxu1 %v16098_v39 }
0x1186   : > { %18046 = vmatprep.subr.mxu1 %v21934_v61 }
0x1187   : > { %18047 = vmatpush3.msra.mxu1 %v16097_v43  ;;  %v16131_v43 = vld [vmem:[%s21771_s9 + $0x178] sm:$0xff] }
0x1188   : > { %18048 = vmatprep.subr.mxu1 %v21934_v61 }
0x1189   : > { %18049 = vmatpush3.msra.mxu1 %v16096_v27  ;;  %v16130_v27 = vld [vmem:[%s21771_s9 + $0x170] sm:$0xff] }
0x118a   : > { %18050 = vmatprep.subr.mxu1 %v21934_v61 }
0x118b   : > { %18051 = vmatpush3.msra.mxu1 %v16095_v0 }
0x118c   : > { %18052 = vmatprep.subr.mxu1 %v21934_v61 }
0x118d   : > { %18053 = vmatpush3.msra.mxu1 %v16094_v30 }
0x118e   : > { %18054 = vmatprep.subr.mxu1 %v21934_v61 }
0x118f   : > { %18055 = vmatpush3.msra.mxu1 %v16093_v55  ;;  %v16129_v55 = vld [vmem:[%s21771_s9 + $0x168] sm:$0xff] }
0x1190   : > { %18056 = vmatprep.subr.mxu1 %v21934_v61 }
0x1191   : > { %18057 = vmatpush3.msra.mxu1 %v16092_v17 }
0x1192   : > { %18058 = vmatprep.subr.mxu1 %v21934_v61 }
0x1193   : > { %18059 = vmatpush3.msra.mxu1 %v16091_v8  ;;  %v16128_v8 = vld [vmem:[%s21771_s9 + $0x160] sm:$0xff] }
0x1194   : > { %18060 = vmatprep.subr.mxu1 %v21934_v61 }
0x1195   : > { %18061 = vmatpush3.msra.mxu1 %v16090_v56 }
0x1196   : > { %18062 = vmatprep.subr.mxu1 %v21934_v61 }
0x1197   : > { %18063 = vmatpush3.msra.mxu1 %v16089_v14  ;;  %v16127_v14 = vld [vmem:[%s21771_s9 + $0x158] sm:$0xff] }
0x1198   : > { %18064 = vmatprep.subr.mxu1 %v21934_v61 }
0x1199   : > { %18065 = vmatpush3.msra.mxu1 %v16088_v46  ;;  %v16126_v46 = vld [vmem:[%s21771_s9 + $0x150] sm:$0xff] }
0x119a   : > { %18066 = vmatprep.subr.mxu1 %v21934_v61 }
0x119b   : > { %18067 = vmatpush3.msra.mxu1 %v16087_v36  ;;  %v16125_v36 = vld [vmem:[%s21771_s9 + $0x148] sm:$0xff] }
0x119c   : > { %18068 = vmatprep.subr.mxu1 %v21934_v61 }
0x119d   : > { %18069 = vmatpush3.msra.mxu1 %v16086_v31  ;;  %v16124_v31 = vld [vmem:[%s21771_s9 + $0x140] sm:$0xff] }
0x119e   : > { %18070 = vmatprep.subr.mxu1 %v21934_v61 }
0x119f   : > { %18071 = vmatpush3.msra.mxu1 %v16085_v25  ;;  %v16123_v25 = vld [vmem:[%s21771_s9 + $0x138] sm:$0xff] }
0x11a0   : > { %18072 = vmatprep.subr.mxu1 %v21934_v61 }
0x11a1   : > { %18073 = vmatpush3.msra.mxu1 %v16084_v11  ;;  %v16122_v11 = vld [vmem:[%s21771_s9 + $0x130] sm:$0xff] }
0x11a2   : > { %18112 = vmatprep.subr.mxu1 %v21934_v61 }
0x11ee   : > { %v15750_v5 = vpop.xlane.xlu0 %15749 }
0x11ef   : > { %v15753_v9 = vmul.f32 0.03125, %v15750_v5  ;;  %v16121_v5 = vld [vmem:[%s21771_s9 + $0x128] sm:$0xff] }
0x11f1   : > { %v15756_v57 = vadd.f32 1e-05, %v15753_v9  ;;  %v16120_v9 = vld [vmem:[%s21771_s9 + $0x120] sm:$0xff] }
0x11f3   : > { %18468 = vrsqrt.f32 %v15756_v57  ;;  %v16119_v57 = vld [vmem:[%s21771_s9 + $0x118] sm:$0xff] }
0x1200   : > { %v18469_v23 = vpop.eup %18468 }
0x1201   : > { %v15762_v32 = vmul.f32 %v18469_v23, %v21440_v7  ;;  %v16104_v7 = vld [vmem:[%s21771_s9 + $0xa0] sm:$0xff]  ;;  %v16118_v23 = vld [vmem:[%s21771_s9 + $0x110] sm:$0xff] }
0x1203   : > { %v15783_v42 = vmul.f32 %v16842_v60, %v15762_v32  ;;  %v16117_v60 = vld [vmem:[%s21771_s9 + $0x108] sm:$0xff]  ;;  %v16116_v32 = vld [vmem:[%s21771_s9 + $0x100] sm:$0xff] }
0x1205   : > { %v21572_v16 = vadd.f32 %v16845_v44, %v15783_v42  ;;  %v16848_v44 = vld [vmem:[%s21770_s8 + $0x2] ss:$0 sm:$0xff] }
0x1207   : > { %18040 = vmatmul.mubr.msk.f32.vlgmr.msra.gmra.mxu0 %vm477_vm1, %v21572_v16 }
0x1208   : > { %18078 = vmatpush3.msra.mxu0 %v16115_v15  ;;  %18109 = vmatprep.mubr.msk.f32.mxu0 %vm18494_vm0, %v21934_v61 }
0x1209   : > { %18079 = vmatprep.subr.mxu0 %v21934_v61 }
0x120a   : > { %18080 = vmatpush3.msra.mxu0 %v16114_v10 }
0x120b   : > { %18081 = vmatprep.subr.mxu0 %v21934_v61 }
0x120c   : > { %18082 = vmatpush3.msra.mxu0 %v16113_v19 }
0x120d   : > { %18083 = vmatprep.subr.mxu0 %v21934_v61 }
0x120e   : > { %18084 = vmatpush3.msra.mxu0 %v16112_v62 }
0x120f   : > { %18085 = vmatprep.subr.mxu0 %v21934_v61 }
0x1210   : > { %18086 = vmatpush3.msra.mxu0 %v16111_v52 }
0x1211   : > { %18087 = vmatprep.subr.mxu0 %v21934_v61 }
0x1212   : > { %18088 = vmatpush3.msra.mxu0 %v16110_v18 }
0x1213   : > { %18089 = vmatprep.subr.mxu0 %v21934_v61 }
0x1214   : > { %18090 = vmatpush3.msra.mxu0 %v16109_v59 }
0x1215   : > { %18091 = vmatprep.subr.mxu0 %v21934_v61 }
0x1216   : > { %18092 = vmatpush3.msra.mxu0 %v16108_v38 }
0x1217   : > { %18093 = vmatprep.subr.mxu0 %v21934_v61 }
0x1218   : > { %18094 = vmatpush3.msra.mxu0 %v16107_v47 }
0x1219   : > { %18095 = vmatprep.subr.mxu0 %v21934_v61 }
0x121a   : > { %18096 = vmatpush3.msra.mxu0 %v16106_v1 }
0x121b   : > { %18097 = vmatprep.subr.mxu0 %v21934_v61 }
0x121c   : > { %18098 = vmatpush3.msra.mxu0 %v16105_v22 }
0x121d   : > { %18099 = vmatprep.subr.mxu0 %v21934_v61 }
0x121e   : > { %18100 = vmatpush3.msra.mxu0 %v16104_v7 }
0x121f   : > { %18101 = vmatprep.subr.mxu0 %v21934_v61 }
0x1220   : > { %18102 = vmatpush3.msra.mxu0 %v16103_v48 }
0x1221   : > { %18103 = vmatprep.subr.mxu0 %v21934_v61 }
0x1222   : > { %18104 = vmatpush3.msra.mxu0 %v16102_v50 }
0x1223   : > { %18105 = vmatprep.subr.mxu0 %v21934_v61 }
0x1224   : > { %18106 = vmatpush3.msra.mxu0 %v16101_v6 }
0x1225   : > { %18107 = vmatprep.subr.mxu0 %v21934_v61 }
0x1226   : > { %18108 = vmatpush3.msra.mxu0 %v16100_v49 }
0x123a   : > { %v15907_v12 = vpop.f32.mrf.mxu1 }
0x123b   : > { %v15908_v4 = vadd.f32 %v16846_v40, %v15907_v12  ;;  %v16853_v40 = vld [vmem:[%s21772_s10 + $0x1] ss:$0 sm:$0xff] }
0x123c   : > { %v18019_v37 = vpop.f32.mrf.mxu1 }
0x123d   : > { %v16057_v54 = vmul.f32 %v15908_v4, %v15908_v4 }
0x123f   : > { %v16060_v24 = vmul.f32 %v16057_v54, %v15908_v4 }
0x1241   : > { %v16063_v20 = vmul.f32 0.044715, %v16060_v24 }
0x1242   : > { %v15980_v33 = vpop.f32.mrf.mxu1 }
0x1243   : > { %v16066_v21 = vadd.f32 %v16063_v20, %v15908_v4  ;;  %v15981_v35 = vadd.f32 %v16847_v13, %v15980_v33  ;;  %v16854_v13 = vld [vmem:[%s21772_s10 + $0x2] ss:$0 sm:$0xff] }
0x1244   : > { %v18030_v26 = vpop.f32.mrf.mxu1 }
0x1245   : > { %v16069_v51 = vmul.f32 0.7978846, %v16066_v21  ;;  %v16058_v41 = vmul.f32 %v15981_v35, %v15981_v35 }
0x1247   : > { %18470 = vtanh.f32 %v16069_v51  ;;  %v16061_v45 = vmul.f32 %v16058_v41, %v15981_v35 }
0x1249   : > { %v16064_v3 = vmul.f32 0.044715, %v16061_v45 }
0x124b   : > { %v16067_v58 = vadd.f32 %v16064_v3, %v15981_v35 }
0x124d   : > { %v16070_v53 = vmul.f32 0.7978846, %v16067_v58 }
0x124f   : > { %18472 = vtanh.f32 %v16070_v53 }
0x1254   : > { %v18471_v29 = vpop.eup %18470 }
0x1255   : > { %v16075_v34 = vadd.f32 1.0, %v18471_v29 }
0x1257   : > { %v16078_v28 = vmul.f32 0.5, %v16075_v34 }
0x1259   : > { %v16081_v39 = vmul.f32 %v16078_v28, %v15908_v4 }
0x125b   : > { %18075 = vmatmul.mubr.f32.vlgmr.msra.gmra.mxu1 %v16081_v39 }
0x125c   : > { %v18473_v0 = vpop.eup %18472  ;;  %18113 = vmatpush3.msra.mxu1 %v16131_v43  ;;  %18144 = vmatprep.mubr.msk.f32.mxu1 %vm18494_vm0, %v21934_v61 }
0x125d   : > { %v16076_v30 = vadd.f32 1.0, %v18473_v0  ;;  %18114 = vmatprep.subr.mxu1 %v21934_v61 }
0x125e   : > { %18115 = vmatpush3.msra.mxu1 %v16130_v27 }
0x125f   : > { %v16079_v17 = vmul.f32 0.5, %v16076_v30  ;;  %18116 = vmatprep.subr.mxu1 %v21934_v61 }
0x1260   : > { %18117 = vmatpush3.msra.mxu1 %v16129_v55 }
0x1261   : > { %v16082_v56 = vmul.f32 %v16079_v17, %v15981_v35  ;;  %18118 = vmatprep.subr.mxu1 %v21934_v61 }
0x1262   : > { %18119 = vmatpush3.msra.mxu1 %v16128_v8 }
0x1263   : > { %18110 = vmatmul.mubr.f32.vlgmr.msra.gmra.mxu0 %v16082_v56  ;;  %18120 = vmatprep.subr.mxu1 %v21934_v61 }
0x1264   : > { %18121 = vmatpush3.msra.mxu1 %v16127_v14 }
0x1265   : > { %18122 = vmatprep.subr.mxu1 %v21934_v61 }
0x1266   : > { %18123 = vmatpush3.msra.mxu1 %v16126_v46  ;;  %v16855_v46 = vld [vmem:[%s21773_s11] ss:$0 sm:$0xff] }
0x1267   : > { %18124 = vmatprep.subr.mxu1 %v21934_v61 }
0x1268   : > { %18125 = vmatpush3.msra.mxu1 %v16125_v36 }
0x1269   : > { %18126 = vmatprep.subr.mxu1 %v21934_v61 }
0x126a   : > { %18127 = vmatpush3.msra.mxu1 %v16124_v31  ;;  %v16858_v31 = vld [vmem:[%s21774_s12] ss:$0 sm:$0xff] }
0x126b   : > { %18128 = vmatprep.subr.mxu1 %v21934_v61 }
0x126c   : > { %18129 = vmatpush3.msra.mxu1 %v16123_v25 }
0x126d   : > { %18130 = vmatprep.subr.mxu1 %v21934_v61 }
0x126e   : > { %18131 = vmatpush3.msra.mxu1 %v16122_v11 }
0x126f   : > { %18132 = vmatprep.subr.mxu1 %v21934_v61 }
0x1270   : > { %18133 = vmatpush3.msra.mxu1 %v16121_v5 }
0x1271   : > { %18134 = vmatprep.subr.mxu1 %v21934_v61 }
0x1272   : > { %18135 = vmatpush3.msra.mxu1 %v16120_v9  ;;  %v16856_v9 = vld [vmem:[%s21773_s11 + $0x1] ss:$0 sm:$0xff] }
0x1273   : > { %18136 = vmatprep.subr.mxu1 %v21934_v61 }
0x1274   : > { %18137 = vmatpush3.msra.mxu1 %v16119_v57 }
0x1275   : > { %18138 = vmatprep.subr.mxu1 %v21934_v61 }
0x1276   : > { %18139 = vmatpush3.msra.mxu1 %v16118_v23  ;;  %v16859_v23 = vld [vmem:[%s21774_s12 + $0x1] ss:$0 sm:$0xff] }
0x1277   : > { %18140 = vmatprep.subr.mxu1 %v21934_v61 }
0x1278   : > { %18141 = vmatpush3.msra.mxu1 %v16117_v60 }
0x1279   : > { %18142 = vmatprep.subr.mxu1 %v21934_v61  ;;  %v16852_v61 = vld [vmem:[%s21772_s10] ss:$0 sm:$0xff] }
0x127a   : > { %18143 = vmatpush3.msra.mxu1 %v16116_v32 }
0x12c7   : > { %v16053_v42 = vpop.f32.mrf.mxu0 }
0x12c8   : > { %v16054_v15 = vadd.f32 %v16848_v44, %v16053_v42 }
0x12c9   : > { %v18041_v10 = vpop.f32.mrf.mxu0 }
0x12ca   : > { %v16059_v19 = vmul.f32 %v16054_v15, %v16054_v15 }
0x12cc   : > { %v16062_v62 = vmul.f32 %v16059_v19, %v16054_v15  ;;  %v16857_v19 = vld [vmem:[%s21773_s11 + $0x2] ss:$0 sm:$0xff] }
0x12ce   : > { %v16065_v52 = vmul.f32 0.044715, %v16062_v62 }
0x12d0   : > { %v16068_v18 = vadd.f32 %v16065_v52, %v16054_v15  ;;  %v16860_v52 = vld [vmem:[%s21774_s12 + $0x2] ss:$0 sm:$0xff] }
0x12d2   : > { %v16071_v59 = vmul.f32 0.7978846, %v16068_v18 }
0x12d4   : > { %18474 = vtanh.f32 %v16071_v59 }
0x12e1   : > { %v18475_v38 = vpop.eup %18474 }
0x12e2   : > { %v16077_v47 = vadd.f32 1.0, %v18475_v38 }
0x12e4   : > { %v16080_v1 = vmul.f32 0.5, %v16077_v47 }
0x12e6   : > { %v16083_v22 = vmul.f32 %v16080_v1, %v16054_v15 }
0x12e8   : > { %18145 = vmatmul.mubr.f32.vlgmr.msra.gmra.mxu1 %v16083_v22 }
0x131b   : > { %v16219_v7 = vpop.f32.mrf.mxu1 }
0x131c   : > { %v16220_v48 = vadd.f32 %v16852_v61, %v16219_v7 }
0x131d   : > { %v18076_v50 = vpop.f32.mrf.mxu1 }
0x131e   : > { %v16363_v6 = vadd.f32 %v16220_v48, %v21451_v2 }
0x1320   : > { %v16372_v49 = vsel %vm477_vm1, %v16363_v6, 0.0 }
0x1321   : > { %16373 = vadd.xlane.f32.xlu1 %v16372_v49 }
0x1323   : > { %v16289_v12 = vpop.f32.mrf.mxu0 }
0x1324   : > { %v16290_v4 = vadd.f32 %v16853_v40, %v16289_v12 }
0x1325   : > { %v18111_v37 = vpop.f32.mrf.mxu0 }
0x1326   : > { %v16364_v54 = vadd.f32 %v16290_v4, %v21478_v63 }
0x1328   : > { %v16375_v24 = vsel %vm477_vm1, %v16364_v54, 0.0 }
0x1329   : > { %16376 = vadd.xlane.f32.xlu0 %v16375_v24 }
0x13a8   : > { %v16359_v2 = vpop.f32.mrf.mxu1 }
0x13a9   : > { %v16360_v20 = vadd.f32 %v16854_v13, %v16359_v2 }
0x13aa   : > { %v16374_v33 = vpop.xlane.xlu1 %16373  ;;  %v18146_v21 = vpop.f32.mrf.mxu1 }
0x13ab   : > { %v16365_v35 = vadd.f32 %v16360_v20, %v21572_v16  ;;  %v16381_v26 = vmul.f32 0.03125, %v16374_v33 }
0x13ad   : > { %v16384_v51 = vsub.f32 %v16363_v6, %v16381_v26  ;;  %v16378_v41 = vsel %vm477_vm1, %v16365_v35, 0.0 }
0x13ae   : > { %16379 = vadd.xlane.f32.xlu1 %v16378_v41 }
0x13af   : > { %v16387_v45 = vmul.f32 %v16384_v51, %v16384_v51 }
0x13b1   : > { %v16390_v63 = vsel %vm477_vm1, %v16387_v45, 0.0 }
0x13b2   : > { %v16377_v3 = vpop.xlane.xlu0 %16376  ;;  %16391 = vadd.xlane.f32.xlu0 %v16390_v63 }
0x13b3   : > { %v16382_v58 = vmul.f32 0.03125, %v16377_v3 }
0x13b5   : > { %v16385_v53 = vsub.f32 %v16364_v54, %v16382_v58 }
0x13b7   : > { %v16388_v29 = vmul.f32 %v16385_v53, %v16385_v53 }
0x13b9   : > { %v16393_v34 = vsel %vm477_vm1, %v16388_v29, 0.0 }
0x13ba   : > { %16394 = vadd.xlane.f32.xlu1 %v16393_v34 }
0x1437   : > { %v16380_v28 = vpop.xlane.xlu1 %16379 }
0x1438   : > { %v16383_v39 = vmul.f32 0.03125, %v16380_v28 }
0x143a   : > { %v16386_v43 = vsub.f32 %v16365_v35, %v16383_v39 }
0x143b   : > { %v16392_v16 = vpop.xlane.xlu0 %16391 }
0x143c   : > { %v16399_v27 = vmul.f32 0.03125, %v16392_v16  ;;  %v16389_v0 = vmul.f32 %v16386_v43, %v16386_v43 }
0x143e   : > { %v16402_v30 = vadd.f32 1e-05, %v16399_v27  ;;  %v16396_v55 = vsel %vm477_vm1, %v16389_v0, 0.0 }
0x143f   : > { %16397 = vadd.xlane.f32.xlu0 %v16396_v55 }
0x1440   : > { %18476 = vrsqrt.f32 %v16402_v30 }
0x1443   : > { %v16395_v17 = vpop.xlane.xlu1 %16394 }
0x1444   : > { %v16400_v8 = vmul.f32 0.03125, %v16395_v17 }
0x1446   : > { %v16403_v56 = vadd.f32 1e-05, %v16400_v8 }
0x1448   : > { %18478 = vrsqrt.f32 %v16403_v56 }
0x144d   : > { %v18477_v14 = vpop.eup %18476 }
0x144e   : > { %v16408_v36 = vmul.f32 %v18477_v14, %v16384_v51 }
0x1450   : > { %v16429_v25 = vmul.f32 %v16855_v46, %v16408_v36 }
0x1452   : > { %v16450_v11 = vadd.f32 %v16858_v31, %v16429_v25 }
0x1454   : > { %16453 = vst.msk [vmem:[%s440_s20] sm:$0xff] %vm477_vm1, %v16450_v11 }
0x1455   : > { %v18479_v5 = vpop.eup %18478 }
0x1456   : > { %v16409_v57 = vmul.f32 %v18479_v5, %v16385_v53 }
0x1458   : > { %v16430_v60 = vmul.f32 %v16856_v9, %v16409_v57 }
0x145a   : > { %v16451_v32 = vadd.f32 %v16859_v23, %v16430_v60 }
0x145c   : > { %16454 = vst.msk [vmem:[%s440_s20 + $0x8] sm:$0xff] %vm477_vm1, %v16451_v32 }
0x14c8   : > { %v16398_v44 = vpop.xlane.xlu0 %16397 }
0x14c9   : > { %v16401_v42 = vmul.f32 0.03125, %v16398_v44 }
0x14cb   : > { %v16404_v15 = vadd.f32 1e-05, %v16401_v42 }
0x14cd   : > { %18480 = vrsqrt.f32 %v16404_v15 }
0x14da   : > { %v18481_v10 = vpop.eup %18480 }
0x14db   : > { %v16410_v62 = vmul.f32 %v18481_v10, %v16386_v43 }
0x14dd   : > { %v16431_v18 = vmul.f32 %v16857_v19, %v16410_v62 }
0x14df   : > { %v16452_v59 = vadd.f32 %v16860_v52, %v16431_v18 }
0x14e1   : > { %16455 = vst.msk [vmem:[%s440_s20 + $0x10] sm:$0xff] %vm477_vm1, %v16452_v59 }
0x14e2 PF: > { %s23_s25 = sadd.s32 1, %s18491_s25  }
0x14e3   : > { %p20_p4 = scmp.ge.s32.totalorder %s23_s25, 4  }
0x14e5   :  { %22 = sbr.rel (!%p20_p4) target bundleno = 1 (0x1), region = 102 }

</bundles_post_ra>
